<compile_context>
chip_gen: v5e
topology: v5e:2x2
jax: 0.10.0
libtpu: 0.0.40
codegen_flags: <defaults>
</compile_context>

<pallas_src>
import jax
import jax.numpy as jnp
from jax.experimental import pallas as pl
from jax.experimental.pallas import tpu as pltpu

LEAKY_SLOPE = 0.2
LN_EPS = 1e-5
CHANNELS = [128, 256, 512, 1024]

_CP = pltpu.CompilerParams(vmem_limit_bytes=32 * 1024 * 1024)
_VMEM = pl.BlockSpec(memory_space=pltpu.MemorySpace.VMEM)


# ---------------------------------------------------------------- helpers ---

def _leaky_relu(x):
    return jnp.where(x > 0, x, LEAKY_SLOPE * x)


def _layer_norm(x, gamma, beta):
    mean = jnp.mean(x, axis=-1, keepdims=True)
    var = jnp.mean((x - mean) ** 2, axis=-1, keepdims=True)
    inv = jax.lax.rsqrt(var + LN_EPS)
    return (x - mean) * inv * gamma + beta


# ----------------------------------------------------------------- kernel ---

def _decoder_kernel(x_ref,
                    w0_ref, b0_ref,
                    w1_ref, b1_ref, g1_ref, be1_ref,
                    w2_ref, b2_ref, g2_ref, be2_ref,
                    w3_ref, b3_ref, g3_ref, be3_ref,
                    wf_ref, bf_ref,
                    o_ref):
    # --- ResidualBlock(128, 128, normalize=False): leaky_relu(x@W+b) + x ---
    x = x_ref[...]                                      # (B, 128) f32
    h = jnp.dot(x.astype(jnp.bfloat16), w0_ref[...],
                preferred_element_type=jnp.float32) + b0_ref[...]
    x = _leaky_relu(h) + x

    # --- Projected residual blocks: one fused (Cin, 2*Cout) matmul each ---
    #   hcat = x @ [W | Ws] + [b | bs]
    #   out  = leaky_relu(LayerNorm(hcat[:, :Cout])) + hcat[:, Cout:]
    blocks = (
        (w1_ref, b1_ref, g1_ref, be1_ref, CHANNELS[1]),
        (w2_ref, b2_ref, g2_ref, be2_ref, CHANNELS[2]),
        (w3_ref, b3_ref, g3_ref, be3_ref, CHANNELS[3]),
    )
    for w_ref, b_ref, g_ref, be_ref, cout in blocks:
        hcat = jnp.dot(x.astype(jnp.bfloat16), w_ref[...],
                       preferred_element_type=jnp.float32) + b_ref[...]
        h_main = hcat[:, :cout]
        h_sc = hcat[:, cout:]
        h = _leaky_relu(_layer_norm(h_main, g_ref[...], be_ref[...]))
        x = h + h_sc

    # --- Final nn.Linear(1024, 1024) ---
    o_ref[...] = jnp.dot(x.astype(jnp.bfloat16), wf_ref[...],
                         preferred_element_type=jnp.float32) + bf_ref[...]


# ------------------------------------------------------------- parameters ---

def _init_linear(key, fan_in, fan_out):
    """PyTorch nn.Linear-style uniform(-1/sqrt(in), 1/sqrt(in)) init."""
    kw, kb = jax.random.split(key)
    bound = 1.0 / float(fan_in) ** 0.5
    w = jax.random.uniform(kw, (fan_in, fan_out), jnp.float32, -bound, bound)
    b = jax.random.uniform(kb, (1, fan_out), jnp.float32, -bound, bound)
    return w, b


def init_decoder_params(seed=0):
    key = jax.random.PRNGKey(seed)
    keys = jax.random.split(key, 16)
    params = {}

    # ResidualBlock(128, 128, normalize=False)
    w0, b0 = _init_linear(keys[0], 128, 128)
    params["rb0_w"] = w0.astype(jnp.bfloat16)
    params["rb0_b"] = b0

    # ResidualBlock(in, out) with LayerNorm + projected shortcut.
    # Main-path W and shortcut Ws are concatenated along the output axis.
    for i in range(3):
        cin, cout = CHANNELS[i], CHANNELS[i + 1]
        w, b = _init_linear(keys[1 + 2 * i], cin, cout)
        ws, bs = _init_linear(keys[2 + 2 * i], cin, cout)
        params[f"rb{i + 1}_wcat"] = jnp.concatenate(
            [w, ws], axis=1).astype(jnp.bfloat16)            # (cin, 2*cout)
        params[f"rb{i + 1}_bcat"] = jnp.concatenate(
            [b, bs], axis=1)                                  # (1, 2*cout) f32
        params[f"rb{i + 1}_g"] = jnp.ones((1, cout), jnp.float32)
        params[f"rb{i + 1}_be"] = jnp.zeros((1, cout), jnp.float32)

    # Final nn.Linear(1024, 1024)
    wf, bf = _init_linear(keys[15], 1024, 1024)
    params["fc_w"] = wf.astype(jnp.bfloat16)
    params["fc_b"] = bf
    return params


# ---------------------------------------------------------------- forward ---

@jax.jit
def decoder_forward(encoded_input, params):
    args = (
        encoded_input,
        params["rb0_w"], params["rb0_b"],
        params["rb1_wcat"], params["rb1_bcat"], params["rb1_g"], params["rb1_be"],
        params["rb2_wcat"], params["rb2_bcat"], params["rb2_g"], params["rb2_be"],
        params["rb3_wcat"], params["rb3_bcat"], params["rb3_g"], params["rb3_be"],
        params["fc_w"], params["fc_b"],
    )
    return pl.pallas_call(
        _decoder_kernel,
        out_shape=jax.ShapeDtypeStruct(
            (encoded_input.shape[0], CHANNELS[-1]), jnp.float32),
        in_specs=[_VMEM] * len(args),
        out_specs=_VMEM,
        compiler_params=_CP,
    )(*args)


# -------------------------------------------------------------------- main ---

if __name__ == "__main__":
    B = 8
    key = jax.random.PRNGKey(0)
    encoded_input = jax.random.normal(key, (B, 128), jnp.float32)

    params = init_decoder_params(seed=0)
    out = decoder_forward(encoded_input, params)
    out = jax.block_until_ready(out)

    assert out.shape == (B, 1024), out.shape
    assert out.dtype == jnp.float32, out.dtype
    assert bool(jnp.all(jnp.isfinite(out)))
    print("KERNEL_OK")
</pallas_src>

<mosaic_0001>
module attributes {stable_mosaic.version = 11 : i64} {
  func.func @_decoder_kernel(%arg0: memref<8x128xf32, #tpu.memory_space<vmem>>, %arg1: memref<128x128xbf16, #tpu.memory_space<vmem>>, %arg2: memref<1x128xf32, #tpu.memory_space<vmem>>, %arg3: memref<128x512xbf16, #tpu.memory_space<vmem>>, %arg4: memref<1x512xf32, #tpu.memory_space<vmem>>, %arg5: memref<1x256xf32, #tpu.memory_space<vmem>>, %arg6: memref<1x256xf32, #tpu.memory_space<vmem>>, %arg7: memref<256x1024xbf16, #tpu.memory_space<vmem>>, %arg8: memref<1x1024xf32, #tpu.memory_space<vmem>>, %arg9: memref<1x512xf32, #tpu.memory_space<vmem>>, %arg10: memref<1x512xf32, #tpu.memory_space<vmem>>, %arg11: memref<512x2048xbf16, #tpu.memory_space<vmem>>, %arg12: memref<1x2048xf32, #tpu.memory_space<vmem>>, %arg13: memref<1x1024xf32, #tpu.memory_space<vmem>>, %arg14: memref<1x1024xf32, #tpu.memory_space<vmem>>, %arg15: memref<1024x1024xbf16, #tpu.memory_space<vmem>>, %arg16: memref<1x1024xf32, #tpu.memory_space<vmem>>, %arg17: memref<8x1024xf32, #tpu.memory_space<vmem>>) attributes {dimension_semantics = [], scalar_prefetch = 0 : i64, scratch_operands = 0 : i64, tpu.core_type = #tpu.core_type<tc>} {
    %c0 = arith.constant 0 : index
    %c0_0 = arith.constant 0 : index
    %0 = vector.load %arg0[%c0, %c0_0] : memref<8x128xf32, #tpu.memory_space<vmem>>, vector<8x128xf32>
    %1 = arith.truncf %0 : vector<8x128xf32> to vector<8x128xbf16>
    %c0_1 = arith.constant 0 : index
    %c0_2 = arith.constant 0 : index
    %2 = vector.load %arg1[%c0_1, %c0_2] : memref<128x128xbf16, #tpu.memory_space<vmem>>, vector<128x128xbf16>
    %cst = arith.constant dense<0.000000e+00> : vector<8x128xf32>
    %3 = tpu.matmul %1, %2, %cst {dimension_numbers = #tpu.dot_dimension_numbers<[1], [0], [0], [1], [0, 0, 1, 1], [], []>} : vector<8x128xbf16>, vector<128x128xbf16>, vector<8x128xf32> -> vector<8x128xf32>
    %c0_3 = arith.constant 0 : index
    %c0_4 = arith.constant 0 : index
    %4 = vector.load %arg2[%c0_3, %c0_4] : memref<1x128xf32, #tpu.memory_space<vmem>>, vector<1x128xf32>
    %5 = vector.broadcast %4 : vector<1x128xf32> to vector<8x128xf32>
    %6 = arith.addf %3, %5 : vector<8x128xf32>
    %cst_5 = arith.constant 0.000000e+00 : f32
    %7 = vector.broadcast %cst_5 : f32 to vector<8x128xf32>
    %8 = arith.cmpf ogt, %6, %7 : vector<8x128xf32>
    %cst_6 = arith.constant 2.000000e-01 : f32
    %9 = vector.broadcast %cst_6 : f32 to vector<8x128xf32>
    %10 = arith.mulf %9, %6 : vector<8x128xf32>
    %11 = arith.select %8, %6, %10 : vector<8x128xi1>, vector<8x128xf32>
    %12 = arith.addf %11, %0 : vector<8x128xf32>
    %13 = arith.truncf %12 : vector<8x128xf32> to vector<8x128xbf16>
    %c0_7 = arith.constant 0 : index
    %c0_8 = arith.constant 0 : index
    %14 = vector.load %arg3[%c0_7, %c0_8] : memref<128x512xbf16, #tpu.memory_space<vmem>>, vector<128x512xbf16>
    %cst_9 = arith.constant dense<0.000000e+00> : vector<8x512xf32>
    %15 = tpu.matmul %13, %14, %cst_9 {dimension_numbers = #tpu.dot_dimension_numbers<[1], [0], [0], [1], [0, 0, 1, 1], [], []>} : vector<8x128xbf16>, vector<128x512xbf16>, vector<8x512xf32> -> vector<8x512xf32>
    %c0_10 = arith.constant 0 : index
    %c0_11 = arith.constant 0 : index
    %16 = vector.load %arg4[%c0_10, %c0_11] : memref<1x512xf32, #tpu.memory_space<vmem>>, vector<1x512xf32>
    %17 = vector.broadcast %16 : vector<1x512xf32> to vector<8x512xf32>
    %18 = arith.addf %15, %17 : vector<8x512xf32>
    %19 = vector.extract_strided_slice %18 {offsets = [0, 0], sizes = [8, 256], strides = [1, 1]} : vector<8x512xf32> to vector<8x256xf32>
    %20 = vector.extract_strided_slice %18 {offsets = [0, 256], sizes = [8, 256], strides = [1, 1]} : vector<8x512xf32> to vector<8x256xf32>
    %c0_12 = arith.constant 0 : index
    %c0_13 = arith.constant 0 : index
    %21 = vector.load %arg5[%c0_12, %c0_13] : memref<1x256xf32, #tpu.memory_space<vmem>>, vector<1x256xf32>
    %c0_14 = arith.constant 0 : index
    %c0_15 = arith.constant 0 : index
    %22 = vector.load %arg6[%c0_14, %c0_15] : memref<1x256xf32, #tpu.memory_space<vmem>>, vector<1x256xf32>
    %cst_16 = arith.constant dense<0.000000e+00> : vector<8xf32>
    %23 = vector.multi_reduction <add>, %19, %cst_16 [1] : vector<8x256xf32> to vector<8xf32>
    %24 = vector.shape_cast %23 : vector<8xf32> to vector<8x1xf32>
    %cst_17 = arith.constant 2.560000e+02 : f32
    %25 = vector.broadcast %cst_17 : f32 to vector<8x1xf32>
    %26 = arith.divf %24, %25 : vector<8x1xf32>
    %27 = vector.broadcast %26 : vector<8x1xf32> to vector<8x256xf32>
    %28 = arith.subf %19, %27 : vector<8x256xf32>
    %29 = arith.mulf %28, %28 : vector<8x256xf32>
    %cst_18 = arith.constant dense<0.000000e+00> : vector<8xf32>
    %30 = vector.multi_reduction <add>, %29, %cst_18 [1] : vector<8x256xf32> to vector<8xf32>
    %31 = vector.shape_cast %30 : vector<8xf32> to vector<8x1xf32>
    %cst_19 = arith.constant 2.560000e+02 : f32
    %32 = vector.broadcast %cst_19 : f32 to vector<8x1xf32>
    %33 = arith.divf %31, %32 : vector<8x1xf32>
    %cst_20 = arith.constant 9.99999974E-6 : f32
    %34 = vector.broadcast %cst_20 : f32 to vector<8x1xf32>
    %35 = arith.addf %33, %34 : vector<8x1xf32>
    %36 = math.rsqrt %35 : vector<8x1xf32>
    %37 = vector.broadcast %26 : vector<8x1xf32> to vector<8x256xf32>
    %38 = arith.subf %19, %37 : vector<8x256xf32>
    %39 = vector.broadcast %36 : vector<8x1xf32> to vector<8x256xf32>
    %40 = arith.mulf %38, %39 : vector<8x256xf32>
    %41 = vector.broadcast %21 : vector<1x256xf32> to vector<8x256xf32>
    %42 = arith.mulf %40, %41 : vector<8x256xf32>
    %43 = vector.broadcast %22 : vector<1x256xf32> to vector<8x256xf32>
    %44 = arith.addf %42, %43 : vector<8x256xf32>
    %cst_21 = arith.constant 0.000000e+00 : f32
    %45 = vector.broadcast %cst_21 : f32 to vector<8x256xf32>
    %46 = arith.cmpf ogt, %44, %45 : vector<8x256xf32>
    %cst_22 = arith.constant 2.000000e-01 : f32
    %47 = vector.broadcast %cst_22 : f32 to vector<8x256xf32>
    %48 = arith.mulf %47, %44 : vector<8x256xf32>
    %49 = arith.select %46, %44, %48 : vector<8x256xi1>, vector<8x256xf32>
    %50 = arith.addf %49, %20 : vector<8x256xf32>
    %51 = arith.truncf %50 : vector<8x256xf32> to vector<8x256xbf16>
    %c0_23 = arith.constant 0 : index
    %c0_24 = arith.constant 0 : index
    %52 = vector.load %arg7[%c0_23, %c0_24] : memref<256x1024xbf16, #tpu.memory_space<vmem>>, vector<256x1024xbf16>
    %cst_25 = arith.constant dense<0.000000e+00> : vector<8x1024xf32>
    %53 = tpu.matmul %51, %52, %cst_25 {dimension_numbers = #tpu.dot_dimension_numbers<[1], [0], [0], [1], [0, 0, 1, 1], [], []>} : vector<8x256xbf16>, vector<256x1024xbf16>, vector<8x1024xf32> -> vector<8x1024xf32>
    %c0_26 = arith.constant 0 : index
    %c0_27 = arith.constant 0 : index
    %54 = vector.load %arg8[%c0_26, %c0_27] : memref<1x1024xf32, #tpu.memory_space<vmem>>, vector<1x1024xf32>
    %55 = vector.broadcast %54 : vector<1x1024xf32> to vector<8x1024xf32>
    %56 = arith.addf %53, %55 : vector<8x1024xf32>
    %57 = vector.extract_strided_slice %56 {offsets = [0, 0], sizes = [8, 512], strides = [1, 1]} : vector<8x1024xf32> to vector<8x512xf32>
    %58 = vector.extract_strided_slice %56 {offsets = [0, 512], sizes = [8, 512], strides = [1, 1]} : vector<8x1024xf32> to vector<8x512xf32>
    %c0_28 = arith.constant 0 : index
    %c0_29 = arith.constant 0 : index
    %59 = vector.load %arg9[%c0_28, %c0_29] : memref<1x512xf32, #tpu.memory_space<vmem>>, vector<1x512xf32>
    %c0_30 = arith.constant 0 : index
    %c0_31 = arith.constant 0 : index
    %60 = vector.load %arg10[%c0_30, %c0_31] : memref<1x512xf32, #tpu.memory_space<vmem>>, vector<1x512xf32>
    %cst_32 = arith.constant dense<0.000000e+00> : vector<8xf32>
    %61 = vector.multi_reduction <add>, %57, %cst_32 [1] : vector<8x512xf32> to vector<8xf32>
    %62 = vector.shape_cast %61 : vector<8xf32> to vector<8x1xf32>
    %cst_33 = arith.constant 5.120000e+02 : f32
    %63 = vector.broadcast %cst_33 : f32 to vector<8x1xf32>
    %64 = arith.divf %62, %63 : vector<8x1xf32>
    %65 = vector.broadcast %64 : vector<8x1xf32> to vector<8x512xf32>
    %66 = arith.subf %57, %65 : vector<8x512xf32>
    %67 = arith.mulf %66, %66 : vector<8x512xf32>
    %cst_34 = arith.constant dense<0.000000e+00> : vector<8xf32>
    %68 = vector.multi_reduction <add>, %67, %cst_34 [1] : vector<8x512xf32> to vector<8xf32>
    %69 = vector.shape_cast %68 : vector<8xf32> to vector<8x1xf32>
    %cst_35 = arith.constant 5.120000e+02 : f32
    %70 = vector.broadcast %cst_35 : f32 to vector<8x1xf32>
    %71 = arith.divf %69, %70 : vector<8x1xf32>
    %cst_36 = arith.constant 9.99999974E-6 : f32
    %72 = vector.broadcast %cst_36 : f32 to vector<8x1xf32>
    %73 = arith.addf %71, %72 : vector<8x1xf32>
    %74 = math.rsqrt %73 : vector<8x1xf32>
    %75 = vector.broadcast %64 : vector<8x1xf32> to vector<8x512xf32>
    %76 = arith.subf %57, %75 : vector<8x512xf32>
    %77 = vector.broadcast %74 : vector<8x1xf32> to vector<8x512xf32>
    %78 = arith.mulf %76, %77 : vector<8x512xf32>
    %79 = vector.broadcast %59 : vector<1x512xf32> to vector<8x512xf32>
    %80 = arith.mulf %78, %79 : vector<8x512xf32>
    %81 = vector.broadcast %60 : vector<1x512xf32> to vector<8x512xf32>
    %82 = arith.addf %80, %81 : vector<8x512xf32>
    %cst_37 = arith.constant 0.000000e+00 : f32
    %83 = vector.broadcast %cst_37 : f32 to vector<8x512xf32>
    %84 = arith.cmpf ogt, %82, %83 : vector<8x512xf32>
    %cst_38 = arith.constant 2.000000e-01 : f32
    %85 = vector.broadcast %cst_38 : f32 to vector<8x512xf32>
    %86 = arith.mulf %85, %82 : vector<8x512xf32>
    %87 = arith.select %84, %82, %86 : vector<8x512xi1>, vector<8x512xf32>
    %88 = arith.addf %87, %58 : vector<8x512xf32>
    %89 = arith.truncf %88 : vector<8x512xf32> to vector<8x512xbf16>
    %c0_39 = arith.constant 0 : index
    %c0_40 = arith.constant 0 : index
    %90 = vector.load %arg11[%c0_39, %c0_40] : memref<512x2048xbf16, #tpu.memory_space<vmem>>, vector<512x2048xbf16>
    %cst_41 = arith.constant dense<0.000000e+00> : vector<8x2048xf32>
    %91 = tpu.matmul %89, %90, %cst_41 {dimension_numbers = #tpu.dot_dimension_numbers<[1], [0], [0], [1], [0, 0, 1, 1], [], []>} : vector<8x512xbf16>, vector<512x2048xbf16>, vector<8x2048xf32> -> vector<8x2048xf32>
    %c0_42 = arith.constant 0 : index
    %c0_43 = arith.constant 0 : index
    %92 = vector.load %arg12[%c0_42, %c0_43] : memref<1x2048xf32, #tpu.memory_space<vmem>>, vector<1x2048xf32>
    %93 = vector.broadcast %92 : vector<1x2048xf32> to vector<8x2048xf32>
    %94 = arith.addf %91, %93 : vector<8x2048xf32>
    %95 = vector.extract_strided_slice %94 {offsets = [0, 0], sizes = [8, 1024], strides = [1, 1]} : vector<8x2048xf32> to vector<8x1024xf32>
    %96 = vector.extract_strided_slice %94 {offsets = [0, 1024], sizes = [8, 1024], strides = [1, 1]} : vector<8x2048xf32> to vector<8x1024xf32>
    %c0_44 = arith.constant 0 : index
    %c0_45 = arith.constant 0 : index
    %97 = vector.load %arg13[%c0_44, %c0_45] : memref<1x1024xf32, #tpu.memory_space<vmem>>, vector<1x1024xf32>
    %c0_46 = arith.constant 0 : index
    %c0_47 = arith.constant 0 : index
    %98 = vector.load %arg14[%c0_46, %c0_47] : memref<1x1024xf32, #tpu.memory_space<vmem>>, vector<1x1024xf32>
    %cst_48 = arith.constant dense<0.000000e+00> : vector<8xf32>
    %99 = vector.multi_reduction <add>, %95, %cst_48 [1] : vector<8x1024xf32> to vector<8xf32>
    %100 = vector.shape_cast %99 : vector<8xf32> to vector<8x1xf32>
    %cst_49 = arith.constant 1.024000e+03 : f32
    %101 = vector.broadcast %cst_49 : f32 to vector<8x1xf32>
    %102 = arith.divf %100, %101 : vector<8x1xf32>
    %103 = vector.broadcast %102 : vector<8x1xf32> to vector<8x1024xf32>
    %104 = arith.subf %95, %103 : vector<8x1024xf32>
    %105 = arith.mulf %104, %104 : vector<8x1024xf32>
    %cst_50 = arith.constant dense<0.000000e+00> : vector<8xf32>
    %106 = vector.multi_reduction <add>, %105, %cst_50 [1] : vector<8x1024xf32> to vector<8xf32>
    %107 = vector.shape_cast %106 : vector<8xf32> to vector<8x1xf32>
    %cst_51 = arith.constant 1.024000e+03 : f32
    %108 = vector.broadcast %cst_51 : f32 to vector<8x1xf32>
    %109 = arith.divf %107, %108 : vector<8x1xf32>
    %cst_52 = arith.constant 9.99999974E-6 : f32
    %110 = vector.broadcast %cst_52 : f32 to vector<8x1xf32>
    %111 = arith.addf %109, %110 : vector<8x1xf32>
    %112 = math.rsqrt %111 : vector<8x1xf32>
    %113 = vector.broadcast %102 : vector<8x1xf32> to vector<8x1024xf32>
    %114 = arith.subf %95, %113 : vector<8x1024xf32>
    %115 = vector.broadcast %112 : vector<8x1xf32> to vector<8x1024xf32>
    %116 = arith.mulf %114, %115 : vector<8x1024xf32>
    %117 = vector.broadcast %97 : vector<1x1024xf32> to vector<8x1024xf32>
    %118 = arith.mulf %116, %117 : vector<8x1024xf32>
    %119 = vector.broadcast %98 : vector<1x1024xf32> to vector<8x1024xf32>
    %120 = arith.addf %118, %119 : vector<8x1024xf32>
    %cst_53 = arith.constant 0.000000e+00 : f32
    %121 = vector.broadcast %cst_53 : f32 to vector<8x1024xf32>
    %122 = arith.cmpf ogt, %120, %121 : vector<8x1024xf32>
    %cst_54 = arith.constant 2.000000e-01 : f32
    %123 = vector.broadcast %cst_54 : f32 to vector<8x1024xf32>
    %124 = arith.mulf %123, %120 : vector<8x1024xf32>
    %125 = arith.select %122, %120, %124 : vector<8x1024xi1>, vector<8x1024xf32>
    %126 = arith.addf %125, %96 : vector<8x1024xf32>
    %127 = arith.truncf %126 : vector<8x1024xf32> to vector<8x1024xbf16>
    %c0_55 = arith.constant 0 : index
    %c0_56 = arith.constant 0 : index
    %128 = vector.load %arg15[%c0_55, %c0_56] : memref<1024x1024xbf16, #tpu.memory_space<vmem>>, vector<1024x1024xbf16>
    %cst_57 = arith.constant dense<0.000000e+00> : vector<8x1024xf32>
    %129 = tpu.matmul %127, %128, %cst_57 {dimension_numbers = #tpu.dot_dimension_numbers<[1], [0], [0], [1], [0, 0, 1, 1], [], []>} : vector<8x1024xbf16>, vector<1024x1024xbf16>, vector<8x1024xf32> -> vector<8x1024xf32>
    %c0_58 = arith.constant 0 : index
    %c0_59 = arith.constant 0 : index
    %130 = vector.load %arg16[%c0_58, %c0_59] : memref<1x1024xf32, #tpu.memory_space<vmem>>, vector<1x1024xf32>
    %131 = vector.broadcast %130 : vector<1x1024xf32> to vector<8x1024xf32>
    %132 = arith.addf %129, %131 : vector<8x1024xf32>
    %c0_60 = arith.constant 0 : index
    %c0_61 = arith.constant 0 : index
    %133 = vector.load %arg17[%c0_60, %c0_61] : memref<8x1024xf32, #tpu.memory_space<vmem>>, vector<8x1024xf32>
    tpu.vector_store %arg17[%c0_60, %c0_61], %132 {strides = array<i32>} : memref<8x1024xf32, #tpu.memory_space<vmem>>, vector<8x1024xf32>,
    return
  }
}

</mosaic_0001>

<bundles_post_ra>
// kernel: decoder_forward.1
= control target key start
LH: loop header
LB: loop body
LE: loop exit
PB: predicated region body
PF: predicated region fallthrough
CT: control target
= control target key end

     0   :  { %s16982_s0 = inlined_call_operand.hbm [shape: f32[8,128], index: 0, kind: input, shape index: {}]   ;;  %s16983_s1 = inlined_call_operand.hbm [shape: bf16[128,128], index: 1, kind: input, shape index: {}]   ;;  %s16984_s2 = inlined_call_operand.hbm [shape: f32[1,128], index: 2, kind: input, shape index: {}]   ;;  %s16985_s3 = inlined_call_operand.hbm [shape: bf16[128,512], index: 3, kind: input, shape index: {}]   ;;  %s16986_s4 = inlined_call_operand.hbm [shape: f32[1,512], index: 4, kind: input, shape index: {}]   ;;  %s16987_s5 = inlined_call_operand.hbm [shape: f32[1,256], index: 5, kind: input, shape index: {}]   ;;  %s16988_s6 = inlined_call_operand.hbm [shape: f32[1,256], index: 6, kind: input, shape index: {}]   ;;  %s16989_s7 = inlined_call_operand.hbm [shape: bf16[256,1024], index: 7, kind: input, shape index: {}]   ;;  %s16990_s8 = inlined_call_operand.hbm [shape: f32[1,1024], index: 8, kind: input, shape index: {}]   ;;  %s16991_s9 = inlined_call_operand.hbm [shape: f32[1,512], index: 9, kind: input, shape index: {}]   ;;  %s16992_s10 = inlined_call_operand.hbm [shape: f32[1,512], index: 10, kind: input, shape index: {}]   ;;  %s16993_s11 = inlined_call_operand.hbm [shape: bf16[512,2048], index: 11, kind: input, shape index: {}]   ;;  %s16994_s12 = inlined_call_operand.hbm [shape: f32[1,2048], index: 12, kind: input, shape index: {}]   ;;  %s16995_s13 = inlined_call_operand.hbm [shape: f32[1,1024], index: 13, kind: input, shape index: {}]   ;;  %s16996_s14 = inlined_call_operand.hbm [shape: f32[1,1024], index: 14, kind: input, shape index: {}]   ;;  %s16997_s15 = inlined_call_operand.hbm [shape: bf16[1024,1024], index: 15, kind: input, shape index: {}]   ;;  %s16998_s16 = inlined_call_operand.hbm [shape: f32[1,1024], index: 16, kind: input, shape index: {}]   ;;  %s16999_s17 = inlined_call_operand.hbm [shape: f32[8,1024], index: 17, kind: output, shape index: {}]  }
   0x1   :  { %17000 = sst [smem:[#allocation40_spill]] %s16982_s0 }
   0x2   :  { %17001 = sst [smem:[#allocation41_spill]] %s16983_s1 }
   0x3   :  { %17002 = sst [smem:[#allocation42_spill]] %s16999_s17 }
   0x4   :  { %22 = vsyncpa [#allocation3], 0 }
   0x5   :  { %23 = vsyncpa [#allocation6], 0 }
   0x6   :  { %24 = vsyncpa [#allocation9], 0 }
   0x7   :  { %25 = vsyncpa [#allocation12], 0 }
   0x8   :  { %26 = vsyncpa [#allocation15], 0 }
   0x9   :  { %27 = vsyncpa [#allocation18], 0 }
   0xa   :  { %28 = vsyncpa [#allocation21], 0 }
   0xb   :  { %29 = vsyncpa [#allocation24], 0 }
   0xc   :  { %30 = vsyncpa [#allocation27], 0  ;;  %s17003_s26 = sld [smem:[#allocation41_spill]] }
  0x12   :  { %s47_s27 = sshll.u32 %s17003_s26, 4  ;;  %s48_s27 = int_to_ptr.hbm [resolvable:$true] %s47_s27 }
  0x13   :  { %31 = vsyncpa [#allocation4], 0  ;;  %s16287_s28 = smov [#allocation5]   ;;  %s71_s18 = sshll.u32 %s16985_s3, 4  ;;  %s72_s18 = int_to_ptr.hbm [resolvable:$true] %s71_s18 }
  0x14   :  { %s49_s29 = sshll.u32 %s16287_s28, 4  ;;  %s16288_s19 = smov 64   ;;  %s50_s29 = int_to_ptr.vmem [resolvable:$true] %s49_s29 }
  0x15   :  { %s16289_s1 = smov 4   ;;  %s16290_s20 = smov [#allocation8]  }
  0x16   :  { %55 = dma.hbm_to_vmem [thread:$0]  %s48_s27, 1024, %s50_s29, [#allocation6], %s16288_s19, %s16288_s19, %s16289_s1  }
  0x17   :  { %s73_s21 = sshll.u32 %s16290_s20, 4  ;;  %s16291_s22 = smov 256   ;;  %s74_s21 = int_to_ptr.vmem [resolvable:$true] %s73_s21 }
  0x18   :  { %s16292_s23 = smov 16   ;;  %s96_s26 = sshll.u32 %s16987_s5, 4  ;;  %s97_s26 = int_to_ptr.hbm [resolvable:$true] %s96_s26 }
  0x19   :  { %79 = dma.hbm_to_vmem [thread:$0]  %s72_s18, 4096, %s74_s21, [#allocation9], %s16291_s22, %s16291_s22, %s16292_s23  }
  0x1a   :  { %s16293_s28 = smov [#allocation11]   ;;  %s117_s17 = sshll.u32 %s16989_s7, 4  ;;  %s118_s17 = int_to_ptr.hbm [resolvable:$true] %s117_s17 }
  0x1b   :  { %s98_s0 = sshll.u32 %s16293_s28, 4  ;;  %s16294_s27 = smov [#allocation14]   ;;  %s99_s0 = int_to_ptr.vmem [resolvable:$true] %s98_s0 }
  0x1c   :  { %101 = dma.hbm_to_vmem [thread:$0]  %s97_s26, 32, %s99_s0, [#allocation12]  }
  0x1d   :  { %s119_s29 = sshll.u32 %s16294_s27, 4  ;;  %s16295_s1 = smov 512   ;;  %s120_s29 = int_to_ptr.vmem [resolvable:$true] %s119_s29 }
  0x1e   :  { %s16296_s20 = smov 32   ;;  %s142_s21 = sshll.u32 %s16991_s9, 4  ;;  %s143_s21 = int_to_ptr.hbm [resolvable:$true] %s142_s21 }
  0x1f   :  { %125 = dma.hbm_to_vmem [thread:$0]  %s118_s17, 16384, %s120_s29, [#allocation15], %s16295_s1, %s16295_s1, %s16296_s20  }
  0x20   :  { %s16297_s22 = smov [#allocation17]   ;;  %s163_s25 = sshll.u32 %s16993_s11, 4  ;;  %s164_s25 = int_to_ptr.hbm [resolvable:$true] %s163_s25 }
  0x21   :  { %s144_s23 = sshll.u32 %s16297_s22, 4  ;;  %s16298_s26 = smov [#allocation20]   ;;  %s145_s23 = int_to_ptr.vmem [resolvable:$true] %s144_s23 }
  0x22   :  { %147 = dma.hbm_to_vmem [thread:$0]  %s143_s21, 64, %s145_s23, [#allocation18]  }
  0x23   :  { %s165_s28 = sshll.u32 %s16298_s26, 4  ;;  %s188_s17 = sshll.u32 %s16995_s13, 4  ;;  %s166_s28 = int_to_ptr.vmem [resolvable:$true] %s165_s28  ;;  %s189_s17 = int_to_ptr.hbm [resolvable:$true] %s188_s17 }
  0x24   :  { %s16299_s30 = smov 1024   ;;  %s16300_s9 = smov [#allocation23]  }
  0x25   :  { %171 = dma.hbm_to_vmem [thread:$0]  %s164_s25, 65536, %s166_s28, [#allocation21], %s16299_s30, %s16299_s30, %s16288_s19  }
  0x26   :  { %s190_s27 = sshll.u32 %s16300_s9, 4  ;;  %s209_s18 = sshll.u32 %s16997_s15, 4  ;;  %s191_s27 = int_to_ptr.vmem [resolvable:$true] %s190_s27  ;;  %s210_s18 = int_to_ptr.hbm [resolvable:$true] %s209_s18 }
  0x27   :  { %193 = dma.hbm_to_vmem [thread:$0]  %s189_s17, 128, %s191_s27, [#allocation24]  }
  0x28   :  { %s17004_s22 = sld [smem:[#allocation40_spill]]  ;;  %s16301_s7 = smov [#allocation26]  }
  0x29   :  { %s211_s24 = sshll.u32 %s16301_s7, 4  ;;  %s16302_s13 = smov [#allocation2]   ;;  %s212_s24 = int_to_ptr.vmem [resolvable:$true] %s211_s24 }
  0x2a   :  { %217 = dma.hbm_to_vmem [thread:$0]  %s210_s18, 65536, %s212_s24, [#allocation27], %s16295_s1, %s16295_s1, %s16296_s20  }
  0x2b   :  { %s39_s19 = sshll.u32 %s16302_s13, 4  ;;  %s61_s15 = sshll.u32 %s16984_s2, 4  ;;  %s40_s19 = int_to_ptr.vmem [resolvable:$true] %s39_s19  ;;  %s62_s15 = int_to_ptr.hbm [resolvable:$true] %s61_s15 }
  0x2c   :  { %s85_s3 = sshll.u32 %s16986_s4, 4  ;;  %s16303_s17 = smov [#allocation7]   ;;  %s86_s3 = int_to_ptr.hbm [resolvable:$true] %s85_s3 }
  0x2d   :  { %s63_s30 = sshll.u32 %s16303_s17, 4  ;;  %s16304_s9 = smov [#allocation10]   ;;  %s64_s30 = int_to_ptr.vmem [resolvable:$true] %s63_s30 }
  0x2e   :  { %s37_s23 = sshll.u32 %s17004_s22, 4  ;;  %s87_s1 = sshll.u32 %s16304_s9, 4  ;;  %s38_s23 = int_to_ptr.hbm [resolvable:$true] %s37_s23  ;;  %s88_s1 = int_to_ptr.vmem [resolvable:$true] %s87_s1 }
  0x2f   :  { %42 = dma.hbm_to_vmem [thread:$0]  %s38_s23, 128, %s40_s19, [#allocation3]  }
  0x30   :  { %66 = dma.hbm_to_vmem [thread:$0]  %s62_s15, 16, %s64_s30, [#allocation6]  }
  0x31   :  { %s107_s29 = sshll.u32 %s16988_s6, 4  ;;  %s131_s18 = sshll.u32 %s16990_s8, 4  ;;  %s108_s29 = int_to_ptr.hbm [resolvable:$true] %s107_s29  ;;  %s132_s18 = int_to_ptr.hbm [resolvable:$true] %s131_s18 }
  0x32   :  { %90 = dma.hbm_to_vmem [thread:$0]  %s86_s3, 64, %s88_s1, [#allocation9]  }
  0x33   :  { %s16305_s11 = smov [#allocation13]   ;;  %s16306_s21 = smov [#allocation16]  }
  0x34   :  { %s109_s4 = sshll.u32 %s16305_s11, 4  ;;  %s133_s22 = sshll.u32 %s16306_s21, 4  ;;  %s110_s4 = int_to_ptr.vmem [resolvable:$true] %s109_s4  ;;  %s134_s22 = int_to_ptr.vmem [resolvable:$true] %s133_s22 }
  0x35   :  { %112 = dma.hbm_to_vmem [thread:$0]  %s108_s29, 32, %s110_s4, [#allocation12]  }
  0x36   :  { %s153_s24 = sshll.u32 %s16992_s10, 4  ;;  %s177_s19 = sshll.u32 %s16994_s12, 4  ;;  %s154_s24 = int_to_ptr.hbm [resolvable:$true] %s153_s24  ;;  %s178_s19 = int_to_ptr.hbm [resolvable:$true] %s177_s19 }
  0x37   :  { %136 = dma.hbm_to_vmem [thread:$0]  %s132_s18, 128, %s134_s22, [#allocation15]  }
  0x38   :  { %s16307_s25 = smov [#allocation19]   ;;  %s16308_s26 = smov [#allocation22]  }
  0x39   :  { %s155_s8 = sshll.u32 %s16307_s25, 4  ;;  %s179_s15 = sshll.u32 %s16308_s26, 4  ;;  %s156_s8 = int_to_ptr.vmem [resolvable:$true] %s155_s8  ;;  %s180_s15 = int_to_ptr.vmem [resolvable:$true] %s179_s15 }
  0x3a   :  { %158 = dma.hbm_to_vmem [thread:$0]  %s154_s24, 64, %s156_s8, [#allocation18]  }
  0x3b   :  { %s199_s3 = sshll.u32 %s16996_s14, 4  ;;  %s223_s30 = sshll.u32 %s16998_s16, 4  ;;  %s200_s3 = int_to_ptr.hbm [resolvable:$true] %s199_s3  ;;  %s224_s30 = int_to_ptr.hbm [resolvable:$true] %s223_s30 }
  0x3c   :  { %182 = dma.hbm_to_vmem [thread:$0]  %s178_s19, 256, %s180_s15, [#allocation21]  }
  0x3d   :  { %s16309_s9 = smov [#allocation25]   ;;  %s16310_s1 = smov [#allocation28]  }
  0x3e   :  { %s201_s12 = sshll.u32 %s16309_s9, 4  ;;  %s225_s20 = sshll.u32 %s16310_s1, 4  ;;  %s202_s12 = int_to_ptr.vmem [resolvable:$true] %s201_s12  ;;  %s226_s20 = int_to_ptr.vmem [resolvable:$true] %s225_s20 }
  0x3f   :  { %204 = dma.hbm_to_vmem [thread:$0]  %s200_s3, 128, %s202_s12, [#allocation24]  }
  0x40   :  { %228 = dma.hbm_to_vmem [thread:$0]  %s224_s30, 128, %s226_s20, [#allocation27]  }
  0x41   :  { %16267 = dma.done.wait [#allocation3], 128  }
  0x42   :  { %16268 = vsyncadd [#allocation3], 4294967168 }
  0x43   :  { %16269 = dma.done.wait [#allocation6], 1040  }
  0x44   :  { %16270 = vsyncadd [#allocation6], 4294966256 }
  0x45   :  { %16271 = dma.done.wait [#allocation9], 4160  }
  0x46   :  { %16272 = vsyncadd [#allocation9], 4294963136 }
  0x47   :  { %16273 = dma.done.wait [#allocation12], 64  }
  0x48   :  { %16274 = vsyncadd [#allocation12], 4294967232 }
  0x49   :  { %16275 = dma.done.wait [#allocation15], 16512  }
  0x4a   :  { %16276 = vsyncadd [#allocation15], 4294950784 }
  0x4b   :  { %16277 = dma.done.wait [#allocation18], 128  }
  0x4c   :  { %16278 = vsyncadd [#allocation18], 4294967168 }
  0x4d   :  { %16279 = dma.done.wait [#allocation21], 65792  }
  0x4e   :  { %16280 = vsyncadd [#allocation21], 4294901504 }
  0x4f   :  { %16281 = dma.done.wait [#allocation24], 256  }
  0x50   :  { %16282 = vsyncadd [#allocation24], 4294967040 }
  0x51   :  { %16283 = dma.done.wait [#allocation27], 65664  }
  0x52   :  { %16284 = vsyncadd [#allocation27], 4294901632  ;;  %v14605_v0 = vld [vmem:[#allocation5 + $0x38] sm:$0xff]  ;;  %v14604_v1 = vld [vmem:[#allocation5 + $0x30] sm:$0xff]  ;;  %s16314_s14 = smov [#allocation29]   ;;  %s17005_s2 = sld [smem:[#allocation42_spill]] }
  0x53   :  { %367 = vmatpush.bf16.msra.mxu0 %v14605_v0  ;;  %v9976_v2 = vld [vmem:[#allocation8 + $0xe0] sm:$0xf]  ;;  %v14636_v3 = vld [vmem:[#allocation8 + $0xec] sm:$0xf0]  ;;  %v14634_v4 = vld [vmem:[#allocation8 + $0xe4] sm:$0xf] }
  0x54   :  { %v9977_v5 = vor.u32 %v14636_v3, %v9976_v2  ;;  %v9978_v6 = vld [vmem:[#allocation8 + $0xf0] sm:$0xf0]  ;;  %v9984_v7 = vld [vmem:[#allocation8 + $0xe8] sm:$0xf]  ;;  %v14637_v8 = vld [vmem:[#allocation8 + $0xf4] sm:$0xf0] }
  0x55   :  { %v14603_v9 = vld [vmem:[#allocation5 + $0x28] sm:$0xff]  ;;  %v9981_v10 = vor.u32 %v14634_v4, %v9978_v6  ;;  %v9985_v11 = vor.u32 %v14637_v8, %v9984_v7  ;;  %v9960_v12 = vld [vmem:[#allocation8 + $0xc0] sm:$0xf]  ;;  %v14632_v13 = vld [vmem:[#allocation8 + $0xcc] sm:$0xf0]  ;;  %s9810_s16 = sshll.u32 %s16314_s14, 4  ;;  %s9811_s16 = int_to_ptr.vmem [resolvable:$true] %s9810_s16 }
  0x56   :  { %587 = vmatpush.bf16.msra.mxu1 %v9977_v5  ;;  %v14630_v14 = vld [vmem:[#allocation8 + $0xc4] sm:$0xf]  ;;  %v9962_v15 = vld [vmem:[#allocation8 + $0xd0] sm:$0xf0]  ;;  %v9961_v16 = vor.u32 %v14632_v13, %v9960_v12  ;;  %v9968_v18 = vld [vmem:[#allocation8 + $0xc8] sm:$0xf] }
  0x57   :  { %368 = vmatpush.bf16.msra.mxu0 %v14604_v1  ;;  %600 = vmatpush.bf16.msra.mxu2 %v9981_v10  ;;  %v9965_v17 = vor.u32 %v14630_v14, %v9962_v15  ;;  %v14633_v19 = vld [vmem:[#allocation8 + $0xd4] sm:$0xf0]  ;;  %v9944_v21 = vld [vmem:[#allocation8 + $0xa0] sm:$0xf]  ;;  %v14628_v22 = vld [vmem:[#allocation8 + $0xac] sm:$0xf0] }
  0x58   :  { %613 = vmatpush.bf16.msra.mxu3 %v9985_v11  ;;  %v9969_v20 = vor.u32 %v14633_v19, %v9968_v18  ;;  %v14626_v23 = vld [vmem:[#allocation8 + $0xa4] sm:$0xf]  ;;  %v9946_v24 = vld [vmem:[#allocation8 + $0xb0] sm:$0xf0]  ;;  %v9952_v25 = vld [vmem:[#allocation8 + $0xa8] sm:$0xf]  ;;  %v9945_v27 = vor.u32 %v14628_v22, %v9944_v21 }
  0x59   :  { %v14602_v26 = vld [vmem:[#allocation5 + $0x20] sm:$0xff]  ;;  %v14629_v28 = vld [vmem:[#allocation8 + $0xb4] sm:$0xf0]  ;;  %v9949_v29 = vor.u32 %v14626_v23, %v9946_v24  ;;  %v14624_v32 = vld [vmem:[#allocation8 + $0x8c] sm:$0xf0]  ;;  %s9812_s5 = sshll.u32 %s17005_s2, 4  ;;  %s9813_s5 = int_to_ptr.hbm [resolvable:$true] %s9812_s5 }
  0x5a   :  { %588 = vmatpush.bf16.msra.mxu1 %v9961_v16  ;;  %v9953_v30 = vor.u32 %v14629_v28, %v9952_v25  ;;  %v9928_v31 = vld [vmem:[#allocation8 + $0x80] sm:$0xf]  ;;  %v14622_v33 = vld [vmem:[#allocation8 + $0x84] sm:$0xf]  ;;  %v9930_v34 = vld [vmem:[#allocation8 + $0x90] sm:$0xf0] }
  0x5b   :  { %369 = vmatpush.bf16.msra.mxu0 %v14603_v9  ;;  %601 = vmatpush.bf16.msra.mxu2 %v9965_v17  ;;  %v9936_v35 = vld [vmem:[#allocation8 + $0x88] sm:$0xf]  ;;  %v14625_v36 = vld [vmem:[#allocation8 + $0x94] sm:$0xf0]  ;;  %v9929_v38 = vor.u32 %v14624_v32, %v9928_v31  ;;  %v9933_v39 = vor.u32 %v14622_v33, %v9930_v34  ;;  %v9912_v41 = vld [vmem:[#allocation8 + $0x60] sm:$0xf] }
  0x5c   :  { %614 = vmatpush.bf16.msra.mxu3 %v9969_v20  ;;  %v14601_v37 = vld [vmem:[#allocation5 + $0x18] sm:$0xff]  ;;  %v9937_v40 = vor.u32 %v14625_v36, %v9936_v35  ;;  %v14620_v42 = vld [vmem:[#allocation8 + $0x6c] sm:$0xf0]  ;;  %v14618_v43 = vld [vmem:[#allocation8 + $0x64] sm:$0xf] }
  0x5d   :  { %v9914_v44 = vld [vmem:[#allocation8 + $0x70] sm:$0xf0]  ;;  %v9920_v45 = vld [vmem:[#allocation8 + $0x68] sm:$0xf]  ;;  %v14621_v46 = vld [vmem:[#allocation8 + $0x74] sm:$0xf0]  ;;  %v9913_v48 = vor.u32 %v14620_v42, %v9912_v41 }
  0x5e   :  { %589 = vmatpush.bf16.msra.mxu1 %v9945_v27  ;;  %v14600_v47 = vld [vmem:[#allocation5 + $0x10] sm:$0xff]  ;;  %v9896_v49 = vld [vmem:[#allocation8 + $0x40] sm:$0xf]  ;;  %v9917_v50 = vor.u32 %v14618_v43, %v9914_v44  ;;  %v9921_v51 = vor.u32 %v14621_v46, %v9920_v45  ;;  %v14614_v53 = vld [vmem:[#allocation8 + $0x44] sm:$0xf] }
  0x5f   :  { %370 = vmatpush.bf16.msra.mxu0 %v14602_v26  ;;  %602 = vmatpush.bf16.msra.mxu2 %v9949_v29  ;;  %v14616_v52 = vld [vmem:[#allocation8 + $0x4c] sm:$0xf0]  ;;  %v9898_v54 = vld [vmem:[#allocation8 + $0x50] sm:$0xf0]  ;;  %v9904_v55 = vld [vmem:[#allocation8 + $0x48] sm:$0xf] }
  0x60   :  { %615 = vmatpush.bf16.msra.mxu3 %v9953_v30  ;;  %v14617_v56 = vld [vmem:[#allocation8 + $0x54] sm:$0xf0]  ;;  %v14599_v57 = vld [vmem:[#allocation5 + $0x8] sm:$0xff]  ;;  %v9897_v58 = vor.u32 %v14616_v52, %v9896_v49  ;;  %v9901_v59 = vor.u32 %v14614_v53, %v9898_v54  ;;  %v9986_v62 = vld [vmem:[#allocation8 + $0xf8] sm:$0xf0] }
  0x61   :  { %v9905_v60 = vor.u32 %v14617_v56, %v9904_v55  ;;  %v14635_v61 = vld [vmem:[#allocation8 + $0xec] sm:$0xf]  ;;  %v14598_v63 = vld [vmem:[#allocation5] sm:$0xff]  ;;  %v16465_v0 = vld [vmem:[#allocation2] sm:$0xff] }
  0x62   :  { %590 = vmatpush.bf16.msra.mxu1 %v9929_v38  ;;  %v9989_v1 = vor.u32 %v14635_v61, %v9986_v62  ;;  %v14631_v2 = vld [vmem:[#allocation8 + $0xcc] sm:$0xf]  ;;  %v9970_v3 = vld [vmem:[#allocation8 + $0xd8] sm:$0xf0]  ;;  %v298_v4 = vpack.c.bf16 %v16465_v0, %v16465_v0  ;;  %v9880_v18 = vld [vmem:[#allocation8 + $0x20] sm:$0xf] }
  0x63   :  { %371 = vmatpush.bf16.msra.mxu0 %v14601_v37  ;;  %603 = vmatpush.bf16.msra.mxu2 %v9933_v39  ;;  %v9973_v5 = vor.u32 %v14631_v2, %v9970_v3  ;;  %v14627_v6 = vld [vmem:[#allocation8 + $0xac] sm:$0xf]  ;;  %v9954_v7 = vld [vmem:[#allocation8 + $0xb8] sm:$0xf0]  ;;  %v14612_v19 = vld [vmem:[#allocation8 + $0x2c] sm:$0xf0] }
  0x64   :  { %616 = vmatpush.bf16.msra.mxu3 %v9937_v40  ;;  %v9957_v8 = vor.u32 %v14627_v6, %v9954_v7  ;;  %v14623_v9 = vld [vmem:[#allocation8 + $0x8c] sm:$0xf]  ;;  %v9938_v10 = vld [vmem:[#allocation8 + $0x98] sm:$0xf0]  ;;  %v14610_v20 = vld [vmem:[#allocation8 + $0x24] sm:$0xf]  ;;  %v9881_v21 = vor.u32 %v14612_v19, %v9880_v18 }
  0x65   :  { %v9941_v11 = vor.u32 %v14623_v9, %v9938_v10  ;;  %v14619_v12 = vld [vmem:[#allocation8 + $0x6c] sm:$0xf]  ;;  %v9922_v13 = vld [vmem:[#allocation8 + $0x78] sm:$0xf0]  ;;  %v9882_v22 = vld [vmem:[#allocation8 + $0x30] sm:$0xf0] }
  0x66   :  { %591 = vmatpush.bf16.msra.mxu1 %v9913_v48  ;;  %v9925_v14 = vor.u32 %v14619_v12, %v9922_v13  ;;  %v14615_v15 = vld [vmem:[#allocation8 + $0x4c] sm:$0xf]  ;;  %v9906_v16 = vld [vmem:[#allocation8 + $0x58] sm:$0xf0]  ;;  %v9888_v23 = vld [vmem:[#allocation8 + $0x28] sm:$0xf]  ;;  %v9885_v25 = vor.u32 %v14610_v20, %v9882_v22 }
  0x67   :  { %372 = vmatpush.bf16.msra.mxu0 %v14600_v47  ;;  %604 = vmatpush.bf16.msra.mxu2 %v9917_v50  ;;  %v9909_v17 = vor.u32 %v14615_v15, %v9906_v16  ;;  %v14613_v24 = vld [vmem:[#allocation8 + $0x34] sm:$0xf0]  ;;  %v14611_v27 = vld [vmem:[#allocation8 + $0x2c] sm:$0xf]  ;;  %v9890_v28 = vld [vmem:[#allocation8 + $0x38] sm:$0xf0] }
  0x68   :  { %617 = vmatpush.bf16.msra.mxu3 %v9921_v51  ;;  %v9889_v26 = vor.u32 %v14613_v24, %v9888_v23  ;;  %v9893_v29 = vor.u32 %v14611_v27, %v9890_v28  ;;  %v9864_v30 = vld [vmem:[#allocation8] sm:$0xf]  ;;  %v14608_v31 = vld [vmem:[#allocation8 + $0xc] sm:$0xf0]  ;;  %v14606_v32 = vld [vmem:[#allocation8 + $0x4] sm:$0xf] }
  0x69   :  { %v9865_v33 = vor.u32 %v14608_v31, %v9864_v30  ;;  %v9866_v34 = vld [vmem:[#allocation8 + $0x10] sm:$0xf0]  ;;  %v9872_v35 = vld [vmem:[#allocation8 + $0x8] sm:$0xf]  ;;  %v14609_v36 = vld [vmem:[#allocation8 + $0x14] sm:$0xf0] }
  0x6a   :  { %592 = vmatpush.bf16.msra.mxu1 %v9897_v58  ;;  %v9869_v37 = vor.u32 %v14606_v32, %v9866_v34  ;;  %v9873_v38 = vor.u32 %v14609_v36, %v9872_v35  ;;  %v14607_v39 = vld [vmem:[#allocation8 + $0xc] sm:$0xf]  ;;  %v9874_v40 = vld [vmem:[#allocation8 + $0x18] sm:$0xf0]  ;;  %v16470_v50 = vld [vmem:[#allocation10] sm:$0xf] }
  0x6b   :  { %373 = vmatpush.bf16.msra.mxu0 %v14599_v57  ;;  %605 = vmatpush.bf16.msra.mxu2 %v9901_v59  ;;  %v9877_v41 = vor.u32 %v14607_v39, %v9874_v40  ;;  %v15818_v42 = vld [vmem:[#allocation7] ss:$0 sm:$0xff]  ;;  %v419_v53 = vperm.slane %v16470_v50, 0  ;;  %v420_v54 = vperm.slane %v16470_v50, 1  ;;  %v10472_v6 = vld [vmem:[#allocation14 + $0x3c0] sm:$0xf] }
  0x6c   :  { %618 = vmatpush.bf16.msra.mxu3 %v9905_v60  ;;  %v14694_v9 = vld [vmem:[#allocation14 + $0x1c4] sm:$0xf]  ;;  %v10184_v15 = vld [vmem:[#allocation14 + $0x180] sm:$0xf] }
  0x6d   :  { %v10218_v10 = vld [vmem:[#allocation14 + $0x1e0] sm:$0xf0]  ;;  %v10440_v18 = vld [vmem:[#allocation14 + $0x380] sm:$0xf] }
  0x6e   :  { %593 = vmatpush.bf16.msra.mxu1 %v9881_v21  ;;  %v10221_v12 = vor.u32 %v14694_v9, %v10218_v10  ;;  %v14758_v13 = vld [vmem:[#allocation14 + $0x3c4] sm:$0xf]  ;;  %v14754_v19 = vld [vmem:[#allocation14 + $0x39c] sm:$0xf0] }
  0x6f   :  { %374 = vmatpush.bf16.msra.mxu0 %v14598_v63  ;;  %606 = vmatpush.bf16.msra.mxu2 %v9885_v25  ;;  %v10441_v21 = vor.u32 %v14754_v19, %v10440_v18  ;;  %v14686_v22 = vld [vmem:[#allocation14 + $0x184] sm:$0xf]  ;;  %v10152_v27 = vld [vmem:[#allocation14 + $0x140] sm:$0xf] }
  0x70   :  { %619 = vmatpush.bf16.msra.mxu3 %v9889_v26  ;;  %v10186_v23 = vld [vmem:[#allocation14 + $0x1a0] sm:$0xf0]  ;;  %v14682_v28 = vld [vmem:[#allocation14 + $0x15c] sm:$0xf0] }
  0x71   :  { %v14750_v24 = vld [vmem:[#allocation14 + $0x384] sm:$0xf]  ;;  %v10189_v25 = vor.u32 %v14686_v22, %v10186_v23  ;;  %v10408_v30 = vld [vmem:[#allocation14 + $0x340] sm:$0xf] }
  0x72   :  { %375 = vmatmul.bf16.vlgmr.msra.gmra.mxu0 %v298_v4  ;;  %594 = vmatpush.bf16.msra.mxu1 %v9865_v33  ;;  %v10216_v4 = vld [vmem:[#allocation14 + $0x1c0] sm:$0xf]  ;;  %v10442_v26 = vld [vmem:[#allocation14 + $0x3a0] sm:$0xf0]  ;;  %v10153_v33 = vor.u32 %v14682_v28, %v10152_v27 }
  0x73   :  { %626 = vmatpush.bf16.msrb.mxu0 %v9989_v1  ;;  %607 = vmatpush.bf16.msra.mxu2 %v9869_v37  ;;  %v14746_v31 = vld [vmem:[#allocation14 + $0x35c] sm:$0xf0]  ;;  %v14678_v32 = vld [vmem:[#allocation14 + $0x144] sm:$0xf] }
  0x74   :  { %620 = vmatpush.bf16.msra.mxu3 %v9873_v38  ;;  %v10154_v34 = vld [vmem:[#allocation14 + $0x160] sm:$0xf0]  ;;  %v10409_v37 = vor.u32 %v14746_v31, %v10408_v30  ;;  %v10120_v39 = vld [vmem:[#allocation14 + $0x100] sm:$0xf] }
  0x75   :  { %v14742_v35 = vld [vmem:[#allocation14 + $0x344] sm:$0xf]  ;;  %v10157_v38 = vor.u32 %v14678_v32, %v10154_v34  ;;  %v14674_v40 = vld [vmem:[#allocation14 + $0x11c] sm:$0xf0] }
  0x76   :  { %v10410_v36 = vld [vmem:[#allocation14 + $0x360] sm:$0xf0]  ;;  %v10312_v9 = vld [vmem:[#allocation14 + $0x280] sm:$0xf] }
  0x77   :  { %627 = vmatpush.bf16.msrb.mxu0 %v9973_v5  ;;  %v14698_v5 = vld [vmem:[#allocation14 + $0x1dc] sm:$0xf0]  ;;  %v14646_v32 = vld [vmem:[#allocation14 + $0x44] sm:$0xf] }
  0x78   :  { %v10217_v7 = vor.u32 %v14698_v5, %v10216_v4  ;;  %1509 = vmatpush.bf16.msrb.mxu3 %v10221_v12  ;;  %v14654_v12 = vld [vmem:[#allocation14 + $0x84] sm:$0xf]  ;;  %v10024_v27 = vld [vmem:[#allocation14 + $0x40] sm:$0xf] }
  0x79   :  { %v14650_v28 = vld [vmem:[#allocation14 + $0x5c] sm:$0xf0] }
  0x7a   :  { %1483 = vmatpush.bf16.msrb.mxu1 %v10217_v7  ;;  %v10056_v7 = vld [vmem:[#allocation14 + $0x80] sm:$0xf]  ;;  %v10025_v30 = vor.u32 %v14650_v28, %v10024_v27  ;;  %v10418_v27 = vld [vmem:[#allocation14 + $0x368] sm:$0xf0] }
  0x7b   :  { %628 = vmatpush.bf16.msrb.mxu0 %v9957_v8  ;;  %v14762_v8 = vld [vmem:[#allocation14 + $0x3dc] sm:$0xf0] }
  0x7c   :  { %1510 = vmatpush.bf16.msrb.mxu3 %v10189_v25  ;;  %v14714_v31 = vld [vmem:[#allocation14 + $0x25c] sm:$0xf0] }
  0x7f   :  { %629 = vmatpush.bf16.msrb.mxu0 %v9941_v11  ;;  %v10473_v11 = vor.u32 %v14762_v8, %v10472_v6  ;;  %v14658_v8 = vld [vmem:[#allocation14 + $0x9c] sm:$0xf0] }
  0x80   :  { %1511 = vmatpush.bf16.msrb.mxu3 %v10157_v38  ;;  %v14642_v38 = vld [vmem:[#allocation14 + $0x1c] sm:$0xf0] }
  0x81   :  { %1496 = vmatpush.bf16.msrb.mxu2 %v10473_v11  ;;  %v14722_v11 = vld [vmem:[#allocation14 + $0x29c] sm:$0xf0] }
  0x83   :  { %630 = vmatpush.bf16.msrb.mxu0 %v9925_v14  ;;  %v10474_v14 = vld [vmem:[#allocation14 + $0x3e0] sm:$0xf0] }
  0x84   :  { %v10477_v16 = vor.u32 %v14758_v13, %v10474_v14  ;;  %v10058_v13 = vld [vmem:[#allocation14 + $0xa0] sm:$0xf0] }
  0x85   :  { %1497 = vmatpush.bf16.msrb.mxu2 %v10441_v21  ;;  %v14718_v14 = vld [vmem:[#allocation14 + $0x284] sm:$0xf]  ;;  %v10061_v18 = vor.u32 %v14654_v12, %v10058_v13  ;;  %v10450_v12 = vld [vmem:[#allocation14 + $0x3a8] sm:$0xf0] }
  0x87   :  { %631 = vmatpush.bf16.msrb.mxu0 %v9909_v17  ;;  %v14690_v17 = vld [vmem:[#allocation14 + $0x19c] sm:$0xf0] }
  0x88   :  { %v10185_v20 = vor.u32 %v14690_v17, %v10184_v15  ;;  %v10314_v15 = vld [vmem:[#allocation14 + $0x2a0] sm:$0xf0]  ;;  %v10313_v17 = vor.u32 %v14722_v11, %v10312_v9  ;;  %v14687_v9 = vld [vmem:[#allocation14 + $0x18c] sm:$0xf] }
  0x89   :  { %1498 = vmatpush.bf16.msrb.mxu2 %v10409_v37  ;;  %v9992_v37 = vld [vmem:[#allocation14] sm:$0xf]  ;;  %v14751_v11 = vld [vmem:[#allocation14 + $0x38c] sm:$0xf] }
  0x8a   :  { %1484 = vmatpush.bf16.msrb.mxu1 %v10185_v20  ;;  %v10317_v20 = vor.u32 %v14718_v14, %v10314_v15  ;;  %v10453_v14 = vor.u32 %v14751_v11, %v10450_v12  ;;  %v10160_v15 = vld [vmem:[#allocation14 + $0x148] sm:$0xf]  ;;  %v10034_v11 = vld [vmem:[#allocation14 + $0x68] sm:$0xf0] }
  0x8b   :  { %632 = vmatpush.bf16.msrb.mxu0 %v9893_v29  ;;  %v10445_v29 = vor.u32 %v14750_v24, %v10442_v26 }
  0x8e   :  { %1485 = vmatpush.bf16.msrb.mxu1 %v10153_v33  ;;  %v10026_v33 = vld [vmem:[#allocation14 + $0x60] sm:$0xf0] }
  0x8f   :  { %633 = vmatpush.bf16.msrb.mxu0 %v9877_v41  ;;  %v10376_v41 = vld [vmem:[#allocation14 + $0x300] sm:$0xf]  ;;  %v10029_v34 = vor.u32 %v14646_v32, %v10026_v33  ;;  %v14739_v33 = vld [vmem:[#allocation14 + $0x324] sm:$0xf0] }
  0x93   :  { %1522 = vmatpush.bf16.msra.mxu0 %v10477_v16  ;;  %v10057_v16 = vor.u32 %v14658_v8, %v10056_v7  ;;  %v10448_v7 = vld [vmem:[#allocation14 + $0x388] sm:$0xf] }
  0x94   :  { %v14755_v8 = vld [vmem:[#allocation14 + $0x3a4] sm:$0xf0] }
  0x97   :  { %1523 = vmatpush.bf16.msra.mxu0 %v10445_v29  ;;  %v10280_v29 = vld [vmem:[#allocation14 + $0x240] sm:$0xf] }
  0xef   :  { %v376_v43 = vpop.f32.mrf.mxu0 }
  0xf0   :  { %v377_v44 = vadd.f32 %v15818_v42, %v376_v43  ;;  %v10413_v42 = vor.u32 %v14742_v35, %v10410_v36  ;;  %v14738_v43 = vld [vmem:[#allocation14 + $0x31c] sm:$0xf0]  ;;  %v14710_v35 = vld [vmem:[#allocation14 + $0x244] sm:$0xf] }
  0xf2   :  { %vm380_vm0 = vcmp.gt.f32.partialorder %v377_v44, 0.0  ;;  %v381_v45 = vmul.f32 0.2, %v377_v44  ;;  %1524 = vmatpush.bf16.msra.mxu0 %v10413_v42  ;;  %v14638_v42 = vld [vmem:[#allocation14 + $0x4] sm:$0xf] }
  0xf4   :  { %v382_v46 = vsel %vm380_vm0, %v377_v44, %v381_v45  ;;  %v14670_v44 = vld [vmem:[#allocation14 + $0x104] sm:$0xf] }
  0xf5   :  { %v383_v47 = vadd.f32 %v382_v46, %v16465_v0  ;;  %v16311_v0 = vmov 256.0   ;;  %v10122_v45 = vld [vmem:[#allocation14 + $0x120] sm:$0xf0] }
  0xf6   :  { %15819 = vrcp.f32 %v16311_v0  ;;  %v14734_v46 = vld [vmem:[#allocation14 + $0x304] sm:$0xf] }
  0xf7   :  { %v384_v48 = vpack.c.bf16 %v383_v47, %v383_v47  ;;  %v378_v49 = vpop.f32.mrf.mxu0  ;;  %v10378_v47 = vld [vmem:[#allocation14 + $0x320] sm:$0xf0] }
  0xf8   :  { %v10377_v49 = vor.u32 %v14738_v43, %v10376_v41  ;;  %v14726_v0 = vld [vmem:[#allocation14 + $0x2c4] sm:$0xf]  ;;  %v14706_v41 = vld [vmem:[#allocation14 + $0x21c] sm:$0xf0] }
  0xf9   :  { %595 = vmatmul.bf16.vlgmr.msra.gmra.mxu1 %v384_v48  ;;  %608 = vmatmul.bf16.vlgmr.msra.gmra.mxu2 %v384_v48  ;;  %v9994_v43 = vld [vmem:[#allocation14 + $0x20] sm:$0xf0] }
  0xfa   :  { %621 = vmatmul.bf16.vlgmr.msra.gmra.mxu3 %v384_v48  ;;  %634 = vmatmul.bf16.vlgmr.msrb.gmra.mxu0 %v384_v48  ;;  %v10121_v48 = vor.u32 %v14674_v40, %v10120_v39  ;;  %v10248_v39 = vld [vmem:[#allocation14 + $0x200] sm:$0xf]  ;;  %v9993_v40 = vor.u32 %v14642_v38, %v9992_v37  ;;  %v10386_v37 = vld [vmem:[#allocation14 + $0x328] sm:$0xf0] }
  0xfb   :  { %1499 = vmatpush.bf16.msrb.mxu2 %v10377_v49 }
  0xfc   :  { %v16484_v1 = vpop.eup %15819  ;;  %1486 = vmatpush.bf16.msrb.mxu1 %v10121_v48  ;;  %v10224_v48 = vld [vmem:[#allocation14 + $0x1c8] sm:$0xf] }
  0xfd   :  { %v16487_v2 = vmul.f32 256.0, %v16484_v1  ;;  %vm649_vm1 = vweird.f32 %v16484_v1 }
  0xff   :  { %v646_v3 = vsub.f32 1.0, %v16487_v2  ;;  %v10346_v2 = vld [vmem:[#allocation14 + $0x2e0] sm:$0xf0] }
 0x176   :  { %v596_v51 = vpop.f32.mrf.mxu1 }
 0x177   :  { %v16472_v52 = vpop.f32.mrf.mxu0  ;;  %v16476_v56 = vadd.f32 %v596_v51, %v419_v53  ;;  %v10125_v51 = vor.u32 %v14670_v44, %v10122_v45  ;;  %v10088_v53 = vld [vmem:[#allocation14 + $0xc0] sm:$0xf]  ;;  %v10249_v44 = vor.u32 %v14706_v41, %v10248_v39  ;;  %v9997_v45 = vor.u32 %v14638_v42, %v9994_v43  ;;  %v10096_v39 = vld [vmem:[#allocation14 + $0xc8] sm:$0xf] }
 0x178   :  { %v10352_v41 = vld [vmem:[#allocation14 + $0x2c8] sm:$0xf] }
 0x179   :  { %1512 = vmatpush.bf16.msrb.mxu3 %v10125_v51  ;;  %v14699_v51 = vld [vmem:[#allocation14 + $0x1e4] sm:$0xf0] }
 0x17a   :  { %v14731_v43 = vld [vmem:[#allocation14 + $0x2e4] sm:$0xf0] }
 0x17c   :  { %v609_v55 = vpop.f32.mrf.mxu2 }
 0x17d   :  { %v16478_v57 = vadd.f32 %v609_v55, %v420_v54  ;;  %v16480_v58 = vpop.f32.mrf.mxu3  ;;  %v14666_v54 = vld [vmem:[#allocation14 + $0xdc] sm:$0xf0] }
 0x17e   :  { %v598_v59 = vpop.f32.mrf.mxu1  ;;  %v10344_v55 = vld [vmem:[#allocation14 + $0x2c0] sm:$0xf]  ;;  %v10089_v4 = vor.u32 %v14666_v54, %v10088_v53  ;;  %v10480_v53 = vld [vmem:[#allocation14 + $0x3c8] sm:$0xf] }
 0x17f   :  { %v637_v60 = vpop.f32.mrf.mxu0  ;;  %v641_v61 = vadd.f32 %v16478_v57, %v16476_v56  ;;  %v647_v59 = vmul.f32 %v16484_v1, %v646_v3  ;;  %v10349_v3 = vor.u32 %v14726_v0, %v10346_v2  ;;  %v14763_v54 = vld [vmem:[#allocation14 + $0x3e4] sm:$0xf0]  ;;  %v10482_v0 = vld [vmem:[#allocation14 + $0x3e8] sm:$0xf0] }
 0x180   :  { %v10381_v60 = vor.u32 %v14734_v46, %v10378_v47  ;;  %1487 = vmatpush.bf16.msrb.mxu1 %v10089_v4  ;;  %v14702_v46 = vld [vmem:[#allocation14 + $0x204] sm:$0xf]  ;;  %v10192_v2 = vld [vmem:[#allocation14 + $0x188] sm:$0xf] }
 0x181   :  { %642 = vadd.xlane.f32.xlu0 %v641_v61  ;;  %v14730_v61 = vld [vmem:[#allocation14 + $0x2dc] sm:$0xf0]  ;;  %v648_v10 = vadd.f32 %v16484_v1, %v647_v59  ;;  %v10250_v47 = vld [vmem:[#allocation14 + $0x220] sm:$0xf0]  ;;  %v10481_v59 = vor.u32 %v14763_v54, %v10480_v53  ;;  %v14691_v4 = vld [vmem:[#allocation14 + $0x1a4] sm:$0xf0] }
 0x182   :  { %v10345_v5 = vor.u32 %v14730_v61, %v10344_v55  ;;  %1525 = vmatpush.bf16.msra.mxu0 %v10381_v60  ;;  %v10253_v49 = vor.u32 %v14702_v46, %v10250_v47  ;;  %v10225_v55 = vor.u32 %v14699_v51, %v10224_v48  ;;  %v14695_v60 = vld [vmem:[#allocation14 + $0x1cc] sm:$0xf]  ;;  %v10353_v46 = vor.u32 %v14731_v43, %v10352_v41  ;;  %v10064_v53 = vld [vmem:[#allocation14 + $0x88] sm:$0xf] }
 0x183   :  { %v16494_v19 = vsel %vm649_vm1, %v16484_v1, %v648_v10  ;;  %v10226_v61 = vld [vmem:[#allocation14 + $0x1e8] sm:$0xf0]  ;;  %v10449_v10 = vor.u32 %v14755_v8, %v10448_v7  ;;  %v14659_v54 = vld [vmem:[#allocation14 + $0xa4] sm:$0xf0] }
 0x184   :  { %v611_v62 = vpop.f32.mrf.mxu2  ;;  %1500 = vmatpush.bf16.msrb.mxu2 %v10345_v5  ;;  %1488 = vmatpush.bf16.msrb.mxu1 %v10057_v16  ;;  %v14683_v16 = vld [vmem:[#allocation14 + $0x164] sm:$0xf0]  ;;  %v14727_v48 = vld [vmem:[#allocation14 + $0x2cc] sm:$0xf] }
 0x185   :  { %v624_v63 = vpop.f32.mrf.mxu3  ;;  %v14662_v62 = vld [vmem:[#allocation14 + $0xc4] sm:$0xf]  ;;  %v14651_v7 = vld [vmem:[#allocation14 + $0x64] sm:$0xf0] }
 0x186   :  { %v10090_v63 = vld [vmem:[#allocation14 + $0xe0] sm:$0xf0]  ;;  %1526 = vmatpush.bf16.msra.mxu0 %v10349_v3  ;;  %v10194_v3 = vld [vmem:[#allocation14 + $0x1a8] sm:$0xf0]  ;;  %v10288_v8 = vld [vmem:[#allocation14 + $0x248] sm:$0xf] }
 0x187   :  { %v10093_v6 = vor.u32 %v14662_v62, %v10090_v63  ;;  %v14759_v62 = vld [vmem:[#allocation14 + $0x3cc] sm:$0xf]  ;;  %v10229_v63 = vor.u32 %v14695_v60, %v10226_v61  ;;  %v10197_v13 = vor.u32 %v14687_v9, %v10194_v3  ;;  %v14723_v60 = vld [vmem:[#allocation14 + $0x2a4] sm:$0xf0] }
 0x188   :  { %1501 = vmatpush.bf16.msrb.mxu2 %v10313_v17  ;;  %1489 = vmatpush.bf16.msrb.mxu1 %v10025_v30  ;;  %v10485_v5 = vor.u32 %v14759_v62, %v10482_v0  ;;  %v10416_v17 = vld [vmem:[#allocation14 + $0x348] sm:$0xf]  ;;  %v14655_v61 = vld [vmem:[#allocation14 + $0x8c] sm:$0xf] }
 0x189   :  { %1513 = vmatpush.bf16.msrb.mxu3 %v10093_v6  ;;  %v10193_v6 = vor.u32 %v14691_v4, %v10192_v2  ;;  %v14675_v30 = vld [vmem:[#allocation14 + $0x124] sm:$0xf0]  ;;  %v10066_v62 = vld [vmem:[#allocation14 + $0xa8] sm:$0xf0] }
 0x18a   :  { %1527 = vmatpush.bf16.msra.mxu0 %v10317_v20  ;;  %v14747_v20 = vld [vmem:[#allocation14 + $0x364] sm:$0xf0]  ;;  %v10069_v0 = vor.u32 %v14655_v61, %v10066_v62  ;;  %v14719_v2 = vld [vmem:[#allocation14 + $0x28c] sm:$0xf]  ;;  %v10232_v61 = vld [vmem:[#allocation14 + $0x1d0] sm:$0xf] }
 0x18b   :  { %v10322_v4 = vld [vmem:[#allocation14 + $0x2a8] sm:$0xf0] }
 0x18c   :  { %1490 = vmatpush.bf16.msrb.mxu1 %v9993_v40  ;;  %v14667_v40 = vld [vmem:[#allocation14 + $0xe4] sm:$0xf0]  ;;  %v14647_v3 = vld [vmem:[#allocation14 + $0x4c] sm:$0xf] }
 0x18d   :  { %1514 = vmatpush.bf16.msrb.mxu3 %v10061_v18  ;;  %v10161_v18 = vor.u32 %v14683_v16, %v10160_v15  ;;  %v10097_v42 = vor.u32 %v14667_v40, %v10096_v39  ;;  %v10290_v15 = vld [vmem:[#allocation14 + $0x268] sm:$0xf0] }
 0x190   :  { %1535 = vmatpush.bf16.msra.mxu1 %v10225_v55  ;;  %v10320_v55 = vld [vmem:[#allocation14 + $0x288] sm:$0xf] }
 0x191   :  { %1515 = vmatpush.bf16.msrb.mxu3 %v10029_v34  ;;  %v10130_v34 = vld [vmem:[#allocation14 + $0x128] sm:$0xf0] }
 0x194   :  { %1536 = vmatpush.bf16.msra.mxu1 %v10193_v6  ;;  %v10032_v6 = vld [vmem:[#allocation14 + $0x48] sm:$0xf] }
 0x195   :  { %1516 = vmatpush.bf16.msrb.mxu3 %v9997_v45  ;;  %v10098_v45 = vld [vmem:[#allocation14 + $0xe8] sm:$0xf0]  ;;  %v10033_v9 = vor.u32 %v14651_v7, %v10032_v6  ;;  %v14760_v6 = vld [vmem:[#allocation14 + $0x3d4] sm:$0xf] }
 0x196   :  { %v10490_v7 = vld [vmem:[#allocation14 + $0x3f0] sm:$0xf0] }
 0x198   :  { %1537 = vmatpush.bf16.msra.mxu1 %v10161_v18 }
 0x199   :  { %1561 = vmatpush.bf16.msra.mxu3 %v10229_v63  ;;  %v10321_v63 = vor.u32 %v14723_v60, %v10320_v55 }
 0x19d   :  { %1562 = vmatpush.bf16.msra.mxu3 %v10197_v13  ;;  %v10037_v13 = vor.u32 %v14647_v3, %v10034_v11  ;;  %v10200_v3 = vld [vmem:[#allocation14 + $0x190] sm:$0xf] }
 0x1f4   :  { %v643_v21 = vpop.xlane.xlu0 %642 }
 0x1f5   :  { %v651_v22 = vmul.f32 %v16494_v19, %v643_v21  ;;  %v14679_v21 = vld [vmem:[#allocation14 + $0x14c] sm:$0xf] }
 0x1f7   :  { %v16498_v23 = vsub.f32 %v16476_v56, %v651_v22  ;;  %v16501_v24 = vsub.f32 %v16478_v57, %v651_v22  ;;  %v10281_v56 = vor.u32 %v14714_v31, %v10280_v29  ;;  %v10282_v57 = vld [vmem:[#allocation14 + $0x260] sm:$0xf0]  ;;  %v10162_v22 = vld [vmem:[#allocation14 + $0x168] sm:$0xf0]  ;;  %v10128_v29 = vld [vmem:[#allocation14 + $0x108] sm:$0xf] }
 0x1f8   :  { %v10285_v36 = vor.u32 %v14710_v35, %v10282_v57  ;;  %v10384_v31 = vld [vmem:[#allocation14 + $0x308] sm:$0xf]  ;;  %v10129_v32 = vor.u32 %v14675_v30, %v10128_v29 }
 0x1f9   :  { %v654_v25 = vmul.f32 %v16498_v23, %v16498_v23  ;;  %v655_v1 = vmul.f32 %v16501_v24, %v16501_v24  ;;  %1502 = vmatpush.bf16.msrb.mxu2 %v10281_v56  ;;  %v14671_v56 = vld [vmem:[#allocation14 + $0x10c] sm:$0xf]  ;;  %v10385_v35 = vor.u32 %v14739_v33, %v10384_v31 }
 0x1fa   :  { %1528 = vmatpush.bf16.msra.mxu0 %v10285_v36  ;;  %v10133_v57 = vor.u32 %v14671_v56, %v10130_v34  ;;  %v14735_v36 = vld [vmem:[#allocation14 + $0x30c] sm:$0xf]  ;;  %1538 = vmatpush.bf16.msra.mxu1 %v10129_v32 }
 0x1fb   :  { %v656_v26 = vadd.f32 %v655_v1, %v654_v25  ;;  %v10417_v25 = vor.u32 %v14747_v20, %v10416_v17  ;;  %v10165_v1 = vor.u32 %v14679_v21, %v10162_v22  ;;  %v10389_v38 = vor.u32 %v14735_v36, %v10386_v37  ;;  %v10000_v20 = vld [vmem:[#allocation14 + $0x8] sm:$0xf]  ;;  %v14703_v31 = vld [vmem:[#allocation14 + $0x20c] sm:$0xf]  ;;  %v640_v37 = vld [vmem:[#allocation13] sm:$0x3] }
 0x1fc   :  { %v14643_v21 = vld [vmem:[#allocation14 + $0x24] sm:$0xf0]  ;;  %v10258_v32 = vld [vmem:[#allocation14 + $0x228] sm:$0xf0]  ;;  %v682_v43 = vperm.slane %v640_v37, 1 }
 0x1fd   :  { %657 = vadd.xlane.f32.xlu0 %v656_v26  ;;  %1503 = vmatpush.bf16.msrb.mxu2 %v10249_v44  ;;  %v14743_v26 = vld [vmem:[#allocation14 + $0x34c] sm:$0xf]  ;;  %v10256_v22 = vld [vmem:[#allocation14 + $0x208] sm:$0xf]  ;;  %v10261_v33 = vor.u32 %v14703_v31, %v10258_v32  ;;  %v14744_v31 = vld [vmem:[#allocation14 + $0x354] sm:$0xf] }
 0x1fe   :  { %1529 = vmatpush.bf16.msra.mxu0 %v10253_v49  ;;  %v10421_v28 = vor.u32 %v14743_v26, %v10418_v27  ;;  %1563 = vmatpush.bf16.msra.mxu3 %v10165_v1  ;;  %v14663_v44 = vld [vmem:[#allocation14 + $0xcc] sm:$0xf]  ;;  %v14707_v1 = vld [vmem:[#allocation14 + $0x224] sm:$0xf0]  ;;  %v10426_v32 = vld [vmem:[#allocation14 + $0x370] sm:$0xf0] }
 0x1ff   :  { %v10101_v47 = vor.u32 %v14663_v44, %v10098_v45  ;;  %v10354_v49 = vld [vmem:[#allocation14 + $0x2e8] sm:$0xf0]  ;;  %1539 = vmatpush.bf16.msra.mxu1 %v10097_v42  ;;  %v10257_v29 = vor.u32 %v14707_v1, %v10256_v22  ;;  %v681_v42 = vperm.slane %v640_v37, 0  ;;  %v10168_v22 = vld [vmem:[#allocation14 + $0x150] sm:$0xf] }
 0x200   :  { %v10357_v51 = vor.u32 %v14727_v48, %v10354_v49  ;;  %v14639_v26 = vld [vmem:[#allocation14 + $0xc] sm:$0xf]  ;;  %v422_v48 = vperm.slane %v16470_v50, 3  ;;  %v421_v49 = vperm.slane %v16470_v50, 2  ;;  %v10234_v50 = vld [vmem:[#allocation14 + $0x1f0] sm:$0xf0] }
 0x201   :  { %1548 = vmatpush.bf16.msra.mxu2 %v10481_v59  ;;  %v10065_v59 = vor.u32 %v14659_v54, %v10064_v53  ;;  %v10002_v27 = vld [vmem:[#allocation14 + $0x28] sm:$0xf0]  ;;  %v14740_v37 = vld [vmem:[#allocation14 + $0x32c] sm:$0xf0] }
 0x202   :  { %1574 = vmatpush.bf16.msrb.mxu0 %v10485_v5  ;;  %1564 = vmatpush.bf16.msra.mxu3 %v10133_v57  ;;  %v10325_v5 = vor.u32 %v14719_v2, %v10322_v4  ;;  %v10005_v30 = vor.u32 %v14639_v26, %v10002_v27  ;;  %v639_v57 = vld [vmem:[#allocation11] sm:$0x3]  ;;  %v623_v60 = vadd.f32 %v16480_v58, %v421_v49  ;;  %v14696_v2 = vld [vmem:[#allocation14 + $0x1d4] sm:$0xf]  ;;  %v14692_v58 = vld [vmem:[#allocation14 + $0x1ac] sm:$0xf0] }
 0x203   :  { %1540 = vmatpush.bf16.msra.mxu1 %v10065_v59  ;;  %v674_v39 = vperm.slane %v639_v57, 0  ;;  %v675_v40 = vperm.slane %v639_v57, 1  ;;  %v636_v59 = vadd.f32 %v16472_v52, %v422_v48  ;;  %v10237_v11 = vor.u32 %v14696_v2, %v10234_v50  ;;  %v10424_v27 = vld [vmem:[#allocation14 + $0x350] sm:$0xf]  ;;  %v14656_v2 = vld [vmem:[#allocation14 + $0x94] sm:$0xf] }
 0x204   :  { %v10429_v57 = vor.u32 %v14744_v31, %v10426_v32  ;;  %v10360_v48 = vld [vmem:[#allocation14 + $0x2d0] sm:$0xf]  ;;  %v10330_v50 = vld [vmem:[#allocation14 + $0x2b0] sm:$0xf0]  ;;  %v10240_v31 = vld [vmem:[#allocation14 + $0x1d8] sm:$0xf] }
 0x205   :  { %1549 = vmatpush.bf16.msra.mxu2 %v10449_v10  ;;  %v14715_v10 = vld [vmem:[#allocation14 + $0x264] sm:$0xf0]  ;;  %v14732_v49 = vld [vmem:[#allocation14 + $0x2ec] sm:$0xf0]  ;;  %v14701_v32 = vld [vmem:[#allocation14 + $0x1f4] sm:$0xf0] }
 0x206   :  { %1575 = vmatpush.bf16.msrb.mxu0 %v10453_v14  ;;  %1565 = vmatpush.bf16.msra.mxu3 %v10101_v47  ;;  %v10289_v12 = vor.u32 %v14715_v10, %v10288_v8  ;;  %v14711_v14 = vld [vmem:[#allocation14 + $0x24c] sm:$0xf] }
 0x207   :  { %v10293_v17 = vor.u32 %v14711_v14, %v10290_v15  ;;  %1541 = vmatpush.bf16.msra.mxu1 %v10033_v9  ;;  %v14756_v14 = vld [vmem:[#allocation14 + $0x3ac] sm:$0xf0]  ;;  %v14688_v15 = vld [vmem:[#allocation14 + $0x194] sm:$0xf] }
 0x209   :  { %1550 = vmatpush.bf16.msra.mxu2 %v10417_v25  ;;  %v10001_v25 = vor.u32 %v14643_v21, %v10000_v20  ;;  %v10201_v20 = vor.u32 %v14692_v58, %v10200_v3 }
 0x20a   :  { %1576 = vmatpush.bf16.msrb.mxu0 %v10421_v28  ;;  %1566 = vmatpush.bf16.msra.mxu3 %v10069_v0  ;;  %v14764_v0 = vld [vmem:[#allocation14 + $0x3ec] sm:$0xf0] }
 0x20b   :  { %1542 = vmatpush.bf16.msra.mxu1 %v10001_v25  ;;  %v14684_v25 = vld [vmem:[#allocation14 + $0x16c] sm:$0xf0] }
 0x20d   :  { %1551 = vmatpush.bf16.msra.mxu2 %v10385_v35 }
 0x20e   :  { %1577 = vmatpush.bf16.msrb.mxu0 %v10389_v38  ;;  %1567 = vmatpush.bf16.msra.mxu3 %v10037_v13  ;;  %v10456_v13 = vld [vmem:[#allocation14 + $0x390] sm:$0xf] }
 0x20f   :  { %v10457_v21 = vor.u32 %v14756_v14, %v10456_v13  ;;  %v14648_v13 = vld [vmem:[#allocation14 + $0x54] sm:$0xf] }
 0x210   :  { %v10042_v14 = vld [vmem:[#allocation14 + $0x70] sm:$0xf0] }
 0x211   :  { %1552 = vmatpush.bf16.msra.mxu2 %v10353_v46 }
 0x212   :  { %1578 = vmatpush.bf16.msrb.mxu0 %v10357_v51  ;;  %1568 = vmatpush.bf16.msra.mxu3 %v10005_v30  ;;  %v10170_v30 = vld [vmem:[#allocation14 + $0x170] sm:$0xf0] }
 0x215   :  { %1553 = vmatpush.bf16.msra.mxu2 %v10321_v63  ;;  %v10488_v63 = vld [vmem:[#allocation14 + $0x3d0] sm:$0xf] }
 0x216   :  { %1579 = vmatpush.bf16.msrb.mxu0 %v10325_v5  ;;  %v10489_v52 = vor.u32 %v14764_v0, %v10488_v63  ;;  %v10328_v63 = vld [vmem:[#allocation14 + $0x290] sm:$0xf] }
 0x217   :  { %v14724_v0 = vld [vmem:[#allocation14 + $0x2ac] sm:$0xf0] }
 0x219   :  { %1554 = vmatpush.bf16.msra.mxu2 %v10289_v12  ;;  %v10493_v12 = vor.u32 %v14760_v6, %v10490_v7  ;;  %v10329_v7 = vor.u32 %v14724_v0, %v10328_v63  ;;  %v14681_v63 = vld [vmem:[#allocation14 + $0x15c] sm:$0xf] }
 0x21a   :  { %1580 = vmatpush.bf16.msrb.mxu0 %v10293_v17  ;;  %v14752_v17 = vld [vmem:[#allocation14 + $0x394] sm:$0xf]  ;;  %v10178_v0 = vld [vmem:[#allocation14 + $0x178] sm:$0xf0] }
 0x21d   :  { %1555 = vmatpush.bf16.msra.mxu2 %v10257_v29  ;;  %v14680_v29 = vld [vmem:[#allocation14 + $0x154] sm:$0xf] }
 0x21e   :  { %1581 = vmatpush.bf16.msrb.mxu0 %v10261_v33  ;;  %v10169_v33 = vor.u32 %v14684_v25, %v10168_v22  ;;  %v10264_v22 = vld [vmem:[#allocation14 + $0x210] sm:$0xf] }
 0x21f   :  { %v14708_v25 = vld [vmem:[#allocation14 + $0x22c] sm:$0xf0] }
 0x270   :  { %v658_v16 = vpop.xlane.xlu0 %657 }
 0x271   :  { %v659_v18 = vmul.f32 %v658_v16, %v16494_v19  ;;  %v10202_v16 = vld [vmem:[#allocation14 + $0x1b0] sm:$0xf0] }
 0x272   :  { %v10205_v1 = vor.u32 %v14688_v15, %v10202_v16  ;;  %v14712_v15 = vld [vmem:[#allocation14 + $0x254] sm:$0xf] }
 0x273   :  { %v660_v28 = vadd.f32 1e-05, %v659_v18  ;;  %v10458_v18 = vld [vmem:[#allocation14 + $0x3b0] sm:$0xf0] }
 0x274   :  { %v10461_v26 = vor.u32 %v14752_v17, %v10458_v18  ;;  %v10298_v16 = vld [vmem:[#allocation14 + $0x270] sm:$0xf0]  ;;  %v10008_v17 = vld [vmem:[#allocation14 + $0x10] sm:$0xf] }
 0x275   :  { %15821 = vrsqrt.f32 %v660_v28  ;;  %vm667_vm3 = vweird.f32 %v660_v28 }
 0x27b   :  { %v15822_v19 = vpop.eup %15821 }
 0x27c   :  { %v662_v56 = vmul.f32 %v15822_v19, %v660_v28  ;;  %vm668_vm2 = vweird.f32 %v15822_v19  ;;  %v14748_v28 = vld [vmem:[#allocation14 + $0x36c] sm:$0xf0] }
 0x27d   :  { %vm669_vm4 = vmor %vm667_vm3, %vm668_vm2 }
 0x27e   :  { %v663_v34 = vmul.f32 %v15822_v19, %v662_v56  ;;  %v10136_v56 = vld [vmem:[#allocation14 + $0x110] sm:$0xf] }
 0x280   :  { %v664_v35 = vmul.f32 0.5, %v663_v34  ;;  %v14676_v34 = vld [vmem:[#allocation14 + $0x12c] sm:$0xf0] }
 0x282   :  { %v665_v36 = vsub.f32 1.5, %v664_v35  ;;  %v10173_v35 = vor.u32 %v14680_v29, %v10170_v30  ;;  %v14704_v29 = vld [vmem:[#allocation14 + $0x214] sm:$0xf] }
 0x283   :  { %v10266_v30 = vld [vmem:[#allocation14 + $0x230] sm:$0xf0] }
 0x284   :  { %v666_v38 = vmul.f32 %v15822_v19, %v665_v36  ;;  %v10392_v36 = vld [vmem:[#allocation14 + $0x310] sm:$0xf] }
 0x286   :  { %v670_v41 = vsel %vm669_vm4, %v15822_v19, %v666_v38  ;;  %v10425_v19 = vor.u32 %v14748_v28, %v10424_v27  ;;  %v14672_v38 = vld [vmem:[#allocation14 + $0x114] sm:$0xf] }
 0x287   :  { %v671_v44 = vmul.f32 %v670_v41, %v16498_v23  ;;  %v672_v45 = vmul.f32 %v670_v41, %v16501_v24  ;;  %v14700_v23 = vld [vmem:[#allocation14 + $0x1ec] sm:$0xf0]  ;;  %v10394_v41 = vld [vmem:[#allocation14 + $0x330] sm:$0xf0] }
 0x288   :  { %v10233_v10 = vor.u32 %v14700_v23, %v10232_v61  ;;  %v10072_v61 = vld [vmem:[#allocation14 + $0x90] sm:$0xf]  ;;  %v14640_v27 = vld [vmem:[#allocation14 + $0x14] sm:$0xf] }
 0x289   :  { %v678_v46 = vmul.f32 %v674_v39, %v671_v44  ;;  %v679_v47 = vmul.f32 %v675_v40, %v672_v45  ;;  %v10138_v39 = vld [vmem:[#allocation14 + $0x130] sm:$0xf0]  ;;  %v10104_v44 = vld [vmem:[#allocation14 + $0xd0] sm:$0xf] }
 0x28a   :  { %v14736_v40 = vld [vmem:[#allocation14 + $0x314] sm:$0xf]  ;;  %v14668_v45 = vld [vmem:[#allocation14 + $0xec] sm:$0xf0] }
 0x28b   :  { %v685_v51 = vadd.f32 %v681_v42, %v678_v46  ;;  %v686_v53 = vadd.f32 %v682_v43, %v679_v47  ;;  %v10137_v42 = vor.u32 %v14676_v34, %v10136_v56  ;;  %v10393_v43 = vor.u32 %v14740_v37, %v10392_v36  ;;  %v14660_v23 = vld [vmem:[#allocation14 + $0xac] sm:$0xf0]  ;;  %v10010_v28 = vld [vmem:[#allocation14 + $0x30] sm:$0xf0]  ;;  %v14697_v56 = vld [vmem:[#allocation14 + $0x1dc] sm:$0xf] }
 0x28c   :  { %v10141_v46 = vor.u32 %v14672_v38, %v10138_v39  ;;  %v10397_v47 = vor.u32 %v14736_v40, %v10394_v41  ;;  %v10073_v6 = vor.u32 %v14660_v23, %v10072_v61  ;;  %v14761_v36 = vld [vmem:[#allocation14 + $0x3dc] sm:$0xf]  ;;  %v10013_v38 = vor.u32 %v14640_v27, %v10010_v28 }
 0x28d   :  { %vm687_vm5 = vcmp.gt.f32.partialorder %v685_v51, 0.0  ;;  %vm688_vm6 = vcmp.gt.f32.partialorder %v686_v53, 0.0  ;;  %v689_v54 = vmul.f32 0.2, %v685_v51  ;;  %v690_v55 = vmul.f32 0.2, %v686_v53 }
 0x28e   :  { %v10498_v37 = vld [vmem:[#allocation14 + $0x3f8] sm:$0xf0]  ;;  %v10269_v39 = vor.u32 %v14704_v29, %v10266_v30  ;;  %v10241_v40 = vor.u32 %v14701_v32, %v10240_v31  ;;  %v10080_v31 = vld [vmem:[#allocation14 + $0x98] sm:$0xf] }
 0x28f   :  { %v691_v62 = vsel %vm687_vm5, %v685_v51, %v689_v54  ;;  %v692_v24 = vsel %vm688_vm6, %v686_v53, %v690_v55  ;;  %v14664_v51 = vld [vmem:[#allocation14 + $0xd4] sm:$0xf]  ;;  %v14729_v27 = vld [vmem:[#allocation14 + $0x2dc] sm:$0xf]  ;;  %v14661_v32 = vld [vmem:[#allocation14 + $0xb4] sm:$0xf0] }
 0x290   :  { %v693_v4 = vadd.f32 %v691_v62, %v623_v60  ;;  %v694_v5 = vadd.f32 %v692_v24, %v636_v59  ;;  %v10106_v53 = vld [vmem:[#allocation14 + $0xf0] sm:$0xf0]  ;;  %v10105_v59 = vor.u32 %v14668_v45, %v10104_v44  ;;  %v10361_v60 = vor.u32 %v14732_v49, %v10360_v48  ;;  %v14689_v48 = vld [vmem:[#allocation14 + $0x19c] sm:$0xf] }
 0x291   :  { %v14728_v54 = vld [vmem:[#allocation14 + $0x2d4] sm:$0xf]  ;;  %v10109_v62 = vor.u32 %v14664_v51, %v10106_v53  ;;  %v10501_v45 = vor.u32 %v14761_v36, %v10498_v37  ;;  %v10210_v49 = vld [vmem:[#allocation14 + $0x1b8] sm:$0xf0] }
 0x292   :  { %v16514_v8 = vpack.c.bf16 %v693_v4, %v693_v4  ;;  %v16516_v9 = vpack.c.bf16 %v694_v5, %v694_v5  ;;  %v10362_v55 = vld [vmem:[#allocation14 + $0x2f0] sm:$0xf0]  ;;  %v14753_v51 = vld [vmem:[#allocation14 + $0x39c] sm:$0xf]  ;;  %v10213_v61 = vor.u32 %v14689_v48, %v10210_v49 }
 0x293   :  { %v10365_v24 = vor.u32 %v14728_v54, %v10362_v55  ;;  %v10074_v4 = vld [vmem:[#allocation14 + $0xb0] sm:$0xf0]  ;;  %v10466_v53 = vld [vmem:[#allocation14 + $0x3b8] sm:$0xf0] }
 0x294   :  { %1491 = vmatmul.bf16.vlgmr.msrb.gmra.mxu1 %v16514_v8  ;;  %1504 = vmatmul.bf16.vlgmr.msrb.gmra.mxu2 %v16516_v9  ;;  %v14720_v5 = vld [vmem:[#allocation14 + $0x294] sm:$0xf]  ;;  %v10077_v3 = vor.u32 %v14656_v2, %v10074_v4  ;;  %v10469_v23 = vor.u32 %v14753_v51, %v10466_v53  ;;  %v14745_v2 = vld [vmem:[#allocation14 + $0x35c] sm:$0xf] }
 0x295   :  { %1517 = vmatmul.bf16.vlgmr.msrb.gmra.mxu3 %v16514_v8  ;;  %1530 = vmatmul.bf16.vlgmr.msra.gmra.mxu0 %v16516_v9  ;;  %v10333_v58 = vor.u32 %v14720_v5, %v10330_v50  ;;  %v10434_v4 = vld [vmem:[#allocation14 + $0x378] sm:$0xf0] }
 0x296   :  { %1587 = vmatpush.bf16.msrb.mxu1 %v10233_v10  ;;  %1600 = vmatpush.bf16.msrb.mxu2 %v10489_v52  ;;  %v10040_v10 = vld [vmem:[#allocation14 + $0x50] sm:$0xf]  ;;  %v10370_v28 = vld [vmem:[#allocation14 + $0x2f8] sm:$0xf0] }
 0x297   :  { %1613 = vmatpush.bf16.msrb.mxu3 %v10237_v11  ;;  %1626 = vmatpush.bf16.msra.mxu0 %v10493_v12  ;;  %v14652_v52 = vld [vmem:[#allocation14 + $0x6c] sm:$0xf0]  ;;  %v14721_v36 = vld [vmem:[#allocation14 + $0x29c] sm:$0xf] }
 0x298   :  { %v10296_v11 = vld [vmem:[#allocation14 + $0x250] sm:$0xf]  ;;  %v10041_v18 = vor.u32 %v14652_v52, %v10040_v10  ;;  %v10181_v10 = vor.u32 %v14681_v63, %v10178_v0  ;;  %v10437_v52 = vor.u32 %v14745_v2, %v10434_v4  ;;  %v10338_v37 = vld [vmem:[#allocation14 + $0x2b8] sm:$0xf0] }
 0x299   :  { %v14716_v12 = vld [vmem:[#allocation14 + $0x26c] sm:$0xf0]  ;;  %v14713_v48 = vld [vmem:[#allocation14 + $0x25c] sm:$0xf] }
 0x29a   :  { %1588 = vmatpush.bf16.msrb.mxu1 %v10201_v20  ;;  %1601 = vmatpush.bf16.msrb.mxu2 %v10457_v21  ;;  %v10297_v20 = vor.u32 %v14716_v12, %v10296_v11  ;;  %v14644_v21 = vld [vmem:[#allocation14 + $0x2c] sm:$0xf0]  ;;  %v14673_v11 = vld [vmem:[#allocation14 + $0x11c] sm:$0xf] }
 0x29b   :  { %1614 = vmatpush.bf16.msrb.mxu3 %v10205_v1  ;;  %1627 = vmatpush.bf16.msra.mxu0 %v10461_v26  ;;  %v10045_v1 = vor.u32 %v14648_v13, %v10042_v14  ;;  %v10301_v26 = vor.u32 %v14712_v15, %v10298_v16  ;;  %v10009_v34 = vor.u32 %v14644_v21, %v10008_v17  ;;  %v10146_v12 = vld [vmem:[#allocation14 + $0x138] sm:$0xf0]  ;;  %v10112_v17 = vld [vmem:[#allocation14 + $0xd8] sm:$0xf] }
 0x29c   :  { %v14737_v13 = vld [vmem:[#allocation14 + $0x31c] sm:$0xf] }
 0x29d   :  { %v10402_v14 = vld [vmem:[#allocation14 + $0x338] sm:$0xf0] }
 0x29e   :  { %1589 = vmatpush.bf16.msrb.mxu1 %v10169_v33  ;;  %1602 = vmatpush.bf16.msrb.mxu2 %v10425_v19  ;;  %v10496_v33 = vld [vmem:[#allocation14 + $0x3d8] sm:$0xf]  ;;  %v10405_v21 = vor.u32 %v14737_v13, %v10402_v14  ;;  %v10306_v49 = vld [vmem:[#allocation14 + $0x278] sm:$0xf0] }
 0x29f   :  { %1615 = vmatpush.bf16.msrb.mxu3 %v10173_v35  ;;  %1628 = vmatpush.bf16.msra.mxu0 %v10429_v57  ;;  %v14765_v19 = vld [vmem:[#allocation14 + $0x3f4] sm:$0xf0]  ;;  %v10265_v35 = vor.u32 %v14708_v25, %v10264_v22  ;;  %v10242_v57 = vld [vmem:[#allocation14 + $0x1f8] sm:$0xf0] }
 0x2a0   :  { %v10497_v41 = vor.u32 %v14765_v19, %v10496_v33  ;;  %v10245_v44 = vor.u32 %v14697_v56, %v10242_v57  ;;  %v10368_v22 = vld [vmem:[#allocation14 + $0x2d8] sm:$0xf]  ;;  %v10373_v19 = vor.u32 %v14729_v27, %v10370_v28  ;;  %v10082_v57 = vld [vmem:[#allocation14 + $0xb8] sm:$0xf0] }
 0x2a1   :  { %v14733_v25 = vld [vmem:[#allocation14 + $0x2f4] sm:$0xf0]  ;;  %v14705_v63 = vld [vmem:[#allocation14 + $0x21c] sm:$0xf] }
 0x2a2   :  { %1590 = vmatpush.bf16.msrb.mxu1 %v10137_v42  ;;  %1603 = vmatpush.bf16.msrb.mxu2 %v10393_v43  ;;  %v10208_v42 = vld [vmem:[#allocation14 + $0x198] sm:$0xf]  ;;  %v10369_v30 = vor.u32 %v14733_v25, %v10368_v22  ;;  %v10274_v0 = vld [vmem:[#allocation14 + $0x238] sm:$0xf0] }
 0x2a3   :  { %1616 = vmatpush.bf16.msrb.mxu3 %v10141_v46  ;;  %1629 = vmatpush.bf16.msra.mxu0 %v10397_v47  ;;  %v14693_v43 = vld [vmem:[#allocation14 + $0x1b4] sm:$0xf0] }
 0x2a4   :  { %1543 = vmatmul.bf16.vlgmr.msra.gmra.mxu1 %v16514_v8  ;;  %1556 = vmatmul.bf16.vlgmr.msra.gmra.mxu2 %v16516_v9  ;;  %v10464_v46 = vld [vmem:[#allocation14 + $0x398] sm:$0xf]  ;;  %v10209_v54 = vor.u32 %v14693_v43, %v10208_v42  ;;  %v10341_v43 = vor.u32 %v14721_v36, %v10338_v37 }
 0x2a5   :  { %1569 = vmatmul.bf16.vlgmr.msra.gmra.mxu3 %v16514_v8  ;;  %1582 = vmatmul.bf16.vlgmr.msrb.gmra.mxu0 %v16516_v9  ;;  %v14757_v47 = vld [vmem:[#allocation14 + $0x3b4] sm:$0xf0] }
 0x2a6   :  { %1591 = vmatpush.bf16.msrb.mxu1 %v10105_v59  ;;  %1604 = vmatpush.bf16.msrb.mxu2 %v10361_v60  ;;  %v10465_v55 = vor.u32 %v14757_v47, %v10464_v46  ;;  %v10176_v59 = vld [vmem:[#allocation14 + $0x158] sm:$0xf]  ;;  %v14649_v46 = vld [vmem:[#allocation14 + $0x5c] sm:$0xf] }
 0x2a7   :  { %1617 = vmatpush.bf16.msrb.mxu3 %v10109_v62  ;;  %1630 = vmatpush.bf16.msra.mxu0 %v10365_v24  ;;  %v14685_v60 = vld [vmem:[#allocation14 + $0x174] sm:$0xf0]  ;;  %v10050_v47 = vld [vmem:[#allocation14 + $0x78] sm:$0xf0] }
 0x2a8   :  { %v10432_v62 = vld [vmem:[#allocation14 + $0x358] sm:$0xf]  ;;  %v10177_v5 = vor.u32 %v14685_v60, %v10176_v59  ;;  %v10053_v59 = vor.u32 %v14649_v46, %v10050_v47  ;;  %v10309_v60 = vor.u32 %v14713_v48, %v10306_v49 }
 0x2a9   :  { %v14749_v24 = vld [vmem:[#allocation14 + $0x374] sm:$0xf0] }
 0x2aa   :  { %1592 = vmatpush.bf16.msrb.mxu1 %v10073_v6  ;;  %1605 = vmatpush.bf16.msrb.mxu2 %v10329_v7  ;;  %v10433_v50 = vor.u32 %v14749_v24, %v10432_v62  ;;  %v10144_v6 = vld [vmem:[#allocation14 + $0x118] sm:$0xf]  ;;  %v14641_v62 = vld [vmem:[#allocation14 + $0x1c] sm:$0xf] }
 0x2ab   :  { %1618 = vmatpush.bf16.msrb.mxu3 %v10077_v3  ;;  %1631 = vmatpush.bf16.msra.mxu0 %v10333_v58  ;;  %v14677_v7 = vld [vmem:[#allocation14 + $0x134] sm:$0xf0]  ;;  %v10018_v24 = vld [vmem:[#allocation14 + $0x38] sm:$0xf0] }
 0x2ac   :  { %v10400_v3 = vld [vmem:[#allocation14 + $0x318] sm:$0xf]  ;;  %v10145_v15 = vor.u32 %v14677_v7, %v10144_v6 }
 0x2ad   :  { %v14741_v58 = vld [vmem:[#allocation14 + $0x334] sm:$0xf0] }
 0x2ae   :  { %1593 = vmatpush.bf16.msrb.mxu1 %v10041_v18  ;;  %1606 = vmatpush.bf16.msrb.mxu2 %v10297_v20  ;;  %v10401_v16 = vor.u32 %v14741_v58, %v10400_v3  ;;  %v14669_v18 = vld [vmem:[#allocation14 + $0xf4] sm:$0xf0]  ;;  %v10149_v20 = vor.u32 %v14673_v11, %v10146_v12  ;;  %v825_v11 = vld [vmem:[#allocation16] sm:$0xff] }
 0x2af   :  { %1619 = vmatpush.bf16.msrb.mxu3 %v10045_v1  ;;  %1632 = vmatpush.bf16.msra.mxu0 %v10301_v26  ;;  %v14665_v1 = vld [vmem:[#allocation14 + $0xdc] sm:$0xf]  ;;  %v10113_v29 = vor.u32 %v14669_v18, %v10112_v17  ;;  %v10336_v56 = vld [vmem:[#allocation14 + $0x298] sm:$0xf]  ;;  %v828_v12 = vperm.slane %v825_v11, 1  ;;  %v827_v14 = vperm.slane %v825_v11, 0 }
 0x2b0   :  { %v10114_v26 = vld [vmem:[#allocation14 + $0xf8] sm:$0xf0]  ;;  %v829_v18 = vperm.slane %v825_v11, 2  ;;  %v832_v37 = vperm.slane %v825_v11, 5  ;;  %v833_v49 = vperm.slane %v825_v11, 6 }
 0x2b1   :  { %v10117_v33 = vor.u32 %v14665_v1, %v10114_v26 }
 0x2b2   :  { %1594 = vmatpush.bf16.msrb.mxu1 %v10009_v34  ;;  %1607 = vmatpush.bf16.msrb.mxu2 %v10265_v35  ;;  %v14725_v34 = vld [vmem:[#allocation14 + $0x2b4] sm:$0xf0]  ;;  %v14657_v35 = vld [vmem:[#allocation14 + $0x9c] sm:$0xf] }
 0x2b3   :  { %1620 = vmatpush.bf16.msrb.mxu3 %v10013_v38  ;;  %1633 = vmatpush.bf16.msra.mxu0 %v10269_v39  ;;  %v10081_v38 = vor.u32 %v14661_v32, %v10080_v31  ;;  %v10337_v39 = vor.u32 %v14725_v34, %v10336_v56  ;;  %v10085_v42 = vor.u32 %v14657_v35, %v10082_v57  ;;  %v831_v57 = vperm.slane %v825_v11, 4 }
 0x2b5   :  { %1595 = vmatmul.bf16.vlgmr.msrb.gmra.mxu1 %v16514_v8  ;;  %1608 = vmatmul.bf16.vlgmr.msrb.gmra.mxu2 %v16516_v9 }
 0x2b6   :  { %1639 = vmatpush.bf16.msra.mxu1 %v10241_v40  ;;  %1652 = vmatpush.bf16.msra.mxu2 %v10497_v41  ;;  %v10048_v40 = vld [vmem:[#allocation14 + $0x58] sm:$0xf] }
 0x2b7   :  { %1665 = vmatpush.bf16.msra.mxu3 %v10245_v44  ;;  %1678 = vmatpush.bf16.msrb.mxu0 %v10501_v45  ;;  %v14653_v41 = vld [vmem:[#allocation14 + $0x74] sm:$0xf0] }
 0x2b8   :  { %1621 = vmatmul.bf16.vlgmr.msrb.gmra.mxu3 %v16514_v8  ;;  %1634 = vmatmul.bf16.vlgmr.msra.gmra.mxu0 %v16516_v9  ;;  %v10304_v44 = vld [vmem:[#allocation14 + $0x258] sm:$0xf]  ;;  %v10049_v51 = vor.u32 %v14653_v41, %v10048_v40 }
 0x2b9   :  { %v14717_v45 = vld [vmem:[#allocation14 + $0x274] sm:$0xf0] }
 0x2ba   :  { %1640 = vmatpush.bf16.msra.mxu1 %v10209_v54  ;;  %1653 = vmatpush.bf16.msra.mxu2 %v10465_v55  ;;  %v10305_v53 = vor.u32 %v14717_v45, %v10304_v44  ;;  %v10016_v54 = vld [vmem:[#allocation14 + $0x18] sm:$0xf] }
 0x2bb   :  { %1666 = vmatpush.bf16.msra.mxu3 %v10213_v61  ;;  %1679 = vmatpush.bf16.msrb.mxu0 %v10469_v23  ;;  %v14645_v55 = vld [vmem:[#allocation14 + $0x34] sm:$0xf0] }
 0x2bc   :  { %v10272_v61 = vld [vmem:[#allocation14 + $0x218] sm:$0xf]  ;;  %v10017_v2 = vor.u32 %v14645_v55, %v10016_v54 }
 0x2bd   :  { %v14709_v23 = vld [vmem:[#allocation14 + $0x234] sm:$0xf0] }
 0x2be   :  { %1641 = vmatpush.bf16.msra.mxu1 %v10177_v5  ;;  %1654 = vmatpush.bf16.msra.mxu2 %v10433_v50  ;;  %v10273_v4 = vor.u32 %v14709_v23, %v10272_v61  ;;  %v10021_v5 = vor.u32 %v14641_v62, %v10018_v24  ;;  %v10277_v50 = vor.u32 %v14705_v63, %v10274_v0 }
 0x2bf   :  { %1667 = vmatpush.bf16.msra.mxu3 %v10181_v10  ;;  %1680 = vmatpush.bf16.msrb.mxu0 %v10437_v52 }
 0x2c2   :  { %1642 = vmatpush.bf16.msra.mxu1 %v10145_v15  ;;  %1655 = vmatpush.bf16.msra.mxu2 %v10401_v16 }
 0x2c3   :  { %1668 = vmatpush.bf16.msra.mxu3 %v10149_v20  ;;  %1681 = vmatpush.bf16.msrb.mxu0 %v10405_v21 }
 0x2c6   :  { %1643 = vmatpush.bf16.msra.mxu1 %v10113_v29  ;;  %1656 = vmatpush.bf16.msra.mxu2 %v10369_v30 }
 0x2c7   :  { %1669 = vmatpush.bf16.msra.mxu3 %v10117_v33  ;;  %1682 = vmatpush.bf16.msrb.mxu0 %v10373_v19 }
 0x2ca   :  { %1644 = vmatpush.bf16.msra.mxu1 %v10081_v38  ;;  %1657 = vmatpush.bf16.msra.mxu2 %v10337_v39 }
 0x2cb   :  { %1670 = vmatpush.bf16.msra.mxu3 %v10085_v42  ;;  %1683 = vmatpush.bf16.msrb.mxu0 %v10341_v43 }
 0x2ce   :  { %1645 = vmatpush.bf16.msra.mxu1 %v10049_v51  ;;  %1658 = vmatpush.bf16.msra.mxu2 %v10305_v53  ;;  %v834_v53 = vperm.slane %v825_v11, 7 }
 0x2cf   :  { %1671 = vmatpush.bf16.msra.mxu3 %v10053_v59  ;;  %1684 = vmatpush.bf16.msrb.mxu0 %v10309_v60 }
 0x2d2   :  { %1646 = vmatpush.bf16.msra.mxu1 %v10017_v2  ;;  %1659 = vmatpush.bf16.msra.mxu2 %v10273_v4  ;;  %v16312_v2 = vmov 512.0  }
 0x2d3   :  { %1672 = vmatpush.bf16.msra.mxu3 %v10021_v5  ;;  %1685 = vmatpush.bf16.msrb.mxu0 %v10277_v50  ;;  %15823 = vrcp.f32 %v16312_v2 }
 0x2d5   :  { %1647 = vmatmul.bf16.vlgmr.msra.gmra.mxu1 %v16514_v8  ;;  %1660 = vmatmul.bf16.vlgmr.msra.gmra.mxu2 %v16516_v9 }
 0x2d6   :  { %1673 = vmatmul.bf16.vlgmr.msra.gmra.mxu3 %v16514_v8  ;;  %1686 = vmatmul.bf16.vlgmr.msrb.gmra.mxu0 %v16516_v9  ;;  %v830_v8 = vperm.slane %v825_v11, 3  ;;  %v15142_v11 = vld [vmem:[#allocation20 + $0xbbc] sm:$0xf0] }
 0x2d9   :  { %v16554_v4 = vpop.eup %15823 }
 0x2da   :  { %v1699_v5 = vmul.f32 512.0, %v16554_v4  ;;  %vm1703_vm7 = vweird.f32 %v16554_v4 }
 0x2dc   :  { %v1700_v50 = vsub.f32 1.0, %v1699_v5  ;;  %v14950_v5 = vld [vmem:[#allocation20 + $0x5bc] sm:$0xf0] }
 0x311   :  { %v1492_v6 = vpop.f32.mrf.mxu1 }
 0x312   :  { %v1531_v7 = vpop.f32.mrf.mxu0  ;;  %v1493_v21 = vadd.f32 %v1492_v6, %v827_v14  ;;  %v10952_v6 = vld [vmem:[#allocation20 + $0x380] sm:$0xf] }
 0x313   :  { %v12488_v14 = vld [vmem:[#allocation20 + $0xf80] sm:$0xf] }
 0x317   :  { %v1505_v10 = vpop.f32.mrf.mxu2 }
 0x318   :  { %v1518_v52 = vpop.f32.mrf.mxu3  ;;  %v16536_v9 = vadd.f32 %v1505_v10, %v1493_v21  ;;  %v11464_v10 = vld [vmem:[#allocation20 + $0x780] sm:$0xf] }
 0x319   :  { %v1494_v3 = vpop.f32.mrf.mxu1  ;;  %v1519_v15 = vadd.f32 %v1518_v52, %v828_v12  ;;  %v14998_v21 = vld [vmem:[#allocation20 + $0x73c] sm:$0xf0] }
 0x31a   :  { %v1533_v58 = vpop.f32.mrf.mxu0  ;;  %v15014_v3 = vld [vmem:[#allocation20 + $0x7bc] sm:$0xf0] }
 0x31b   :  { %v16534_v22 = vadd.f32 %v1531_v7, %v1519_v15  ;;  %v14886_v7 = vld [vmem:[#allocation20 + $0x3bc] sm:$0xf0]  ;;  %v11465_v12 = vor.u32 %v15014_v3, %v11464_v10 }
 0x31c   :  { %v10953_v52 = vor.u32 %v14886_v7, %v10952_v6  ;;  %v11976_v58 = vld [vmem:[#allocation20 + $0xb80] sm:$0xf] }
 0x31d   :  { %v1693_v28 = vadd.f32 %v16534_v22, %v16536_v9  ;;  %v15270_v15 = vld [vmem:[#allocation20 + $0xfbc] sm:$0xf0]  ;;  %4902 = vmatpush.bf16.msrb.mxu2 %v11465_v12 }
 0x31e   :  { %4889 = vmatpush.bf16.msrb.mxu1 %v10953_v52  ;;  %v15078_v6 = vld [vmem:[#allocation20 + $0x9bc] sm:$0xf0] }
 0x31f   :  { %v1507_v13 = vpop.f32.mrf.mxu2  ;;  %v12232_v7 = vld [vmem:[#allocation20 + $0xd80] sm:$0xf] }
 0x320   :  { %v1520_v16 = vpop.f32.mrf.mxu3  ;;  %v11977_v13 = vor.u32 %v15142_v11, %v11976_v58  ;;  %v15206_v10 = vld [vmem:[#allocation20 + $0xdbc] sm:$0xf0] }
 0x321   :  { %v1544_v17 = vpop.f32.mrf.mxu1  ;;  %v10888_v16 = vld [vmem:[#allocation20 + $0x300] sm:$0xf] }
 0x322   :  { %v1583_v20 = vpop.f32.mrf.mxu0  ;;  %v1545_v25 = vadd.f32 %v1544_v17, %v829_v18  ;;  %v12489_v17 = vor.u32 %v15270_v15, %v12488_v14  ;;  %v14870_v18 = vld [vmem:[#allocation20 + $0x33c] sm:$0xf0]  ;;  %4915 = vmatpush.bf16.msrb.mxu3 %v11977_v13  ;;  %v12233_v14 = vor.u32 %v15206_v10, %v12232_v7 }
 0x323   :  { %v10632_v11 = vld [vmem:[#allocation20 + $0x100] sm:$0xf] }
 0x324   :  { %4928 = vmatpush.bf16.msra.mxu0 %v12489_v17  ;;  %v14806_v12 = vld [vmem:[#allocation20 + $0x13c] sm:$0xf0] }
 0x325   :  { %v11144_v15 = vld [vmem:[#allocation20 + $0x500] sm:$0xf] }
 0x326   :  { %v11656_v17 = vld [vmem:[#allocation20 + $0x900] sm:$0xf] }
 0x327   :  { %v1557_v1 = vpop.f32.mrf.mxu2 }
 0x328   :  { %v16538_v26 = vadd.f32 %v1557_v1, %v1545_v25  ;;  %v1570_v27 = vpop.f32.mrf.mxu3  ;;  %v11912_v1 = vld [vmem:[#allocation20 + $0xb00] sm:$0xf] }
 0x329   :  { %v1571_v29 = vadd.f32 %v1570_v27, %v830_v8  ;;  %v1546_v30 = vpop.f32.mrf.mxu1  ;;  %v10889_v8 = vor.u32 %v14870_v18, %v10888_v16  ;;  %v15126_v27 = vld [vmem:[#allocation20 + $0xb3c] sm:$0xf0] }
 0x32a   :  { %v1585_v31 = vpop.f32.mrf.mxu0  ;;  %v1694_v32 = vadd.f32 %v1693_v28, %v16538_v26  ;;  %v12424_v28 = vld [vmem:[#allocation20 + $0xf00] sm:$0xf] }
 0x32b   :  { %v16543_v33 = vadd.f32 %v1583_v20, %v1571_v29  ;;  %v11400_v20 = vld [vmem:[#allocation20 + $0x700] sm:$0xf]  ;;  %v11913_v29 = vor.u32 %v15126_v27, %v11912_v1  ;;  %4890 = vmatpush.bf16.msrb.mxu1 %v10889_v8 }
 0x32c   :  { %v11401_v25 = vor.u32 %v14998_v21, %v11400_v20  ;;  %v15254_v30 = vld [vmem:[#allocation20 + $0xf3c] sm:$0xf0] }
 0x32d   :  { %v1695_v19 = vadd.f32 %v1694_v32, %v16543_v33  ;;  %v10824_v31 = vld [vmem:[#allocation20 + $0x280] sm:$0xf]  ;;  %4916 = vmatpush.bf16.msrb.mxu3 %v11913_v29 }
 0x32e   :  { %v14854_v32 = vld [vmem:[#allocation20 + $0x2bc] sm:$0xf0]  ;;  %4903 = vmatpush.bf16.msrb.mxu2 %v11401_v25  ;;  %v10633_v25 = vor.u32 %v14806_v12, %v10632_v11  ;;  %v12490_v12 = vld [vmem:[#allocation20 + $0xfc0] sm:$0xf0] }
 0x32f   :  { %1696 = vadd.xlane.f32.xlu1 %v1695_v19  ;;  %v1559_v56 = vpop.f32.mrf.mxu2  ;;  %v12425_v19 = vor.u32 %v15254_v30, %v12424_v28  ;;  %v14934_v16 = vld [vmem:[#allocation20 + $0x53c] sm:$0xf0] }
 0x330   :  { %v1572_v34 = vpop.f32.mrf.mxu3  ;;  %v11336_v56 = vld [vmem:[#allocation20 + $0x680] sm:$0xf]  ;;  %v11145_v27 = vor.u32 %v14934_v16, %v11144_v15  ;;  %v10890_v15 = vld [vmem:[#allocation20 + $0x340] sm:$0xf0] }
 0x331   :  { %v14982_v34 = vld [vmem:[#allocation20 + $0x6bc] sm:$0xf0]  ;;  %4929 = vmatpush.bf16.msra.mxu0 %v12425_v19 }
 0x332   :  { %v1596_v35 = vpop.f32.mrf.mxu1  ;;  %v15062_v18 = vld [vmem:[#allocation20 + $0x93c] sm:$0xf0] }
 0x333   :  { %v1597_v38 = vadd.f32 %v1596_v35, %v831_v57  ;;  %v11848_v35 = vld [vmem:[#allocation20 + $0xa80] sm:$0xf]  ;;  %v10825_v57 = vor.u32 %v14854_v32, %v10824_v31  ;;  %v11657_v28 = vor.u32 %v15062_v18, %v11656_v17  ;;  %v14990_v18 = vld [vmem:[#allocation20 + $0x704] sm:$0xf] }
 0x334   :  { %v12168_v20 = vld [vmem:[#allocation20 + $0xd00] sm:$0xf] }
 0x335   :  { %v1635_v36 = vpop.f32.mrf.mxu0  ;;  %4891 = vmatpush.bf16.msrb.mxu1 %v10825_v57  ;;  %v15190_v21 = vld [vmem:[#allocation20 + $0xd3c] sm:$0xf0] }
 0x336   :  { %v14790_v57 = vld [vmem:[#allocation20 + $0xbc] sm:$0xf0] }
 0x338   :  { %v1609_v39 = vpop.f32.mrf.mxu2 }
 0x339   :  { %v16546_v40 = vadd.f32 %v1609_v39, %v1597_v38  ;;  %v15238_v38 = vld [vmem:[#allocation20 + $0xebc] sm:$0xf0]  ;;  %v11337_v39 = vor.u32 %v14982_v34, %v11336_v56 }
 0x33a   :  { %v1598_v43 = vpop.f32.mrf.mxu1 }
 0x33b   :  { %v1622_v41 = vpop.f32.mrf.mxu3  ;;  %v14838_v43 = vld [vmem:[#allocation20 + $0x23c] sm:$0xf0]  ;;  %4904 = vmatpush.bf16.msrb.mxu2 %v11337_v39 }
 0x33c   :  { %v1623_v42 = vadd.f32 %v1622_v41, %v832_v37  ;;  %v12360_v37 = vld [vmem:[#allocation20 + $0xe80] sm:$0xf] }
 0x33d   :  { %v1637_v44 = vpop.f32.mrf.mxu0  ;;  %v11592_v39 = vld [vmem:[#allocation20 + $0x880] sm:$0xf] }
 0x33e   :  { %v16548_v45 = vadd.f32 %v1635_v36, %v1623_v42  ;;  %v15110_v36 = vld [vmem:[#allocation20 + $0xabc] sm:$0xf0] }
 0x33f   :  { %v11849_v41 = vor.u32 %v15110_v36, %v11848_v35  ;;  %v10760_v42 = vld [vmem:[#allocation20 + $0x200] sm:$0xf] }
 0x340   :  { %v1611_v46 = vpop.f32.mrf.mxu2  ;;  %v11272_v44 = vld [vmem:[#allocation20 + $0x600] sm:$0xf] }
 0x341   :  { %v1701_v46 = vmul.f32 %v16554_v4, %v1700_v50  ;;  %4917 = vmatpush.bf16.msrb.mxu3 %v11849_v41  ;;  %v11720_v50 = vld [vmem:[#allocation20 + $0x980] sm:$0xf] }
 0x342   :  { %v11721_v58 = vor.u32 %v15078_v6, %v11720_v50  ;;  %v11080_v36 = vld [vmem:[#allocation20 + $0x480] sm:$0xf]  ;;  %v15006_v50 = vld [vmem:[#allocation20 + $0x784] sm:$0xf] }
 0x343   :  { %v1624_v47 = vpop.f32.mrf.mxu3  ;;  %v15046_v41 = vld [vmem:[#allocation20 + $0x8bc] sm:$0xf0]  ;;  %v11466_v6 = vld [vmem:[#allocation20 + $0x7c0] sm:$0xf0] }
 0x344   :  { %v12361_v47 = vor.u32 %v15238_v38, %v12360_v37  ;;  %v14918_v38 = vld [vmem:[#allocation20 + $0x4bc] sm:$0xf0]  ;;  %v11469_v10 = vor.u32 %v15006_v50, %v11466_v6  ;;  %v15198_v50 = vld [vmem:[#allocation20 + $0xd84] sm:$0xf] }
 0x345   :  { %v12234_v6 = vld [vmem:[#allocation20 + $0xdc0] sm:$0xf0] }
 0x346   :  { %4930 = vmatpush.bf16.msra.mxu0 %v12361_v47 }
 0x352   :  { %v1648_v48 = vpop.f32.mrf.mxu1 }
 0x353   :  { %v1687_v51 = vpop.f32.mrf.mxu0  ;;  %v1649_v54 = vadd.f32 %v1648_v48, %v833_v49  ;;  %v14966_v48 = vld [vmem:[#allocation20 + $0x63c] sm:$0xf0] }
 0x354   :  { %v11784_v49 = vld [vmem:[#allocation20 + $0xa00] sm:$0xf] }
 0x358   :  { %v1661_v55 = vpop.f32.mrf.mxu2 }
 0x359   :  { %v16550_v59 = vadd.f32 %v1661_v55, %v1649_v54  ;;  %v1674_v60 = vpop.f32.mrf.mxu3  ;;  %v15222_v54 = vld [vmem:[#allocation20 + $0xe3c] sm:$0xf0]  ;;  %v10761_v55 = vor.u32 %v14838_v43, %v10760_v42  ;;  %v11081_v42 = vor.u32 %v14918_v38, %v11080_v36  ;;  %v11593_v43 = vor.u32 %v15046_v41, %v11592_v39  ;;  %v15230_v36 = vld [vmem:[#allocation20 + $0xe84] sm:$0xf] }
 0x35a   :  { %v1675_v61 = vadd.f32 %v1674_v60, %v834_v53  ;;  %v1650_v23 = vpop.f32.mrf.mxu1  ;;  %v12296_v53 = vld [vmem:[#allocation20 + $0xe00] sm:$0xf]  ;;  %v11273_v60 = vor.u32 %v14966_v48, %v11272_v44  ;;  %v14830_v39 = vld [vmem:[#allocation20 + $0x204] sm:$0xf] }
 0x35b   :  { %v1689_v62 = vpop.f32.mrf.mxu0  ;;  %v10696_v23 = vld [vmem:[#allocation20 + $0x180] sm:$0xf]  ;;  %v12297_v2 = vor.u32 %v15222_v54, %v12296_v53  ;;  %4892 = vmatpush.bf16.msrb.mxu1 %v10761_v55  ;;  %v10762_v41 = vld [vmem:[#allocation20 + $0x240] sm:$0xf0] }
 0x35c   :  { %v16552_v24 = vadd.f32 %v1687_v51, %v1675_v61  ;;  %v15094_v51 = vld [vmem:[#allocation20 + $0xa3c] sm:$0xf0]  ;;  %4905 = vmatpush.bf16.msrb.mxu2 %v11273_v60 }
 0x35d   :  { %v11785_v61 = vor.u32 %v15094_v51, %v11784_v49  ;;  %v14822_v62 = vld [vmem:[#allocation20 + $0x1bc] sm:$0xf0]  ;;  %4931 = vmatpush.bf16.msra.mxu0 %v12297_v2 }
 0x35e   :  { %v10697_v52 = vor.u32 %v14822_v62, %v10696_v23  ;;  %v12104_v44 = vld [vmem:[#allocation20 + $0xc80] sm:$0xf] }
 0x35f   :  { %4918 = vmatpush.bf16.msrb.mxu3 %v11785_v61  ;;  %v10504_v48 = vld [vmem:[#allocation20] sm:$0xf] }
 0x360   :  { %v1663_v63 = vpop.f32.mrf.mxu2  ;;  %4893 = vmatpush.bf16.msrb.mxu1 %v10697_v52  ;;  %v14774_v49 = vld [vmem:[#allocation20 + $0x3c] sm:$0xf0]  ;;  %v15134_v52 = vld [vmem:[#allocation20 + $0xb84] sm:$0xf] }
 0x361   :  { %v1676_v0 = vpop.f32.mrf.mxu3  ;;  %v11208_v63 = vld [vmem:[#allocation20 + $0x580] sm:$0xf]  ;;  %4932 = vmatpush.bf16.msra.mxu0 %v12233_v14  ;;  %v10505_v53 = vor.u32 %v14774_v49, %v10504_v48  ;;  %v14862_v14 = vld [vmem:[#allocation20 + $0x304] sm:$0xf] }
 0x362   :  { %v1702_v0 = vadd.f32 %v16554_v4, %v1701_v46  ;;  %v11209_v3 = vor.u32 %v14950_v5, %v11208_v63  ;;  %v15174_v46 = vld [vmem:[#allocation20 + $0xcbc] sm:$0xf0]  ;;  %v10954_v5 = vld [vmem:[#allocation20 + $0x3c0] sm:$0xf0]  ;;  %v10893_v17 = vor.u32 %v14862_v14, %v10890_v15 }
 0x363   :  { %4919 = vmatpush.bf16.msrb.mxu3 %v11721_v58  ;;  %v12105_v47 = vor.u32 %v15174_v46, %v12104_v44  ;;  %v11016_v51 = vld [vmem:[#allocation20 + $0x400] sm:$0xf]  ;;  %v15262_v58 = vld [vmem:[#allocation20 + $0xf84] sm:$0xf] }
 0x364   :  { %v16561_v13 = vsel %vm1703_vm7, %v16554_v4, %v1702_v0  ;;  %4906 = vmatpush.bf16.msrb.mxu2 %v11209_v3  ;;  %v12169_v4 = vor.u32 %v15190_v21, %v12168_v20  ;;  %4894 = vmatpush.bf16.msrb.mxu1 %v10633_v25  ;;  %v14902_v54 = vld [vmem:[#allocation20 + $0x43c] sm:$0xf0]  ;;  %v14878_v0 = vld [vmem:[#allocation20 + $0x384] sm:$0xf]  ;;  %v12493_v16 = vor.u32 %v15262_v58, %v12490_v12 }
 0x365   :  { %v11528_v55 = vld [vmem:[#allocation20 + $0x800] sm:$0xf]  ;;  %v11017_v61 = vor.u32 %v14902_v54, %v11016_v51  ;;  %v10957_v7 = vor.u32 %v14878_v0, %v10954_v5  ;;  %v11978_v3 = vld [vmem:[#allocation20 + $0xbc0] sm:$0xf0] }
 0x366   :  { %4933 = vmatpush.bf16.msra.mxu0 %v12169_v4  ;;  %v15030_v60 = vld [vmem:[#allocation20 + $0x83c] sm:$0xf0]  ;;  %v11981_v11 = vor.u32 %v15134_v52, %v11978_v3  ;;  %v11402_v20 = vld [vmem:[#allocation20 + $0x740] sm:$0xf0] }
 0x367   :  { %4920 = vmatpush.bf16.msrb.mxu3 %v11657_v28  ;;  %v11529_v23 = vor.u32 %v15030_v60, %v11528_v55  ;;  %v12040_v62 = vld [vmem:[#allocation20 + $0xc00] sm:$0xf]  ;;  %v15118_v21 = vld [vmem:[#allocation20 + $0xb04] sm:$0xf] }
 0x368   :  { %4907 = vmatpush.bf16.msrb.mxu2 %v11145_v27  ;;  %v15158_v63 = vld [vmem:[#allocation20 + $0xc3c] sm:$0xf0]  ;;  %v11914_v25 = vld [vmem:[#allocation20 + $0xb40] sm:$0xf0] }
 0x369   :  { %v12041_v2 = vor.u32 %v15158_v63, %v12040_v62  ;;  %v12426_v27 = vld [vmem:[#allocation20 + $0xf40] sm:$0xf0]  ;;  %v11917_v28 = vor.u32 %v15118_v21, %v11914_v25 }
 0x36a   :  { %4934 = vmatpush.bf16.msra.mxu0 %v12105_v47  ;;  %v11274_v44 = vld [vmem:[#allocation20 + $0x640] sm:$0xf0] }
 0x36b   :  { %4921 = vmatpush.bf16.msrb.mxu3 %v11593_v43  ;;  %v10765_v43 = vor.u32 %v14830_v39, %v10762_v41  ;;  %v15086_v46 = vld [vmem:[#allocation20 + $0xa04] sm:$0xf] }
 0x36c   :  { %4908 = vmatpush.bf16.msrb.mxu2 %v11081_v42  ;;  %v14958_v42 = vld [vmem:[#allocation20 + $0x604] sm:$0xf] }
 0x36d   :  { %v11786_v47 = vld [vmem:[#allocation20 + $0xa40] sm:$0xf0]  ;;  %v11277_v48 = vor.u32 %v14958_v42, %v11274_v44 }
 0x36e   :  { %4935 = vmatpush.bf16.msra.mxu0 %v12041_v2  ;;  %v11789_v49 = vor.u32 %v15086_v46, %v11786_v47  ;;  %v15214_v51 = vld [vmem:[#allocation20 + $0xe04] sm:$0xf] }
 0x36f   :  { %4922 = vmatpush.bf16.msrb.mxu3 %v11529_v23  ;;  %v14814_v55 = vld [vmem:[#allocation20 + $0x184] sm:$0xf] }
 0x370   :  { %4909 = vmatpush.bf16.msrb.mxu2 %v11017_v61  ;;  %v10698_v60 = vld [vmem:[#allocation20 + $0x1c0] sm:$0xf0] }
 0x371   :  { %v14942_v61 = vld [vmem:[#allocation20 + $0x584] sm:$0xf]  ;;  %v10701_v23 = vor.u32 %v14814_v55, %v10698_v60  ;;  %v1692_v55 = vld [vmem:[#allocation19] sm:$0xf] }
 0x372   :  { %4980 = vmatpush.bf16.msrb.mxu0 %v12493_v16  ;;  %v11210_v62 = vld [vmem:[#allocation20 + $0x5c0] sm:$0xf0] }
 0x373   :  { %4967 = vmatpush.bf16.msra.mxu3 %v11981_v11  ;;  %v15070_v63 = vld [vmem:[#allocation20 + $0x984] sm:$0xf]  ;;  %v11213_v2 = vor.u32 %v14942_v61, %v11210_v62 }
 0x374   :  { %4954 = vmatpush.bf16.msra.mxu2 %v11469_v10  ;;  %v11722_v0 = vld [vmem:[#allocation20 + $0x9c0] sm:$0xf0] }
 0x375   :  { %v11725_v5 = vor.u32 %v15070_v63, %v11722_v0  ;;  %v14798_v10 = vld [vmem:[#allocation20 + $0x104] sm:$0xf] }
 0x376   :  { %v10634_v52 = vld [vmem:[#allocation20 + $0x140] sm:$0xf0] }
 0x377   :  { %4968 = vmatpush.bf16.msra.mxu3 %v11917_v28  ;;  %v14926_v3 = vld [vmem:[#allocation20 + $0x504] sm:$0xf]  ;;  %v10637_v58 = vor.u32 %v14798_v10, %v10634_v52 }
 0x378   :  { %v11146_v11 = vld [vmem:[#allocation20 + $0x540] sm:$0xf0] }
 0x379   :  { %v15054_v12 = vld [vmem:[#allocation20 + $0x904] sm:$0xf]  ;;  %v11149_v15 = vor.u32 %v14926_v3, %v11146_v11 }
 0x37a   :  { %v11658_v14 = vld [vmem:[#allocation20 + $0x940] sm:$0xf0] }
 0x37b   :  { %v11661_v16 = vor.u32 %v15054_v12, %v11658_v14  ;;  %v14782_v21 = vld [vmem:[#allocation20 + $0x84] sm:$0xf] }
 0x37c   :  { %v14910_v25 = vld [vmem:[#allocation20 + $0x484] sm:$0xf] }
 0x37d   :  { %v11082_v28 = vld [vmem:[#allocation20 + $0x4c0] sm:$0xf0] }
 0x37e   :  { %v11018_v39 = vld [vmem:[#allocation20 + $0x440] sm:$0xf0] }
 0x37f   :  { %v15022_v41 = vld [vmem:[#allocation20 + $0x804] sm:$0xf] }
 0x380   :  { %v12042_v44 = vld [vmem:[#allocation20 + $0xc40] sm:$0xf0] }
 0x3a2   :  { %v1697_v8 = vpop.xlane.xlu1 %1696 }
 0x3a3   :  { %v1705_v1 = vmul.f32 %v16561_v13, %v1697_v8  ;;  %v11405_v8 = vor.u32 %v14990_v18, %v11402_v20  ;;  %v12170_v18 = vld [vmem:[#allocation20 + $0xd40] sm:$0xf0] }
 0x3a5   :  { %v16565_v29 = vsub.f32 %v16536_v9, %v1705_v1  ;;  %v16568_v30 = vsub.f32 %v16534_v22, %v1705_v1  ;;  %v16571_v31 = vsub.f32 %v16538_v26, %v1705_v1  ;;  %v16574_v32 = vsub.f32 %v16543_v33, %v1705_v1  ;;  %v10568_v33 = vld [vmem:[#allocation20 + $0x80] sm:$0xf]  ;;  %v15246_v1 = vld [vmem:[#allocation20 + $0xf04] sm:$0xf]  ;;  %4955 = vmatpush.bf16.msra.mxu2 %v11405_v8 }
 0x3a6   :  { %v10569_v37 = vor.u32 %v14790_v57, %v10568_v33  ;;  %v12429_v4 = vor.u32 %v15246_v1, %v12426_v27  ;;  %v10570_v8 = vld [vmem:[#allocation20 + $0xc0] sm:$0xf0] }
 0x3a7   :  { %v1710_v19 = vmul.f32 %v16565_v29, %v16565_v29  ;;  %v1711_v56 = vmul.f32 %v16568_v30, %v16568_v30  ;;  %v1712_v22 = vmul.f32 %v16571_v31, %v16571_v31  ;;  %v1713_v26 = vmul.f32 %v16574_v32, %v16574_v32 }
 0x3a8   :  { %4895 = vmatpush.bf16.msrb.mxu1 %v10569_v37  ;;  %v12362_v37 = vld [vmem:[#allocation20 + $0xec0] sm:$0xf0]  ;;  %4981 = vmatpush.bf16.msrb.mxu0 %v12429_v4  ;;  %v10573_v27 = vor.u32 %v14782_v21, %v10570_v8 }
 0x3a9   :  { %v1714_v9 = vadd.f32 %v1711_v56, %v1710_v19  ;;  %v14846_v19 = vld [vmem:[#allocation20 + $0x284] sm:$0xf]  ;;  %v12365_v38 = vor.u32 %v15230_v36, %v12362_v37 }
 0x3aa   :  { %v10826_v56 = vld [vmem:[#allocation20 + $0x2c0] sm:$0xf0] }
 0x3ab   :  { %v1715_v34 = vadd.f32 %v1714_v9, %v1712_v22  ;;  %v14974_v22 = vld [vmem:[#allocation20 + $0x684] sm:$0xf]  ;;  %v10829_v9 = vor.u32 %v14846_v19, %v10826_v56 }
 0x3ac   :  { %4896 = vmatpush.bf16.msrb.mxu1 %v10505_v53  ;;  %v12298_v53 = vld [vmem:[#allocation20 + $0xe40] sm:$0xf0]  ;;  %4982 = vmatpush.bf16.msrb.mxu0 %v12365_v38 }
 0x3ad   :  { %v1716_v35 = vadd.f32 %v1715_v34, %v1713_v26  ;;  %v11338_v26 = vld [vmem:[#allocation20 + $0x6c0] sm:$0xf0]  ;;  %v12301_v54 = vor.u32 %v15214_v51, %v12298_v53 }
 0x3ae   :  { %v15102_v34 = vld [vmem:[#allocation20 + $0xa84] sm:$0xf]  ;;  %v11341_v33 = vor.u32 %v14974_v22, %v11338_v26  ;;  %v11085_v22 = vor.u32 %v14910_v25, %v11082_v28  ;;  %v10960_v25 = vld [vmem:[#allocation20 + $0x388] sm:$0xf] }
 0x3af   :  { %1717 = vadd.xlane.f32.xlu1 %v1716_v35  ;;  %v11850_v35 = vld [vmem:[#allocation20 + $0xac0] sm:$0xf0]  ;;  %v11472_v28 = vld [vmem:[#allocation20 + $0x788] sm:$0xf] }
 0x3b0   :  { %4941 = vmatpush.bf16.msra.mxu1 %v10957_v7  ;;  %v11853_v57 = vor.u32 %v15102_v34, %v11850_v35  ;;  %4956 = vmatpush.bf16.msra.mxu2 %v11341_v33  ;;  %v12237_v7 = vor.u32 %v15198_v50, %v12234_v6  ;;  %v15038_v4 = vld [vmem:[#allocation20 + $0x884] sm:$0xf]  ;;  %v1751_v50 = vperm.slane %v1692_v55, 2  ;;  %v1752_v6 = vperm.slane %v1692_v55, 3 }
 0x3b1   :  { %4983 = vmatpush.bf16.msrb.mxu0 %v12301_v54  ;;  %v11594_v19 = vld [vmem:[#allocation20 + $0x8c0] sm:$0xf0]  ;;  %v1691_v54 = vld [vmem:[#allocation17] sm:$0xf] }
 0x3b2   :  { %4969 = vmatpush.bf16.msra.mxu3 %v11853_v57  ;;  %v15166_v26 = vld [vmem:[#allocation20 + $0xc84] sm:$0xf]  ;;  %v1736_v61 = vperm.slane %v1691_v54, 0  ;;  %v1737_v62 = vperm.slane %v1691_v54, 1  ;;  %v1738_v63 = vperm.slane %v1691_v54, 2  ;;  %v1739_v0 = vperm.slane %v1691_v54, 3 }
 0x3b3   :  { %v12106_v34 = vld [vmem:[#allocation20 + $0xcc0] sm:$0xf0]  ;;  %v14855_v54 = vld [vmem:[#allocation20 + $0x2c4] sm:$0xf0] }
 0x3b4   :  { %4942 = vmatpush.bf16.msra.mxu1 %v10893_v17  ;;  %4957 = vmatpush.bf16.msra.mxu2 %v11277_v48  ;;  %v15182_v17 = vld [vmem:[#allocation20 + $0xd04] sm:$0xf]  ;;  %v12109_v35 = vor.u32 %v15166_v26, %v12106_v34  ;;  %v15143_v34 = vld [vmem:[#allocation20 + $0xbc4] sm:$0xf0] }
 0x3b5   :  { %4984 = vmatpush.bf16.msrb.mxu0 %v12237_v7  ;;  %v12173_v20 = vor.u32 %v15182_v17, %v12170_v18  ;;  %v14766_v57 = vld [vmem:[#allocation20 + $0x4] sm:$0xf] }
 0x3b6   :  { %4970 = vmatpush.bf16.msra.mxu3 %v11789_v49  ;;  %v10506_v36 = vld [vmem:[#allocation20 + $0x40] sm:$0xf0] }
 0x3b7   :  { %v10509_v37 = vor.u32 %v14766_v57, %v10506_v36  ;;  %v14894_v38 = vld [vmem:[#allocation20 + $0x404] sm:$0xf] }
 0x3b8   :  { %4943 = vmatpush.bf16.msra.mxu1 %v10829_v9  ;;  %4958 = vmatpush.bf16.msra.mxu2 %v11213_v2  ;;  %v11597_v9 = vor.u32 %v15038_v4, %v11594_v19  ;;  %v11021_v42 = vor.u32 %v14894_v38, %v11018_v39  ;;  %v1749_v2 = vperm.slane %v1692_v55, 0  ;;  %v15015_v4 = vld [vmem:[#allocation20 + $0x7c4] sm:$0xf0] }
 0x3b9   :  { %4985 = vmatpush.bf16.msrb.mxu0 %v12173_v20  ;;  %v11984_v19 = vld [vmem:[#allocation20 + $0xb88] sm:$0xf] }
 0x3ba   :  { %4971 = vmatpush.bf16.msra.mxu3 %v11725_v5  ;;  %v1750_v5 = vperm.slane %v1692_v55, 1 }
 0x3bc   :  { %4944 = vmatpush.bf16.msra.mxu1 %v10765_v43  ;;  %4959 = vmatpush.bf16.msra.mxu2 %v11149_v15  ;;  %v15150_v43 = vld [vmem:[#allocation20 + $0xc04] sm:$0xf] }
 0x3bd   :  { %4986 = vmatpush.bf16.msrb.mxu0 %v12109_v35  ;;  %v12045_v47 = vor.u32 %v15150_v43, %v12042_v44  ;;  %v12496_v35 = vld [vmem:[#allocation20 + $0xf88] sm:$0xf] }
 0x3be   :  { %4972 = vmatpush.bf16.msra.mxu3 %v11661_v16  ;;  %v14999_v44 = vld [vmem:[#allocation20 + $0x744] sm:$0xf0] }
 0x3c0   :  { %4945 = vmatpush.bf16.msra.mxu1 %v10701_v23  ;;  %4960 = vmatpush.bf16.msra.mxu2 %v11085_v22 }
 0x3c1   :  { %4987 = vmatpush.bf16.msrb.mxu0 %v12045_v47  ;;  %v12432_v47 = vld [vmem:[#allocation20 + $0xf08] sm:$0xf] }
 0x3c2   :  { %4973 = vmatpush.bf16.msra.mxu3 %v11597_v9 }
 0x3c4   :  { %4946 = vmatpush.bf16.msra.mxu1 %v10637_v58  ;;  %4961 = vmatpush.bf16.msra.mxu2 %v11021_v42  ;;  %v10896_v42 = vld [vmem:[#allocation20 + $0x308] sm:$0xf] }
 0x3c8   :  { %4947 = vmatpush.bf16.msra.mxu1 %v10573_v27 }
 0x3cc   :  { %4948 = vmatpush.bf16.msra.mxu1 %v10509_v37 }
 0x422   :  { %v1718_v1 = vpop.xlane.xlu1 %1717 }
 0x423   :  { %v1719_v56 = vmul.f32 %v1718_v1, %v16561_v13  ;;  %v11530_v13 = vld [vmem:[#allocation20 + $0x840] sm:$0xf0] }
 0x424   :  { %v11533_v46 = vor.u32 %v15022_v41, %v11530_v13  ;;  %v11473_v41 = vor.u32 %v15015_v4, %v11472_v28  ;;  %v14871_v13 = vld [vmem:[#allocation20 + $0x344] sm:$0xf0] }
 0x425   :  { %v1720_v33 = vadd.f32 1e-05, %v1719_v56  ;;  %v10640_v4 = vld [vmem:[#allocation20 + $0x108] sm:$0xf] }
 0x426   :  { %4974 = vmatpush.bf16.msra.mxu3 %v11533_v46  ;;  %v11920_v46 = vld [vmem:[#allocation20 + $0xb08] sm:$0xf] }
 0x427   :  { %15825 = vrsqrt.f32 %v1720_v33  ;;  %vm1727_vm9 = vweird.f32 %v1720_v33 }
 0x42d   :  { %v15826_v48 = vpop.eup %15825 }
 0x42e   :  { %v1722_v49 = vmul.f32 %v15826_v48, %v1720_v33  ;;  %vm1728_vm8 = vweird.f32 %v15826_v48  ;;  %v15271_v33 = vld [vmem:[#allocation20 + $0xfc4] sm:$0xf0] }
 0x42f   :  { %vm1729_vm10 = vmor %vm1727_vm9, %vm1728_vm8  ;;  %v12497_v43 = vor.u32 %v15271_v33, %v12496_v35  ;;  %v15063_v35 = vld [vmem:[#allocation20 + $0x944] sm:$0xf0] }
 0x430   :  { %v1723_v51 = vmul.f32 %v15826_v48, %v1722_v49  ;;  %v10897_v49 = vor.u32 %v14871_v13, %v10896_v42  ;;  %v12176_v33 = vld [vmem:[#allocation20 + $0xd08] sm:$0xf] }
 0x431   :  { %v10576_v42 = vld [vmem:[#allocation20 + $0x88] sm:$0xf] }
 0x432   :  { %v1724_v53 = vmul.f32 0.5, %v1723_v51  ;;  %v14791_v13 = vld [vmem:[#allocation20 + $0xc4] sm:$0xf0] }
 0x434   :  { %v1725_v60 = vsub.f32 1.5, %v1724_v53  ;;  %v10832_v53 = vld [vmem:[#allocation20 + $0x288] sm:$0xf] }
 0x436   :  { %v1726_v23 = vmul.f32 %v15826_v48, %v1725_v60 }
 0x438   :  { %v1730_v7 = vsel %vm1729_vm10, %v15826_v48, %v1726_v23  ;;  %v15255_v48 = vld [vmem:[#allocation20 + $0xf44] sm:$0xf0] }
 0x439   :  { %v1731_v10 = vmul.f32 %v1730_v7, %v16565_v29  ;;  %v1732_v52 = vmul.f32 %v1730_v7, %v16568_v30  ;;  %v1733_v3 = vmul.f32 %v1730_v7, %v16571_v31  ;;  %v1734_v58 = vmul.f32 %v1730_v7, %v16574_v32  ;;  %v14887_v31 = vld [vmem:[#allocation20 + $0x3c4] sm:$0xf0] }
 0x43a   :  { %v10961_v36 = vor.u32 %v14887_v31, %v10960_v25  ;;  %v12433_v60 = vor.u32 %v15255_v48, %v12432_v47  ;;  %v14983_v23 = vld [vmem:[#allocation20 + $0x6c4] sm:$0xf0] }
 0x43b   :  { %v1744_v11 = vmul.f32 %v1736_v61, %v1731_v10  ;;  %v1745_v12 = vmul.f32 %v1737_v62, %v1732_v52  ;;  %v1746_v14 = vmul.f32 %v1738_v63, %v1733_v3  ;;  %v1747_v15 = vmul.f32 %v1739_v0, %v1734_v58  ;;  %v11344_v61 = vld [vmem:[#allocation20 + $0x688] sm:$0xf] }
 0x43c   :  { %v11856_v62 = vld [vmem:[#allocation20 + $0xa88] sm:$0xf] }
 0x43d   :  { %v1757_v16 = vadd.f32 %v1749_v2, %v1744_v11  ;;  %v1758_v17 = vadd.f32 %v1750_v5, %v1745_v12  ;;  %v1759_v18 = vadd.f32 %v1751_v50, %v1746_v14  ;;  %v1760_v20 = vadd.f32 %v1752_v6, %v1747_v15  ;;  %v15111_v63 = vld [vmem:[#allocation20 + $0xac4] sm:$0xf0] }
 0x43e   :  { %v12368_v0 = vld [vmem:[#allocation20 + $0xe88] sm:$0xf]  ;;  %v10833_v5 = vor.u32 %v14855_v54, %v10832_v53  ;;  %v11345_v50 = vor.u32 %v14983_v23, %v11344_v61  ;;  %v11857_v10 = vor.u32 %v15111_v63, %v11856_v62 }
 0x43f   :  { %vm1761_vm11 = vcmp.gt.f32.partialorder %v1757_v16, 0.0  ;;  %vm1762_vm12 = vcmp.gt.f32.partialorder %v1758_v17, 0.0  ;;  %vm1763_vm13 = vcmp.gt.f32.partialorder %v1759_v18, 0.0  ;;  %vm1764_vm14 = vcmp.gt.f32.partialorder %v1760_v20, 0.0  ;;  %v15239_v2 = vld [vmem:[#allocation20 + $0xec4] sm:$0xf0] }
 0x440   :  { %v1765_v21 = vmul.f32 0.2, %v1757_v16  ;;  %v1766_v29 = vmul.f32 0.2, %v1758_v17  ;;  %v1767_v8 = vmul.f32 0.2, %v1759_v18  ;;  %v12369_v52 = vor.u32 %v15239_v2, %v12368_v0 }
 0x441   :  { %v1768_v30 = vmul.f32 0.2, %v1760_v20  ;;  %v10768_v6 = vld [vmem:[#allocation20 + $0x208] sm:$0xf] }
 0x442   :  { %v1769_v1 = vsel %vm1761_vm11, %v1757_v16, %v1765_v21  ;;  %v1770_v32 = vsel %vm1762_vm12, %v1758_v17, %v1766_v29  ;;  %v1771_v27 = vsel %vm1763_vm13, %v1759_v18, %v1767_v8  ;;  %v14839_v7 = vld [vmem:[#allocation20 + $0x244] sm:$0xf0] }
 0x443   :  { %v1772_v56 = vsel %vm1764_vm14, %v1760_v20, %v1768_v30  ;;  %v1773_v22 = vadd.f32 %v1769_v1, %v16546_v40  ;;  %v1774_v9 = vadd.f32 %v1770_v32, %v16548_v45  ;;  %v1775_v26 = vadd.f32 %v1771_v27, %v16550_v59  ;;  %v11408_v59 = vld [vmem:[#allocation20 + $0x708] sm:$0xf] }
 0x444   :  { %v1776_v57 = vadd.f32 %v1772_v56, %v16552_v24  ;;  %v11985_v45 = vor.u32 %v15143_v34, %v11984_v19  ;;  %v15127_v24 = vld [vmem:[#allocation20 + $0xb44] sm:$0xf0]  ;;  %v11409_v51 = vor.u32 %v14999_v44, %v11408_v59  ;;  %v10769_v16 = vor.u32 %v14839_v7, %v10768_v6  ;;  %v15007_v6 = vld [vmem:[#allocation20 + $0x78c] sm:$0xf] }
 0x445   :  { %v16593_v37 = vpack.c.bf16 %v1773_v22, %v1773_v22  ;;  %v16595_v38 = vpack.c.bf16 %v1774_v9, %v1774_v9  ;;  %v16597_v39 = vpack.c.bf16 %v1775_v26, %v1775_v26  ;;  %v11921_v55 = vor.u32 %v15127_v24, %v11920_v46  ;;  %v11280_v3 = vld [vmem:[#allocation20 + $0x608] sm:$0xf]  ;;  %v11474_v7 = vld [vmem:[#allocation20 + $0x7c8] sm:$0xf0] }
 0x446   :  { %v16599_v40 = vpack.c.bf16 %v1776_v57, %v1776_v57  ;;  %v14967_v58 = vld [vmem:[#allocation20 + $0x644] sm:$0xf0] }
 0x447   :  { %4897 = vmatmul.bf16.vlgmr.msrb.gmra.mxu1 %v16593_v37  ;;  %4910 = vmatmul.bf16.vlgmr.msrb.gmra.mxu2 %v16595_v38  ;;  %v11792_v11 = vld [vmem:[#allocation20 + $0xa08] sm:$0xf]  ;;  %v11281_v17 = vor.u32 %v14967_v58, %v11280_v3  ;;  %v11986_v58 = vld [vmem:[#allocation20 + $0xbc8] sm:$0xf0] }
 0x448   :  { %4923 = vmatmul.bf16.vlgmr.msrb.gmra.mxu3 %v16597_v39  ;;  %4936 = vmatmul.bf16.vlgmr.msra.gmra.mxu0 %v16599_v40  ;;  %v15095_v12 = vld [vmem:[#allocation20 + $0xa44] sm:$0xf0] }
 0x449   :  { %4993 = vmatpush.bf16.msrb.mxu1 %v10961_v36  ;;  %5006 = vmatpush.bf16.msrb.mxu2 %v11473_v41  ;;  %v12304_v14 = vld [vmem:[#allocation20 + $0xe08] sm:$0xf]  ;;  %v11793_v21 = vor.u32 %v15095_v12, %v11792_v11  ;;  %v15263_v11 = vld [vmem:[#allocation20 + $0xf8c] sm:$0xf] }
 0x44a   :  { %5019 = vmatpush.bf16.msrb.mxu3 %v11985_v45  ;;  %5032 = vmatpush.bf16.msra.mxu0 %v12497_v43  ;;  %v15223_v15 = vld [vmem:[#allocation20 + $0xe44] sm:$0xf0]  ;;  %v12498_v12 = vld [vmem:[#allocation20 + $0xfc8] sm:$0xf0] }
 0x44b   :  { %v10704_v18 = vld [vmem:[#allocation20 + $0x188] sm:$0xf]  ;;  %v12305_v29 = vor.u32 %v15223_v15, %v12304_v14 }
 0x44c   :  { %v14823_v20 = vld [vmem:[#allocation20 + $0x1c4] sm:$0xf0] }
 0x44d   :  { %4994 = vmatpush.bf16.msrb.mxu1 %v10897_v49  ;;  %5007 = vmatpush.bf16.msrb.mxu2 %v11409_v51  ;;  %v11216_v8 = vld [vmem:[#allocation20 + $0x588] sm:$0xf]  ;;  %v10705_v27 = vor.u32 %v14823_v20, %v10704_v18  ;;  %v10577_v51 = vor.u32 %v14791_v13, %v10576_v42  ;;  %v14863_v18 = vld [vmem:[#allocation20 + $0x30c] sm:$0xf] }
 0x44e   :  { %5020 = vmatpush.bf16.msrb.mxu3 %v11921_v55  ;;  %5033 = vmatpush.bf16.msra.mxu0 %v12433_v60  ;;  %v14951_v30 = vld [vmem:[#allocation20 + $0x5c4] sm:$0xf0]  ;;  %v10898_v20 = vld [vmem:[#allocation20 + $0x348] sm:$0xf0] }
 0x44f   :  { %v11728_v25 = vld [vmem:[#allocation20 + $0x988] sm:$0xf]  ;;  %v11217_v28 = vor.u32 %v14951_v30, %v11216_v8  ;;  %v14991_v8 = vld [vmem:[#allocation20 + $0x70c] sm:$0xf] }
 0x450   :  { %v15079_v31 = vld [vmem:[#allocation20 + $0x9c4] sm:$0xf0]  ;;  %v11410_v30 = vld [vmem:[#allocation20 + $0x748] sm:$0xf0] }
 0x451   :  { %4995 = vmatpush.bf16.msrb.mxu1 %v10833_v5  ;;  %5008 = vmatpush.bf16.msrb.mxu2 %v11345_v50  ;;  %v12240_v1 = vld [vmem:[#allocation20 + $0xd88] sm:$0xf]  ;;  %v11729_v56 = vor.u32 %v15079_v31, %v11728_v25  ;;  %v14879_v5 = vld [vmem:[#allocation20 + $0x38c] sm:$0xf] }
 0x452   :  { %5021 = vmatpush.bf16.msrb.mxu3 %v11857_v10  ;;  %5034 = vmatpush.bf16.msra.mxu0 %v12369_v52  ;;  %v15207_v32 = vld [vmem:[#allocation20 + $0xdc4] sm:$0xf0]  ;;  %v10962_v50 = vld [vmem:[#allocation20 + $0x3c8] sm:$0xf0] }
 0x453   :  { %v14807_v19 = vld [vmem:[#allocation20 + $0x144] sm:$0xf0]  ;;  %v12241_v22 = vor.u32 %v15207_v32, %v12240_v1  ;;  %v15135_v10 = vld [vmem:[#allocation20 + $0xb8c] sm:$0xf] }
 0x454   :  { %v11152_v9 = vld [vmem:[#allocation20 + $0x508] sm:$0xf]  ;;  %v10641_v36 = vor.u32 %v14807_v19, %v10640_v4  ;;  %v15119_v25 = vld [vmem:[#allocation20 + $0xb0c] sm:$0xf] }
 0x455   :  { %4996 = vmatpush.bf16.msrb.mxu1 %v10769_v16  ;;  %5009 = vmatpush.bf16.msrb.mxu2 %v11281_v17  ;;  %v14935_v26 = vld [vmem:[#allocation20 + $0x544] sm:$0xf0]  ;;  %v10965_v16 = vor.u32 %v14879_v5, %v10962_v50  ;;  %v11477_v17 = vor.u32 %v15007_v6, %v11474_v7  ;;  %v11922_v31 = vld [vmem:[#allocation20 + $0xb48] sm:$0xf0] }
 0x456   :  { %5022 = vmatpush.bf16.msrb.mxu3 %v11793_v21  ;;  %5035 = vmatpush.bf16.msra.mxu0 %v12305_v29  ;;  %v11664_v34 = vld [vmem:[#allocation20 + $0x908] sm:$0xf]  ;;  %v11153_v41 = vor.u32 %v14935_v26, %v11152_v9  ;;  %v11989_v21 = vor.u32 %v15135_v10, %v11986_v58  ;;  %v12501_v29 = vor.u32 %v15263_v11, %v12498_v12  ;;  %v15247_v1 = vld [vmem:[#allocation20 + $0xf0c] sm:$0xf] }
 0x457   :  { %4949 = vmatmul.bf16.vlgmr.msra.gmra.mxu1 %v16593_v37  ;;  %4962 = vmatmul.bf16.vlgmr.msra.gmra.mxu2 %v16595_v38  ;;  %v15191_v57 = vld [vmem:[#allocation20 + $0xd44] sm:$0xf0]  ;;  %v11665_v45 = vor.u32 %v15063_v35, %v11664_v34  ;;  %v12434_v32 = vld [vmem:[#allocation20 + $0xf48] sm:$0xf0] }
 0x458   :  { %4975 = vmatmul.bf16.vlgmr.msra.gmra.mxu3 %v16597_v39  ;;  %4988 = vmatmul.bf16.vlgmr.msrb.gmra.mxu0 %v16599_v40  ;;  %v12177_v43 = vor.u32 %v15191_v57, %v12176_v33  ;;  %v11088_v59 = vld [vmem:[#allocation20 + $0x488] sm:$0xf]  ;;  %v14847_v4 = vld [vmem:[#allocation20 + $0x28c] sm:$0xf] }
 0x459   :  { %4997 = vmatpush.bf16.msrb.mxu1 %v10705_v27  ;;  %5010 = vmatpush.bf16.msrb.mxu2 %v11217_v28  ;;  %v14919_v44 = vld [vmem:[#allocation20 + $0x4c4] sm:$0xf0]  ;;  %v10901_v27 = vor.u32 %v14863_v18, %v10898_v20  ;;  %v11413_v28 = vor.u32 %v14991_v8, %v11410_v30  ;;  %v10834_v19 = vld [vmem:[#allocation20 + $0x2c8] sm:$0xf0] }
 0x45a   :  { %5023 = vmatpush.bf16.msrb.mxu3 %v11729_v56  ;;  %5036 = vmatpush.bf16.msra.mxu0 %v12241_v22  ;;  %v11600_v46 = vld [vmem:[#allocation20 + $0x888] sm:$0xf]  ;;  %v11089_v53 = vor.u32 %v14919_v44, %v11088_v59  ;;  %v11925_v56 = vor.u32 %v15119_v25, %v11922_v31  ;;  %v12437_v22 = vor.u32 %v15247_v1, %v12434_v32  ;;  %v14975_v9 = vld [vmem:[#allocation20 + $0x68c] sm:$0xf] }
 0x45b   :  { %v15047_v24 = vld [vmem:[#allocation20 + $0x8c4] sm:$0xf0]  ;;  %v11346_v26 = vld [vmem:[#allocation20 + $0x6c8] sm:$0xf0] }
 0x45c   :  { %v12112_v47 = vld [vmem:[#allocation20 + $0xc88] sm:$0xf]  ;;  %v11601_v61 = vor.u32 %v15047_v24, %v11600_v46  ;;  %v15103_v34 = vld [vmem:[#allocation20 + $0xa8c] sm:$0xf] }
 0x45d   :  { %v15175_v48 = vld [vmem:[#allocation20 + $0xcc4] sm:$0xf0]  ;;  %4998 = vmatpush.bf16.msrb.mxu1 %v10641_v36  ;;  %5011 = vmatpush.bf16.msrb.mxu2 %v11153_v41  ;;  %v11858_v35 = vld [vmem:[#allocation20 + $0xac8] sm:$0xf0]  ;;  %v10837_v36 = vor.u32 %v14847_v4, %v10834_v19  ;;  %v11349_v41 = vor.u32 %v14975_v9, %v11346_v26 }
 0x45e   :  { %v10512_v49 = vld [vmem:[#allocation20 + $0x8] sm:$0xf]  ;;  %5024 = vmatpush.bf16.msrb.mxu3 %v11665_v45  ;;  %5037 = vmatpush.bf16.msra.mxu0 %v12177_v43  ;;  %v12113_v23 = vor.u32 %v15175_v48, %v12112_v47  ;;  %v15231_v33 = vld [vmem:[#allocation20 + $0xe8c] sm:$0xf]  ;;  %v11861_v45 = vor.u32 %v15103_v34, %v11858_v35 }
 0x45f   :  { %v14775_v54 = vld [vmem:[#allocation20 + $0x44] sm:$0xf0]  ;;  %v12370_v57 = vld [vmem:[#allocation20 + $0xec8] sm:$0xf0] }
 0x460   :  { %v11024_v55 = vld [vmem:[#allocation20 + $0x408] sm:$0xf]  ;;  %v10513_v52 = vor.u32 %v14775_v54, %v10512_v49  ;;  %v14831_v42 = vld [vmem:[#allocation20 + $0x20c] sm:$0xf]  ;;  %v12373_v43 = vor.u32 %v15231_v33, %v12370_v57 }
 0x461   :  { %v14903_v60 = vld [vmem:[#allocation20 + $0x444] sm:$0xf0]  ;;  %4999 = vmatpush.bf16.msrb.mxu1 %v10577_v51  ;;  %5012 = vmatpush.bf16.msrb.mxu2 %v11089_v53  ;;  %v10770_v13 = vld [vmem:[#allocation20 + $0x248] sm:$0xf0] }
 0x462   :  { %v11536_v62 = vld [vmem:[#allocation20 + $0x808] sm:$0xf]  ;;  %v11025_v3 = vor.u32 %v14903_v60, %v11024_v55  ;;  %5025 = vmatpush.bf16.msrb.mxu3 %v11601_v61  ;;  %5038 = vmatpush.bf16.msra.mxu0 %v12113_v23  ;;  %v14959_v59 = vld [vmem:[#allocation20 + $0x60c] sm:$0xf]  ;;  %v10773_v49 = vor.u32 %v14831_v42, %v10770_v13  ;;  %v11480_v42 = vld [vmem:[#allocation20 + $0x790] sm:$0xf] }
 0x463   :  { %v15031_v63 = vld [vmem:[#allocation20 + $0x844] sm:$0xf0]  ;;  %v11282_v44 = vld [vmem:[#allocation20 + $0x648] sm:$0xf0]  ;;  %v15016_v13 = vld [vmem:[#allocation20 + $0x7cc] sm:$0xf0] }
 0x464   :  { %v12048_v0 = vld [vmem:[#allocation20 + $0xc08] sm:$0xf]  ;;  %v11537_v14 = vor.u32 %v15031_v63, %v11536_v62  ;;  %v15087_v46 = vld [vmem:[#allocation20 + $0xa0c] sm:$0xf]  ;;  %v11285_v51 = vor.u32 %v14959_v59, %v11282_v44  ;;  %v15144_v44 = vld [vmem:[#allocation20 + $0xbcc] sm:$0xf0] }
 0x465   :  { %v15159_v2 = vld [vmem:[#allocation20 + $0xc44] sm:$0xf0]  ;;  %5000 = vmatpush.bf16.msrb.mxu1 %v10513_v52  ;;  %5013 = vmatpush.bf16.msrb.mxu2 %v11025_v3  ;;  %v11794_v24 = vld [vmem:[#allocation20 + $0xa48] sm:$0xf0] }
 0x466   :  { %v12049_v15 = vor.u32 %v15159_v2, %v12048_v0  ;;  %5026 = vmatpush.bf16.msrb.mxu3 %v11537_v14  ;;  %v15215_v47 = vld [vmem:[#allocation20 + $0xe0c] sm:$0xf]  ;;  %v11797_v55 = vor.u32 %v15087_v46, %v11794_v24  ;;  %v12504_v46 = vld [vmem:[#allocation20 + $0xf90] sm:$0xf] }
 0x467   :  { %v12306_v48 = vld [vmem:[#allocation20 + $0xe48] sm:$0xf0]  ;;  %v15272_v24 = vld [vmem:[#allocation20 + $0xfcc] sm:$0xf0] }
 0x468   :  { %5039 = vmatpush.bf16.msra.mxu0 %v12049_v15  ;;  %5001 = vmatmul.bf16.vlgmr.msrb.gmra.mxu1 %v16593_v37  ;;  %v14815_v53 = vld [vmem:[#allocation20 + $0x18c] sm:$0xf]  ;;  %v12309_v60 = vor.u32 %v15215_v47, %v12306_v48 }
 0x469   :  { %5045 = vmatpush.bf16.msra.mxu1 %v10965_v16  ;;  %5058 = vmatpush.bf16.msra.mxu2 %v11477_v17  ;;  %v10706_v54 = vld [vmem:[#allocation20 + $0x1c8] sm:$0xf0] }
 0x46a   :  { %5071 = vmatpush.bf16.msra.mxu3 %v11989_v21  ;;  %5014 = vmatmul.bf16.vlgmr.msrb.gmra.mxu2 %v16595_v38  ;;  %v14943_v61 = vld [vmem:[#allocation20 + $0x58c] sm:$0xf]  ;;  %v10709_v5 = vor.u32 %v14815_v53, %v10706_v54  ;;  %v10904_v53 = vld [vmem:[#allocation20 + $0x310] sm:$0xf] }
 0x46b   :  { %5027 = vmatmul.bf16.vlgmr.msrb.gmra.mxu3 %v16597_v39  ;;  %5040 = vmatmul.bf16.vlgmr.msra.gmra.mxu0 %v16599_v40  ;;  %v11218_v23 = vld [vmem:[#allocation20 + $0x5c8] sm:$0xf0]  ;;  %v14872_v54 = vld [vmem:[#allocation20 + $0x34c] sm:$0xf0] }
 0x46c   :  { %5084 = vmatpush.bf16.msrb.mxu0 %v12501_v29  ;;  %v15071_v62 = vld [vmem:[#allocation20 + $0x98c] sm:$0xf]  ;;  %v11221_v50 = vor.u32 %v14943_v61, %v11218_v23  ;;  %v11416_v61 = vld [vmem:[#allocation20 + $0x710] sm:$0xf] }
 0x46d   :  { %5046 = vmatpush.bf16.msra.mxu1 %v10901_v27  ;;  %5059 = vmatpush.bf16.msra.mxu2 %v11413_v28  ;;  %v11730_v63 = vld [vmem:[#allocation20 + $0x9c8] sm:$0xf0]  ;;  %v15000_v23 = vld [vmem:[#allocation20 + $0x74c] sm:$0xf0] }
 0x46e   :  { %5072 = vmatpush.bf16.msra.mxu3 %v11925_v56  ;;  %v15199_v0 = vld [vmem:[#allocation20 + $0xd8c] sm:$0xf]  ;;  %v11733_v10 = vor.u32 %v15071_v62, %v11730_v63  ;;  %v11928_v62 = vld [vmem:[#allocation20 + $0xb10] sm:$0xf] }
 0x46f   :  { %v12242_v2 = vld [vmem:[#allocation20 + $0xdc8] sm:$0xf0]  ;;  %v15128_v63 = vld [vmem:[#allocation20 + $0xb4c] sm:$0xf0] }
 0x470   :  { %5085 = vmatpush.bf16.msrb.mxu0 %v12437_v22  ;;  %v14799_v6 = vld [vmem:[#allocation20 + $0x10c] sm:$0xf]  ;;  %v12245_v52 = vor.u32 %v15199_v0, %v12242_v2  ;;  %v12440_v0 = vld [vmem:[#allocation20 + $0xf10] sm:$0xf] }
 0x471   :  { %5047 = vmatpush.bf16.msra.mxu1 %v10837_v36  ;;  %5060 = vmatpush.bf16.msra.mxu2 %v11349_v41  ;;  %v10642_v7 = vld [vmem:[#allocation20 + $0x148] sm:$0xf0]  ;;  %v10968_v36 = vld [vmem:[#allocation20 + $0x390] sm:$0xf] }
 0x472   :  { %5073 = vmatpush.bf16.msra.mxu3 %v11861_v45  ;;  %v14927_v3 = vld [vmem:[#allocation20 + $0x50c] sm:$0xf]  ;;  %v10645_v16 = vor.u32 %v14799_v6, %v10642_v7  ;;  %v14888_v41 = vld [vmem:[#allocation20 + $0x3cc] sm:$0xf0] }
 0x473   :  { %v11154_v58 = vld [vmem:[#allocation20 + $0x548] sm:$0xf0]  ;;  %v11992_v45 = vld [vmem:[#allocation20 + $0xb90] sm:$0xf] }
 0x474   :  { %5086 = vmatpush.bf16.msrb.mxu0 %v12373_v43  ;;  %v15055_v11 = vld [vmem:[#allocation20 + $0x90c] sm:$0xf]  ;;  %v11157_v17 = vor.u32 %v14927_v3, %v11154_v58  ;;  %v15256_v2 = vld [vmem:[#allocation20 + $0xf4c] sm:$0xf0] }
 0x475   :  { %5048 = vmatpush.bf16.msra.mxu1 %v10773_v49  ;;  %5061 = vmatpush.bf16.msra.mxu2 %v11285_v51  ;;  %v11666_v12 = vld [vmem:[#allocation20 + $0x948] sm:$0xf0]  ;;  %v10969_v49 = vor.u32 %v14888_v41, %v10968_v36  ;;  %v11481_v51 = vor.u32 %v15016_v13, %v11480_v42  ;;  %v10840_v6 = vld [vmem:[#allocation20 + $0x290] sm:$0xf] }
 0x476   :  { %5074 = vmatpush.bf16.msra.mxu3 %v11797_v55  ;;  %v15183_v14 = vld [vmem:[#allocation20 + $0xd0c] sm:$0xf]  ;;  %v11669_v21 = vor.u32 %v15055_v11, %v11666_v12  ;;  %v11993_v55 = vor.u32 %v15144_v44, %v11992_v45  ;;  %v14856_v7 = vld [vmem:[#allocation20 + $0x2cc] sm:$0xf0] }
 0x477   :  { %v12178_v15 = vld [vmem:[#allocation20 + $0xd48] sm:$0xf0]  ;;  %v11352_v3 = vld [vmem:[#allocation20 + $0x690] sm:$0xf] }
 0x478   :  { %5087 = vmatpush.bf16.msrb.mxu0 %v12309_v60  ;;  %v14783_v18 = vld [vmem:[#allocation20 + $0x8c] sm:$0xf]  ;;  %v12181_v29 = vor.u32 %v15183_v14, %v12178_v15  ;;  %v12505_v60 = vor.u32 %v15272_v24, %v12504_v46  ;;  %v14984_v58 = vld [vmem:[#allocation20 + $0x6cc] sm:$0xf0] }
 0x479   :  { %5049 = vmatpush.bf16.msra.mxu1 %v10709_v5  ;;  %5062 = vmatpush.bf16.msra.mxu2 %v11221_v50  ;;  %v10578_v20 = vld [vmem:[#allocation20 + $0xc8] sm:$0xf0]  ;;  %v10905_v5 = vor.u32 %v14872_v54, %v10904_v53  ;;  %v11417_v50 = vor.u32 %v15000_v23, %v11416_v61  ;;  %v11864_v11 = vld [vmem:[#allocation20 + $0xa90] sm:$0xf] }
 0x47a   :  { %5075 = vmatpush.bf16.msra.mxu3 %v11733_v10  ;;  %v14911_v8 = vld [vmem:[#allocation20 + $0x48c] sm:$0xf]  ;;  %v10581_v28 = vor.u32 %v14783_v18, %v10578_v20  ;;  %v11929_v10 = vor.u32 %v15128_v63, %v11928_v62  ;;  %v15112_v12 = vld [vmem:[#allocation20 + $0xacc] sm:$0xf0] }
 0x47b   :  { %v11090_v30 = vld [vmem:[#allocation20 + $0x4c8] sm:$0xf0]  ;;  %v12376_v14 = vld [vmem:[#allocation20 + $0xe90] sm:$0xf] }
 0x47c   :  { %5088 = vmatpush.bf16.msrb.mxu0 %v12245_v52  ;;  %v15039_v25 = vld [vmem:[#allocation20 + $0x88c] sm:$0xf]  ;;  %v11093_v4 = vor.u32 %v14911_v8, %v11090_v30  ;;  %v12441_v52 = vor.u32 %v15256_v2, %v12440_v0  ;;  %v15240_v15 = vld [vmem:[#allocation20 + $0xecc] sm:$0xf0] }
 0x47d   :  { %v11602_v31 = vld [vmem:[#allocation20 + $0x8c8] sm:$0xf0]  ;;  %5050 = vmatpush.bf16.msra.mxu1 %v10645_v16  ;;  %5063 = vmatpush.bf16.msra.mxu2 %v11157_v17  ;;  %v10841_v16 = vor.u32 %v14856_v7, %v10840_v6  ;;  %v11353_v17 = vor.u32 %v14984_v58, %v11352_v3  ;;  %v10776_v18 = vld [vmem:[#allocation20 + $0x210] sm:$0xf] }
 0x47e   :  { %v15167_v1 = vld [vmem:[#allocation20 + $0xc8c] sm:$0xf]  ;;  %5076 = vmatpush.bf16.msra.mxu3 %v11669_v21  ;;  %v11605_v9 = vor.u32 %v15039_v25, %v11602_v31  ;;  %v14840_v20 = vld [vmem:[#allocation20 + $0x24c] sm:$0xf0]  ;;  %v11865_v21 = vor.u32 %v15112_v12, %v11864_v11 }
 0x47f   :  { %v12114_v32 = vld [vmem:[#allocation20 + $0xcc8] sm:$0xf0]  ;;  %v11288_v8 = vld [vmem:[#allocation20 + $0x610] sm:$0xf] }
 0x480   :  { %v14767_v27 = vld [vmem:[#allocation20 + $0xc] sm:$0xf]  ;;  %5089 = vmatpush.bf16.msrb.mxu0 %v12181_v29  ;;  %v12117_v26 = vor.u32 %v15167_v1, %v12114_v32  ;;  %v12377_v29 = vor.u32 %v15240_v15, %v12376_v14  ;;  %v14968_v30 = vld [vmem:[#allocation20 + $0x64c] sm:$0xf0] }
 0x481   :  { %v10514_v19 = vld [vmem:[#allocation20 + $0x48] sm:$0xf0]  ;;  %5051 = vmatpush.bf16.msra.mxu1 %v10581_v28  ;;  %5064 = vmatpush.bf16.msra.mxu2 %v11093_v4  ;;  %v11800_v25 = vld [vmem:[#allocation20 + $0xa10] sm:$0xf]  ;;  %v11289_v28 = vor.u32 %v14968_v30, %v11288_v8  ;;  %v11994_v30 = vld [vmem:[#allocation20 + $0xbd0] sm:$0xf0] }
 0x482   :  { %v14895_v56 = vld [vmem:[#allocation20 + $0x40c] sm:$0xf]  ;;  %v10517_v43 = vor.u32 %v14767_v27, %v10514_v19  ;;  %5077 = vmatpush.bf16.msra.mxu3 %v11605_v9  ;;  %v15096_v31 = vld [vmem:[#allocation20 + $0xa4c] sm:$0xf0]  ;;  %v10777_v27 = vor.u32 %v14840_v20, %v10776_v18  ;;  %v15008_v18 = vld [vmem:[#allocation20 + $0x794] sm:$0xf] }
 0x483   :  { %v11026_v22 = vld [vmem:[#allocation20 + $0x448] sm:$0xf0]  ;;  %v12312_v1 = vld [vmem:[#allocation20 + $0xe10] sm:$0xf]  ;;  %v11482_v20 = vld [vmem:[#allocation20 + $0x7d0] sm:$0xf0] }
 0x484   :  { %v15023_v34 = vld [vmem:[#allocation20 + $0x80c] sm:$0xf]  ;;  %v11029_v59 = vor.u32 %v14895_v56, %v11026_v22  ;;  %5090 = vmatpush.bf16.msrb.mxu0 %v12117_v26  ;;  %v15224_v32 = vld [vmem:[#allocation20 + $0xe4c] sm:$0xf0]  ;;  %v11801_v56 = vor.u32 %v15096_v31, %v11800_v25  ;;  %v15264_v25 = vld [vmem:[#allocation20 + $0xf94] sm:$0xf] }
 0x485   :  { %v11538_v35 = vld [vmem:[#allocation20 + $0x848] sm:$0xf0]  ;;  %5052 = vmatpush.bf16.msra.mxu1 %v10517_v43  ;;  %v10712_v4 = vld [vmem:[#allocation20 + $0x190] sm:$0xf]  ;;  %v12313_v22 = vor.u32 %v15224_v32, %v12312_v1  ;;  %v12506_v31 = vld [vmem:[#allocation20 + $0xfd0] sm:$0xf0] }
 0x486   :  { %v15151_v33 = vld [vmem:[#allocation20 + $0xc0c] sm:$0xf]  ;;  %v11541_v47 = vor.u32 %v15023_v34, %v11538_v35  ;;  %5065 = vmatpush.bf16.msra.mxu2 %v11029_v59  ;;  %v14824_v19 = vld [vmem:[#allocation20 + $0x1cc] sm:$0xf0] }
 0x487   :  { %v12050_v57 = vld [vmem:[#allocation20 + $0xc48] sm:$0xf0]  ;;  %v11224_v9 = vld [vmem:[#allocation20 + $0x590] sm:$0xf]  ;;  %v10713_v36 = vor.u32 %v14824_v19, %v10712_v4  ;;  %v14864_v4 = vld [vmem:[#allocation20 + $0x314] sm:$0xf] }
 0x488   :  { %v12053_v48 = vor.u32 %v15151_v33, %v12050_v57  ;;  %5078 = vmatpush.bf16.msra.mxu3 %v11541_v47  ;;  %5053 = vmatmul.bf16.vlgmr.msra.gmra.mxu1 %v16593_v37  ;;  %v14952_v26 = vld [vmem:[#allocation20 + $0x5cc] sm:$0xf0]  ;;  %v10906_v19 = vld [vmem:[#allocation20 + $0x350] sm:$0xf0] }
 0x489   :  { %5097 = vmatpush.bf16.msrb.mxu1 %v10969_v49  ;;  %5066 = vmatmul.bf16.vlgmr.msra.gmra.mxu2 %v16595_v38  ;;  %v11736_v34 = vld [vmem:[#allocation20 + $0x990] sm:$0xf]  ;;  %v11225_v41 = vor.u32 %v14952_v26, %v11224_v9  ;;  %v14992_v9 = vld [vmem:[#allocation20 + $0x714] sm:$0xf] }
 0x48a   :  { %5091 = vmatpush.bf16.msrb.mxu0 %v12053_v48  ;;  %5110 = vmatpush.bf16.msrb.mxu2 %v11481_v51  ;;  %v15080_v35 = vld [vmem:[#allocation20 + $0x9cc] sm:$0xf0]  ;;  %v11418_v26 = vld [vmem:[#allocation20 + $0x750] sm:$0xf0] }
 0x48b   :  { %5079 = vmatmul.bf16.vlgmr.msra.gmra.mxu3 %v16597_v39  ;;  %v12248_v33 = vld [vmem:[#allocation20 + $0xd90] sm:$0xf]  ;;  %v11737_v45 = vor.u32 %v15080_v35, %v11736_v34  ;;  %v15120_v34 = vld [vmem:[#allocation20 + $0xb14] sm:$0xf] }
 0x48c   :  { %5123 = vmatpush.bf16.msrb.mxu3 %v11993_v55  ;;  %v15208_v57 = vld [vmem:[#allocation20 + $0xdcc] sm:$0xf0]  ;;  %v11930_v35 = vld [vmem:[#allocation20 + $0xb50] sm:$0xf0] }
 0x48d   :  { %5092 = vmatmul.bf16.vlgmr.msrb.gmra.mxu0 %v16599_v40  ;;  %5098 = vmatpush.bf16.msrb.mxu1 %v10905_v5  ;;  %v10648_v42 = vld [vmem:[#allocation20 + $0x110] sm:$0xf]  ;;  %v12249_v43 = vor.u32 %v15208_v57, %v12248_v33  ;;  %v15248_v33 = vld [vmem:[#allocation20 + $0xf14] sm:$0xf] }
 0x48e   :  { %5136 = vmatpush.bf16.msra.mxu0 %v12505_v60  ;;  %5111 = vmatpush.bf16.msrb.mxu2 %v11417_v50  ;;  %v14808_v13 = vld [vmem:[#allocation20 + $0x14c] sm:$0xf0]  ;;  %v12442_v57 = vld [vmem:[#allocation20 + $0xf50] sm:$0xf0] }
 0x48f   :  { %v11160_v59 = vld [vmem:[#allocation20 + $0x510] sm:$0xf]  ;;  %v10649_v49 = vor.u32 %v14808_v13, %v10648_v42  ;;  %v14848_v42 = vld [vmem:[#allocation20 + $0x294] sm:$0xf] }
 0x490   :  { %5124 = vmatpush.bf16.msrb.mxu3 %v11929_v10  ;;  %v14936_v44 = vld [vmem:[#allocation20 + $0x54c] sm:$0xf0]  ;;  %v10842_v13 = vld [vmem:[#allocation20 + $0x2d0] sm:$0xf0] }
 0x491   :  { %5099 = vmatpush.bf16.msrb.mxu1 %v10841_v16  ;;  %v11672_v46 = vld [vmem:[#allocation20 + $0x910] sm:$0xf]  ;;  %v11161_v51 = vor.u32 %v14936_v44, %v11160_v59  ;;  %v14880_v16 = vld [vmem:[#allocation20 + $0x394] sm:$0xf] }
 0x492   :  { %5137 = vmatpush.bf16.msra.mxu0 %v12441_v52  ;;  %5112 = vmatpush.bf16.msrb.mxu2 %v11353_v17  ;;  %v15064_v24 = vld [vmem:[#allocation20 + $0x94c] sm:$0xf0]  ;;  %v10970_v17 = vld [vmem:[#allocation20 + $0x3d0] sm:$0xf0] }
 0x493   :  { %v12184_v47 = vld [vmem:[#allocation20 + $0xd10] sm:$0xf]  ;;  %v11673_v55 = vor.u32 %v15064_v24, %v11672_v46  ;;  %v14976_v59 = vld [vmem:[#allocation20 + $0x694] sm:$0xf] }
 0x494   :  { %5125 = vmatpush.bf16.msrb.mxu3 %v11865_v21  ;;  %v15192_v48 = vld [vmem:[#allocation20 + $0xd4c] sm:$0xf0]  ;;  %v15136_v21 = vld [vmem:[#allocation20 + $0xb94] sm:$0xf] }
 0x495   :  { %5100 = vmatpush.bf16.msrb.mxu1 %v10777_v27  ;;  %v10584_v53 = vld [vmem:[#allocation20 + $0x90] sm:$0xf]  ;;  %v12185_v60 = vor.u32 %v15192_v48, %v12184_v47  ;;  %v10973_v27 = vor.u32 %v14880_v16, %v10970_v17  ;;  %v11354_v44 = vld [vmem:[#allocation20 + $0x6d0] sm:$0xf0] }
 0x496   :  { %5138 = vmatpush.bf16.msra.mxu0 %v12377_v29  ;;  %5113 = vmatpush.bf16.msrb.mxu2 %v11289_v28  ;;  %v14792_v54 = vld [vmem:[#allocation20 + $0xcc] sm:$0xf0]  ;;  %v11485_v28 = vor.u32 %v15008_v18, %v11482_v20  ;;  %v15104_v46 = vld [vmem:[#allocation20 + $0xa94] sm:$0xf] }
 0x497   :  { %v11096_v61 = vld [vmem:[#allocation20 + $0x490] sm:$0xf]  ;;  %v10585_v50 = vor.u32 %v14792_v54, %v10584_v53  ;;  %v11866_v24 = vld [vmem:[#allocation20 + $0xad0] sm:$0xf0] }
 0x498   :  { %5126 = vmatpush.bf16.msrb.mxu3 %v11801_v56  ;;  %v14920_v23 = vld [vmem:[#allocation20 + $0x4cc] sm:$0xf0]  ;;  %v11997_v56 = vor.u32 %v15136_v21, %v11994_v30  ;;  %v15232_v47 = vld [vmem:[#allocation20 + $0xe94] sm:$0xf] }
 0x499   :  { %5101 = vmatpush.bf16.msrb.mxu1 %v10713_v36  ;;  %v11608_v62 = vld [vmem:[#allocation20 + $0x890] sm:$0xf]  ;;  %v11097_v6 = vor.u32 %v14920_v23, %v11096_v61  ;;  %v10909_v36 = vor.u32 %v14864_v4, %v10906_v19  ;;  %v12378_v48 = vld [vmem:[#allocation20 + $0xed0] sm:$0xf0] }
 0x49a   :  { %5139 = vmatpush.bf16.msra.mxu0 %v12313_v22  ;;  %5114 = vmatpush.bf16.msrb.mxu2 %v11225_v41  ;;  %v15048_v63 = vld [vmem:[#allocation20 + $0x8cc] sm:$0xf0]  ;;  %v12509_v22 = vor.u32 %v15264_v25, %v12506_v31  ;;  %v11421_v41 = vor.u32 %v14992_v9, %v11418_v26  ;;  %v14832_v53 = vld [vmem:[#allocation20 + $0x214] sm:$0xf] }
 0x49b   :  { %v12120_v0 = vld [vmem:[#allocation20 + $0xc90] sm:$0xf]  ;;  %v11609_v3 = vor.u32 %v15048_v63, %v11608_v62  ;;  %v10778_v54 = vld [vmem:[#allocation20 + $0x250] sm:$0xf0] }
 0x49c   :  { %5127 = vmatpush.bf16.msrb.mxu3 %v11737_v45  ;;  %v15176_v2 = vld [vmem:[#allocation20 + $0xccc] sm:$0xf0]  ;;  %v11933_v45 = vor.u32 %v15120_v34, %v11930_v35  ;;  %v14960_v61 = vld [vmem:[#allocation20 + $0x614] sm:$0xf] }
 0x49d   :  { %v10520_v5 = vld [vmem:[#allocation20 + $0x10] sm:$0xf]  ;;  %5102 = vmatpush.bf16.msrb.mxu1 %v10649_v49  ;;  %v12121_v58 = vor.u32 %v15176_v2, %v12120_v0  ;;  %v10845_v49 = vor.u32 %v14848_v42, %v10842_v13  ;;  %v11290_v23 = vld [vmem:[#allocation20 + $0x650] sm:$0xf0] }
 0x49e   :  { %5140 = vmatpush.bf16.msra.mxu0 %v12249_v43  ;;  %5115 = vmatpush.bf16.msrb.mxu2 %v11161_v51  ;;  %v14776_v7 = vld [vmem:[#allocation20 + $0x4c] sm:$0xf0]  ;;  %v12445_v43 = vor.u32 %v15248_v33, %v12442_v57  ;;  %v11357_v51 = vor.u32 %v14976_v59, %v11354_v44  ;;  %v15088_v62 = vld [vmem:[#allocation20 + $0xa14] sm:$0xf] }
 0x49f   :  { %v11032_v10 = vld [vmem:[#allocation20 + $0x410] sm:$0xf]  ;;  %v10521_v29 = vor.u32 %v14776_v7, %v10520_v5  ;;  %v11802_v63 = vld [vmem:[#allocation20 + $0xa50] sm:$0xf0]  ;;  %v10781_v5 = vor.u32 %v14832_v53, %v10778_v54  ;;  %v11488_v53 = vld [vmem:[#allocation20 + $0x798] sm:$0xf] }
 0x4a0   :  { %v14904_v52 = vld [vmem:[#allocation20 + $0x44c] sm:$0xf0]  ;;  %5128 = vmatpush.bf16.msrb.mxu3 %v11673_v55  ;;  %v11869_v55 = vor.u32 %v15104_v46, %v11866_v24  ;;  %v15216_v0 = vld [vmem:[#allocation20 + $0xe14] sm:$0xf]  ;;  %v15017_v54 = vld [vmem:[#allocation20 + $0x7d4] sm:$0xf0] }
 0x4a1   :  { %v11544_v11 = vld [vmem:[#allocation20 + $0x810] sm:$0xf]  ;;  %5103 = vmatpush.bf16.msrb.mxu1 %v10585_v50  ;;  %v11033_v8 = vor.u32 %v14904_v52, %v11032_v10  ;;  %v12314_v2 = vld [vmem:[#allocation20 + $0xe50] sm:$0xf0]  ;;  %v11293_v50 = vor.u32 %v14960_v61, %v11290_v23  ;;  %v11805_v10 = vor.u32 %v15088_v62, %v11802_v63  ;;  %v15145_v23 = vld [vmem:[#allocation20 + $0xbd4] sm:$0xf0] }
 0x4a2   :  { %5141 = vmatpush.bf16.msra.mxu0 %v12185_v60  ;;  %v15032_v12 = vld [vmem:[#allocation20 + $0x84c] sm:$0xf0]  ;;  %5116 = vmatpush.bf16.msrb.mxu2 %v11097_v6  ;;  %v12381_v60 = vor.u32 %v15232_v47, %v12378_v48  ;;  %v14816_v6 = vld [vmem:[#allocation20 + $0x194] sm:$0xf]  ;;  %v12317_v52 = vor.u32 %v15216_v0, %v12314_v2  ;;  %v12512_v62 = vld [vmem:[#allocation20 + $0xf98] sm:$0xf] }
 0x4a3   :  { %v12056_v14 = vld [vmem:[#allocation20 + $0xc10] sm:$0xf]  ;;  %v11545_v1 = vor.u32 %v15032_v12, %v11544_v11  ;;  %v10714_v7 = vld [vmem:[#allocation20 + $0x1d0] sm:$0xf0]  ;;  %v15273_v63 = vld [vmem:[#allocation20 + $0xfd4] sm:$0xf0] }
 0x4a4   :  { %v15160_v15 = vld [vmem:[#allocation20 + $0xc4c] sm:$0xf0]  ;;  %5129 = vmatpush.bf16.msrb.mxu3 %v11609_v3  ;;  %v14944_v3 = vld [vmem:[#allocation20 + $0x594] sm:$0xf]  ;;  %v10717_v16 = vor.u32 %v14816_v6, %v10714_v7  ;;  %v10912_v6 = vld [vmem:[#allocation20 + $0x318] sm:$0xf] }
 0x4a5   :  { %v12057_v32 = vor.u32 %v15160_v15, %v12056_v14  ;;  %5104 = vmatpush.bf16.msrb.mxu1 %v10521_v29  ;;  %v15072_v11 = vld [vmem:[#allocation20 + $0x994] sm:$0xf]  ;;  %v14873_v7 = vld [vmem:[#allocation20 + $0x354] sm:$0xf0] }
 0x4a6   :  { %5142 = vmatpush.bf16.msra.mxu0 %v12121_v58  ;;  %5117 = vmatpush.bf16.msrb.mxu2 %v11033_v8  ;;  %v11226_v58 = vld [vmem:[#allocation20 + $0x5d0] sm:$0xf0] }
 0x4a7   :  { %v11738_v12 = vld [vmem:[#allocation20 + $0x9d0] sm:$0xf0]  ;;  %v11229_v17 = vor.u32 %v14944_v3, %v11226_v58  ;;  %v11424_v3 = vld [vmem:[#allocation20 + $0x718] sm:$0xf] }
 0x4a8   :  { %5130 = vmatpush.bf16.msrb.mxu3 %v11545_v1  ;;  %5105 = vmatmul.bf16.vlgmr.msrb.gmra.mxu1 %v16593_v37  ;;  %v15200_v14 = vld [vmem:[#allocation20 + $0xd94] sm:$0xf]  ;;  %v11741_v21 = vor.u32 %v15072_v11, %v11738_v12  ;;  %v15001_v58 = vld [vmem:[#allocation20 + $0x754] sm:$0xf0] }
 0x4a9   :  { %5149 = vmatpush.bf16.msra.mxu1 %v10973_v27  ;;  %5118 = vmatmul.bf16.vlgmr.msrb.gmra.mxu2 %v16595_v38  ;;  %v12250_v15 = vld [vmem:[#allocation20 + $0xdd0] sm:$0xf0]  ;;  %v11936_v11 = vld [vmem:[#allocation20 + $0xb18] sm:$0xf] }
 0x4aa   :  { %5143 = vmatpush.bf16.msra.mxu0 %v12057_v32  ;;  %5162 = vmatpush.bf16.msra.mxu2 %v11485_v28  ;;  %v14800_v18 = vld [vmem:[#allocation20 + $0x114] sm:$0xf]  ;;  %v12253_v29 = vor.u32 %v15200_v14, %v12250_v15  ;;  %v15129_v12 = vld [vmem:[#allocation20 + $0xb54] sm:$0xf0] }
 0x4ab   :  { %5131 = vmatmul.bf16.vlgmr.msrb.gmra.mxu3 %v16597_v39  ;;  %v10650_v20 = vld [vmem:[#allocation20 + $0x150] sm:$0xf0]  ;;  %v12448_v14 = vld [vmem:[#allocation20 + $0xf18] sm:$0xf] }
 0x4ac   :  { %5175 = vmatpush.bf16.msra.mxu3 %v11997_v56  ;;  %v14928_v8 = vld [vmem:[#allocation20 + $0x514] sm:$0xf]  ;;  %v10653_v27 = vor.u32 %v14800_v18, %v10650_v20  ;;  %v15257_v15 = vld [vmem:[#allocation20 + $0xf54] sm:$0xf0] }
 0x4ad   :  { %5144 = vmatmul.bf16.vlgmr.msra.gmra.mxu0 %v16599_v40  ;;  %5150 = vmatpush.bf16.msra.mxu1 %v10909_v36  ;;  %v11162_v30 = vld [vmem:[#allocation20 + $0x550] sm:$0xf0]  ;;  %v10848_v18 = vld [vmem:[#allocation20 + $0x298] sm:$0xf] }
 0x4ae   :  { %5188 = vmatpush.bf16.msrb.mxu0 %v12509_v22  ;;  %5163 = vmatpush.bf16.msra.mxu2 %v11421_v41  ;;  %v15056_v25 = vld [vmem:[#allocation20 + $0x914] sm:$0xf]  ;;  %v11165_v28 = vor.u32 %v14928_v8, %v11162_v30  ;;  %v14857_v20 = vld [vmem:[#allocation20 + $0x2d4] sm:$0xf0]  ;;  %v12449_v8 = vor.u32 %v15257_v15, %v12448_v14 }
 0x4af   :  { %v11674_v31 = vld [vmem:[#allocation20 + $0x950] sm:$0xf0]  ;;  %v14985_v30 = vld [vmem:[#allocation20 + $0x6d4] sm:$0xf0] }
 0x4b0   :  { %5176 = vmatpush.bf16.msra.mxu3 %v11933_v45  ;;  %v15184_v1 = vld [vmem:[#allocation20 + $0xd14] sm:$0xf]  ;;  %v11677_v56 = vor.u32 %v15056_v25, %v11674_v31  ;;  %v11872_v25 = vld [vmem:[#allocation20 + $0xa98] sm:$0xf]  ;;  %v16621_v31 = vld [vmem:[#allocation22] sm:$0xff] }
 0x4b1   :  { %5151 = vmatpush.bf16.msra.mxu1 %v10845_v49  ;;  %v12186_v32 = vld [vmem:[#allocation20 + $0xd50] sm:$0xf0]  ;;  %v10976_v49 = vld [vmem:[#allocation20 + $0x398] sm:$0xf] }
 0x4b2   :  { %5189 = vmatpush.bf16.msrb.mxu0 %v12445_v43  ;;  %5164 = vmatpush.bf16.msra.mxu2 %v11357_v51  ;;  %v14784_v4 = vld [vmem:[#allocation20 + $0x94] sm:$0xf]  ;;  %v12189_v22 = vor.u32 %v15184_v1, %v12186_v32  ;;  %v14889_v51 = vld [vmem:[#allocation20 + $0x3d4] sm:$0xf0] }
 0x4b3   :  { %v10586_v19 = vld [vmem:[#allocation20 + $0xd0] sm:$0xf0]  ;;  %v15113_v1 = vld [vmem:[#allocation20 + $0xad4] sm:$0xf0] }
 0x4b4   :  { %5177 = vmatpush.bf16.msra.mxu3 %v11869_v55  ;;  %v14912_v9 = vld [vmem:[#allocation20 + $0x494] sm:$0xf]  ;;  %v10589_v41 = vor.u32 %v14784_v4, %v10586_v19  ;;  %v12000_v55 = vld [vmem:[#allocation20 + $0xb98] sm:$0xf]  ;;  %v10849_v4 = vor.u32 %v14857_v20, %v10848_v18 }
 0x4b5   :  { %5152 = vmatpush.bf16.msra.mxu1 %v10781_v5  ;;  %v11098_v26 = vld [vmem:[#allocation20 + $0x4d0] sm:$0xf0]  ;;  %v10977_v5 = vor.u32 %v14889_v51, %v10976_v49  ;;  %v12384_v32 = vld [vmem:[#allocation20 + $0xe98] sm:$0xf] }
 0x4b6   :  { %5190 = vmatpush.bf16.msrb.mxu0 %v12381_v60  ;;  %5165 = vmatpush.bf16.msra.mxu2 %v11293_v50  ;;  %v15040_v34 = vld [vmem:[#allocation20 + $0x894] sm:$0xf]  ;;  %v11101_v42 = vor.u32 %v14912_v9, %v11098_v26  ;;  %v11489_v50 = vor.u32 %v15017_v54, %v11488_v53  ;;  %v10784_v9 = vld [vmem:[#allocation20 + $0x218] sm:$0xf] }
 0x4b7   :  { %v11610_v35 = vld [vmem:[#allocation20 + $0x8d0] sm:$0xf0]  ;;  %v14841_v26 = vld [vmem:[#allocation20 + $0x254] sm:$0xf0] }
 0x4b8   :  { %5178 = vmatpush.bf16.msra.mxu3 %v11805_v10  ;;  %v15168_v33 = vld [vmem:[#allocation20 + $0xc94] sm:$0xf]  ;;  %v11613_v59 = vor.u32 %v15040_v34, %v11610_v35  ;;  %v12001_v10 = vor.u32 %v15145_v23, %v12000_v55  ;;  %v11873_v34 = vor.u32 %v15113_v1, %v11872_v25  ;;  %v11232_v49 = vld [vmem:[#allocation20 + $0x598] sm:$0xf] }
 0x4b9   :  { %5153 = vmatpush.bf16.msra.mxu1 %v10717_v16  ;;  %v12122_v57 = vld [vmem:[#allocation20 + $0xcd0] sm:$0xf0]  ;;  %v10913_v16 = vor.u32 %v14873_v7, %v10912_v6  ;;  %v14953_v51 = vld [vmem:[#allocation20 + $0x5d4] sm:$0xf0] }
 0x4ba   :  { %5191 = vmatpush.bf16.msrb.mxu0 %v12317_v52  ;;  %5166 = vmatpush.bf16.msra.mxu2 %v11229_v17  ;;  %v14768_v36 = vld [vmem:[#allocation20 + $0x14] sm:$0xf]  ;;  %v12125_v44 = vor.u32 %v15168_v33, %v12122_v57  ;;  %v12513_v52 = vor.u32 %v15273_v63, %v12512_v62  ;;  %v11425_v17 = vor.u32 %v15001_v58, %v11424_v3  ;;  %v11296_v33 = vld [vmem:[#allocation20 + $0x618] sm:$0xf] }
 0x4bb   :  { %v10522_v13 = vld [vmem:[#allocation20 + $0x50] sm:$0xf0]  ;;  %v14969_v57 = vld [vmem:[#allocation20 + $0x654] sm:$0xf0] }
 0x4bc   :  { %5179 = vmatpush.bf16.msra.mxu3 %v11741_v21  ;;  %v14896_v45 = vld [vmem:[#allocation20 + $0x414] sm:$0xf]  ;;  %v10525_v60 = vor.u32 %v14768_v36, %v10522_v13  ;;  %v11360_v21 = vld [vmem:[#allocation20 + $0x698] sm:$0xf] }
 0x4bd   :  { %5154 = vmatpush.bf16.msra.mxu1 %v10653_v27  ;;  %v11034_v43 = vld [vmem:[#allocation20 + $0x450] sm:$0xf0]  ;;  %v15241_v27 = vld [vmem:[#allocation20 + $0xed4] sm:$0xf0]  ;;  %v11361_v19 = vor.u32 %v14985_v30, %v11360_v21 }
 0x4be   :  { %5192 = vmatpush.bf16.msrb.mxu0 %v12253_v29  ;;  %5167 = vmatpush.bf16.msra.mxu2 %v11165_v28  ;;  %v15024_v46 = vld [vmem:[#allocation20 + $0x814] sm:$0xf]  ;;  %v11037_v61 = vor.u32 %v14896_v45, %v11034_v43  ;;  %v11937_v29 = vor.u32 %v15129_v12, %v11936_v11  ;;  %v12385_v35 = vor.u32 %v15241_v27, %v12384_v32  ;;  %v11808_v36 = vld [vmem:[#allocation20 + $0xa18] sm:$0xf] }
 0x4bf   :  { %v11546_v24 = vld [vmem:[#allocation20 + $0x850] sm:$0xf0]  ;;  %v15225_v13 = vld [vmem:[#allocation20 + $0xe54] sm:$0xf0]  ;;  %v10785_v43 = vor.u32 %v14841_v26, %v10784_v9 }
 0x4c0   :  { %5180 = vmatpush.bf16.msra.mxu3 %v11677_v56  ;;  %v15152_v47 = vld [vmem:[#allocation20 + $0xc14] sm:$0xf]  ;;  %v11549_v0 = vor.u32 %v15024_v46, %v11546_v24  ;;  %v2297_v56 = vperm.slane %v16621_v31, 0  ;;  %v14825_v46 = vld [vmem:[#allocation20 + $0x1d4] sm:$0xf0] }
 0x4c1   :  { %v12058_v48 = vld [vmem:[#allocation20 + $0xc50] sm:$0xf0]  ;;  %5155 = vmatpush.bf16.msra.mxu1 %v10589_v41  ;;  %v15097_v41 = vld [vmem:[#allocation20 + $0xa54] sm:$0xf0] }
 0x4c2   :  { %5193 = vmatpush.bf16.msrb.mxu0 %v12189_v22  ;;  %5168 = vmatpush.bf16.msra.mxu2 %v11101_v42  ;;  %v12061_v2 = vor.u32 %v15152_v47, %v12058_v48  ;;  %v12320_v42 = vld [vmem:[#allocation20 + $0xe18] sm:$0xf]  ;;  %v11809_v24 = vor.u32 %v15097_v41, %v11808_v36 }
 0x4c3   :  { %v12321_v47 = vor.u32 %v15225_v13, %v12320_v42  ;;  %v11744_v53 = vld [vmem:[#allocation20 + $0x998] sm:$0xf] }
 0x4c4   :  { %5181 = vmatpush.bf16.msra.mxu3 %v11613_v59  ;;  %v4898_v28 = vpop.f32.mrf.mxu1  ;;  %v11297_v59 = vor.u32 %v14969_v57, %v11296_v33  ;;  %v15209_v23 = vld [vmem:[#allocation20 + $0xdd4] sm:$0xf0] }
 0x4c5   :  { %5156 = vmatpush.bf16.msra.mxu1 %v10525_v60  ;;  %v4937_v22 = vpop.f32.mrf.mxu0  ;;  %v4899_v45 = vadd.f32 %v4898_v28, %v2297_v56  ;;  %v15081_v60 = vld [vmem:[#allocation20 + $0x9d4] sm:$0xf0] }
 0x4c6   :  { %5194 = vmatpush.bf16.msrb.mxu0 %v12125_v44  ;;  %5169 = vmatpush.bf16.msra.mxu2 %v11037_v61  ;;  %v10720_v44 = vld [vmem:[#allocation20 + $0x198] sm:$0xf]  ;;  %v11745_v7 = vor.u32 %v15081_v60, %v11744_v53  ;;  %v12002_v53 = vld [vmem:[#allocation20 + $0xbd8] sm:$0xf0] }
 0x4c7   :  { %v12256_v61 = vld [vmem:[#allocation20 + $0xd98] sm:$0xf] }
 0x4c8   :  { %5182 = vmatpush.bf16.msra.mxu3 %v11549_v0  ;;  %5157 = vmatmul.bf16.vlgmr.msra.gmra.mxu1 %v16593_v37  ;;  %v10721_v0 = vor.u32 %v14825_v46, %v10720_v44  ;;  %v14809_v6 = vld [vmem:[#allocation20 + $0x154] sm:$0xf0]  ;;  %v10978_v44 = vld [vmem:[#allocation20 + $0x3d8] sm:$0xf0] }
 0x4c9   :  { %5201 = vmatpush.bf16.msrb.mxu1 %v10977_v5  ;;  %5170 = vmatmul.bf16.vlgmr.msra.gmra.mxu2 %v16595_v38  ;;  %v14937_v3 = vld [vmem:[#allocation20 + $0x554] sm:$0xf0]  ;;  %v15009_v46 = vld [vmem:[#allocation20 + $0x79c] sm:$0xf] }
 0x4ca   :  { %5195 = vmatpush.bf16.msrb.mxu0 %v12061_v2  ;;  %5214 = vmatpush.bf16.msrb.mxu2 %v11489_v50  ;;  %v4911_v48 = vpop.f32.mrf.mxu2  ;;  %v11233_v2 = vor.u32 %v14953_v51, %v11232_v49  ;;  %v10656_v50 = vld [vmem:[#allocation20 + $0x118] sm:$0xf] }
 0x4cb   :  { %5183 = vmatmul.bf16.vlgmr.msra.gmra.mxu3 %v16597_v39  ;;  %v4912_v54 = vadd.f32 %v4911_v48, %v4899_v45  ;;  %v4924_v55 = vpop.f32.mrf.mxu3  ;;  %v11680_v58 = vld [vmem:[#allocation20 + $0x918] sm:$0xf] }
 0x4cc   :  { %5227 = vmatpush.bf16.msrb.mxu3 %v12001_v10  ;;  %v4900_v62 = vpop.f32.mrf.mxu1  ;;  %v12257_v10 = vor.u32 %v15209_v23, %v12256_v61  ;;  %v15065_v12 = vld [vmem:[#allocation20 + $0x954] sm:$0xf0] }
 0x4cd   :  { %5196 = vmatmul.bf16.vlgmr.msrb.gmra.mxu0 %v16599_v40  ;;  %5202 = vmatpush.bf16.msrb.mxu1 %v10913_v16  ;;  %v4925_v63 = vadd.f32 %v4924_v55, %v4912_v54  ;;  %v4939_v5 = vpop.f32.mrf.mxu0  ;;  %v12192_v14 = vld [vmem:[#allocation20 + $0xd18] sm:$0xf]  ;;  %v10657_v16 = vor.u32 %v14809_v6, %v10656_v50  ;;  %v11681_v21 = vor.u32 %v15065_v12, %v11680_v58  ;;  %v15265_v54 = vld [vmem:[#allocation20 + $0xf9c] sm:$0xf] }
 0x4ce   :  { %5240 = vmatpush.bf16.msra.mxu0 %v12513_v52  ;;  %5215 = vmatpush.bf16.msrb.mxu2 %v11425_v17  ;;  %v11168_v52 = vld [vmem:[#allocation20 + $0x518] sm:$0xf]  ;;  %v12514_v55 = vld [vmem:[#allocation20 + $0xfd8] sm:$0xf0] }
 0x4cf   :  { %v16628_v11 = vadd.f32 %v4937_v22, %v4925_v63  ;;  %v15193_v15 = vld [vmem:[#allocation20 + $0xd54] sm:$0xf0]  ;;  %v11169_v17 = vor.u32 %v14937_v3, %v11168_v52  ;;  %v14865_v5 = vld [vmem:[#allocation20 + $0x31c] sm:$0xf] }
 0x4d0   :  { %5228 = vmatpush.bf16.msrb.mxu3 %v11937_v29  ;;  %v10592_v18 = vld [vmem:[#allocation20 + $0x98] sm:$0xf]  ;;  %v12193_v29 = vor.u32 %v15193_v15, %v12192_v14  ;;  %v10914_v50 = vld [vmem:[#allocation20 + $0x358] sm:$0xf0] }
 0x4d1   :  { %5203 = vmatpush.bf16.msrb.mxu1 %v10849_v4  ;;  %v14793_v20 = vld [vmem:[#allocation20 + $0xd4] sm:$0xf0]  ;;  %v14993_v52 = vld [vmem:[#allocation20 + $0x71c] sm:$0xf] }
 0x4d2   :  { %5241 = vmatpush.bf16.msra.mxu0 %v12449_v8  ;;  %5216 = vmatpush.bf16.msrb.mxu2 %v11361_v19  ;;  %v4913_v8 = vpop.f32.mrf.mxu2  ;;  %v11104_v30 = vld [vmem:[#allocation20 + $0x498] sm:$0xf]  ;;  %v2298_v19 = vperm.slane %v16621_v31, 1  ;;  %v10593_v9 = vor.u32 %v14793_v20, %v10592_v18  ;;  %v11426_v3 = vld [vmem:[#allocation20 + $0x758] sm:$0xf0]  ;;  %v10917_v20 = vor.u32 %v14865_v5, %v10914_v50 }
 0x4d3   :  { %v14921_v25 = vld [vmem:[#allocation20 + $0x4d4] sm:$0xf0]  ;;  %v4926_v32 = vpop.f32.mrf.mxu3  ;;  %v15121_v58 = vld [vmem:[#allocation20 + $0xb1c] sm:$0xf] }
 0x4d4   :  { %5229 = vmatpush.bf16.msrb.mxu3 %v11873_v34  ;;  %v11616_v1 = vld [vmem:[#allocation20 + $0x898] sm:$0xf]  ;;  %v4950_v56 = vpop.f32.mrf.mxu1  ;;  %v11105_v26 = vor.u32 %v14921_v25, %v11104_v30  ;;  %v11938_v15 = vld [vmem:[#allocation20 + $0xb58] sm:$0xf0] }
 0x4d5   :  { %5204 = vmatpush.bf16.msrb.mxu1 %v10785_v43  ;;  %v15049_v27 = vld [vmem:[#allocation20 + $0x8d4] sm:$0xf0]  ;;  %v4989_v34 = vpop.f32.mrf.mxu0  ;;  %v4951_v48 = vadd.f32 %v4950_v56, %v2298_v19  ;;  %v10850_v8 = vld [vmem:[#allocation20 + $0x2d8] sm:$0xf0]  ;;  %v11941_v30 = vor.u32 %v15121_v58, %v11938_v15 }
 0x4d6   :  { %5242 = vmatpush.bf16.msra.mxu0 %v12385_v35  ;;  %5217 = vmatpush.bf16.msrb.mxu2 %v11297_v59  ;;  %v12128_v28 = vld [vmem:[#allocation20 + $0xc98] sm:$0xf]  ;;  %v11617_v36 = vor.u32 %v15049_v27, %v11616_v1  ;;  %v14881_v59 = vld [vmem:[#allocation20 + $0x39c] sm:$0xf] }
 0x4d7   :  { %v15177_v4 = vld [vmem:[#allocation20 + $0xcd4] sm:$0xf0]  ;;  %v10981_v62 = vor.u32 %v14881_v59, %v10978_v44  ;;  %v14977_v1 = vld [vmem:[#allocation20 + $0x69c] sm:$0xf]  ;;  %v2299_v44 = vperm.slane %v16621_v31, 2 }
 0x4d8   :  { %5230 = vmatpush.bf16.msrb.mxu3 %v11809_v24  ;;  %v10528_v22 = vld [vmem:[#allocation20 + $0x18] sm:$0xf]  ;;  %v12129_v41 = vor.u32 %v15177_v4, %v12128_v28  ;;  %v11490_v24 = vld [vmem:[#allocation20 + $0x7d8] sm:$0xf0] }
 0x4d9   :  { %5205 = vmatpush.bf16.msrb.mxu1 %v10721_v0  ;;  %v14777_v35 = vld [vmem:[#allocation20 + $0x54] sm:$0xf0]  ;;  %v11493_v63 = vor.u32 %v15009_v46, %v11490_v24  ;;  %v11362_v32 = vld [vmem:[#allocation20 + $0x6d8] sm:$0xf0] }
 0x4da   :  { %5243 = vmatpush.bf16.msra.mxu0 %v12321_v47  ;;  %5218 = vmatpush.bf16.msrb.mxu2 %v11233_v2  ;;  %v11040_v33 = vld [vmem:[#allocation20 + $0x418] sm:$0xf]  ;;  %v15137_v47 = vld [vmem:[#allocation20 + $0xb9c] sm:$0xf]  ;;  %v10529_v49 = vor.u32 %v14777_v35, %v10528_v22  ;;  %v4963_v23 = vpop.f32.mrf.mxu2 }
 0x4db   :  { %v14905_v57 = vld [vmem:[#allocation20 + $0x454] sm:$0xf0]  ;;  %v4964_v0 = vadd.f32 %v4963_v23, %v4951_v48  ;;  %v4976_v2 = vpop.f32.mrf.mxu3  ;;  %v12005_v6 = vor.u32 %v15137_v47, %v12002_v53  ;;  %v15105_v27 = vld [vmem:[#allocation20 + $0xa9c] sm:$0xf] }
 0x4dc   :  { %5231 = vmatpush.bf16.msrb.mxu3 %v11745_v7  ;;  %v11552_v42 = vld [vmem:[#allocation20 + $0x818] sm:$0xf]  ;;  %v11041_v51 = vor.u32 %v14905_v57, %v11040_v33  ;;  %v12517_v7 = vor.u32 %v15265_v54, %v12514_v55  ;;  %v11874_v28 = vld [vmem:[#allocation20 + $0xad8] sm:$0xf0] }
 0x4dd   :  { %5206 = vmatpush.bf16.msrb.mxu1 %v10657_v16  ;;  %v15033_v13 = vld [vmem:[#allocation20 + $0x854] sm:$0xf0]  ;;  %v4977_v12 = vadd.f32 %v4976_v2, %v4964_v0  ;;  %v4991_v14 = vpop.f32.mrf.mxu0  ;;  %v15249_v16 = vld [vmem:[#allocation20 + $0xf1c] sm:$0xf]  ;;  %v11877_v33 = vor.u32 %v15105_v27, %v11874_v28 }
 0x4de   :  { %5244 = vmatpush.bf16.msra.mxu0 %v12257_v10  ;;  %5219 = vmatpush.bf16.msrb.mxu2 %v11169_v17  ;;  %v12064_v45 = vld [vmem:[#allocation20 + $0xc18] sm:$0xf]  ;;  %v11553_v60 = vor.u32 %v15033_v13, %v11552_v42  ;;  %v4952_v10 = vpop.f32.mrf.mxu1  ;;  %v12450_v17 = vld [vmem:[#allocation20 + $0xf58] sm:$0xf0] }
 0x4df   :  { %v15161_v43 = vld [vmem:[#allocation20 + $0xc54] sm:$0xf0]  ;;  %v16631_v18 = vadd.f32 %v4989_v34, %v4977_v12  ;;  %v12453_v25 = vor.u32 %v15249_v16, %v12450_v17  ;;  %v15233_v4 = vld [vmem:[#allocation20 + $0xe9c] sm:$0xf] }
 0x4e0   :  { %5232 = vmatpush.bf16.msrb.mxu3 %v11681_v21  ;;  %v12065_v61 = vor.u32 %v15161_v43, %v12064_v45  ;;  %v11429_v21 = vor.u32 %v14993_v52, %v11426_v3  ;;  %v12386_v19 = vld [vmem:[#allocation20 + $0xed8] sm:$0xf0] }
 0x4e1   :  { %5207 = vmatpush.bf16.msrb.mxu1 %v10593_v9  ;;  %v11365_v9 = vor.u32 %v14977_v1, %v11362_v32  ;;  %v14833_v34 = vld [vmem:[#allocation20 + $0x21c] sm:$0xf]  ;;  %v12389_v57 = vor.u32 %v15233_v4, %v12386_v19 }
 0x4e2   :  { %5245 = vmatpush.bf16.msra.mxu0 %v12193_v29  ;;  %5220 = vmatpush.bf16.msrb.mxu2 %v11105_v26  ;;  %v14849_v29 = vld [vmem:[#allocation20 + $0x29c] sm:$0xf]  ;;  %v4965_v56 = vpop.f32.mrf.mxu2 }
 0x4e3   :  { %v10853_v22 = vor.u32 %v14849_v29, %v10850_v8  ;;  %v4978_v26 = vpop.f32.mrf.mxu3  ;;  %v10786_v35 = vld [vmem:[#allocation20 + $0x258] sm:$0xf0] }
 0x4e4   :  { %5233 = vmatpush.bf16.msrb.mxu3 %v11617_v36  ;;  %v14961_v36 = vld [vmem:[#allocation20 + $0x61c] sm:$0xf]  ;;  %v10789_v24 = vor.u32 %v14833_v34, %v10786_v35 }
 0x4e5   :  { %5208 = vmatpush.bf16.msrb.mxu1 %v10529_v49  ;;  %v15089_v42 = vld [vmem:[#allocation20 + $0xa1c] sm:$0xf] }
 0x4e6   :  { %5246 = vmatpush.bf16.msra.mxu0 %v12129_v41  ;;  %5221 = vmatpush.bf16.msrb.mxu2 %v11041_v51  ;;  %v11298_v41 = vld [vmem:[#allocation20 + $0x658] sm:$0xf0]  ;;  %v5002_v59 = vpop.f32.mrf.mxu1 }
 0x4e7   :  { %v11810_v13 = vld [vmem:[#allocation20 + $0xa58] sm:$0xf0]  ;;  %v11301_v47 = vor.u32 %v14961_v36, %v11298_v41 }
 0x4e8   :  { %5234 = vmatpush.bf16.msrb.mxu3 %v11553_v60  ;;  %5209 = vmatmul.bf16.vlgmr.msrb.gmra.mxu1 %v16593_v37  ;;  %v15217_v45 = vld [vmem:[#allocation20 + $0xe1c] sm:$0xf]  ;;  %v5041_v46 = vpop.f32.mrf.mxu0  ;;  %v11813_v51 = vor.u32 %v15089_v42, %v11810_v13 }
 0x4e9   :  { %5253 = vmatpush.bf16.msra.mxu1 %v10981_v62  ;;  %5222 = vmatmul.bf16.vlgmr.msrb.gmra.mxu2 %v16595_v38  ;;  %v12322_v43 = vld [vmem:[#allocation20 + $0xe58] sm:$0xf0] }
 0x4ea   :  { %5247 = vmatpush.bf16.msra.mxu0 %v12065_v61  ;;  %5266 = vmatpush.bf16.msra.mxu2 %v11493_v63  ;;  %v14817_v48 = vld [vmem:[#allocation20 + $0x19c] sm:$0xf]  ;;  %v12325_v53 = vor.u32 %v15217_v45, %v12322_v43  ;;  %v5003_v63 = vadd.f32 %v5002_v59, %v2299_v44 }
 0x4eb   :  { %5235 = vmatmul.bf16.vlgmr.msrb.gmra.mxu3 %v16597_v39  ;;  %v10722_v49 = vld [vmem:[#allocation20 + $0x1d8] sm:$0xf0] }
 0x4ec   :  { %5279 = vmatpush.bf16.msra.mxu3 %v12005_v6  ;;  %v14945_v54 = vld [vmem:[#allocation20 + $0x59c] sm:$0xf]  ;;  %v10725_v0 = vor.u32 %v14817_v48, %v10722_v49  ;;  %v14890_v48 = vld [vmem:[#allocation20 + $0x3dc] sm:$0xf0] }
 0x4ed   :  { %5248 = vmatmul.bf16.vlgmr.msra.gmra.mxu0 %v16599_v40  ;;  %5254 = vmatpush.bf16.msra.mxu1 %v10917_v20  ;;  %v11234_v55 = vld [vmem:[#allocation20 + $0x5d8] sm:$0xf0]  ;;  %v5015_v10 = vpop.f32.mrf.mxu2  ;;  %v11496_v49 = vld [vmem:[#allocation20 + $0x7a0] sm:$0xf] }
 0x4ee   :  { %5292 = vmatpush.bf16.msrb.mxu0 %v12517_v7  ;;  %5267 = vmatpush.bf16.msra.mxu2 %v11429_v21  ;;  %v15073_v60 = vld [vmem:[#allocation20 + $0x99c] sm:$0xf]  ;;  %v11237_v2 = vor.u32 %v14945_v54, %v11234_v55  ;;  %v5016_v12 = vadd.f32 %v5015_v10, %v5003_v63  ;;  %v5028_v14 = vpop.f32.mrf.mxu3  ;;  %v5004_v20 = vpop.f32.mrf.mxu1  ;;  %v11432_v10 = vld [vmem:[#allocation20 + $0x720] sm:$0xf] }
 0x4ef   :  { %v11746_v61 = vld [vmem:[#allocation20 + $0x9d8] sm:$0xf0]  ;;  %v14858_v20 = vld [vmem:[#allocation20 + $0x2dc] sm:$0xf0] }
 0x4f0   :  { %5280 = vmatpush.bf16.msra.mxu3 %v11941_v30  ;;  %v15201_v23 = vld [vmem:[#allocation20 + $0xd9c] sm:$0xf]  ;;  %v11749_v6 = vor.u32 %v15073_v60, %v11746_v61  ;;  %v5029_v21 = vadd.f32 %v5028_v14, %v5016_v12  ;;  %v5043_v29 = vpop.f32.mrf.mxu0  ;;  %v15146_v60 = vld [vmem:[#allocation20 + $0xbdc] sm:$0xf0] }
 0x4f1   :  { %5255 = vmatpush.bf16.msra.mxu1 %v10853_v22  ;;  %v12258_v62 = vld [vmem:[#allocation20 + $0xdd8] sm:$0xf0]  ;;  %v12520_v61 = vld [vmem:[#allocation20 + $0xfa0] sm:$0xf] }
 0x4f2   :  { %5293 = vmatpush.bf16.msrb.mxu0 %v12453_v25  ;;  %5268 = vmatpush.bf16.msra.mxu2 %v11365_v9  ;;  %v14801_v5 = vld [vmem:[#allocation20 + $0x11c] sm:$0xf]  ;;  %v12261_v7 = vor.u32 %v15201_v23, %v12258_v62  ;;  %v16638_v56 = vadd.f32 %v5041_v46, %v5029_v21  ;;  %v15274_v23 = vld [vmem:[#allocation20 + $0xfdc] sm:$0xf0] }
 0x4f3   :  { %v10658_v50 = vld [vmem:[#allocation20 + $0x158] sm:$0xf0]  ;;  %v12456_v12 = vld [vmem:[#allocation20 + $0xf20] sm:$0xf] }
 0x4f4   :  { %5281 = vmatpush.bf16.msra.mxu3 %v11877_v33  ;;  %v14929_v52 = vld [vmem:[#allocation20 + $0x51c] sm:$0xf]  ;;  %v10661_v8 = vor.u32 %v14801_v5, %v10658_v50  ;;  %v10920_v5 = vld [vmem:[#allocation20 + $0x320] sm:$0xf] }
 0x4f5   :  { %5256 = vmatpush.bf16.msra.mxu1 %v10789_v24  ;;  %v11170_v3 = vld [vmem:[#allocation20 + $0x558] sm:$0xf0]  ;;  %v5017_v45 = vpop.f32.mrf.mxu2  ;;  %v14874_v50 = vld [vmem:[#allocation20 + $0x35c] sm:$0xf0] }
 0x4f6   :  { %5294 = vmatpush.bf16.msrb.mxu0 %v12389_v57  ;;  %5269 = vmatpush.bf16.msra.mxu2 %v11301_v47  ;;  %v15057_v58 = vld [vmem:[#allocation20 + $0x91c] sm:$0xf]  ;;  %v11173_v30 = vor.u32 %v14929_v52, %v11170_v3  ;;  %v5030_v46 = vpop.f32.mrf.mxu3  ;;  %v10984_v47 = vld [vmem:[#allocation20 + $0x3a0] sm:$0xf] }
 0x4f7   :  { %v11682_v15 = vld [vmem:[#allocation20 + $0x958] sm:$0xf0]  ;;  %v15002_v52 = vld [vmem:[#allocation20 + $0x75c] sm:$0xf0] }
 0x4f8   :  { %5282 = vmatpush.bf16.msra.mxu3 %v11813_v51  ;;  %v15185_v16 = vld [vmem:[#allocation20 + $0xd1c] sm:$0xf]  ;;  %v11685_v32 = vor.u32 %v15057_v58, %v11682_v15  ;;  %v15018_v51 = vld [vmem:[#allocation20 + $0x7dc] sm:$0xf0]  ;;  %v10921_v15 = vor.u32 %v14874_v50, %v10920_v5 }
 0x4f9   :  { %v12194_v17 = vld [vmem:[#allocation20 + $0xd58] sm:$0xf0]  ;;  %5257 = vmatpush.bf16.msra.mxu1 %v10725_v0  ;;  %v10985_v0 = vor.u32 %v14890_v48, %v10984_v47  ;;  %v11944_v3 = vld [vmem:[#allocation20 + $0xb20] sm:$0xf] }
 0x4fa   :  { %5295 = vmatpush.bf16.msrb.mxu0 %v12325_v53  ;;  %5270 = vmatpush.bf16.msra.mxu2 %v11237_v2  ;;  %v14785_v25 = vld [vmem:[#allocation20 + $0x9c] sm:$0xf]  ;;  %v12197_v27 = vor.u32 %v15185_v16, %v12194_v17  ;;  %v12008_v53 = vld [vmem:[#allocation20 + $0xba0] sm:$0xf]  ;;  %v11497_v2 = vor.u32 %v15018_v51, %v11496_v49  ;;  %v11433_v16 = vor.u32 %v15002_v52, %v11432_v10 }
 0x4fb   :  { %v10594_v1 = vld [vmem:[#allocation20 + $0xd8] sm:$0xf0]  ;;  %v15130_v58 = vld [vmem:[#allocation20 + $0xb5c] sm:$0xf0] }
 0x4fc   :  { %5283 = vmatpush.bf16.msra.mxu3 %v11749_v6  ;;  %v14913_v28 = vld [vmem:[#allocation20 + $0x49c] sm:$0xf]  ;;  %v10597_v35 = vor.u32 %v14785_v25, %v10594_v1  ;;  %v12009_v6 = vor.u32 %v15146_v60, %v12008_v53  ;;  %v15258_v14 = vld [vmem:[#allocation20 + $0xf5c] sm:$0xf0]  ;;  %v11945_v21 = vor.u32 %v15130_v58, %v11944_v3 }
 0x4fd   :  { %v11106_v4 = vld [vmem:[#allocation20 + $0x4d8] sm:$0xf0]  ;;  %5258 = vmatpush.bf16.msra.mxu1 %v10661_v8  ;;  %v10856_v17 = vld [vmem:[#allocation20 + $0x2a0] sm:$0xf]  ;;  %v12457_v29 = vor.u32 %v15258_v14, %v12456_v12 }
 0x4fe   :  { %5296 = vmatpush.bf16.msrb.mxu0 %v12261_v7  ;;  %v15041_v19 = vld [vmem:[#allocation20 + $0x89c] sm:$0xf]  ;;  %5271 = vmatpush.bf16.msra.mxu2 %v11173_v30  ;;  %v11109_v33 = vor.u32 %v14913_v28, %v11106_v4  ;;  %v12521_v7 = vor.u32 %v15274_v23, %v12520_v61  ;;  %v11368_v8 = vld [vmem:[#allocation20 + $0x6a0] sm:$0xf]  ;;  %v10857_v28 = vor.u32 %v14858_v20, %v10856_v17 }
 0x4ff   :  { %v11618_v22 = vld [vmem:[#allocation20 + $0x8d8] sm:$0xf0]  ;;  %v14986_v30 = vld [vmem:[#allocation20 + $0x6dc] sm:$0xf0] }
 0x500   :  { %v15169_v9 = vld [vmem:[#allocation20 + $0xc9c] sm:$0xf]  ;;  %5284 = vmatpush.bf16.msra.mxu3 %v11685_v32  ;;  %v11621_v42 = vor.u32 %v15041_v19, %v11618_v22  ;;  %v11880_v25 = vld [vmem:[#allocation20 + $0xaa0] sm:$0xf]  ;;  %v11369_v4 = vor.u32 %v14986_v30, %v11368_v8 }
 0x501   :  { %v12130_v26 = vld [vmem:[#allocation20 + $0xcd8] sm:$0xf0]  ;;  %5259 = vmatpush.bf16.msra.mxu1 %v10597_v35  ;;  %v15114_v1 = vld [vmem:[#allocation20 + $0xadc] sm:$0xf0] }
 0x502   :  { %v14769_v34 = vld [vmem:[#allocation20 + $0x1c] sm:$0xf]  ;;  %5297 = vmatpush.bf16.msrb.mxu0 %v12197_v27  ;;  %v12133_v13 = vor.u32 %v15169_v9, %v12130_v26  ;;  %5272 = vmatpush.bf16.msra.mxu2 %v11109_v33  ;;  %v12392_v32 = vld [vmem:[#allocation20 + $0xea0] sm:$0xf]  ;;  %v11881_v9 = vor.u32 %v15114_v1, %v11880_v25 }
 0x503   :  { %v10530_v57 = vld [vmem:[#allocation20 + $0x58] sm:$0xf0]  ;;  %v15242_v27 = vld [vmem:[#allocation20 + $0xedc] sm:$0xf0] }
 0x504   :  { %v14897_v36 = vld [vmem:[#allocation20 + $0x41c] sm:$0xf]  ;;  %v10533_v54 = vor.u32 %v14769_v34, %v10530_v57  ;;  %5285 = vmatpush.bf16.msra.mxu3 %v11621_v42  ;;  %v10792_v19 = vld [vmem:[#allocation20 + $0x220] sm:$0xf]  ;;  %v12393_v26 = vor.u32 %v15242_v27, %v12392_v32 }
 0x505   :  { %v11042_v41 = vld [vmem:[#allocation20 + $0x458] sm:$0xf0]  ;;  %v14842_v22 = vld [vmem:[#allocation20 + $0x25c] sm:$0xf0]  ;;  %v5054_v42 = vpop.f32.mrf.mxu1 }
 0x506   :  { %v15025_v43 = vld [vmem:[#allocation20 + $0x81c] sm:$0xf]  ;;  %v11045_v55 = vor.u32 %v14897_v36, %v11042_v41  ;;  %5298 = vmatpush.bf16.msrb.mxu0 %v12133_v13  ;;  %5260 = vmatpush.bf16.msra.mxu1 %v10533_v54  ;;  %v11304_v34 = vld [vmem:[#allocation20 + $0x620] sm:$0xf]  ;;  %v2300_v13 = vperm.slane %v16621_v31, 3 }
 0x507   :  { %v11554_v59 = vld [vmem:[#allocation20 + $0x858] sm:$0xf0]  ;;  %v14970_v35 = vld [vmem:[#allocation20 + $0x65c] sm:$0xf0] }
 0x508   :  { %v15153_v44 = vld [vmem:[#allocation20 + $0xc1c] sm:$0xf]  ;;  %v11557_v62 = vor.u32 %v15025_v43, %v11554_v59  ;;  %5273 = vmatpush.bf16.msra.mxu2 %v11045_v55  ;;  %v11816_v33 = vld [vmem:[#allocation20 + $0xa20] sm:$0xf]  ;;  %v10793_v43 = vor.u32 %v14842_v22, %v10792_v19  ;;  %v11305_v59 = vor.u32 %v14970_v35, %v11304_v34  ;;  %v5055_v60 = vadd.f32 %v5054_v42, %v2300_v13 }
 0x509   :  { %v12066_v24 = vld [vmem:[#allocation20 + $0xc58] sm:$0xf0]  ;;  %5261 = vmatmul.bf16.vlgmr.msra.gmra.mxu1 %v16593_v37  ;;  %v15098_v57 = vld [vmem:[#allocation20 + $0xa5c] sm:$0xf0] }
 0x50a   :  { %v12069_v63 = vor.u32 %v15153_v44, %v12066_v24  ;;  %5286 = vmatpush.bf16.msra.mxu3 %v11557_v62  ;;  %5305 = vmatpush.bf16.msrb.mxu1 %v10985_v0  ;;  %v12328_v36 = vld [vmem:[#allocation20 + $0xe20] sm:$0xf]  ;;  %v5093_v45 = vpop.f32.mrf.mxu0  ;;  %v11817_v24 = vor.u32 %v15098_v57, %v11816_v33 }
 0x50b   :  { %5274 = vmatmul.bf16.vlgmr.msra.gmra.mxu2 %v16595_v38  ;;  %v15226_v41 = vld [vmem:[#allocation20 + $0xe5c] sm:$0xf0] }
 0x50c   :  { %5299 = vmatpush.bf16.msrb.mxu0 %v12069_v63  ;;  %5318 = vmatpush.bf16.msrb.mxu2 %v11497_v2  ;;  %v10728_v44 = vld [vmem:[#allocation20 + $0x1a0] sm:$0xf]  ;;  %v12329_v47 = vor.u32 %v15226_v41, %v12328_v36  ;;  %v5067_v5 = vpop.f32.mrf.mxu2 }
 0x50d   :  { %5287 = vmatmul.bf16.vlgmr.msra.gmra.mxu3 %v16597_v39  ;;  %v14826_v46 = vld [vmem:[#allocation20 + $0x1dc] sm:$0xf0]  ;;  %v5068_v10 = vadd.f32 %v5067_v5, %v5055_v60  ;;  %v5056_v14 = vpop.f32.mrf.mxu1 }
 0x50e   :  { %5331 = vmatpush.bf16.msrb.mxu3 %v12009_v6  ;;  %5306 = vmatpush.bf16.msrb.mxu1 %v10921_v15  ;;  %v11240_v48 = vld [vmem:[#allocation20 + $0x5a0] sm:$0xf]  ;;  %v10729_v61 = vor.u32 %v14826_v46, %v10728_v44  ;;  %v5080_v52 = vpop.f32.mrf.mxu3  ;;  %v14882_v44 = vld [vmem:[#allocation20 + $0x3a4] sm:$0xf] }
 0x50f   :  { %5300 = vmatmul.bf16.vlgmr.msrb.gmra.mxu0 %v16599_v40  ;;  %v14954_v49 = vld [vmem:[#allocation20 + $0x5dc] sm:$0xf0]  ;;  %v5081_v15 = vadd.f32 %v5080_v52, %v5068_v10  ;;  %v10986_v46 = vld [vmem:[#allocation20 + $0x3e0] sm:$0xf0] }
 0x510   :  { %5344 = vmatpush.bf16.msra.mxu0 %v12521_v7  ;;  %5319 = vmatpush.bf16.msrb.mxu2 %v11433_v16  ;;  %v11752_v51 = vld [vmem:[#allocation20 + $0x9a0] sm:$0xf]  ;;  %v11241_v23 = vor.u32 %v14954_v49, %v11240_v48  ;;  %v15138_v48 = vld [vmem:[#allocation20 + $0xba4] sm:$0xf] }
 0x511   :  { %v15082_v53 = vld [vmem:[#allocation20 + $0x9dc] sm:$0xf0]  ;;  %v16645_v27 = vadd.f32 %v5093_v45, %v5081_v15  ;;  %v11946_v10 = vld [vmem:[#allocation20 + $0xb60] sm:$0xf0] }
 0x512   :  { %5332 = vmatpush.bf16.msrb.mxu3 %v11945_v21  ;;  %5307 = vmatpush.bf16.msrb.mxu1 %v10857_v28  ;;  %v12264_v54 = vld [vmem:[#allocation20 + $0xda0] sm:$0xf]  ;;  %v11753_v0 = vor.u32 %v15082_v53, %v11752_v51  ;;  %v5095_v16 = vpop.f32.mrf.mxu0  ;;  %v12010_v53 = vld [vmem:[#allocation20 + $0xbe0] sm:$0xf0] }
 0x513   :  { %v15210_v55 = vld [vmem:[#allocation20 + $0xddc] sm:$0xf0]  ;;  %v15250_v52 = vld [vmem:[#allocation20 + $0xf24] sm:$0xf] }
 0x514   :  { %5345 = vmatpush.bf16.msra.mxu0 %v12457_v29  ;;  %5320 = vmatpush.bf16.msrb.mxu2 %v11369_v4  ;;  %v10664_v62 = vld [vmem:[#allocation20 + $0x120] sm:$0xf]  ;;  %v12265_v2 = vor.u32 %v15210_v55, %v12264_v54  ;;  %v5069_v41 = vpop.f32.mrf.mxu2  ;;  %v15266_v54 = vld [vmem:[#allocation20 + $0xfa4] sm:$0xf] }
 0x515   :  { %v14810_v63 = vld [vmem:[#allocation20 + $0x15c] sm:$0xf0]  ;;  %v12522_v55 = vld [vmem:[#allocation20 + $0xfe0] sm:$0xf0]  ;;  %v2301_v41 = vperm.slane %v16621_v31, 4 }
 0x516   :  { %5333 = vmatpush.bf16.msrb.mxu3 %v11881_v9  ;;  %5308 = vmatpush.bf16.msrb.mxu1 %v10793_v43  ;;  %v11176_v50 = vld [vmem:[#allocation20 + $0x520] sm:$0xf]  ;;  %v10665_v17 = vor.u32 %v14810_v63, %v10664_v62  ;;  %v5082_v43 = vpop.f32.mrf.mxu3  ;;  %v14866_v63 = vld [vmem:[#allocation20 + $0x324] sm:$0xf]  ;;  %v12525_v5 = vor.u32 %v15266_v54, %v12522_v55 }
 0x517   :  { %v14938_v6 = vld [vmem:[#allocation20 + $0x55c] sm:$0xf0]  ;;  %v14850_v14 = vld [vmem:[#allocation20 + $0x2a4] sm:$0xf] }
 0x518   :  { %5346 = vmatpush.bf16.msra.mxu0 %v12393_v26  ;;  %5321 = vmatpush.bf16.msrb.mxu2 %v11305_v59  ;;  %v11688_v7 = vld [vmem:[#allocation20 + $0x920] sm:$0xf]  ;;  %v11177_v20 = vor.u32 %v14938_v6, %v11176_v50  ;;  %v14994_v50 = vld [vmem:[#allocation20 + $0x724] sm:$0xf] }
 0x519   :  { %v15066_v3 = vld [vmem:[#allocation20 + $0x95c] sm:$0xf0]  ;;  %v11434_v6 = vld [vmem:[#allocation20 + $0x760] sm:$0xf0] }
 0x51a   :  { %5334 = vmatpush.bf16.msrb.mxu3 %v11817_v24  ;;  %v12200_v58 = vld [vmem:[#allocation20 + $0xd20] sm:$0xf]  ;;  %5309 = vmatpush.bf16.msrb.mxu1 %v10729_v61  ;;  %v11689_v8 = vor.u32 %v15066_v3, %v11688_v7  ;;  %v15010_v24 = vld [vmem:[#allocation20 + $0x7a4] sm:$0xf] }
 0x51b   :  { %v15194_v12 = vld [vmem:[#allocation20 + $0xd5c] sm:$0xf0]  ;;  %v15122_v7 = vld [vmem:[#allocation20 + $0xb24] sm:$0xf] }
 0x51c   :  { %5347 = vmatpush.bf16.msra.mxu0 %v12329_v47  ;;  %5322 = vmatpush.bf16.msrb.mxu2 %v11241_v23  ;;  %v10600_v21 = vld [vmem:[#allocation20 + $0xa0] sm:$0xf]  ;;  %v12201_v30 = vor.u32 %v15194_v12, %v12200_v58  ;;  %v11498_v47 = vld [vmem:[#allocation20 + $0x7e0] sm:$0xf0]  ;;  %v10989_v23 = vor.u32 %v14882_v44, %v10986_v46  ;;  %v11437_v12 = vor.u32 %v14994_v50, %v11434_v6 }
 0x51d   :  { %v14794_v29 = vld [vmem:[#allocation20 + $0xdc] sm:$0xf0]  ;;  %v11501_v62 = vor.u32 %v15010_v24, %v11498_v47  ;;  %v12458_v3 = vld [vmem:[#allocation20 + $0xf60] sm:$0xf0]  ;;  %v11949_v16 = vor.u32 %v15122_v7, %v11946_v10 }
 0x51e   :  { %5335 = vmatpush.bf16.msrb.mxu3 %v11753_v0  ;;  %v11112_v25 = vld [vmem:[#allocation20 + $0x4a0] sm:$0xf]  ;;  %5310 = vmatpush.bf16.msrb.mxu1 %v10665_v17  ;;  %v10601_v9 = vor.u32 %v14794_v29, %v10600_v21  ;;  %v10922_v0 = vld [vmem:[#allocation20 + $0x360] sm:$0xf0]  ;;  %v12461_v17 = vor.u32 %v15250_v52, %v12458_v3 }
 0x51f   :  { %v14922_v1 = vld [vmem:[#allocation20 + $0x4dc] sm:$0xf0]  ;;  %v10925_v58 = vor.u32 %v14866_v63, %v10922_v0  ;;  %v10858_v15 = vld [vmem:[#allocation20 + $0x2e0] sm:$0xf0] }
 0x520   :  { %5348 = vmatpush.bf16.msra.mxu0 %v12265_v2  ;;  %v11624_v32 = vld [vmem:[#allocation20 + $0x8a0] sm:$0xf]  ;;  %5323 = vmatpush.bf16.msrb.mxu2 %v11177_v20  ;;  %v11113_v26 = vor.u32 %v14922_v1, %v11112_v25  ;;  %v12013_v2 = vor.u32 %v15138_v48, %v12010_v53  ;;  %v14978_v20 = vld [vmem:[#allocation20 + $0x6a4] sm:$0xf]  ;;  %v10861_v1 = vor.u32 %v14850_v14, %v10858_v15 }
 0x521   :  { %v15050_v28 = vld [vmem:[#allocation20 + $0x8dc] sm:$0xf0]  ;;  %v11370_v21 = vld [vmem:[#allocation20 + $0x6e0] sm:$0xf0] }
 0x522   :  { %v12136_v4 = vld [vmem:[#allocation20 + $0xca0] sm:$0xf]  ;;  %5336 = vmatpush.bf16.msrb.mxu3 %v11689_v8  ;;  %v11625_v57 = vor.u32 %v15050_v28, %v11624_v32  ;;  %5311 = vmatpush.bf16.msrb.mxu1 %v10601_v9  ;;  %v15106_v29 = vld [vmem:[#allocation20 + $0xaa4] sm:$0xf]  ;;  %v11373_v32 = vor.u32 %v14978_v20, %v11370_v21 }
 0x523   :  { %v15178_v19 = vld [vmem:[#allocation20 + $0xcdc] sm:$0xf0]  ;;  %v11882_v8 = vld [vmem:[#allocation20 + $0xae0] sm:$0xf0] }
 0x524   :  { %v10536_v22 = vld [vmem:[#allocation20 + $0x20] sm:$0xf]  ;;  %5349 = vmatpush.bf16.msra.mxu0 %v12201_v30  ;;  %v12137_v36 = vor.u32 %v15178_v19, %v12136_v4  ;;  %5324 = vmatpush.bf16.msrb.mxu2 %v11113_v26  ;;  %v15234_v30 = vld [vmem:[#allocation20 + $0xea4] sm:$0xf]  ;;  %v11885_v19 = vor.u32 %v15106_v29, %v11882_v8 }
 0x525   :  { %v14778_v34 = vld [vmem:[#allocation20 + $0x5c] sm:$0xf0]  ;;  %v12394_v25 = vld [vmem:[#allocation20 + $0xee0] sm:$0xf0] }
 0x526   :  { %v11048_v35 = vld [vmem:[#allocation20 + $0x420] sm:$0xf]  ;;  %v10537_v49 = vor.u32 %v14778_v34, %v10536_v22  ;;  %5337 = vmatpush.bf16.msrb.mxu3 %v11625_v57  ;;  %v14834_v28 = vld [vmem:[#allocation20 + $0x224] sm:$0xf]  ;;  %v12397_v22 = vor.u32 %v15234_v30, %v12394_v25 }
 0x527   :  { %v14906_v33 = vld [vmem:[#allocation20 + $0x45c] sm:$0xf0]  ;;  %v10794_v4 = vld [vmem:[#allocation20 + $0x260] sm:$0xf0] }
 0x528   :  { %v11560_v42 = vld [vmem:[#allocation20 + $0x820] sm:$0xf]  ;;  %v11049_v51 = vor.u32 %v14906_v33, %v11048_v35  ;;  %5350 = vmatpush.bf16.msra.mxu0 %v12137_v36  ;;  %5312 = vmatpush.bf16.msrb.mxu1 %v10537_v49  ;;  %v14962_v9 = vld [vmem:[#allocation20 + $0x624] sm:$0xf]  ;;  %v5106_v36 = vpop.f32.mrf.mxu1 }
 0x529   :  { %v15034_v13 = vld [vmem:[#allocation20 + $0x85c] sm:$0xf0]  ;;  %v11306_v26 = vld [vmem:[#allocation20 + $0x660] sm:$0xf0]  ;;  %v5107_v54 = vadd.f32 %v5106_v36, %v2301_v41 }
 0x52a   :  { %v12072_v45 = vld [vmem:[#allocation20 + $0xc20] sm:$0xf]  ;;  %v11561_v60 = vor.u32 %v15034_v13, %v11560_v42  ;;  %5325 = vmatpush.bf16.msrb.mxu2 %v11049_v51  ;;  %v15090_v34 = vld [vmem:[#allocation20 + $0xa24] sm:$0xf]  ;;  %v5145_v42 = vpop.f32.mrf.mxu0  ;;  %v10797_v13 = vor.u32 %v14834_v28, %v10794_v4 }
 0x52b   :  { %v15162_v59 = vld [vmem:[#allocation20 + $0xc5c] sm:$0xf0]  ;;  %5313 = vmatmul.bf16.vlgmr.msrb.gmra.mxu1 %v16593_v37  ;;  %v11818_v35 = vld [vmem:[#allocation20 + $0xa60] sm:$0xf0] }
 0x52c   :  { %v12073_v61 = vor.u32 %v15162_v59, %v12072_v45  ;;  %5338 = vmatpush.bf16.msrb.mxu3 %v11561_v60  ;;  %5357 = vmatpush.bf16.msra.mxu1 %v10989_v23  ;;  %v15218_v33 = vld [vmem:[#allocation20 + $0xe24] sm:$0xf]  ;;  %v11309_v45 = vor.u32 %v14962_v9, %v11306_v26  ;;  %v11821_v44 = vor.u32 %v15090_v34, %v11818_v35  ;;  %v5119_v63 = vpop.f32.mrf.mxu2 }
 0x52d   :  { %5326 = vmatmul.bf16.vlgmr.msrb.gmra.mxu2 %v16595_v38  ;;  %v12330_v57 = vld [vmem:[#allocation20 + $0xe60] sm:$0xf0]  ;;  %v5120_v50 = vadd.f32 %v5119_v63, %v5107_v54 }
 0x52e   :  { %5351 = vmatpush.bf16.msra.mxu0 %v12073_v61  ;;  %5370 = vmatpush.bf16.msra.mxu2 %v11501_v62  ;;  %v14818_v43 = vld [vmem:[#allocation20 + $0x1a4] sm:$0xf]  ;;  %v12333_v46 = vor.u32 %v15218_v33, %v12330_v57  ;;  %v5132_v6 = vpop.f32.mrf.mxu3 }
 0x52f   :  { %5339 = vmatmul.bf16.vlgmr.msrb.gmra.mxu3 %v16597_v39  ;;  %v10730_v59 = vld [vmem:[#allocation20 + $0x1e0] sm:$0xf0] }
 0x530   :  { %5383 = vmatpush.bf16.msra.mxu3 %v12013_v2  ;;  %5358 = vmatpush.bf16.msra.mxu1 %v10925_v58  ;;  %v14946_v24 = vld [vmem:[#allocation20 + $0x5a4] sm:$0xf]  ;;  %v10733_v55 = vor.u32 %v14818_v43, %v10730_v59  ;;  %v5108_v3 = vpop.f32.mrf.mxu1  ;;  %v5133_v58 = vadd.f32 %v5132_v6, %v5120_v50  ;;  %v10992_v43 = vld [vmem:[#allocation20 + $0x3a8] sm:$0xf] }
 0x531   :  { %5352 = vmatmul.bf16.vlgmr.msra.gmra.mxu0 %v16599_v40  ;;  %v11242_v47 = vld [vmem:[#allocation20 + $0x5e0] sm:$0xf0]  ;;  %v14891_v59 = vld [vmem:[#allocation20 + $0x3e4] sm:$0xf0] }
 0x532   :  { %5396 = vmatpush.bf16.msrb.mxu0 %v12525_v5  ;;  %5371 = vmatpush.bf16.msra.mxu2 %v11437_v12  ;;  %v15074_v48 = vld [vmem:[#allocation20 + $0x9a4] sm:$0xf]  ;;  %v11245_v31 = vor.u32 %v14946_v24, %v11242_v47  ;;  %v5147_v12 = vpop.f32.mrf.mxu0  ;;  %v16652_v25 = vadd.f32 %v5145_v42, %v5133_v58  ;;  %v12016_v24 = vld [vmem:[#allocation20 + $0xba8] sm:$0xf] }
 0x533   :  { %v11754_v49 = vld [vmem:[#allocation20 + $0x9e0] sm:$0xf0]  ;;  %v15131_v50 = vld [vmem:[#allocation20 + $0xb64] sm:$0xf0] }
 0x534   :  { %5384 = vmatpush.bf16.msra.mxu3 %v11949_v16  ;;  %5359 = vmatpush.bf16.msra.mxu1 %v10861_v1  ;;  %v15202_v51 = vld [vmem:[#allocation20 + $0xda4] sm:$0xf]  ;;  %v11757_v23 = vor.u32 %v15074_v48, %v11754_v49  ;;  %v5121_v57 = vpop.f32.mrf.mxu2  ;;  %v15147_v49 = vld [vmem:[#allocation20 + $0xbe4] sm:$0xf0] }
 0x535   :  { %v12266_v53 = vld [vmem:[#allocation20 + $0xde0] sm:$0xf0]  ;;  %v12464_v6 = vld [vmem:[#allocation20 + $0xf28] sm:$0xf] }
 0x536   :  { %5397 = vmatpush.bf16.msrb.mxu0 %v12461_v17  ;;  %5372 = vmatpush.bf16.msra.mxu2 %v11373_v32  ;;  %v14802_v60 = vld [vmem:[#allocation20 + $0x124] sm:$0xf]  ;;  %v12269_v62 = vor.u32 %v15202_v51, %v12266_v53  ;;  %v12528_v51 = vld [vmem:[#allocation20 + $0xfa8] sm:$0xf] }
 0x537   :  { %v10666_v61 = vld [vmem:[#allocation20 + $0x160] sm:$0xf0]  ;;  %v15275_v53 = vld [vmem:[#allocation20 + $0xfe4] sm:$0xf0] }
 0x538   :  { %5385 = vmatpush.bf16.msra.mxu3 %v11885_v19  ;;  %5360 = vmatpush.bf16.msra.mxu1 %v10797_v13  ;;  %v14930_v0 = vld [vmem:[#allocation20 + $0x524] sm:$0xf]  ;;  %v10669_v14 = vor.u32 %v14802_v60, %v10666_v61  ;;  %v5134_v13 = vpop.f32.mrf.mxu3  ;;  %v10928_v61 = vld [vmem:[#allocation20 + $0x328] sm:$0xf]  ;;  %v12529_v63 = vor.u32 %v15275_v53, %v12528_v51 }
 0x539   :  { %v11178_v2 = vld [vmem:[#allocation20 + $0x560] sm:$0xf0]  ;;  %v10864_v3 = vld [vmem:[#allocation20 + $0x2a8] sm:$0xf] }
 0x53a   :  { %5398 = vmatpush.bf16.msrb.mxu0 %v12397_v22  ;;  %5373 = vmatpush.bf16.msra.mxu2 %v11309_v45  ;;  %v15058_v5 = vld [vmem:[#allocation20 + $0x924] sm:$0xf]  ;;  %v11181_v15 = vor.u32 %v14930_v0, %v11178_v2  ;;  %v11440_v0 = vld [vmem:[#allocation20 + $0x728] sm:$0xf] }
 0x53b   :  { %v11690_v7 = vld [vmem:[#allocation20 + $0x960] sm:$0xf0]  ;;  %v15003_v2 = vld [vmem:[#allocation20 + $0x764] sm:$0xf0] }
 0x53c   :  { %5386 = vmatpush.bf16.msra.mxu3 %v11821_v44  ;;  %v15186_v10 = vld [vmem:[#allocation20 + $0xd24] sm:$0xf]  ;;  %5361 = vmatpush.bf16.msra.mxu1 %v10733_v55  ;;  %v11693_v20 = vor.u32 %v15058_v5, %v11690_v7  ;;  %v11504_v44 = vld [vmem:[#allocation20 + $0x7a8] sm:$0xf] }
 0x53d   :  { %v12202_v52 = vld [vmem:[#allocation20 + $0xd60] sm:$0xf0]  ;;  %v11952_v5 = vld [vmem:[#allocation20 + $0xb28] sm:$0xf] }
 0x53e   :  { %5399 = vmatpush.bf16.msrb.mxu0 %v12333_v46  ;;  %5374 = vmatpush.bf16.msra.mxu2 %v11245_v31  ;;  %v14786_v16 = vld [vmem:[#allocation20 + $0xa4] sm:$0xf]  ;;  %v12205_v21 = vor.u32 %v15186_v10, %v12202_v52  ;;  %v15019_v46 = vld [vmem:[#allocation20 + $0x7e4] sm:$0xf0]  ;;  %v10993_v31 = vor.u32 %v14891_v59, %v10992_v43  ;;  %v11441_v52 = vor.u32 %v15003_v2, %v11440_v0 }
 0x53f   :  { %v10602_v17 = vld [vmem:[#allocation20 + $0xe0] sm:$0xf0]  ;;  %v11505_v60 = vor.u32 %v15019_v46, %v11504_v44  ;;  %v15259_v7 = vld [vmem:[#allocation20 + $0xf64] sm:$0xf0]  ;;  %v11953_v12 = vor.u32 %v15131_v50, %v11952_v5 }
 0x540   :  { %5387 = vmatpush.bf16.msra.mxu3 %v11757_v23  ;;  %v14914_v29 = vld [vmem:[#allocation20 + $0x4a4] sm:$0xf]  ;;  %5362 = vmatpush.bf16.msra.mxu1 %v10669_v14  ;;  %v10605_v19 = vor.u32 %v14786_v16, %v10602_v17  ;;  %v14875_v23 = vld [vmem:[#allocation20 + $0x364] sm:$0xf0]  ;;  %v12465_v14 = vor.u32 %v15259_v7, %v12464_v6 }
 0x541   :  { %v11114_v8 = vld [vmem:[#allocation20 + $0x4e0] sm:$0xf0]  ;;  %v10929_v10 = vor.u32 %v14875_v23, %v10928_v61  ;;  %v14859_v58 = vld [vmem:[#allocation20 + $0x2e4] sm:$0xf0] }
 0x542   :  { %5400 = vmatpush.bf16.msrb.mxu0 %v12269_v62  ;;  %v15042_v30 = vld [vmem:[#allocation20 + $0x8a4] sm:$0xf]  ;;  %5375 = vmatpush.bf16.msra.mxu2 %v11181_v15  ;;  %v11117_v22 = vor.u32 %v14914_v29, %v11114_v8  ;;  %v12017_v62 = vor.u32 %v15147_v49, %v12016_v24  ;;  %v11376_v15 = vld [vmem:[#allocation20 + $0x6a8] sm:$0xf]  ;;  %v10865_v8 = vor.u32 %v14859_v58, %v10864_v3 }
 0x543   :  { %v11626_v1 = vld [vmem:[#allocation20 + $0x8e0] sm:$0xf0]  ;;  %v14987_v16 = vld [vmem:[#allocation20 + $0x6e4] sm:$0xf0] }
 0x544   :  { %v15170_v32 = vld [vmem:[#allocation20 + $0xca4] sm:$0xf]  ;;  %5388 = vmatpush.bf16.msra.mxu3 %v11693_v20  ;;  %v11629_v35 = vor.u32 %v15042_v30, %v11626_v1  ;;  %5363 = vmatpush.bf16.msra.mxu1 %v10605_v19  ;;  %v11888_v17 = vld [vmem:[#allocation20 + $0xaa8] sm:$0xf]  ;;  %v11377_v30 = vor.u32 %v14987_v16, %v11376_v15 }
 0x545   :  { %v12138_v28 = vld [vmem:[#allocation20 + $0xce0] sm:$0xf0]  ;;  %v15115_v20 = vld [vmem:[#allocation20 + $0xae4] sm:$0xf0] }
 0x546   :  { %v14770_v4 = vld [vmem:[#allocation20 + $0x24] sm:$0xf]  ;;  %5401 = vmatpush.bf16.msrb.mxu0 %v12205_v21  ;;  %v12141_v33 = vor.u32 %v15170_v32, %v12138_v28  ;;  %5376 = vmatpush.bf16.msra.mxu2 %v11117_v22  ;;  %v12400_v21 = vld [vmem:[#allocation20 + $0xea8] sm:$0xf]  ;;  %v11889_v28 = vor.u32 %v15115_v20, %v11888_v17 }
 0x547   :  { %v10538_v9 = vld [vmem:[#allocation20 + $0x60] sm:$0xf0]  ;;  %v15243_v29 = vld [vmem:[#allocation20 + $0xee4] sm:$0xf0] }
 0x548   :  { %v14898_v26 = vld [vmem:[#allocation20 + $0x424] sm:$0xf]  ;;  %v10541_v47 = vor.u32 %v14770_v4, %v10538_v9  ;;  %5389 = vmatpush.bf16.msra.mxu3 %v11629_v35  ;;  %v10800_v1 = vld [vmem:[#allocation20 + $0x228] sm:$0xf]  ;;  %v12401_v4 = vor.u32 %v15243_v29, %v12400_v21 }
 0x549   :  { %v11050_v34 = vld [vmem:[#allocation20 + $0x460] sm:$0xf0]  ;;  %v14843_v32 = vld [vmem:[#allocation20 + $0x264] sm:$0xf0] }
 0x54a   :  { %v15026_v36 = vld [vmem:[#allocation20 + $0x824] sm:$0xf]  ;;  %v11053_v48 = vor.u32 %v14898_v26, %v11050_v34  ;;  %5402 = vmatpush.bf16.msrb.mxu0 %v12141_v33  ;;  %5364 = vmatpush.bf16.msra.mxu1 %v10541_v47  ;;  %v11312_v19 = vld [vmem:[#allocation20 + $0x628] sm:$0xf]  ;;  %v16658_v33 = vpop.f32.mrf.mxu1  ;;  %v16660_v57 = vpop.f32.mrf.mxu0 }
 0x54b   :  { %v11562_v41 = vld [vmem:[#allocation20 + $0x860] sm:$0xf0]  ;;  %v14971_v22 = vld [vmem:[#allocation20 + $0x664] sm:$0xf0] }
 0x54c   :  { %v15154_v42 = vld [vmem:[#allocation20 + $0xc24] sm:$0xf]  ;;  %v11565_v54 = vor.u32 %v15026_v36, %v11562_v41  ;;  %5377 = vmatpush.bf16.msra.mxu2 %v11053_v48  ;;  %v11824_v9 = vld [vmem:[#allocation20 + $0xa28] sm:$0xf]  ;;  %v10801_v36 = vor.u32 %v14843_v32, %v10800_v1  ;;  %v11313_v41 = vor.u32 %v14971_v22, %v11312_v19 }
 0x54d   :  { %v12074_v45 = vld [vmem:[#allocation20 + $0xc60] sm:$0xf0]  ;;  %5365 = vmatmul.bf16.vlgmr.msra.gmra.mxu1 %v16593_v37  ;;  %v15099_v26 = vld [vmem:[#allocation20 + $0xa64] sm:$0xf0] }
 0x54e   :  { %v12077_v55 = vor.u32 %v15154_v42, %v12074_v45  ;;  %5390 = vmatpush.bf16.msra.mxu3 %v11565_v54  ;;  %5409 = vmatpush.bf16.msrb.mxu1 %v10993_v31  ;;  %v12336_v34 = vld [vmem:[#allocation20 + $0xe28] sm:$0xf]  ;;  %v11825_v45 = vor.u32 %v15099_v26, %v11824_v9 }
 0x54f   :  { %5378 = vmatmul.bf16.vlgmr.msra.gmra.mxu2 %v16595_v38  ;;  %v15227_v35 = vld [vmem:[#allocation20 + $0xe64] sm:$0xf0] }
 0x550   :  { %5403 = vmatpush.bf16.msrb.mxu0 %v12077_v55  ;;  %5422 = vmatpush.bf16.msrb.mxu2 %v11505_v60  ;;  %v10736_v42 = vld [vmem:[#allocation20 + $0x1a8] sm:$0xf]  ;;  %v12337_v43 = vor.u32 %v15227_v35, %v12336_v34  ;;  %v16662_v60 = vpop.f32.mrf.mxu2 }
 0x551   :  { %5391 = vmatmul.bf16.vlgmr.msra.gmra.mxu3 %v16597_v39  ;;  %v14827_v13 = vld [vmem:[#allocation20 + $0x1e4] sm:$0xf0] }
 0x552   :  { %5435 = vmatpush.bf16.msrb.mxu3 %v12017_v62  ;;  %5410 = vmatpush.bf16.msrb.mxu1 %v10929_v10  ;;  %v11248_v59 = vld [vmem:[#allocation20 + $0x5a8] sm:$0xf]  ;;  %v10737_v49 = vor.u32 %v14827_v13, %v10736_v42  ;;  %v5160_v50 = vpop.f32.mrf.mxu1  ;;  %v5199_v6 = vpop.f32.mrf.mxu0  ;;  %v10994_v42 = vld [vmem:[#allocation20 + $0x3e8] sm:$0xf0] }
 0x553   :  { %5404 = vmatmul.bf16.vlgmr.msrb.gmra.mxu0 %v16599_v40  ;;  %v14955_v44 = vld [vmem:[#allocation20 + $0x5e4] sm:$0xf0]  ;;  %v15011_v13 = vld [vmem:[#allocation20 + $0x7ac] sm:$0xf] }
 0x554   :  { %5448 = vmatpush.bf16.msra.mxu0 %v12529_v63  ;;  %5423 = vmatpush.bf16.msrb.mxu2 %v11441_v52  ;;  %v11760_v46 = vld [vmem:[#allocation20 + $0x9a8] sm:$0xf]  ;;  %v11249_v51 = vor.u32 %v14955_v44, %v11248_v59  ;;  %v16664_v63 = vpop.f32.mrf.mxu3  ;;  %v12466_v50 = vld [vmem:[#allocation20 + $0xf68] sm:$0xf0] }
 0x555   :  { %v15083_v24 = vld [vmem:[#allocation20 + $0x9e4] sm:$0xf0] }
 0x556   :  { %5436 = vmatpush.bf16.msrb.mxu3 %v11953_v12  ;;  %5411 = vmatpush.bf16.msrb.mxu1 %v10865_v8  ;;  %v12272_v47 = vld [vmem:[#allocation20 + $0xda8] sm:$0xf]  ;;  %v11761_v55 = vor.u32 %v15083_v24, %v11760_v46  ;;  %v12018_v46 = vld [vmem:[#allocation20 + $0xbe8] sm:$0xf0] }
 0x557   :  { %v15211_v48 = vld [vmem:[#allocation20 + $0xde4] sm:$0xf0]  ;;  %v15267_v24 = vld [vmem:[#allocation20 + $0xfac] sm:$0xf] }
 0x558   :  { %5449 = vmatpush.bf16.msra.mxu0 %v12465_v14  ;;  %5424 = vmatpush.bf16.msrb.mxu2 %v11377_v30  ;;  %v10672_v53 = vld [vmem:[#allocation20 + $0x128] sm:$0xf]  ;;  %v12273_v31 = vor.u32 %v15211_v48, %v12272_v47  ;;  %v5173_v22 = vpop.f32.mrf.mxu2  ;;  %v12530_v47 = vld [vmem:[#allocation20 + $0xfe8] sm:$0xf0] }
 0x559   :  { %v14811_v54 = vld [vmem:[#allocation20 + $0x164] sm:$0xf0]  ;;  %v11826_v22 = vld [vmem:[#allocation20 + $0xa68] sm:$0xf0] }
 0x55a   :  { %5437 = vmatpush.bf16.msrb.mxu3 %v11889_v28  ;;  %5412 = vmatpush.bf16.msrb.mxu1 %v10801_v36  ;;  %v11184_v61 = vld [vmem:[#allocation20 + $0x528] sm:$0xf]  ;;  %v10673_v7 = vor.u32 %v14811_v54, %v10672_v53  ;;  %v14867_v54 = vld [vmem:[#allocation20 + $0x32c] sm:$0xf] }
 0x55b   :  { %v14939_v23 = vld [vmem:[#allocation20 + $0x564] sm:$0xf0] }
 0x55c   :  { %5450 = vmatpush.bf16.msra.mxu0 %v12401_v4  ;;  %5425 = vmatpush.bf16.msrb.mxu2 %v11313_v41  ;;  %v11696_v62 = vld [vmem:[#allocation20 + $0x928] sm:$0xf]  ;;  %v11185_v10 = vor.u32 %v14939_v23, %v11184_v61  ;;  %v5186_v35 = vpop.f32.mrf.mxu3  ;;  %v14883_v41 = vld [vmem:[#allocation20 + $0x3ac] sm:$0xf]  ;;  %v12533_v61 = vor.u32 %v15267_v24, %v12530_v47 }
 0x55d   :  { %v15067_v0 = vld [vmem:[#allocation20 + $0x964] sm:$0xf0]  ;;  %v14995_v23 = vld [vmem:[#allocation20 + $0x72c] sm:$0xf] }
 0x55e   :  { %5438 = vmatpush.bf16.msrb.mxu3 %v11825_v45  ;;  %v12208_v2 = vld [vmem:[#allocation20 + $0xd28] sm:$0xf]  ;;  %5413 = vmatpush.bf16.msrb.mxu1 %v10737_v49  ;;  %v11697_v58 = vor.u32 %v15067_v0, %v11696_v62  ;;  %v11506_v45 = vld [vmem:[#allocation20 + $0x7e8] sm:$0xf0] }
 0x55f   :  { %v15195_v5 = vld [vmem:[#allocation20 + $0xd64] sm:$0xf0]  ;;  %v11509_v53 = vor.u32 %v15011_v13, %v11506_v45  ;;  %v11442_v62 = vld [vmem:[#allocation20 + $0x768] sm:$0xf0] }
 0x560   :  { %5451 = vmatpush.bf16.msra.mxu0 %v12337_v43  ;;  %5426 = vmatpush.bf16.msrb.mxu2 %v11249_v51  ;;  %v10608_v52 = vld [vmem:[#allocation20 + $0xa8] sm:$0xf]  ;;  %v12209_v12 = vor.u32 %v15195_v5, %v12208_v2  ;;  %v15139_v43 = vld [vmem:[#allocation20 + $0xbac] sm:$0xf]  ;;  %v10997_v51 = vor.u32 %v14883_v41, %v10994_v42 }
 0x561   :  { %v14795_v3 = vld [vmem:[#allocation20 + $0xe4] sm:$0xf0]  ;;  %v15123_v0 = vld [vmem:[#allocation20 + $0xb2c] sm:$0xf] }
 0x562   :  { %5439 = vmatpush.bf16.msrb.mxu3 %v11761_v55  ;;  %v11120_v14 = vld [vmem:[#allocation20 + $0x4a8] sm:$0xf]  ;;  %5414 = vmatpush.bf16.msrb.mxu1 %v10673_v7  ;;  %v10609_v8 = vor.u32 %v14795_v3, %v10608_v52  ;;  %v10930_v55 = vld [vmem:[#allocation20 + $0x368] sm:$0xf0]  ;;  %v11445_v7 = vor.u32 %v14995_v23, %v11442_v62 }
 0x563   :  { %v14923_v15 = vld [vmem:[#allocation20 + $0x4e4] sm:$0xf0]  ;;  %v11954_v2 = vld [vmem:[#allocation20 + $0xb68] sm:$0xf0]  ;;  %v10933_v6 = vor.u32 %v14867_v54, %v10930_v55 }
 0x564   :  { %5452 = vmatpush.bf16.msra.mxu0 %v12273_v31  ;;  %v11632_v16 = vld [vmem:[#allocation20 + $0x8a8] sm:$0xf]  ;;  %5427 = vmatpush.bf16.msrb.mxu2 %v11185_v10  ;;  %v11121_v30 = vor.u32 %v14923_v15, %v11120_v14  ;;  %v12021_v31 = vor.u32 %v15139_v43, %v12018_v46  ;;  %v15251_v5 = vld [vmem:[#allocation20 + $0xf2c] sm:$0xf]  ;;  %v11957_v3 = vor.u32 %v15123_v0, %v11954_v2 }
 0x565   :  { %v15051_v17 = vld [vmem:[#allocation20 + $0x8e4] sm:$0xf0]  ;;  %v14851_v10 = vld [vmem:[#allocation20 + $0x2ac] sm:$0xf] }
 0x566   :  { %v12144_v20 = vld [vmem:[#allocation20 + $0xca8] sm:$0xf]  ;;  %5440 = vmatpush.bf16.msrb.mxu3 %v11697_v58  ;;  %v11633_v4 = vor.u32 %v15051_v17, %v11632_v16  ;;  %5415 = vmatpush.bf16.msrb.mxu1 %v10609_v8  ;;  %v10866_v52 = vld [vmem:[#allocation20 + $0x2e8] sm:$0xf0]  ;;  %v12469_v58 = vor.u32 %v15251_v5, %v12466_v50 }
 0x567   :  { %v15179_v21 = vld [vmem:[#allocation20 + $0xce4] sm:$0xf0]  ;;  %v11378_v14 = vld [vmem:[#allocation20 + $0x6e8] sm:$0xf0] }
 0x568   :  { %v10544_v29 = vld [vmem:[#allocation20 + $0x28] sm:$0xf]  ;;  %5453 = vmatpush.bf16.msra.mxu0 %v12209_v12  ;;  %v12145_v19 = vor.u32 %v15179_v21, %v12144_v20  ;;  %5428 = vmatpush.bf16.msrb.mxu2 %v11121_v30  ;;  %v14979_v12 = vld [vmem:[#allocation20 + $0x6ac] sm:$0xf]  ;;  %v10869_v21 = vor.u32 %v14851_v10, %v10866_v52 }
 0x569   :  { %v14779_v1 = vld [vmem:[#allocation20 + $0x64] sm:$0xf0]  ;;  %v15107_v15 = vld [vmem:[#allocation20 + $0xaac] sm:$0xf] }
 0x56a   :  { %v11056_v32 = vld [vmem:[#allocation20 + $0x428] sm:$0xf]  ;;  %v10545_v59 = vor.u32 %v14779_v1, %v10544_v29  ;;  %5441 = vmatpush.bf16.msrb.mxu3 %v11633_v4  ;;  %v11890_v16 = vld [vmem:[#allocation20 + $0xae8] sm:$0xf0]  ;;  %v11381_v29 = vor.u32 %v14979_v12, %v11378_v14  ;;  %v16672_v35 = vpop.f32.mrf.mxu0 }
 0x56b   :  { %v14907_v28 = vld [vmem:[#allocation20 + $0x464] sm:$0xf0]  ;;  %v15235_v17 = vld [vmem:[#allocation20 + $0xeac] sm:$0xf]  ;;  %v11893_v1 = vor.u32 %v15107_v15, %v11890_v16 }
 0x56c   :  { %v11568_v9 = vld [vmem:[#allocation20 + $0x828] sm:$0xf]  ;;  %v11057_v44 = vor.u32 %v14907_v28, %v11056_v32  ;;  %5454 = vmatpush.bf16.msra.mxu0 %v12145_v19  ;;  %5416 = vmatpush.bf16.msrb.mxu1 %v10545_v59  ;;  %v12402_v20 = vld [vmem:[#allocation20 + $0xee8] sm:$0xf0] }
 0x56d   :  { %v15035_v26 = vld [vmem:[#allocation20 + $0x864] sm:$0xf0]  ;;  %v14835_v8 = vld [vmem:[#allocation20 + $0x22c] sm:$0xf]  ;;  %v12405_v32 = vor.u32 %v15235_v17, %v12402_v20 }
 0x56e   :  { %v12080_v34 = vld [vmem:[#allocation20 + $0xc28] sm:$0xf]  ;;  %v11569_v48 = vor.u32 %v15035_v26, %v11568_v9  ;;  %5429 = vmatpush.bf16.msrb.mxu2 %v11057_v44  ;;  %v10802_v30 = vld [vmem:[#allocation20 + $0x268] sm:$0xf0]  ;;  %v16676_v2 = vpop.f32.mrf.mxu3 }
 0x56f   :  { %v15163_v36 = vld [vmem:[#allocation20 + $0xc64] sm:$0xf0]  ;;  %5417 = vmatmul.bf16.vlgmr.msrb.gmra.mxu1 %v16593_v37  ;;  %v14963_v28 = vld [vmem:[#allocation20 + $0x62c] sm:$0xf] }
 0x570   :  { %v12081_v49 = vor.u32 %v15163_v36, %v12080_v34  ;;  %5442 = vmatpush.bf16.msrb.mxu3 %v11569_v48  ;;  %5461 = vmatpush.bf16.msra.mxu1 %v10997_v51  ;;  %v11314_v4 = vld [vmem:[#allocation20 + $0x668] sm:$0xf0]  ;;  %v16670_v34 = vpop.f32.mrf.mxu1  ;;  %v10805_v36 = vor.u32 %v14835_v8, %v10802_v30 }
 0x571   :  { %5430 = vmatmul.bf16.vlgmr.msrb.gmra.mxu2 %v16595_v38  ;;  %v15091_v19 = vld [vmem:[#allocation20 + $0xa2c] sm:$0xf]  ;;  %v11317_v41 = vor.u32 %v14963_v28, %v11314_v4 }
 0x572   :  { %5455 = vmatpush.bf16.msra.mxu0 %v12081_v49  ;;  %5474 = vmatpush.bf16.msra.mxu2 %v11509_v53  ;;  %v15219_v9 = vld [vmem:[#allocation20 + $0xe2c] sm:$0xf]  ;;  %v11829_v45 = vor.u32 %v15091_v19, %v11826_v22  ;;  %v5251_v10 = vpop.f32.mrf.mxu0 }
 0x573   :  { %5443 = vmatmul.bf16.vlgmr.msrb.gmra.mxu3 %v16597_v39  ;;  %v12338_v26 = vld [vmem:[#allocation20 + $0xe68] sm:$0xf0]  ;;  %v11448_v10 = vld [vmem:[#allocation20 + $0x730] sm:$0xf] }
 0x574   :  { %5487 = vmatpush.bf16.msra.mxu3 %v12021_v31  ;;  %5462 = vmatpush.bf16.msra.mxu1 %v10933_v6  ;;  %v14819_v42 = vld [vmem:[#allocation20 + $0x1ac] sm:$0xf]  ;;  %v12341_v43 = vor.u32 %v15219_v9, %v12338_v26 }
 0x575   :  { %5456 = vmatmul.bf16.vlgmr.msra.gmra.mxu0 %v16599_v40  ;;  %v10738_v13 = vld [vmem:[#allocation20 + $0x1e8] sm:$0xf0] }
 0x576   :  { %5500 = vmatpush.bf16.msrb.mxu0 %v12533_v61  ;;  %5475 = vmatpush.bf16.msra.mxu2 %v11445_v7  ;;  %v14947_v59 = vld [vmem:[#allocation20 + $0x5ac] sm:$0xf]  ;;  %v10741_v49 = vor.u32 %v14819_v42, %v10738_v13  ;;  %v16674_v61 = vpop.f32.mrf.mxu2  ;;  %v5238_v13 = vpop.f32.mrf.mxu3 }
 0x577   :  { %v11250_v44 = vld [vmem:[#allocation20 + $0x5e8] sm:$0xf0] }
 0x578   :  { %5488 = vmatpush.bf16.msra.mxu3 %v11957_v3  ;;  %5463 = vmatpush.bf16.msra.mxu1 %v10869_v21  ;;  %v15075_v46 = vld [vmem:[#allocation20 + $0x9ac] sm:$0xf]  ;;  %v11253_v51 = vor.u32 %v14947_v59, %v11250_v44  ;;  %v5212_v7 = vpop.f32.mrf.mxu1  ;;  %v14892_v59 = vld [vmem:[#allocation20 + $0x3ec] sm:$0xf0] }
 0x579   :  { %v11762_v24 = vld [vmem:[#allocation20 + $0x9e8] sm:$0xf0]  ;;  %v11512_v44 = vld [vmem:[#allocation20 + $0x7b0] sm:$0xf] }
 0x57a   :  { %5501 = vmatpush.bf16.msrb.mxu0 %v12469_v58  ;;  %5476 = vmatpush.bf16.msra.mxu2 %v11381_v29  ;;  %v15203_v47 = vld [vmem:[#allocation20 + $0xdac] sm:$0xf]  ;;  %v11765_v55 = vor.u32 %v15075_v46, %v11762_v24  ;;  %v15020_v46 = vld [vmem:[#allocation20 + $0x7ec] sm:$0xf0] }
 0x57b   :  { %v12274_v48 = vld [vmem:[#allocation20 + $0xde8] sm:$0xf0]  ;;  %v12024_v24 = vld [vmem:[#allocation20 + $0xbb0] sm:$0xf] }
 0x57c   :  { %5489 = vmatpush.bf16.msra.mxu3 %v11893_v1  ;;  %5464 = vmatpush.bf16.msra.mxu1 %v10805_v36  ;;  %v14803_v53 = vld [vmem:[#allocation20 + $0x12c] sm:$0xf]  ;;  %v12277_v31 = vor.u32 %v15203_v47, %v12274_v48 }
 0x57d   :  { %v10674_v54 = vld [vmem:[#allocation20 + $0x168] sm:$0xf0] }
 0x57e   :  { %5502 = vmatpush.bf16.msrb.mxu0 %v12405_v32  ;;  %5477 = vmatpush.bf16.msra.mxu2 %v11317_v41  ;;  %v14931_v23 = vld [vmem:[#allocation20 + $0x52c] sm:$0xf]  ;;  %v10677_v52 = vor.u32 %v14803_v53, %v10674_v54  ;;  %v5225_v26 = vpop.f32.mrf.mxu2  ;;  %v15276_v53 = vld [vmem:[#allocation20 + $0xfec] sm:$0xf0] }
 0x57f   :  { %v11186_v62 = vld [vmem:[#allocation20 + $0x568] sm:$0xf0] }
 0x580   :  { %5490 = vmatpush.bf16.msra.mxu3 %v11829_v45  ;;  %v15059_v0 = vld [vmem:[#allocation20 + $0x92c] sm:$0xf]  ;;  %5465 = vmatpush.bf16.msra.mxu1 %v10741_v49  ;;  %v11189_v3 = vor.u32 %v14931_v23, %v11186_v62  ;;  %v15148_v49 = vld [vmem:[#allocation20 + $0xbec] sm:$0xf0] }
 0x581   :  { %v11698_v5 = vld [vmem:[#allocation20 + $0x968] sm:$0xf0] }
 0x582   :  { %5503 = vmatpush.bf16.msrb.mxu0 %v12341_v43  ;;  %v15187_v50 = vld [vmem:[#allocation20 + $0xd2c] sm:$0xf]  ;;  %5478 = vmatpush.bf16.msra.mxu2 %v11253_v51  ;;  %v11701_v14 = vor.u32 %v15059_v0, %v11698_v5  ;;  %v11000_v43 = vld [vmem:[#allocation20 + $0x3b0] sm:$0xf]  ;;  %v11513_v0 = vor.u32 %v15020_v46, %v11512_v44 }
 0x583   :  { %v12210_v6 = vld [vmem:[#allocation20 + $0xd68] sm:$0xf0]  ;;  %v12536_v51 = vld [vmem:[#allocation20 + $0xfb0] sm:$0xf]  ;;  %v11001_v62 = vor.u32 %v14892_v59, %v11000_v43 }
 0x584   :  { %v14787_v58 = vld [vmem:[#allocation20 + $0xac] sm:$0xf]  ;;  %5491 = vmatpush.bf16.msra.mxu3 %v11765_v55  ;;  %v12213_v15 = vor.u32 %v15187_v50, %v12210_v6  ;;  %5466 = vmatpush.bf16.msra.mxu1 %v10677_v52  ;;  %v10936_v5 = vld [vmem:[#allocation20 + $0x330] sm:$0xf]  ;;  %v12025_v6 = vor.u32 %v15148_v49, %v12024_v24  ;;  %v12537_v7 = vor.u32 %v15276_v53, %v12536_v51 }
 0x585   :  { %v10610_v12 = vld [vmem:[#allocation20 + $0xe8] sm:$0xf0]  ;;  %v14876_v50 = vld [vmem:[#allocation20 + $0x36c] sm:$0xf0] }
 0x586   :  { %5504 = vmatpush.bf16.msrb.mxu0 %v12277_v31  ;;  %v14915_v16 = vld [vmem:[#allocation20 + $0x4ac] sm:$0xf]  ;;  %5479 = vmatpush.bf16.msra.mxu2 %v11189_v3  ;;  %v10613_v1 = vor.u32 %v14787_v58, %v10610_v12  ;;  %v16678_v31 = vld [vmem:[#allocation22] sm:$0xff]  ;;  %v15004_v52 = vld [vmem:[#allocation20 + $0x76c] sm:$0xf0]  ;;  %v5262_v49 = vpop.f32.mrf.mxu1 }
 0x587   :  { %v11122_v17 = vld [vmem:[#allocation20 + $0x4e8] sm:$0xf0]  ;;  %v2302_v23 = vperm.slane %v16678_v31, 5  ;;  %v11960_v3 = vld [vmem:[#allocation20 + $0xb30] sm:$0xf]  ;;  %v2304_v51 = vperm.slane %v16678_v31, 7 }
 0x588   :  { %v15043_v20 = vld [vmem:[#allocation20 + $0x8ac] sm:$0xf]  ;;  %v11125_v32 = vor.u32 %v14915_v16, %v11122_v17  ;;  %5492 = vmatpush.bf16.msra.mxu3 %v11701_v14  ;;  %5467 = vmatpush.bf16.msra.mxu1 %v10613_v1  ;;  %v15132_v58 = vld [vmem:[#allocation20 + $0xb6c] sm:$0xf0]  ;;  %v10937_v16 = vor.u32 %v14876_v50, %v10936_v5  ;;  %v11449_v17 = vor.u32 %v15004_v52, %v11448_v10 }
 0x589   :  { %v11634_v21 = vld [vmem:[#allocation20 + $0x8e8] sm:$0xf0]  ;;  %v12472_v12 = vld [vmem:[#allocation20 + $0xf30] sm:$0xf] }
 0x58a   :  { %v15171_v29 = vld [vmem:[#allocation20 + $0xcac] sm:$0xf]  ;;  %5505 = vmatpush.bf16.msrb.mxu0 %v12213_v15  ;;  %v11637_v22 = vor.u32 %v15043_v20, %v11634_v21  ;;  %5480 = vmatpush.bf16.msra.mxu2 %v11125_v32  ;;  %v15260_v14 = vld [vmem:[#allocation20 + $0xf6c] sm:$0xf0]  ;;  %v2303_v15 = vperm.slane %v16678_v31, 6 }
 0x58b   :  { %v12146_v8 = vld [vmem:[#allocation20 + $0xce8] sm:$0xf0]  ;;  %v10872_v20 = vld [vmem:[#allocation20 + $0x2b0] sm:$0xf] }
 0x58c   :  { %v14771_v30 = vld [vmem:[#allocation20 + $0x2c] sm:$0xf]  ;;  %v12149_v9 = vor.u32 %v15171_v29, %v12146_v8  ;;  %5493 = vmatpush.bf16.msra.mxu3 %v11637_v22  ;;  %v14860_v21 = vld [vmem:[#allocation20 + $0x2ec] sm:$0xf0]  ;;  %v5159_v29 = vadd.f32 %v16658_v33, %v2302_v23  ;;  %v11961_v8 = vor.u32 %v15132_v58, %v11960_v3  ;;  %v5211_v33 = vadd.f32 %v16670_v34, %v2303_v15  ;;  %v5301_v53 = vpop.f32.mrf.mxu0 }
 0x58d   :  { %v10546_v28 = vld [vmem:[#allocation20 + $0x68] sm:$0xf0]  ;;  %v11384_v1 = vld [vmem:[#allocation20 + $0x6b0] sm:$0xf]  ;;  %v10873_v26 = vor.u32 %v14860_v21, %v10872_v20  ;;  %v5723_v34 = vadd.f32 %v16631_v18, %v16628_v11 }
 0x58e   :  { %v14899_v4 = vld [vmem:[#allocation20 + $0x42c] sm:$0xf]  ;;  %v10549_v47 = vor.u32 %v14771_v30, %v10546_v28  ;;  %5506 = vmatpush.bf16.msrb.mxu0 %v12149_v9  ;;  %v12473_v30 = vor.u32 %v15260_v14, %v12472_v12  ;;  %v14988_v32 = vld [vmem:[#allocation20 + $0x6ec] sm:$0xf0]  ;;  %v5172_v9 = vadd.f32 %v16662_v60, %v5159_v29  ;;  %v5224_v60 = vadd.f32 %v16674_v61, %v5211_v33  ;;  %v5275_v29 = vpop.f32.mrf.mxu2 }
 0x58f   :  { %v11058_v19 = vld [vmem:[#allocation20 + $0x468] sm:$0xf0]  ;;  %v11896_v28 = vld [vmem:[#allocation20 + $0xab0] sm:$0xf]  ;;  %v5724_v61 = vadd.f32 %v5723_v34, %v16638_v56  ;;  %v5263_v12 = vadd.f32 %v5262_v49, %v2304_v51 }
 0x590   :  { %v15027_v36 = vld [vmem:[#allocation20 + $0x82c] sm:$0xf]  ;;  %v11061_v48 = vor.u32 %v14899_v4, %v11058_v19  ;;  %5468 = vmatpush.bf16.msra.mxu1 %v10549_v47  ;;  %v15116_v4 = vld [vmem:[#allocation20 + $0xaec] sm:$0xf0] }
 0x591   :  { %v11570_v41 = vld [vmem:[#allocation20 + $0x868] sm:$0xf0]  ;;  %v12408_v19 = vld [vmem:[#allocation20 + $0xeb0] sm:$0xf]  ;;  %v11897_v13 = vor.u32 %v15116_v4, %v11896_v28  ;;  %v5725_v31 = vadd.f32 %v5724_v61, %v16645_v27  ;;  %v5288_v28 = vpop.f32.mrf.mxu3 }
 0x592   :  { %v15155_v42 = vld [vmem:[#allocation20 + $0xc2c] sm:$0xf]  ;;  %v11573_v54 = vor.u32 %v15027_v36, %v11570_v41  ;;  %5481 = vmatpush.bf16.msra.mxu2 %v11061_v48  ;;  %v15244_v22 = vld [vmem:[#allocation20 + $0xeec] sm:$0xf0]  ;;  %v11385_v36 = vor.u32 %v14988_v32, %v11384_v1  ;;  %v5185_v48 = vadd.f32 %v16664_v63, %v5172_v9  ;;  %v5237_v63 = vadd.f32 %v16676_v2, %v5224_v60  ;;  %v5264_v9 = vpop.f32.mrf.mxu1 }
 0x593   :  { %v12082_v45 = vld [vmem:[#allocation20 + $0xc68] sm:$0xf0]  ;;  %5469 = vmatmul.bf16.vlgmr.msra.gmra.mxu1 %v16593_v37  ;;  %v10808_v41 = vld [vmem:[#allocation20 + $0x230] sm:$0xf]  ;;  %v5726_v20 = vadd.f32 %v5725_v31, %v16652_v25  ;;  %v5276_v32 = vadd.f32 %v5275_v29, %v5263_v12  ;;  %v15012_v31 = vld [vmem:[#allocation20 + $0x7b4] sm:$0xf] }
 0x594   :  { %v12085_v55 = vor.u32 %v15155_v42, %v12082_v45  ;;  %5494 = vmatpush.bf16.msra.mxu3 %v11573_v54  ;;  %5513 = vmatpush.bf16.msrb.mxu1 %v11001_v62  ;;  %v14844_v42 = vld [vmem:[#allocation20 + $0x26c] sm:$0xf0]  ;;  %v12409_v45 = vor.u32 %v15244_v22, %v12408_v19  ;;  %v16698_v58 = vadd.f32 %v16660_v57, %v5185_v48  ;;  %v11514_v12 = vld [vmem:[#allocation20 + $0x7f0] sm:$0xf0] }
 0x595   :  { %5482 = vmatmul.bf16.vlgmr.msra.gmra.mxu2 %v16595_v38  ;;  %v11320_v43 = vld [vmem:[#allocation20 + $0x630] sm:$0xf]  ;;  %v10809_v54 = vor.u32 %v14844_v42, %v10808_v41  ;;  %v16702_v57 = vadd.f32 %v16672_v35, %v5237_v63  ;;  %v15124_v9 = vld [vmem:[#allocation20 + $0xb34] sm:$0xf] }
 0x596   :  { %5507 = vmatpush.bf16.msrb.mxu0 %v12085_v55  ;;  %5526 = vmatpush.bf16.msrb.mxu2 %v11513_v0  ;;  %v14972_v59 = vld [vmem:[#allocation20 + $0x66c] sm:$0xf0]  ;;  %v5727_v33 = vadd.f32 %v5726_v20, %v16698_v58  ;;  %v15268_v20 = vld [vmem:[#allocation20 + $0xfb4] sm:$0xf] }
 0x597   :  { %5495 = vmatmul.bf16.vlgmr.msra.gmra.mxu3 %v16597_v39  ;;  %v11832_v44 = vld [vmem:[#allocation20 + $0xa30] sm:$0xf]  ;;  %v11321_v55 = vor.u32 %v14972_v59, %v11320_v43 }
 0x598   :  { %5539 = vmatpush.bf16.msrb.mxu3 %v12025_v6  ;;  %5514 = vmatpush.bf16.msrb.mxu1 %v10937_v16  ;;  %v15100_v46 = vld [vmem:[#allocation20 + $0xa6c] sm:$0xf0]  ;;  %v5728_v48 = vadd.f32 %v5727_v33, %v16702_v57  ;;  %v11962_v33 = vld [vmem:[#allocation20 + $0xb70] sm:$0xf0] }
 0x599   :  { %5508 = vmatmul.bf16.vlgmr.msrb.gmra.mxu0 %v16599_v40  ;;  %v12344_v24 = vld [vmem:[#allocation20 + $0xe30] sm:$0xf]  ;;  %v11833_v0 = vor.u32 %v15100_v46, %v11832_v44  ;;  %v5290_v63 = vpop.f32.mrf.mxu3 }
 0x59a   :  { %5552 = vmatpush.bf16.msra.mxu0 %v12537_v7  ;;  %5527 = vmatpush.bf16.msrb.mxu2 %v11449_v17  ;;  %v15228_v47 = vld [vmem:[#allocation20 + $0xe6c] sm:$0xf0] }
 0x59b   :  { %v10744_v23 = vld [vmem:[#allocation20 + $0x1b0] sm:$0xf]  ;;  %v12345_v5 = vor.u32 %v15228_v47, %v12344_v24 }
 0x59c   :  { %5540 = vmatpush.bf16.msrb.mxu3 %v11961_v8  ;;  %5515 = vmatpush.bf16.msrb.mxu1 %v10873_v26  ;;  %v14828_v62 = vld [vmem:[#allocation20 + $0x1ec] sm:$0xf0]  ;;  %v5289_v26 = vadd.f32 %v5288_v28, %v5276_v32  ;;  %v10938_v32 = vld [vmem:[#allocation20 + $0x370] sm:$0xf0] }
 0x59d   :  { %v11256_v50 = vld [vmem:[#allocation20 + $0x5b0] sm:$0xf]  ;;  %v10745_v14 = vor.u32 %v14828_v62, %v10744_v23 }
 0x59e   :  { %5553 = vmatpush.bf16.msra.mxu0 %v12473_v30  ;;  %5528 = vmatpush.bf16.msrb.mxu2 %v11385_v36  ;;  %v14956_v6 = vld [vmem:[#allocation20 + $0x5ec] sm:$0xf0]  ;;  %v5303_v36 = vpop.f32.mrf.mxu0  ;;  %v16705_v34 = vadd.f32 %v5301_v53, %v5289_v26  ;;  %v15252_v26 = vld [vmem:[#allocation20 + $0xf34] sm:$0xf] }
 0x59f   :  { %v11768_v7 = vld [vmem:[#allocation20 + $0x9b0] sm:$0xf]  ;;  %v11257_v15 = vor.u32 %v14956_v6, %v11256_v50  ;;  %v5277_v50 = vpop.f32.mrf.mxu2  ;;  %v12474_v36 = vld [vmem:[#allocation20 + $0xf70] sm:$0xf0] }
 0x5a0   :  { %5541 = vmatpush.bf16.msrb.mxu3 %v11897_v13  ;;  %v15084_v10 = vld [vmem:[#allocation20 + $0x9ec] sm:$0xf0]  ;;  %5516 = vmatpush.bf16.msrb.mxu1 %v10809_v54  ;;  %v11834_v50 = vld [vmem:[#allocation20 + $0xa70] sm:$0xf0] }
 0x5a1   :  { %v12280_v52 = vld [vmem:[#allocation20 + $0xdb0] sm:$0xf]  ;;  %v11769_v2 = vor.u32 %v15084_v10, %v11768_v7 }
 0x5a2   :  { %5554 = vmatpush.bf16.msra.mxu0 %v12409_v45  ;;  %v15212_v3 = vld [vmem:[#allocation20 + $0xdec] sm:$0xf0]  ;;  %5529 = vmatpush.bf16.msrb.mxu2 %v11321_v55  ;;  %v5729_v55 = vadd.f32 %v5728_v48, %v16705_v34 }
 0x5a3   :  { %v10680_v16 = vld [vmem:[#allocation20 + $0x130] sm:$0xf]  ;;  %v12281_v21 = vor.u32 %v15212_v3, %v12280_v52  ;;  %v14884_v52 = vld [vmem:[#allocation20 + $0x3b4] sm:$0xf] }
 0x5a4   :  { %v14812_v17 = vld [vmem:[#allocation20 + $0x16c] sm:$0xf0]  ;;  %5542 = vmatpush.bf16.msrb.mxu3 %v11833_v0  ;;  %5517 = vmatpush.bf16.msrb.mxu1 %v10745_v14  ;;  %v11002_v3 = vld [vmem:[#allocation20 + $0x3f0] sm:$0xf0] }
 0x5a5   :  { %v11192_v8 = vld [vmem:[#allocation20 + $0x530] sm:$0xf]  ;;  %v10681_v41 = vor.u32 %v14812_v17, %v10680_v16  ;;  %5730 = vadd.xlane.f32.xlu2 %v5729_v55  ;;  %v15140_v14 = vld [vmem:[#allocation20 + $0xbb4] sm:$0xf] }
 0x5a6   :  { %5555 = vmatpush.bf16.msra.mxu0 %v12345_v5  ;;  %v14940_v30 = vld [vmem:[#allocation20 + $0x56c] sm:$0xf0]  ;;  %5530 = vmatpush.bf16.msrb.mxu2 %v11257_v15  ;;  %v12026_v17 = vld [vmem:[#allocation20 + $0xbf0] sm:$0xf0] }
 0x5a7   :  { %v11704_v1 = vld [vmem:[#allocation20 + $0x930] sm:$0xf]  ;;  %v11193_v42 = vor.u32 %v14940_v30, %v11192_v8  ;;  %v11005_v8 = vor.u32 %v14884_v52, %v11002_v3  ;;  %v11517_v30 = vor.u32 %v15012_v31, %v11514_v12  ;;  %v12029_v28 = vor.u32 %v15140_v14, %v12026_v17  ;;  %v10810_v55 = vld [vmem:[#allocation20 + $0x270] sm:$0xf0] }
 0x5a8   :  { %v15068_v4 = vld [vmem:[#allocation20 + $0x96c] sm:$0xf0]  ;;  %5543 = vmatpush.bf16.msrb.mxu3 %v11769_v2  ;;  %5518 = vmatpush.bf16.msrb.mxu1 %v10681_v41  ;;  %v12538_v2 = vld [vmem:[#allocation20 + $0xff0] sm:$0xf0] }
 0x5a9   :  { %v12216_v19 = vld [vmem:[#allocation20 + $0xd30] sm:$0xf]  ;;  %v11705_v35 = vor.u32 %v15068_v4, %v11704_v1  ;;  %v14868_v1 = vld [vmem:[#allocation20 + $0x334] sm:$0xf]  ;;  %v12541_v4 = vor.u32 %v15268_v20, %v12538_v2 }
 0x5aa   :  { %v15196_v22 = vld [vmem:[#allocation20 + $0xd6c] sm:$0xf0]  ;;  %5556 = vmatpush.bf16.msra.mxu0 %v12281_v21  ;;  %5531 = vmatpush.bf16.msrb.mxu2 %v11193_v42  ;;  %v10941_v41 = vor.u32 %v14868_v1, %v10938_v32  ;;  %v14820_v31 = vld [vmem:[#allocation20 + $0x1b4] sm:$0xf] }
 0x5ab   :  { %v10616_v13 = vld [vmem:[#allocation20 + $0xb0] sm:$0xf]  ;;  %v12217_v43 = vor.u32 %v15196_v22, %v12216_v19  ;;  %v14996_v19 = vld [vmem:[#allocation20 + $0x734] sm:$0xf] }
 0x5ac   :  { %v14796_v45 = vld [vmem:[#allocation20 + $0xec] sm:$0xf0]  ;;  %5544 = vmatpush.bf16.msrb.mxu3 %v11705_v35  ;;  %v11450_v22 = vld [vmem:[#allocation20 + $0x770] sm:$0xf0]  ;;  %v11965_v35 = vor.u32 %v15124_v9, %v11962_v33 }
 0x5ad   :  { %v11128_v59 = vld [vmem:[#allocation20 + $0x4b0] sm:$0xf]  ;;  %v10617_v51 = vor.u32 %v14796_v45, %v10616_v13  ;;  %v11453_v42 = vor.u32 %v14996_v19, %v11450_v22  ;;  %v14852_v13 = vld [vmem:[#allocation20 + $0x2b4] sm:$0xf] }
 0x5ae   :  { %v14924_v44 = vld [vmem:[#allocation20 + $0x4ec] sm:$0xf0]  ;;  %5557 = vmatpush.bf16.msra.mxu0 %v12217_v43  ;;  %v10874_v45 = vld [vmem:[#allocation20 + $0x2f0] sm:$0xf0]  ;;  %v12477_v43 = vor.u32 %v15252_v26, %v12474_v36 }
 0x5af   :  { %v11640_v60 = vld [vmem:[#allocation20 + $0x8b0] sm:$0xf]  ;;  %v11129_v54 = vor.u32 %v14924_v44, %v11128_v59  ;;  %5519 = vmatpush.bf16.msrb.mxu1 %v10617_v51  ;;  %v14980_v59 = vld [vmem:[#allocation20 + $0x6b4] sm:$0xf]  ;;  %v10877_v48 = vor.u32 %v14852_v13, %v10874_v45  ;;  %v16713_v51 = vld [vmem:[#allocation22 + $0x8] sm:$0xff] }
 0x5b0   :  { %v15052_v46 = vld [vmem:[#allocation20 + $0x8ec] sm:$0xf0]  ;;  %v11386_v44 = vld [vmem:[#allocation20 + $0x6f0] sm:$0xf0]  ;;  %v2305_v63 = vperm.slane %v16713_v51, 0  ;;  %v5327_v22 = vpop.f32.mrf.mxu2 }
 0x5b1   :  { %v12152_v24 = vld [vmem:[#allocation20 + $0xcb0] sm:$0xf]  ;;  %v11641_v0 = vor.u32 %v15052_v46, %v11640_v60  ;;  %5532 = vmatpush.bf16.msrb.mxu2 %v11129_v54  ;;  %v15108_v60 = vld [vmem:[#allocation20 + $0xab4] sm:$0xf] }
 0x5b2   :  { %v15180_v47 = vld [vmem:[#allocation20 + $0xcec] sm:$0xf0]  ;;  %v11898_v46 = vld [vmem:[#allocation20 + $0xaf0] sm:$0xf0] }
 0x5b3   :  { %v10552_v49 = vld [vmem:[#allocation20 + $0x30] sm:$0xf]  ;;  %v12153_v5 = vor.u32 %v15180_v47, %v12152_v24  ;;  %5545 = vmatpush.bf16.msrb.mxu3 %v11641_v0  ;;  %v15236_v24 = vld [vmem:[#allocation20 + $0xeb4] sm:$0xf] }
 0x5b4   :  { %v14780_v23 = vld [vmem:[#allocation20 + $0x6c] sm:$0xf0]  ;;  %v12410_v47 = vld [vmem:[#allocation20 + $0xef0] sm:$0xf0] }
 0x5b5   :  { %v11064_v62 = vld [vmem:[#allocation20 + $0x430] sm:$0xf]  ;;  %v10553_v15 = vor.u32 %v14780_v23, %v10552_v49  ;;  %5558 = vmatpush.bf16.msra.mxu0 %v12153_v5  ;;  %v11389_v49 = vor.u32 %v14980_v59, %v11386_v44  ;;  %v14836_v54 = vld [vmem:[#allocation20 + $0x234] sm:$0xf]  ;;  %v11901_v23 = vor.u32 %v15108_v60, %v11898_v46 }
 0x5b6   :  { %v14908_v61 = vld [vmem:[#allocation20 + $0x46c] sm:$0xf0]  ;;  %v11322_v0 = vld [vmem:[#allocation20 + $0x670] sm:$0xf0]  ;;  %v10813_v52 = vor.u32 %v14836_v54, %v10810_v55 }
 0x5b7   :  { %v11576_v6 = vld [vmem:[#allocation20 + $0x830] sm:$0xf]  ;;  %v11065_v16 = vor.u32 %v14908_v61, %v11064_v62  ;;  %5520 = vmatpush.bf16.msrb.mxu1 %v10553_v15  ;;  %v12413_v62 = vor.u32 %v15236_v24, %v12410_v47  ;;  %v14964_v61 = vld [vmem:[#allocation20 + $0x634] sm:$0xf] }
 0x5b8   :  { %v15036_v53 = vld [vmem:[#allocation20 + $0x86c] sm:$0xf0]  ;;  %v15092_v5 = vld [vmem:[#allocation20 + $0xa34] sm:$0xf]  ;;  %v11325_v3 = vor.u32 %v14964_v61, %v11322_v0 }
 0x5b9   :  { %v12088_v7 = vld [vmem:[#allocation20 + $0xc30] sm:$0xf]  ;;  %v11577_v21 = vor.u32 %v15036_v53, %v11576_v6  ;;  %5533 = vmatpush.bf16.msrb.mxu2 %v11065_v16  ;;  %v15220_v6 = vld [vmem:[#allocation20 + $0xe34] sm:$0xf]  ;;  %v11837_v14 = vor.u32 %v15092_v5, %v11834_v50 }
 0x5ba   :  { %v15164_v10 = vld [vmem:[#allocation20 + $0xc6c] sm:$0xf0]  ;;  %5521 = vmatmul.bf16.vlgmr.msrb.gmra.mxu1 %v16593_v37  ;;  %v12346_v53 = vld [vmem:[#allocation20 + $0xe70] sm:$0xf0] }
 0x5bb   :  { %v12089_v29 = vor.u32 %v15164_v10, %v12088_v7  ;;  %5546 = vmatpush.bf16.msrb.mxu3 %v11577_v21  ;;  %5565 = vmatpush.bf16.msra.mxu1 %v11005_v8  ;;  %v5314_v7 = vpop.f32.mrf.mxu1  ;;  %v5353_v10 = vpop.f32.mrf.mxu0  ;;  %v10746_v12 = vld [vmem:[#allocation20 + $0x1f0] sm:$0xf0]  ;;  %v12349_v15 = vor.u32 %v15220_v6, %v12346_v53 }
 0x5bc   :  { %5534 = vmatmul.bf16.vlgmr.msrb.gmra.mxu2 %v16595_v38  ;;  %v14948_v16 = vld [vmem:[#allocation20 + $0x5b4] sm:$0xf]  ;;  %v5315_v8 = vadd.f32 %v5314_v7, %v2305_v63 }
 0x5bd   :  { %5559 = vmatpush.bf16.msra.mxu0 %v12089_v29  ;;  %5578 = vmatpush.bf16.msra.mxu2 %v11517_v30  ;;  %v11258_v17 = vld [vmem:[#allocation20 + $0x5f0] sm:$0xf0]  ;;  %v10749_v30 = vor.u32 %v14820_v31, %v10746_v12  ;;  %v5329_v31 = vpop.f32.mrf.mxu2 }
 0x5be   :  { %5547 = vmatmul.bf16.vlgmr.msrb.gmra.mxu3 %v16597_v39  ;;  %v15076_v20 = vld [vmem:[#allocation20 + $0x9b4] sm:$0xf]  ;;  %v11261_v1 = vor.u32 %v14948_v16, %v11258_v17  ;;  %v5328_v36 = vadd.f32 %v5327_v22, %v5315_v8  ;;  %v11008_v17 = vld [vmem:[#allocation20 + $0x3b8] sm:$0xf] }
 0x5bf   :  { %5591 = vmatpush.bf16.msra.mxu3 %v12029_v28  ;;  %5566 = vmatpush.bf16.msra.mxu1 %v10941_v41  ;;  %v11770_v2 = vld [vmem:[#allocation20 + $0x9f0] sm:$0xf0]  ;;  %v5340_v41 = vpop.f32.mrf.mxu3  ;;  %v11840_v31 = vld [vmem:[#allocation20 + $0xa38] sm:$0xf] }
 0x5c0   :  { %5560 = vmatmul.bf16.vlgmr.msra.gmra.mxu0 %v16599_v40  ;;  %v15204_v21 = vld [vmem:[#allocation20 + $0xdb4] sm:$0xf] }
 0x5c1   :  { %5604 = vmatpush.bf16.msrb.mxu0 %v12541_v4  ;;  %5579 = vmatpush.bf16.msra.mxu2 %v11453_v42  ;;  %v12282_v29 = vld [vmem:[#allocation20 + $0xdf0] sm:$0xf0]  ;;  %v11773_v4 = vor.u32 %v15076_v20, %v11770_v2  ;;  %v14893_v20 = vld [vmem:[#allocation20 + $0x3f4] sm:$0xf0] }
 0x5c2   :  { %v14804_v32 = vld [vmem:[#allocation20 + $0x134] sm:$0xf]  ;;  %v12285_v19 = vor.u32 %v15204_v21, %v12282_v29  ;;  %v11520_v2 = vld [vmem:[#allocation20 + $0x7b8] sm:$0xf]  ;;  %v11009_v22 = vor.u32 %v14893_v20, %v11008_v17 }
 0x5c3   :  { %5592 = vmatpush.bf16.msra.mxu3 %v11965_v35  ;;  %5567 = vmatpush.bf16.msra.mxu1 %v10877_v48  ;;  %v10682_v28 = vld [vmem:[#allocation20 + $0x170] sm:$0xf0]  ;;  %v5316_v35 = vpop.f32.mrf.mxu1  ;;  %v5355_v59 = vpop.f32.mrf.mxu0  ;;  %v15021_v21 = vld [vmem:[#allocation20 + $0x7f4] sm:$0xf0] }
 0x5c4   :  { %v14932_v9 = vld [vmem:[#allocation20 + $0x534] sm:$0xf]  ;;  %v10685_v44 = vor.u32 %v14804_v32, %v10682_v28  ;;  %v12032_v29 = vld [vmem:[#allocation20 + $0xbb8] sm:$0xf] }
 0x5c5   :  { %5605 = vmatpush.bf16.msrb.mxu0 %v12477_v43  ;;  %5580 = vmatpush.bf16.msra.mxu2 %v11389_v49  ;;  %v11194_v33 = vld [vmem:[#allocation20 + $0x570] sm:$0xf0]  ;;  %v5341_v43 = vadd.f32 %v5340_v41, %v5328_v36  ;;  %v12544_v32 = vld [vmem:[#allocation20 + $0xfb8] sm:$0xf] }
 0x5c6   :  { %v15060_v26 = vld [vmem:[#allocation20 + $0x934] sm:$0xf]  ;;  %v11197_v60 = vor.u32 %v14932_v9, %v11194_v33  ;;  %v15277_v28 = vld [vmem:[#allocation20 + $0xff4] sm:$0xf0]  ;;  %v11521_v9 = vor.u32 %v15021_v21, %v11520_v2 }
 0x5c7   :  { %5593 = vmatpush.bf16.msra.mxu3 %v11901_v23  ;;  %5568 = vmatpush.bf16.msra.mxu1 %v10813_v52  ;;  %v11706_v42 = vld [vmem:[#allocation20 + $0x970] sm:$0xf0]  ;;  %v16716_v23 = vadd.f32 %v5353_v10, %v5341_v43  ;;  %v10944_v33 = vld [vmem:[#allocation20 + $0x338] sm:$0xf]  ;;  %v12545_v41 = vor.u32 %v15277_v28, %v12544_v32 }
 0x5c8   :  { %v15188_v13 = vld [vmem:[#allocation20 + $0xd34] sm:$0xf]  ;;  %v11709_v47 = vor.u32 %v15060_v26, %v11706_v42  ;;  %v14877_v26 = vld [vmem:[#allocation20 + $0x374] sm:$0xf0] }
 0x5c9   :  { %5606 = vmatpush.bf16.msrb.mxu0 %v12413_v62  ;;  %5581 = vmatpush.bf16.msra.mxu2 %v11325_v3  ;;  %v12218_v45 = vld [vmem:[#allocation20 + $0xd70] sm:$0xf0]  ;;  %v11456_v42 = vld [vmem:[#allocation20 + $0x738] sm:$0xf] }
 0x5ca   :  { %v14788_v46 = vld [vmem:[#allocation20 + $0xb4] sm:$0xf]  ;;  %v12221_v48 = vor.u32 %v15188_v13, %v12218_v45  ;;  %v15005_v13 = vld [vmem:[#allocation20 + $0x774] sm:$0xf0] }
 0x5cb   :  { %5594 = vmatpush.bf16.msra.mxu3 %v11837_v14  ;;  %5569 = vmatpush.bf16.msra.mxu1 %v10749_v30  ;;  %v10618_v24 = vld [vmem:[#allocation20 + $0xf0] sm:$0xf0]  ;;  %v11968_v45 = vld [vmem:[#allocation20 + $0xb38] sm:$0xf] }
 0x5cc   :  { %v14916_v49 = vld [vmem:[#allocation20 + $0x4b4] sm:$0xf]  ;;  %v10621_v50 = vor.u32 %v14788_v46, %v10618_v24  ;;  %v15133_v35 = vld [vmem:[#allocation20 + $0xb74] sm:$0xf0] }
 0x5cd   :  { %5607 = vmatpush.bf16.msrb.mxu0 %v12349_v15  ;;  %5582 = vmatpush.bf16.msra.mxu2 %v11261_v1  ;;  %v11130_v54 = vld [vmem:[#allocation20 + $0x4f0] sm:$0xf0]  ;;  %v5342_v15 = vpop.f32.mrf.mxu3  ;;  %v15149_v1 = vld [vmem:[#allocation20 + $0xbf4] sm:$0xf0] }
 0x5ce   :  { %v15044_v55 = vld [vmem:[#allocation20 + $0x8b4] sm:$0xf]  ;;  %v11133_v6 = vor.u32 %v14916_v49, %v11130_v54  ;;  %v12033_v36 = vor.u32 %v15149_v1, %v12032_v29  ;;  %v12480_v43 = vld [vmem:[#allocation20 + $0xf38] sm:$0xf]  ;;  %v5366_v15 = vpop.f32.mrf.mxu1 }
 0x5cf   :  { %5595 = vmatpush.bf16.msra.mxu3 %v11773_v4  ;;  %v11642_v62 = vld [vmem:[#allocation20 + $0x8f0] sm:$0xf0]  ;;  %5570 = vmatpush.bf16.msra.mxu1 %v10685_v44  ;;  %v15261_v59 = vld [vmem:[#allocation20 + $0xf74] sm:$0xf0]  ;;  %v10945_v44 = vor.u32 %v14877_v26, %v10944_v33 }
 0x5d0   :  { %v15172_v61 = vld [vmem:[#allocation20 + $0xcb4] sm:$0xf]  ;;  %v11645_v52 = vor.u32 %v15044_v55, %v11642_v62  ;;  %v10880_v46 = vld [vmem:[#allocation20 + $0x2b8] sm:$0xf]  ;;  %v5405_v17 = vpop.f32.mrf.mxu0 }
 0x5d1   :  { %5608 = vmatpush.bf16.msrb.mxu0 %v12285_v19  ;;  %v12154_v0 = vld [vmem:[#allocation20 + $0xcf0] sm:$0xf0]  ;;  %5583 = vmatpush.bf16.msra.mxu2 %v11197_v60  ;;  %v11457_v60 = vor.u32 %v15005_v13, %v11456_v42  ;;  %v14861_v24 = vld [vmem:[#allocation20 + $0x2f4] sm:$0xf0] }
 0x5d2   :  { %v14772_v5 = vld [vmem:[#allocation20 + $0x34] sm:$0xf]  ;;  %v12157_v3 = vor.u32 %v15172_v61, %v12154_v0  ;;  %v11392_v49 = vld [vmem:[#allocation20 + $0x6b8] sm:$0xf] }
 0x5d3   :  { %v10554_v53 = vld [vmem:[#allocation20 + $0x70] sm:$0xf0]  ;;  %5596 = vmatpush.bf16.msra.mxu3 %v11709_v47  ;;  %5571 = vmatpush.bf16.msra.mxu1 %v10621_v50  ;;  %v11969_v47 = vor.u32 %v15133_v35, %v11968_v45  ;;  %v14989_v54 = vld [vmem:[#allocation20 + $0x6f4] sm:$0xf0]  ;;  %v5379_v45 = vpop.f32.mrf.mxu2 }
 0x5d4   :  { %v14900_v7 = vld [vmem:[#allocation20 + $0x434] sm:$0xf]  ;;  %v10557_v8 = vor.u32 %v14772_v5, %v10554_v53  ;;  %v11904_v55 = vld [vmem:[#allocation20 + $0xab8] sm:$0xf]  ;;  %v10881_v5 = vor.u32 %v14861_v24, %v10880_v46  ;;  %v11393_v50 = vor.u32 %v14989_v54, %v11392_v49 }
 0x5d5   :  { %v11066_v63 = vld [vmem:[#allocation20 + $0x470] sm:$0xf0]  ;;  %5609 = vmatpush.bf16.msrb.mxu0 %v12221_v48  ;;  %5584 = vmatpush.bf16.msra.mxu2 %v11133_v6  ;;  %v12481_v48 = vor.u32 %v15261_v59, %v12480_v43  ;;  %v15117_v62 = vld [vmem:[#allocation20 + $0xaf4] sm:$0xf0] }
 0x5d6   :  { %v15028_v12 = vld [vmem:[#allocation20 + $0x834] sm:$0xf]  ;;  %v11069_v30 = vor.u32 %v14900_v7, %v11066_v63  ;;  %v12416_v61 = vld [vmem:[#allocation20 + $0xeb8] sm:$0xf]  ;;  %v11905_v7 = vor.u32 %v15117_v62, %v11904_v55 }
 0x5d7   :  { %v11578_v14 = vld [vmem:[#allocation20 + $0x870] sm:$0xf0]  ;;  %5597 = vmatpush.bf16.msra.mxu3 %v11645_v52  ;;  %5572 = vmatpush.bf16.msra.mxu1 %v10557_v8  ;;  %v15245_v0 = vld [vmem:[#allocation20 + $0xef4] sm:$0xf0] }
 0x5d8   :  { %v15156_v10 = vld [vmem:[#allocation20 + $0xc34] sm:$0xf]  ;;  %v11581_v4 = vor.u32 %v15028_v12, %v11578_v14  ;;  %v10816_v6 = vld [vmem:[#allocation20 + $0x238] sm:$0xf]  ;;  %v12417_v63 = vor.u32 %v15245_v0, %v12416_v61  ;;  %v5407_v54 = vpop.f32.mrf.mxu0 }
 0x5d9   :  { %v12090_v16 = vld [vmem:[#allocation20 + $0xc70] sm:$0xf0]  ;;  %5610 = vmatpush.bf16.msrb.mxu0 %v12157_v3  ;;  %5585 = vmatpush.bf16.msra.mxu2 %v11069_v30  ;;  %v14845_v53 = vld [vmem:[#allocation20 + $0x274] sm:$0xf0]  ;;  %v15253_v54 = vld [vmem:[#allocation20 + $0xf3c] sm:$0xf] }
 0x5da   :  { %v12093_v19 = vor.u32 %v15156_v10, %v12090_v16  ;;  %5573 = vmatmul.bf16.vlgmr.msra.gmra.mxu1 %v16593_v37  ;;  %v11328_v52 = vld [vmem:[#allocation20 + $0x638] sm:$0xf]  ;;  %v2306_v16 = vperm.slane %v16713_v51, 1  ;;  %v10817_v20 = vor.u32 %v14845_v53, %v10816_v6 }
 0x5db   :  { %5598 = vmatpush.bf16.msra.mxu3 %v11581_v4  ;;  %5617 = vmatpush.bf16.msrb.mxu1 %v11009_v22  ;;  %v14973_v3 = vld [vmem:[#allocation20 + $0x674] sm:$0xf0] }
 0x5dc   :  { %5586 = vmatmul.bf16.vlgmr.msra.gmra.mxu2 %v16595_v38  ;;  %v15101_v12 = vld [vmem:[#allocation20 + $0xa74] sm:$0xf0]  ;;  %v11329_v2 = vor.u32 %v14973_v3, %v11328_v52 }
 0x5dd   :  { %5611 = vmatpush.bf16.msrb.mxu0 %v12093_v19  ;;  %5630 = vmatpush.bf16.msrb.mxu2 %v11521_v9  ;;  %v12352_v14 = vld [vmem:[#allocation20 + $0xe38] sm:$0xf]  ;;  %v11841_v8 = vor.u32 %v15101_v12, %v11840_v31  ;;  %v5367_v9 = vadd.f32 %v5366_v15, %v2306_v16 }
 0x5de   :  { %5599 = vmatmul.bf16.vlgmr.msra.gmra.mxu3 %v16597_v39  ;;  %v15229_v10 = vld [vmem:[#allocation20 + $0xe74] sm:$0xf0] }
 0x5df   :  { %5643 = vmatpush.bf16.msrb.mxu3 %v12033_v36  ;;  %5618 = vmatpush.bf16.msrb.mxu1 %v10945_v44  ;;  %v10752_v21 = vld [vmem:[#allocation20 + $0x1b8] sm:$0xf]  ;;  %v12353_v30 = vor.u32 %v15229_v10, %v12352_v14  ;;  %v5380_v44 = vadd.f32 %v5379_v45, %v5367_v9  ;;  %v15141_v9 = vld [vmem:[#allocation20 + $0xbbc] sm:$0xf] }
 0x5e0   :  { %5612 = vmatmul.bf16.vlgmr.msrb.gmra.mxu0 %v16599_v40  ;;  %v14829_v29 = vld [vmem:[#allocation20 + $0x1f4] sm:$0xf0] }
 0x5e1   :  { %5656 = vmatpush.bf16.msra.mxu0 %v12545_v41  ;;  %5631 = vmatpush.bf16.msrb.mxu2 %v11457_v60  ;;  %v11264_v1 = vld [vmem:[#allocation20 + $0x5b8] sm:$0xf]  ;;  %v10753_v33 = vor.u32 %v14829_v29, %v10752_v21  ;;  %v5392_v60 = vpop.f32.mrf.mxu3  ;;  %v5381_v29 = vpop.f32.mrf.mxu2 }
 0x5e2   :  { %v14957_v32 = vld [vmem:[#allocation20 + $0x5f4] sm:$0xf0]  ;;  %v5393_v49 = vadd.f32 %v5392_v60, %v5380_v44  ;;  %v10946_v44 = vld [vmem:[#allocation20 + $0x378] sm:$0xf0] }
 0x5e3   :  { %5644 = vmatpush.bf16.msrb.mxu3 %v11969_v47  ;;  %5619 = vmatpush.bf16.msrb.mxu1 %v10881_v5  ;;  %v11776_v28 = vld [vmem:[#allocation20 + $0x9b8] sm:$0xf]  ;;  %v11265_v26 = vor.u32 %v14957_v32, %v11264_v1  ;;  %v11330_v29 = vld [vmem:[#allocation20 + $0x678] sm:$0xf0] }
 0x5e4   :  { %v15085_v4 = vld [vmem:[#allocation20 + $0x9f4] sm:$0xf0] }
 0x5e5   :  { %5657 = vmatpush.bf16.msra.mxu0 %v12481_v48  ;;  %5632 = vmatpush.bf16.msrb.mxu2 %v11393_v50  ;;  %v12288_v19 = vld [vmem:[#allocation20 + $0xdb8] sm:$0xf]  ;;  %v11777_v42 = vor.u32 %v15085_v4, %v11776_v28  ;;  %v5368_v48 = vpop.f32.mrf.mxu1  ;;  %v14885_v28 = vld [vmem:[#allocation20 + $0x3bc] sm:$0xf] }
 0x5e6   :  { %v15213_v22 = vld [vmem:[#allocation20 + $0xdf4] sm:$0xf0]  ;;  %v11010_v4 = vld [vmem:[#allocation20 + $0x3f8] sm:$0xf0] }
 0x5e7   :  { %5645 = vmatpush.bf16.msrb.mxu3 %v11905_v7  ;;  %5620 = vmatpush.bf16.msrb.mxu1 %v10817_v20  ;;  %v10688_v36 = vld [vmem:[#allocation20 + $0x138] sm:$0xf]  ;;  %v12289_v13 = vor.u32 %v15213_v22, %v12288_v19  ;;  %v15013_v19 = vld [vmem:[#allocation20 + $0x7bc] sm:$0xf] }
 0x5e8   :  { %v14813_v41 = vld [vmem:[#allocation20 + $0x174] sm:$0xf0]  ;;  %v11522_v22 = vld [vmem:[#allocation20 + $0x7f8] sm:$0xf0] }
 0x5e9   :  { %5658 = vmatpush.bf16.msra.mxu0 %v12417_v63  ;;  %5633 = vmatpush.bf16.msrb.mxu2 %v11329_v2  ;;  %v11200_v35 = vld [vmem:[#allocation20 + $0x538] sm:$0xf]  ;;  %v10689_v55 = vor.u32 %v14813_v41, %v10688_v36  ;;  %v16723_v63 = vadd.f32 %v5405_v17, %v5393_v49  ;;  %v5394_v1 = vpop.f32.mrf.mxu3  ;;  %v12034_v36 = vld [vmem:[#allocation20 + $0xbf8] sm:$0xf0] }
 0x5ea   :  { %v14941_v43 = vld [vmem:[#allocation20 + $0x574] sm:$0xf0]  ;;  %v15269_v41 = vld [vmem:[#allocation20 + $0xfbc] sm:$0xf]  ;;  %v12037_v60 = vor.u32 %v15141_v9, %v12034_v36 }
 0x5eb   :  { %5646 = vmatpush.bf16.msrb.mxu3 %v11841_v8  ;;  %v11712_v59 = vld [vmem:[#allocation20 + $0x938] sm:$0xf]  ;;  %5621 = vmatpush.bf16.msrb.mxu1 %v10753_v33  ;;  %v11201_v62 = vor.u32 %v14941_v43, %v11200_v35  ;;  %v11013_v35 = vor.u32 %v14885_v28, %v11010_v4  ;;  %v11525_v43 = vor.u32 %v15013_v19, %v11522_v22  ;;  %v15125_v48 = vld [vmem:[#allocation20 + $0xb3c] sm:$0xf]  ;;  %v2307_v28 = vperm.slane %v16713_v51, 2 }
 0x5ec   :  { %v15069_v46 = vld [vmem:[#allocation20 + $0x974] sm:$0xf0]  ;;  %v11970_v49 = vld [vmem:[#allocation20 + $0xb78] sm:$0xf0] }
 0x5ed   :  { %5659 = vmatpush.bf16.msra.mxu0 %v12353_v30  ;;  %v12224_v24 = vld [vmem:[#allocation20 + $0xd38] sm:$0xf]  ;;  %5634 = vmatpush.bf16.msrb.mxu2 %v11265_v26  ;;  %v11713_v5 = vor.u32 %v15069_v46, %v11712_v59  ;;  %v14869_v59 = vld [vmem:[#allocation20 + $0x33c] sm:$0xf] }
 0x5ee   :  { %v15197_v47 = vld [vmem:[#allocation20 + $0xd74] sm:$0xf0]  ;;  %v12354_v1 = vld [vmem:[#allocation20 + $0xe78] sm:$0xf0] }
 0x5ef   :  { %v10624_v61 = vld [vmem:[#allocation20 + $0xb8] sm:$0xf]  ;;  %5647 = vmatpush.bf16.msrb.mxu3 %v11777_v42  ;;  %v12225_v50 = vor.u32 %v15197_v47, %v12224_v24  ;;  %5622 = vmatpush.bf16.msrb.mxu1 %v10689_v55  ;;  %v12546_v42 = vld [vmem:[#allocation20 + $0xff8] sm:$0xf0] }
 0x5f0   :  { %v14797_v0 = vld [vmem:[#allocation20 + $0xf4] sm:$0xf0]  ;;  %v12549_v46 = vor.u32 %v15269_v41, %v12546_v42  ;;  %v14997_v24 = vld [vmem:[#allocation20 + $0x73c] sm:$0xf] }
 0x5f1   :  { %5660 = vmatpush.bf16.msra.mxu0 %v12289_v13  ;;  %v11136_v6 = vld [vmem:[#allocation20 + $0x4b8] sm:$0xf]  ;;  %5635 = vmatpush.bf16.msrb.mxu2 %v11201_v62  ;;  %v10625_v14 = vor.u32 %v14797_v0, %v10624_v61  ;;  %v11458_v47 = vld [vmem:[#allocation20 + $0x778] sm:$0xf0]  ;;  %v10949_v62 = vor.u32 %v14869_v59, %v10946_v44 }
 0x5f2   :  { %v14925_v53 = vld [vmem:[#allocation20 + $0x4f4] sm:$0xf0]  ;;  %v12482_v55 = vld [vmem:[#allocation20 + $0xf78] sm:$0xf0]  ;;  %v11461_v61 = vor.u32 %v14997_v24, %v11458_v47  ;;  %v5457_v4 = vpop.f32.mrf.mxu0 }
 0x5f3   :  { %v11648_v7 = vld [vmem:[#allocation20 + $0x8b8] sm:$0xf]  ;;  %v11137_v10 = vor.u32 %v14925_v53, %v11136_v6  ;;  %5648 = vmatpush.bf16.msrb.mxu3 %v11713_v5  ;;  %5623 = vmatpush.bf16.msrb.mxu1 %v10625_v14  ;;  %v14853_v0 = vld [vmem:[#allocation20 + $0x2bc] sm:$0xf]  ;;  %v12485_v6 = vor.u32 %v15253_v54, %v12482_v55 }
 0x5f4   :  { %v15053_v52 = vld [vmem:[#allocation20 + $0x8f4] sm:$0xf0]  ;;  %v10882_v5 = vld [vmem:[#allocation20 + $0x2f8] sm:$0xf0] }
 0x5f5   :  { %v12160_v3 = vld [vmem:[#allocation20 + $0xcb8] sm:$0xf]  ;;  %5661 = vmatpush.bf16.msra.mxu0 %v12225_v50  ;;  %v11649_v2 = vor.u32 %v15053_v52, %v11648_v7  ;;  %5636 = vmatpush.bf16.msrb.mxu2 %v11137_v10  ;;  %v11973_v50 = vor.u32 %v15125_v48, %v11970_v49  ;;  %v14981_v53 = vld [vmem:[#allocation20 + $0x6bc] sm:$0xf]  ;;  %v10885_v14 = vor.u32 %v14853_v0, %v10882_v5  ;;  %v5431_v49 = vpop.f32.mrf.mxu2 }
 0x5f6   :  { %v15181_v31 = vld [vmem:[#allocation20 + $0xcf4] sm:$0xf0]  ;;  %v11394_v7 = vld [vmem:[#allocation20 + $0x6f8] sm:$0xf0]  ;;  %v5444_v0 = vpop.f32.mrf.mxu3 }
 0x5f7   :  { %v10560_v12 = vld [vmem:[#allocation20 + $0x38] sm:$0xf]  ;;  %v12161_v21 = vor.u32 %v15181_v31, %v12160_v3  ;;  %5649 = vmatpush.bf16.msrb.mxu3 %v11649_v2  ;;  %v15109_v52 = vld [vmem:[#allocation20 + $0xabc] sm:$0xf]  ;;  %v11397_v10 = vor.u32 %v14981_v53, %v11394_v7 }
 0x5f8   :  { %v14781_v15 = vld [vmem:[#allocation20 + $0x74] sm:$0xf0]  ;;  %v11906_v3 = vld [vmem:[#allocation20 + $0xaf8] sm:$0xf0] }
 0x5f9   :  { %v11072_v16 = vld [vmem:[#allocation20 + $0x438] sm:$0xf]  ;;  %v10561_v33 = vor.u32 %v14781_v15, %v10560_v12  ;;  %5662 = vmatpush.bf16.msra.mxu0 %v12161_v21  ;;  %v15237_v31 = vld [vmem:[#allocation20 + $0xebc] sm:$0xf] }
 0x5fa   :  { %v14909_v20 = vld [vmem:[#allocation20 + $0x474] sm:$0xf0]  ;;  %v12418_v12 = vld [vmem:[#allocation20 + $0xef8] sm:$0xf0] }
 0x5fb   :  { %v11584_v8 = vld [vmem:[#allocation20 + $0x838] sm:$0xf]  ;;  %v11073_v26 = vor.u32 %v14909_v20, %v11072_v16  ;;  %5624 = vmatpush.bf16.msrb.mxu1 %v10561_v33  ;;  %v14837_v15 = vld [vmem:[#allocation20 + $0x23c] sm:$0xf]  ;;  %v11909_v20 = vor.u32 %v15109_v52, %v11906_v3  ;;  %v12421_v2 = vor.u32 %v15237_v31, %v12418_v12  ;;  %v5459_v52 = vpop.f32.mrf.mxu0 }
 0x5fc   :  { %v15037_v30 = vld [vmem:[#allocation20 + $0x874] sm:$0xf0]  ;;  %v10818_v16 = vld [vmem:[#allocation20 + $0x278] sm:$0xf0] }
 0x5fd   :  { %v12096_v17 = vld [vmem:[#allocation20 + $0xc38] sm:$0xf]  ;;  %v11585_v13 = vor.u32 %v15037_v30, %v11584_v8  ;;  %5637 = vmatpush.bf16.msrb.mxu2 %v11073_v26  ;;  %v14965_v21 = vld [vmem:[#allocation20 + $0x63c] sm:$0xf]  ;;  %v10821_v19 = vor.u32 %v14837_v15, %v10818_v16 }
 0x5fe   :  { %v15165_v32 = vld [vmem:[#allocation20 + $0xc74] sm:$0xf0]  ;;  %5625 = vmatmul.bf16.vlgmr.msrb.gmra.mxu1 %v16593_v37  ;;  %v15093_v8 = vld [vmem:[#allocation20 + $0xa3c] sm:$0xf]  ;;  %v11333_v22 = vor.u32 %v14965_v21, %v11330_v29 }
 0x5ff   :  { %v12097_v45 = vor.u32 %v15165_v32, %v12096_v17  ;;  %5650 = vmatpush.bf16.msrb.mxu3 %v11585_v13  ;;  %5669 = vmatpush.bf16.msra.mxu1 %v11013_v35  ;;  %v11842_v30 = vld [vmem:[#allocation20 + $0xa78] sm:$0xf0]  ;;  %v5418_v32 = vpop.f32.mrf.mxu1 }
 0x600   :  { %5638 = vmatmul.bf16.vlgmr.msrb.gmra.mxu2 %v16595_v38  ;;  %v15221_v17 = vld [vmem:[#allocation20 + $0xe3c] sm:$0xf]  ;;  %v11845_v26 = vor.u32 %v15093_v8, %v11842_v30  ;;  %v5419_v59 = vadd.f32 %v5418_v32, %v2307_v28 }
 0x601   :  { %5663 = vmatpush.bf16.msra.mxu0 %v12097_v45  ;;  %5682 = vmatpush.bf16.msra.mxu2 %v11525_v43  ;;  %v14821_v9 = vld [vmem:[#allocation20 + $0x1bc] sm:$0xf]  ;;  %v12357_v36 = vor.u32 %v15221_v17, %v12354_v1 }
 0x602   :  { %5651 = vmatmul.bf16.vlgmr.msrb.gmra.mxu3 %v16597_v39  ;;  %v10754_v33 = vld [vmem:[#allocation20 + $0x1f8] sm:$0xf0] }
 0x603   :  { %5695 = vmatpush.bf16.msra.mxu3 %v12037_v60  ;;  %5670 = vmatpush.bf16.msra.mxu1 %v10949_v62  ;;  %v14949_v41 = vld [vmem:[#allocation20 + $0x5bc] sm:$0xf]  ;;  %v10757_v44 = vor.u32 %v14821_v9, %v10754_v33  ;;  %v5433_v33 = vpop.f32.mrf.mxu2 }
 0x604   :  { %5664 = vmatmul.bf16.vlgmr.msra.gmra.mxu0 %v16599_v40  ;;  %v11266_v42 = vld [vmem:[#allocation20 + $0x5f8] sm:$0xf0] }
 0x605   :  { %5708 = vmatpush.bf16.msrb.mxu0 %v12549_v46  ;;  %5683 = vmatpush.bf16.msra.mxu2 %v11461_v61  ;;  %v15077_v13 = vld [vmem:[#allocation20 + $0x9bc] sm:$0xf]  ;;  %v11269_v60 = vor.u32 %v14949_v41, %v11266_v42  ;;  %v5432_v61 = vadd.f32 %v5431_v49, %v5419_v59  ;;  %v5446_v41 = vpop.f32.mrf.mxu3  ;;  %v2308_v49 = vperm.slane %v16713_v51, 3 }
 0x606   :  { %v11778_v45 = vld [vmem:[#allocation20 + $0x9f8] sm:$0xf0] }
 0x607   :  { %5696 = vmatpush.bf16.msra.mxu3 %v11973_v50  ;;  %5671 = vmatpush.bf16.msra.mxu1 %v10885_v14  ;;  %v15205_v35 = vld [vmem:[#allocation20 + $0xdbc] sm:$0xf]  ;;  %v11781_v47 = vor.u32 %v15077_v13, %v11778_v45  ;;  %v5420_v53 = vpop.f32.mrf.mxu1  ;;  %v5445_v7 = vadd.f32 %v5444_v0, %v5432_v61 }
 0x608   :  { %v12290_v43 = vld [vmem:[#allocation20 + $0xdf8] sm:$0xf0] }
 0x609   :  { %5709 = vmatpush.bf16.msrb.mxu0 %v12485_v6  ;;  %5684 = vmatpush.bf16.msra.mxu2 %v11397_v10  ;;  %v14805_v46 = vld [vmem:[#allocation20 + $0x13c] sm:$0xf]  ;;  %v12293_v48 = vor.u32 %v15205_v35, %v12290_v43  ;;  %v16730_v21 = vadd.f32 %v5457_v4, %v5445_v7 }
 0x60a   :  { %v10690_v24 = vld [vmem:[#allocation20 + $0x178] sm:$0xf0] }
 0x60b   :  { %5697 = vmatpush.bf16.msra.mxu3 %v11909_v20  ;;  %5672 = vmatpush.bf16.msra.mxu1 %v10821_v19  ;;  %v14933_v54 = vld [vmem:[#allocation20 + $0x53c] sm:$0xf]  ;;  %v10693_v3 = vor.u32 %v14805_v46, %v10690_v24  ;;  %v16313_v19 = vmov 1024.0  }
 0x60c   :  { %v11202_v55 = vld [vmem:[#allocation20 + $0x578] sm:$0xf0]  ;;  %15827 = vrcp.f32 %v16313_v19 }
 0x60d   :  { %5710 = vmatpush.bf16.msrb.mxu0 %v12421_v2  ;;  %5685 = vmatpush.bf16.msra.mxu2 %v11333_v22  ;;  %v15061_v62 = vld [vmem:[#allocation20 + $0x93c] sm:$0xf]  ;;  %v11205_v31 = vor.u32 %v14933_v54, %v11202_v55 }
 0x60e   :  { %v11714_v5 = vld [vmem:[#allocation20 + $0x978] sm:$0xf0] }
 0x60f   :  { %5698 = vmatpush.bf16.msra.mxu3 %v11845_v26  ;;  %v15189_v50 = vld [vmem:[#allocation20 + $0xd3c] sm:$0xf]  ;;  %5673 = vmatpush.bf16.msra.mxu1 %v10757_v44  ;;  %v11717_v15 = vor.u32 %v15061_v62, %v11714_v5 }
 0x610   :  { %v12226_v6 = vld [vmem:[#allocation20 + $0xd78] sm:$0xf0] }
 0x611   :  { %5711 = vmatpush.bf16.msrb.mxu0 %v12357_v36  ;;  %5686 = vmatpush.bf16.msra.mxu2 %v11269_v60  ;;  %v14789_v12 = vld [vmem:[#allocation20 + $0xbc] sm:$0xf]  ;;  %v12229_v16 = vor.u32 %v15189_v50, %v12226_v6 }
 0x612   :  { %v10626_v14 = vld [vmem:[#allocation20 + $0xf8] sm:$0xf0]  ;;  %v15828_v60 = vpop.eup %15827 }
 0x613   :  { %v14917_v10 = vld [vmem:[#allocation20 + $0x4bc] sm:$0xf]  ;;  %5699 = vmatpush.bf16.msra.mxu3 %v11781_v47  ;;  %5674 = vmatpush.bf16.msra.mxu1 %v10693_v3  ;;  %v10629_v17 = vor.u32 %v14789_v12, %v10626_v14  ;;  %v5733_v46 = vmul.f32 1024.0, %v15828_v60  ;;  %v5470_v47 = vpop.f32.mrf.mxu1  ;;  %vm5737_vm15 = vweird.f32 %v15828_v60 }
 0x614   :  { %v11138_v20 = vld [vmem:[#allocation20 + $0x4f8] sm:$0xf0]  ;;  %v5471_v62 = vadd.f32 %v5470_v47, %v2308_v49 }
 0x615   :  { %5712 = vmatpush.bf16.msrb.mxu0 %v12293_v48  ;;  %v15045_v2 = vld [vmem:[#allocation20 + $0x8bc] sm:$0xf]  ;;  %5687 = vmatpush.bf16.msra.mxu2 %v11205_v31  ;;  %v11141_v1 = vor.u32 %v14917_v10, %v11138_v20  ;;  %v5734_v24 = vsub.f32 1.0, %v5733_v46 }
 0x616   :  { %v11650_v29 = vld [vmem:[#allocation20 + $0x8f8] sm:$0xf0]  ;;  %v5509_v54 = vpop.f32.mrf.mxu0 }
 0x617   :  { %v15173_v8 = vld [vmem:[#allocation20 + $0xcbc] sm:$0xf]  ;;  %5700 = vmatpush.bf16.msra.mxu3 %v11717_v15  ;;  %v11653_v22 = vor.u32 %v15045_v2, %v11650_v29  ;;  %5675 = vmatpush.bf16.msra.mxu1 %v10629_v17  ;;  %v5735_v48 = vmul.f32 %v15828_v60, %v5734_v24 }
 0x618   :  { %v12162_v30 = vld [vmem:[#allocation20 + $0xcf8] sm:$0xf0]  ;;  %v5483_v61 = vpop.f32.mrf.mxu2 }
 0x619   :  { %v14773_v32 = vld [vmem:[#allocation20 + $0x3c] sm:$0xf]  ;;  %5713 = vmatpush.bf16.msrb.mxu0 %v12229_v16  ;;  %v12165_v9 = vor.u32 %v15173_v8, %v12162_v30  ;;  %5688 = vmatpush.bf16.msra.mxu2 %v11141_v1  ;;  %v5736_v55 = vadd.f32 %v15828_v60, %v5735_v48  ;;  %v5484_v0 = vadd.f32 %v5483_v61, %v5471_v62 }
 0x61a   :  { %v10562_v28 = vld [vmem:[#allocation20 + $0x78] sm:$0xf0]  ;;  %v5496_v5 = vpop.f32.mrf.mxu3 }
 0x61b   :  { %v14901_v26 = vld [vmem:[#allocation20 + $0x43c] sm:$0xf]  ;;  %v10565_v35 = vor.u32 %v14773_v32, %v10562_v28  ;;  %5701 = vmatpush.bf16.msra.mxu3 %v11653_v22  ;;  %v5472_v50 = vpop.f32.mrf.mxu1  ;;  %v2309_v22 = vperm.slane %v16713_v51, 4 }
 0x61c   :  { %v11074_v36 = vld [vmem:[#allocation20 + $0x478] sm:$0xf0] }
 0x61d   :  { %v15029_v4 = vld [vmem:[#allocation20 + $0x83c] sm:$0xf]  ;;  %v11077_v43 = vor.u32 %v14901_v26, %v11074_v36  ;;  %5714 = vmatpush.bf16.msrb.mxu0 %v12165_v9  ;;  %5676 = vmatpush.bf16.msra.mxu1 %v10565_v35 }
 0x61e   :  { %v11586_v42 = vld [vmem:[#allocation20 + $0x878] sm:$0xf0]  ;;  %v5511_v6 = vpop.f32.mrf.mxu0 }
 0x61f   :  { %v15157_v13 = vld [vmem:[#allocation20 + $0xc3c] sm:$0xf]  ;;  %v11589_v59 = vor.u32 %v15029_v4, %v11586_v42  ;;  %5689 = vmatpush.bf16.msra.mxu2 %v11077_v43 }
 0x620   :  { %v12098_v45 = vld [vmem:[#allocation20 + $0xc78] sm:$0xf0]  ;;  %5677 = vmatmul.bf16.vlgmr.msra.gmra.mxu1 %v16593_v37  ;;  %v16737_v37 = vsel %vm5737_vm15, %v15828_v60, %v5736_v55  ;;  %v5485_v31 = vpop.f32.mrf.mxu2 }
 0x621   :  { %v12101_v44 = vor.u32 %v15157_v13, %v12098_v45  ;;  %5702 = vmatpush.bf16.msra.mxu3 %v11589_v59  ;;  %v2310_v59 = vperm.slane %v16713_v51, 5  ;;  %v12776_v31 = vld [vmem:[#allocation26 + $0x1c0] sm:$0xf] }
 0x622   :  { %5690 = vmatmul.bf16.vlgmr.msra.gmra.mxu2 %v16595_v38  ;;  %v5497_v38 = vadd.f32 %v5496_v5, %v5484_v0  ;;  %v5498_v12 = vpop.f32.mrf.mxu3  ;;  %v2311_v5 = vperm.slane %v16713_v51, 6 }
 0x623   :  { %5715 = vmatpush.bf16.msrb.mxu0 %v12101_v44  ;;  %v15338_v12 = vld [vmem:[#allocation26 + $0x1dc] sm:$0xf0] }
 0x624   :  { %5703 = vmatmul.bf16.vlgmr.msra.gmra.mxu3 %v16597_v39  ;;  %v5731_v39 = vpop.xlane.xlu2 %5730  ;;  %v16739_v53 = vadd.f32 %v5509_v54, %v5497_v38 }
 0x626   :  { %5716 = vmatmul.bf16.vlgmr.msrb.gmra.mxu0 %v16599_v40  ;;  %v5739_v40 = vmul.f32 %v16737_v37, %v5731_v39 }
 0x628   :  { %v16743_v7 = vsub.f32 %v16628_v11, %v5739_v40  ;;  %v16746_v52 = vsub.f32 %v16631_v18, %v5739_v40  ;;  %v16749_v3 = vsub.f32 %v16638_v56, %v5739_v40  ;;  %v16752_v14 = vsub.f32 %v16645_v27, %v5739_v40 }
 0x629   :  { %v16759_v11 = vsub.f32 %v16652_v25, %v5739_v40  ;;  %v16764_v56 = vsub.f32 %v16698_v58, %v5739_v40  ;;  %v16769_v2 = vsub.f32 %v16702_v57, %v5739_v40  ;;  %v16774_v25 = vsub.f32 %v16705_v34, %v5739_v40 }
 0x62a   :  { %v5748_v10 = vmul.f32 %v16743_v7, %v16743_v7  ;;  %v5749_v15 = vmul.f32 %v16746_v52, %v16746_v52  ;;  %v5750_v18 = vmul.f32 %v16749_v3, %v16749_v3  ;;  %v5751_v27 = vmul.f32 %v16752_v14, %v16752_v14 }
 0x62b   :  { %v5752_v29 = vmul.f32 %v16759_v11, %v16759_v11  ;;  %v5753_v30 = vmul.f32 %v16764_v56, %v16764_v56  ;;  %v5754_v58 = vmul.f32 %v16769_v2, %v16769_v2  ;;  %v5755_v32 = vmul.f32 %v16774_v25, %v16774_v25 }
 0x62c   :  { %v5756_v16 = vadd.f32 %v5749_v15, %v5748_v10  ;;  %v13032_v10 = vld [vmem:[#allocation26 + $0x3c0] sm:$0xf] }
 0x62e   :  { %v5757_v20 = vadd.f32 %v5756_v16, %v5750_v18  ;;  %v12777_v18 = vor.u32 %v15338_v12, %v12776_v31  ;;  %v15402_v16 = vld [vmem:[#allocation26 + $0x3dc] sm:$0xf0] }
 0x62f   :  { %v13448_v31 = vld [vmem:[#allocation26 + $0x700] sm:$0xf] }
 0x630   :  { %v5758_v8 = vadd.f32 %v5757_v20, %v5751_v27  ;;  %v13288_v27 = vld [vmem:[#allocation26 + $0x5c0] sm:$0xf]  ;;  %8965 = vmatpush.bf16.msrb.mxu1 %v12777_v18 }
 0x631   :  { %v15466_v20 = vld [vmem:[#allocation26 + $0x5dc] sm:$0xf0] }
 0x632   :  { %v5759_v17 = vadd.f32 %v5758_v8, %v5752_v29  ;;  %v15506_v12 = vld [vmem:[#allocation26 + $0x71c] sm:$0xf0] }
 0x633   :  { %v12648_v18 = vld [vmem:[#allocation26 + $0xc0] sm:$0xf] }
 0x634   :  { %v5760_v1 = vadd.f32 %v5759_v17, %v5753_v30  ;;  %v13033_v30 = vor.u32 %v15402_v16, %v13032_v10  ;;  %v13289_v17 = vor.u32 %v15466_v20, %v13288_v27  ;;  %v15306_v16 = vld [vmem:[#allocation26 + $0xdc] sm:$0xf0]  ;;  %v13449_v20 = vor.u32 %v15506_v12, %v13448_v31 }
 0x635   :  { %v12904_v27 = vld [vmem:[#allocation26 + $0x2c0] sm:$0xf] }
 0x636   :  { %v5761_v57 = vadd.f32 %v5760_v1, %v5754_v58  ;;  %v13544_v58 = vld [vmem:[#allocation26 + $0x7c0] sm:$0xf]  ;;  %8978 = vmatpush.bf16.msrb.mxu2 %v13033_v30  ;;  %8991 = vmatpush.bf16.msrb.mxu3 %v13289_v17 }
 0x637   :  { %v5522_v19 = vpop.f32.mrf.mxu1  ;;  %v15530_v1 = vld [vmem:[#allocation26 + $0x7dc] sm:$0xf0] }
 0x638   :  { %v5762_v28 = vadd.f32 %v5761_v57, %v5755_v32  ;;  %v5523_v34 = vadd.f32 %v5522_v19, %v2309_v22  ;;  %v13545_v51 = vor.u32 %v15530_v1, %v13544_v58  ;;  %v12744_v57 = vld [vmem:[#allocation26 + $0x180] sm:$0xf]  ;;  %v12649_v1 = vor.u32 %v15306_v16, %v12648_v18 }
 0x639   :  { %v13000_v19 = vld [vmem:[#allocation26 + $0x380] sm:$0xf] }
 0x63a   :  { %5763 = vadd.xlane.f32.xlu2 %v5762_v28  ;;  %v15330_v28 = vld [vmem:[#allocation26 + $0x19c] sm:$0xf0]  ;;  %9004 = vmatpush.bf16.msra.mxu0 %v13545_v51 }
 0x63b   :  { %v12745_v22 = vor.u32 %v15330_v28, %v12744_v57  ;;  %v15434_v30 = vld [vmem:[#allocation26 + $0x4dc] sm:$0xf0] }
 0x63c   :  { %v13416_v17 = vld [vmem:[#allocation26 + $0x6c0] sm:$0xf] }
 0x63d   :  { %v5561_v9 = vpop.f32.mrf.mxu0  ;;  %8966 = vmatpush.bf16.msrb.mxu1 %v12745_v22  ;;  %v15498_v58 = vld [vmem:[#allocation26 + $0x6dc] sm:$0xf0] }
 0x63e   :  { %v12616_v28 = vld [vmem:[#allocation26 + $0x80] sm:$0xf] }
 0x63f   :  { %v5535_v33 = vpop.f32.mrf.mxu2  ;;  %v5524_v4 = vpop.f32.mrf.mxu1  ;;  %v12872_v22 = vld [vmem:[#allocation26 + $0x280] sm:$0xf] }
 0x640   :  { %v5536_v26 = vadd.f32 %v5535_v33, %v5523_v34  ;;  %v13256_v34 = vld [vmem:[#allocation26 + $0x580] sm:$0xf] }
 0x641   :  { %v5548_v36 = vpop.f32.mrf.mxu3  ;;  %v15458_v33 = vld [vmem:[#allocation26 + $0x59c] sm:$0xf0] }
 0x642   :  { %v5549_v41 = vadd.f32 %v5548_v36, %v5536_v26  ;;  %v13257_v36 = vor.u32 %v15458_v33, %v13256_v34  ;;  %v13512_v4 = vld [vmem:[#allocation26 + $0x780] sm:$0xf] }
 0x643   :  { %v15362_v34 = vld [vmem:[#allocation26 + $0x29c] sm:$0xf0] }
 0x644   :  { %v16783_v13 = vadd.f32 %v5561_v9, %v5549_v41  ;;  %v15394_v9 = vld [vmem:[#allocation26 + $0x39c] sm:$0xf0]  ;;  %8992 = vmatpush.bf16.msrb.mxu3 %v13257_v36 }
 0x645   :  { %v5563_v42 = vpop.f32.mrf.mxu0  ;;  %v13001_v26 = vor.u32 %v15394_v9, %v13000_v19  ;;  %v15522_v41 = vld [vmem:[#allocation26 + $0x79c] sm:$0xf0]  ;;  %v13417_v9 = vor.u32 %v15498_v58, %v13416_v17 }
 0x646   :  { %v12712_v42 = vld [vmem:[#allocation26 + $0x140] sm:$0xf] }
 0x647   :  { %v5537_v45 = vpop.f32.mrf.mxu2  ;;  %8979 = vmatpush.bf16.msrb.mxu2 %v13001_v26  ;;  %v15298_v19 = vld [vmem:[#allocation26 + $0x9c] sm:$0xf0] }
 0x648   :  { %v13128_v33 = vld [vmem:[#allocation26 + $0x480] sm:$0xf] }
 0x649   :  { %v5550_v35 = vpop.f32.mrf.mxu3  ;;  %v15426_v26 = vld [vmem:[#allocation26 + $0x49c] sm:$0xf0] }
 0x64a   :  { %v13513_v35 = vor.u32 %v15522_v41, %v13512_v4  ;;  %v13384_v36 = vld [vmem:[#allocation26 + $0x680] sm:$0xf]  ;;  %v12617_v41 = vor.u32 %v15298_v19, %v12616_v28 }
 0x64b   :  { %v15490_v4 = vld [vmem:[#allocation26 + $0x69c] sm:$0xf0] }
 0x64c   :  { %9005 = vmatpush.bf16.msra.mxu0 %v13513_v35  ;;  %v13385_v35 = vor.u32 %v15490_v4, %v13384_v36  ;;  %v15282_v31 = vld [vmem:[#allocation26 + $0x1c] sm:$0xf0] }
 0x64d   :  { %v12808_v12 = vld [vmem:[#allocation26 + $0x200] sm:$0xf] }
 0x64e   :  { %v15346_v16 = vld [vmem:[#allocation26 + $0x21c] sm:$0xf0] }
 0x64f   :  { %v13320_v17 = vld [vmem:[#allocation26 + $0x600] sm:$0xf] }
 0x650   :  { %v15474_v58 = vld [vmem:[#allocation26 + $0x61c] sm:$0xf0] }
 0x651   :  { %v13321_v28 = vor.u32 %v15474_v58, %v13320_v17  ;;  %v15594_v19 = vld [vmem:[#allocation26 + $0x9dc] sm:$0xf0] }
 0x652   :  { %v15722_v36 = vld [vmem:[#allocation26 + $0xddc] sm:$0xf0] }
 0x653   :  { %v14568_v4 = vld [vmem:[#allocation26 + $0xfc0] sm:$0xf] }
 0x654   :  { %v15634_v17 = vld [vmem:[#allocation26 + $0xb1c] sm:$0xf0] }
 0x655   :  { %v14216_v58 = vld [vmem:[#allocation26 + $0xd00] sm:$0xf] }
 0x657   :  { %v5574_v43 = vpop.f32.mrf.mxu1 }
 0x658   :  { %v5575_v60 = vadd.f32 %v5574_v43, %v2310_v59  ;;  %v15322_v43 = vld [vmem:[#allocation26 + $0x15c] sm:$0xf0] }
 0x659   :  { %v12968_v59 = vld [vmem:[#allocation26 + $0x340] sm:$0xf] }
 0x65d   :  { %v5613_v44 = vpop.f32.mrf.mxu0 }
 0x65f   :  { %v5587_v46 = vpop.f32.mrf.mxu2  ;;  %v5576_v48 = vpop.f32.mrf.mxu1 }
 0x660   :  { %v5588_v24 = vadd.f32 %v5587_v46, %v5575_v60  ;;  %v12713_v46 = vor.u32 %v15322_v43, %v12712_v42  ;;  %v15450_v48 = vld [vmem:[#allocation26 + $0x55c] sm:$0xf0]  ;;  %v12873_v42 = vor.u32 %v15362_v34, %v12872_v22 }
 0x661   :  { %v5600_v47 = vpop.f32.mrf.mxu3  ;;  %v14056_v22 = vld [vmem:[#allocation26 + $0xbc0] sm:$0xf] }
 0x662   :  { %v5601_v49 = vadd.f32 %v5600_v47, %v5588_v24  ;;  %v13224_v47 = vld [vmem:[#allocation26 + $0x540] sm:$0xf]  ;;  %8967 = vmatpush.bf16.msrb.mxu1 %v12713_v46 }
 0x663   :  { %v12584_v46 = vld [vmem:[#allocation26 + $0x40] sm:$0xf] }
 0x664   :  { %v16786_v55 = vadd.f32 %v5613_v44, %v5601_v49  ;;  %v15386_v44 = vld [vmem:[#allocation26 + $0x35c] sm:$0xf0] }
 0x665   :  { %v5615_v54 = vpop.f32.mrf.mxu0  ;;  %v12969_v24 = vor.u32 %v15386_v44, %v12968_v59  ;;  %v13480_v49 = vld [vmem:[#allocation26 + $0x740] sm:$0xf]  ;;  %v15832_v59 = vld [vmem:[#allocation22 + $0x8] sm:$0xff] }
 0x666   :  { %v13225_v54 = vor.u32 %v15450_v48, %v13224_v47  ;;  %v2312_v44 = vperm.slane %v15832_v59, 7  ;;  %v12840_v47 = vld [vmem:[#allocation26 + $0x240] sm:$0xf] }
 0x667   :  { %v5589_v62 = vpop.f32.mrf.mxu2  ;;  %8980 = vmatpush.bf16.msrb.mxu2 %v12969_v24  ;;  %v15290_v24 = vld [vmem:[#allocation26 + $0x5c] sm:$0xf0] }
 0x668   :  { %v15514_v62 = vld [vmem:[#allocation26 + $0x75c] sm:$0xf0]  ;;  %8993 = vmatpush.bf16.msrb.mxu3 %v13225_v54  ;;  %v12585_v48 = vor.u32 %v15290_v24, %v12584_v46 }
 0x669   :  { %v5602_v61 = vpop.f32.mrf.mxu3  ;;  %v13096_v54 = vld [vmem:[#allocation26 + $0x440] sm:$0xf] }
 0x66a   :  { %v12680_v61 = vld [vmem:[#allocation26 + $0x100] sm:$0xf] }
 0x66b   :  { %v14024_v46 = vld [vmem:[#allocation26 + $0xb80] sm:$0xf] }
 0x66c   :  { %v15650_v24 = vld [vmem:[#allocation26 + $0xb9c] sm:$0xf0] }
 0x67b   :  { %v5626_v0 = vpop.f32.mrf.mxu1 }
 0x67c   :  { %v5627_v38 = vadd.f32 %v5626_v0, %v2311_v5  ;;  %v15314_v0 = vld [vmem:[#allocation26 + $0x11c] sm:$0xf0]  ;;  %v13481_v5 = vor.u32 %v15514_v62, %v13480_v49 }
 0x67d   :  { %v15354_v49 = vld [vmem:[#allocation26 + $0x25c] sm:$0xf0] }
 0x67e   :  { %9006 = vmatpush.bf16.msra.mxu0 %v13481_v5  ;;  %v15418_v62 = vld [vmem:[#allocation26 + $0x45c] sm:$0xf0] }
 0x67f   :  { %v13352_v5 = vld [vmem:[#allocation26 + $0x640] sm:$0xf] }
 0x681   :  { %v5665_v50 = vpop.f32.mrf.mxu0 }
 0x682   :  { %9007 = vmatpush.bf16.msra.mxu0 %v13449_v20  ;;  %v15410_v20 = vld [vmem:[#allocation26 + $0x41c] sm:$0xf0] }
 0x683   :  { %v5639_v6 = vpop.f32.mrf.mxu2  ;;  %v5628_v15 = vpop.f32.mrf.mxu1 }
 0x684   :  { %v5640_v39 = vadd.f32 %v5639_v6, %v5627_v38  ;;  %v15378_v38 = vld [vmem:[#allocation26 + $0x31c] sm:$0xf0] }
 0x685   :  { %v5652_v40 = vpop.f32.mrf.mxu3  ;;  %v13192_v6 = vld [vmem:[#allocation26 + $0x500] sm:$0xf] }
 0x686   :  { %v5653_v29 = vadd.f32 %v5652_v40, %v5640_v39  ;;  %v12681_v39 = vor.u32 %v15314_v0, %v12680_v61  ;;  %v15442_v40 = vld [vmem:[#allocation26 + $0x51c] sm:$0xf0]  ;;  %9008 = vmatpush.bf16.msra.mxu0 %v13417_v9  ;;  %v12841_v61 = vor.u32 %v15354_v49, %v12840_v47  ;;  %v13097_v0 = vor.u32 %v15418_v62, %v13096_v54 }
 0x687   :  { %v13193_v15 = vor.u32 %v15442_v40, %v13192_v6  ;;  %v12552_v40 = vld [vmem:[#allocation26] sm:$0xf] }
 0x688   :  { %v16789_v32 = vadd.f32 %v5665_v50, %v5653_v29  ;;  %v12936_v50 = vld [vmem:[#allocation26 + $0x300] sm:$0xf]  ;;  %8968 = vmatpush.bf16.msrb.mxu1 %v12681_v39  ;;  %v12553_v18 = vor.u32 %v15282_v31, %v12552_v40 }
 0x689   :  { %v5667_v8 = vpop.f32.mrf.mxu0  ;;  %v12937_v10 = vor.u32 %v15378_v38, %v12936_v50  ;;  %v15370_v29 = vld [vmem:[#allocation26 + $0x2dc] sm:$0xf0]  ;;  %8994 = vmatpush.bf16.msrb.mxu3 %v13193_v15 }
 0x68a   :  { %v13160_v8 = vld [vmem:[#allocation26 + $0x4c0] sm:$0xf]  ;;  %v12905_v51 = vor.u32 %v15370_v29, %v12904_v27  ;;  %9009 = vmatpush.bf16.msra.mxu0 %v13385_v35 }
 0x68b   :  { %v5641_v45 = vpop.f32.mrf.mxu2  ;;  %8981 = vmatpush.bf16.msrb.mxu2 %v12937_v10  ;;  %v13161_v57 = vor.u32 %v15434_v30, %v13160_v8  ;;  %v15482_v50 = vld [vmem:[#allocation26 + $0x65c] sm:$0xf0]  ;;  %v12809_v8 = vor.u32 %v15346_v16, %v12808_v12 }
 0x68c   :  { %8969 = vmatpush.bf16.msrb.mxu1 %v12649_v1  ;;  %v13129_v45 = vor.u32 %v15426_v26, %v13128_v33  ;;  %v13353_v6 = vor.u32 %v15482_v50, %v13352_v5  ;;  %v13064_v27 = vld [vmem:[#allocation26 + $0x400] sm:$0xf] }
 0x68d   :  { %v5654_v60 = vpop.f32.mrf.mxu3  ;;  %8995 = vmatpush.bf16.msrb.mxu3 %v13161_v57  ;;  %v13065_v30 = vor.u32 %v15410_v20, %v13064_v27  ;;  %v13800_v1 = vld [vmem:[#allocation26 + $0x9c0] sm:$0xf] }
 0x68e   :  { %9010 = vmatpush.bf16.msra.mxu0 %v13353_v6  ;;  %v15658_v9 = vld [vmem:[#allocation26 + $0xbdc] sm:$0xf0]  ;;  %v13801_v34 = vor.u32 %v15594_v19, %v13800_v1 }
 0x68f   :  { %8982 = vmatpush.bf16.msrb.mxu2 %v12905_v51  ;;  %v14057_v33 = vor.u32 %v15658_v9, %v14056_v22  ;;  %v14312_v26 = vld [vmem:[#allocation26 + $0xdc0] sm:$0xf] }
 0x690   :  { %8970 = vmatpush.bf16.msrb.mxu1 %v12617_v41  ;;  %v13768_v35 = vld [vmem:[#allocation26 + $0x980] sm:$0xf] }
 0x691   :  { %8996 = vmatpush.bf16.msrb.mxu3 %v13129_v45  ;;  %v15786_v45 = vld [vmem:[#allocation26 + $0xfdc] sm:$0xf0] }
 0x692   :  { %9011 = vmatpush.bf16.msra.mxu0 %v13321_v28  ;;  %v14569_v59 = vor.u32 %v15786_v45, %v14568_v4  ;;  %v14280_v47 = vld [vmem:[#allocation26 + $0xd80] sm:$0xf] }
 0x693   :  { %8983 = vmatpush.bf16.msrb.mxu2 %v12873_v42  ;;  %v14313_v42 = vor.u32 %v15722_v36, %v14312_v26  ;;  %v15714_v49 = vld [vmem:[#allocation26 + $0xd9c] sm:$0xf0] }
 0x694   :  { %8971 = vmatpush.bf16.msrb.mxu1 %v12585_v48  ;;  %v14025_v48 = vor.u32 %v15650_v24, %v14024_v46  ;;  %v14536_v54 = vld [vmem:[#allocation26 + $0xf80] sm:$0xf] }
 0x695   :  { %8997 = vmatpush.bf16.msrb.mxu3 %v13097_v0  ;;  %v15778_v62 = vld [vmem:[#allocation26 + $0xf9c] sm:$0xf0] }
 0x696   :  { %9056 = vmatpush.bf16.msrb.mxu0 %v14569_v59  ;;  %v14537_v0 = vor.u32 %v15778_v62, %v14536_v54  ;;  %v13736_v50 = vld [vmem:[#allocation26 + $0x940] sm:$0xf] }
 0x697   :  { %8984 = vmatpush.bf16.msrb.mxu2 %v12841_v61  ;;  %v13992_v6 = vld [vmem:[#allocation26 + $0xb40] sm:$0xf] }
 0x698   :  { %8972 = vmatpush.bf16.msrb.mxu1 %v12553_v18  ;;  %v15642_v40 = vld [vmem:[#allocation26 + $0xb5c] sm:$0xf0] }
 0x699   :  { %8998 = vmatpush.bf16.msrb.mxu3 %v13065_v30  ;;  %v14248_v31 = vld [vmem:[#allocation26 + $0xd40] sm:$0xf] }
 0x69a   :  { %v15706_v12 = vld [vmem:[#allocation26 + $0xd5c] sm:$0xf0]  ;;  %9057 = vmatpush.bf16.msrb.mxu0 %v14537_v0 }
 0x69b   :  { %8985 = vmatpush.bf16.msrb.mxu2 %v12809_v8  ;;  %v14504_v18 = vld [vmem:[#allocation26 + $0xf40] sm:$0xf] }
 0x69c   :  { %9017 = vmatpush.bf16.msra.mxu1 %v13801_v34  ;;  %v15770_v16 = vld [vmem:[#allocation26 + $0xf5c] sm:$0xf0] }
 0x69d   :  { %v5678_v43 = vpop.f32.mrf.mxu1  ;;  %9043 = vmatpush.bf16.msra.mxu3 %v14313_v42  ;;  %v14505_v27 = vor.u32 %v15770_v16, %v14504_v18  ;;  %v13704_v20 = vld [vmem:[#allocation26 + $0x900] sm:$0xf] }
 0x69e   :  { %v5679_v38 = vadd.f32 %v5678_v43, %v2312_v44  ;;  %v15586_v43 = vld [vmem:[#allocation26 + $0x99c] sm:$0xf0] }
 0x69f   :  { %9030 = vmatpush.bf16.msra.mxu2 %v14057_v33  ;;  %v13769_v44 = vor.u32 %v15586_v43, %v13768_v35  ;;  %v13960_v8 = vld [vmem:[#allocation26 + $0xb00] sm:$0xf]  ;;  %9058 = vmatpush.bf16.msrb.mxu0 %v14505_v27 }
 0x6a0   :  { %v15698_v1 = vld [vmem:[#allocation26 + $0xd1c] sm:$0xf0] }
 0x6a1   :  { %9018 = vmatpush.bf16.msra.mxu1 %v13769_v44  ;;  %v14472_v28 = vld [vmem:[#allocation26 + $0xf00] sm:$0xf] }
 0x6a2   :  { %v15762_v19 = vld [vmem:[#allocation26 + $0xf1c] sm:$0xf0] }
 0x6a3   :  { %v5717_v60 = vpop.f32.mrf.mxu0  ;;  %9031 = vmatpush.bf16.msra.mxu2 %v14025_v48  ;;  %v14473_v22 = vor.u32 %v15762_v19, %v14472_v28  ;;  %v13672_v9 = vld [vmem:[#allocation26 + $0x8c0] sm:$0xf] }
 0x6a4   :  { %v15562_v34 = vld [vmem:[#allocation26 + $0x8dc] sm:$0xf0] }
 0x6a5   :  { %v5691_v39 = vpop.f32.mrf.mxu2  ;;  %v5680_v29 = vpop.f32.mrf.mxu1  ;;  %v13928_v33 = vld [vmem:[#allocation26 + $0xac0] sm:$0xf]  ;;  %v13673_v26 = vor.u32 %v15562_v34, %v13672_v9  ;;  %9059 = vmatpush.bf16.msrb.mxu0 %v14473_v22 }
 0x6a6   :  { %v5692_v10 = vadd.f32 %v5691_v39, %v5679_v38  ;;  %v15578_v38 = vld [vmem:[#allocation26 + $0x95c] sm:$0xf0] }
 0x6a7   :  { %v5704_v15 = vpop.f32.mrf.mxu3  ;;  %v13737_v39 = vor.u32 %v15578_v38, %v13736_v50  ;;  %v15570_v29 = vld [vmem:[#allocation26 + $0x91c] sm:$0xf0] }
 0x6a8   :  { %v5705_v51 = vadd.f32 %v5704_v15, %v5692_v10  ;;  %v13993_v10 = vor.u32 %v15642_v40, %v13992_v6  ;;  %v14249_v15 = vor.u32 %v15706_v12, %v14248_v31  ;;  %v13705_v30 = vor.u32 %v15570_v29, %v13704_v20  ;;  %v15626_v36 = vld [vmem:[#allocation26 + $0xadc] sm:$0xf0] }
 0x6a9   :  { %9019 = vmatpush.bf16.msra.mxu1 %v13737_v39  ;;  %v14184_v4 = vld [vmem:[#allocation26 + $0xcc0] sm:$0xf]  ;;  %v13929_v45 = vor.u32 %v15626_v36, %v13928_v33 }
 0x6aa   :  { %v16791_v41 = vadd.f32 %v5717_v60, %v5705_v51  ;;  %v14281_v60 = vor.u32 %v15714_v49, %v14280_v47  ;;  %9032 = vmatpush.bf16.msra.mxu2 %v13993_v10  ;;  %v13961_v51 = vor.u32 %v15634_v17, %v13960_v8  ;;  %v15690_v42 = vld [vmem:[#allocation26 + $0xcdc] sm:$0xf0] }
 0x6ab   :  { %v5719_v57 = vpop.f32.mrf.mxu0  ;;  %v14185_v35 = vor.u32 %v15690_v42, %v14184_v4  ;;  %v14440_v43 = vld [vmem:[#allocation26 + $0xec0] sm:$0xf] }
 0x6ac   :  { %9044 = vmatpush.bf16.msra.mxu3 %v14281_v60  ;;  %v14217_v57 = vor.u32 %v15698_v1, %v14216_v58  ;;  %v15754_v59 = vld [vmem:[#allocation26 + $0xedc] sm:$0xf0] }
 0x6ad   :  { %v5693_v61 = vpop.f32.mrf.mxu2  ;;  %9020 = vmatpush.bf16.msra.mxu1 %v13705_v30  ;;  %v14441_v44 = vor.u32 %v15754_v59, %v14440_v43  ;;  %v5764_v46 = vpop.xlane.xlu2 %5763  ;;  %v13640_v24 = vld [vmem:[#allocation26 + $0x880] sm:$0xf] }
 0x6ae   :  { %9033 = vmatpush.bf16.msra.mxu2 %v13961_v51  ;;  %v15554_v47 = vld [vmem:[#allocation26 + $0x89c] sm:$0xf0]  ;;  %v5765_v49 = vmul.f32 %v5764_v46, %v16737_v37 }
 0x6af   :  { %v5706_v5 = vpop.f32.mrf.mxu3  ;;  %v13896_v48 = vld [vmem:[#allocation26 + $0xa80] sm:$0xf]  ;;  %v13641_v54 = vor.u32 %v15554_v47, %v13640_v24  ;;  %9060 = vmatpush.bf16.msrb.mxu0 %v14441_v44 }
 0x6b0   :  { %9045 = vmatpush.bf16.msra.mxu3 %v14249_v15  ;;  %v15618_v62 = vld [vmem:[#allocation26 + $0xa9c] sm:$0xf0]  ;;  %v5766_v39 = vadd.f32 1e-05, %v5765_v49 }
 0x6b1   :  { %9021 = vmatpush.bf16.msra.mxu1 %v13673_v26  ;;  %v14152_v61 = vld [vmem:[#allocation26 + $0xc80] sm:$0xf]  ;;  %v13897_v0 = vor.u32 %v15618_v62, %v13896_v48 }
 0x6b2   :  { %9034 = vmatpush.bf16.msra.mxu2 %v13929_v45  ;;  %v15682_v60 = vld [vmem:[#allocation26 + $0xc9c] sm:$0xf0]  ;;  %15829 = vrsqrt.f32 %v5766_v39  ;;  %v5721_v45 = vld [vmem:[#allocation23] sm:$0xff]  ;;  %vm5773_vm1 = vweird.f32 %v5766_v39 }
 0x6b3   :  { %v14153_v5 = vor.u32 %v15682_v60, %v14152_v61  ;;  %v14408_v50 = vld [vmem:[#allocation26 + $0xe80] sm:$0xf]  ;;  %v5786_v59 = vperm.slane %v5721_v45, 0  ;;  %v5787_v46 = vperm.slane %v5721_v45, 1  ;;  %v5788_v24 = vperm.slane %v5721_v45, 2 }
 0x6b4   :  { %9046 = vmatpush.bf16.msra.mxu3 %v14217_v57  ;;  %v15746_v38 = vld [vmem:[#allocation26 + $0xe9c] sm:$0xf0]  ;;  %v5789_v47 = vperm.slane %v5721_v45, 3 }
 0x6b5   :  { %v13608_v6 = vld [vmem:[#allocation26 + $0x840] sm:$0xf]  ;;  %v14409_v40 = vor.u32 %v15746_v38, %v14408_v50  ;;  %9022 = vmatpush.bf16.msra.mxu1 %v13641_v54 }
 0x6b6   :  { %v15546_v31 = vld [vmem:[#allocation26 + $0x85c] sm:$0xf0]  ;;  %9035 = vmatpush.bf16.msra.mxu2 %v13897_v0 }
 0x6b7   :  { %v13864_v12 = vld [vmem:[#allocation26 + $0xa40] sm:$0xf]  ;;  %v13609_v18 = vor.u32 %v15546_v31, %v13608_v6  ;;  %9061 = vmatpush.bf16.msrb.mxu0 %v14409_v40  ;;  %v5790_v31 = vperm.slane %v5721_v45, 4 }
 0x6b8   :  { %9047 = vmatpush.bf16.msra.mxu3 %v14185_v35  ;;  %v15610_v10 = vld [vmem:[#allocation26 + $0xa5c] sm:$0xf0]  ;;  %v15830_v33 = vpop.eup %15829  ;;  %v16794_v35 = vld [vmem:[#allocation25] sm:$0xff] }
 0x6b9   :  { %v14120_v15 = vld [vmem:[#allocation26 + $0xc40] sm:$0xf]  ;;  %v13865_v16 = vor.u32 %v15610_v10, %v13864_v12  ;;  %9023 = vmatpush.bf16.msra.mxu1 %v13609_v18  ;;  %v5768_v36 = vmul.f32 %v15830_v33, %v5766_v39  ;;  %vm5774_vm0 = vweird.f32 %v15830_v33  ;;  %v5811_v48 = vperm.slane %v16794_v35, 0 }
 0x6ba   :  { %v15674_v37 = vld [vmem:[#allocation26 + $0xc5c] sm:$0xf0]  ;;  %vm5775_vm2 = vmor %vm5773_vm1, %vm5774_vm0  ;;  %v5812_v49 = vperm.slane %v16794_v35, 1  ;;  %v5813_v54 = vperm.slane %v16794_v35, 2  ;;  %v5814_v62 = vperm.slane %v16794_v35, 3  ;;  %v5791_v12 = vperm.slane %v5721_v45, 5 }
 0x6bb   :  { %v14376_v27 = vld [vmem:[#allocation26 + $0xe40] sm:$0xf]  ;;  %v14121_v8 = vor.u32 %v15674_v37, %v14120_v15  ;;  %9036 = vmatpush.bf16.msra.mxu2 %v13865_v16  ;;  %v5769_v4 = vmul.f32 %v15830_v33, %v5768_v36  ;;  %v5792_v10 = vperm.slane %v5721_v45, 6  ;;  %v5793_v15 = vperm.slane %v5721_v45, 7  ;;  %v15526_v36 = vld [vmem:[#allocation26 + $0x7c4] sm:$0xf] }
 0x6bc   :  { %v15738_v20 = vld [vmem:[#allocation26 + $0xe5c] sm:$0xf0]  ;;  %9048 = vmatpush.bf16.msra.mxu3 %v14153_v5 }
 0x6bd   :  { %v13576_v29 = vld [vmem:[#allocation26 + $0x800] sm:$0xf]  ;;  %v14377_v1 = vor.u32 %v15738_v20, %v14376_v27  ;;  %v5770_v42 = vmul.f32 0.5, %v5769_v4  ;;  %v5817_v20 = vperm.slane %v16794_v35, 6  ;;  %v13546_v4 = vld [vmem:[#allocation26 + $0x7e0] sm:$0xf0] }
 0x6be   :  { %v15538_v30 = vld [vmem:[#allocation26 + $0x81c] sm:$0xf0] }
 0x6bf   :  { %v13832_v17 = vld [vmem:[#allocation26 + $0xa00] sm:$0xf]  ;;  %v13577_v22 = vor.u32 %v15538_v30, %v13576_v29  ;;  %9062 = vmatpush.bf16.msrb.mxu0 %v14377_v1  ;;  %v5771_v43 = vsub.f32 1.5, %v5770_v42  ;;  %v5818_v29 = vperm.slane %v16794_v35, 7  ;;  %v15398_v1 = vld [vmem:[#allocation26 + $0x3c4] sm:$0xf] }
 0x6c0   :  { %v15602_v58 = vld [vmem:[#allocation26 + $0xa1c] sm:$0xf0]  ;;  %9049 = vmatpush.bf16.msra.mxu3 %v14121_v8 }
 0x6c1   :  { %v14088_v51 = vld [vmem:[#allocation26 + $0xc00] sm:$0xf]  ;;  %v13833_v9 = vor.u32 %v15602_v58, %v13832_v17  ;;  %9024 = vmatpush.bf16.msra.mxu1 %v13577_v22  ;;  %v5772_v44 = vmul.f32 %v15830_v33, %v5771_v43  ;;  %v15334_v17 = vld [vmem:[#allocation26 + $0x1c4] sm:$0xf] }
 0x6c2   :  { %v15666_v57 = vld [vmem:[#allocation26 + $0xc1c] sm:$0xf0]  ;;  %v12778_v58 = vld [vmem:[#allocation26 + $0x1e0] sm:$0xf0] }
 0x6c3   :  { %v14344_v28 = vld [vmem:[#allocation26 + $0xe00] sm:$0xf]  ;;  %v14089_v34 = vor.u32 %v15666_v57, %v14088_v51  ;;  %9037 = vmatpush.bf16.msra.mxu2 %v13833_v9  ;;  %v5776_v61 = vsel %vm5775_vm2, %v15830_v33, %v5772_v44  ;;  %v13034_v22 = vld [vmem:[#allocation26 + $0x3e0] sm:$0xf0] }
 0x6c4   :  { %v15730_v19 = vld [vmem:[#allocation26 + $0xe1c] sm:$0xf0]  ;;  %v5777_v60 = vmul.f32 %v5776_v61, %v16743_v7  ;;  %v5778_v0 = vmul.f32 %v5776_v61, %v16746_v52  ;;  %v5779_v5 = vmul.f32 %v5776_v61, %v16749_v3  ;;  %v5780_v50 = vmul.f32 %v5776_v61, %v16752_v14  ;;  %v15462_v9 = vld [vmem:[#allocation26 + $0x5c4] sm:$0xf] }
 0x6c5   :  { %v14345_v26 = vor.u32 %v15730_v19, %v14344_v28  ;;  %9050 = vmatpush.bf16.msra.mxu3 %v14089_v34  ;;  %v5815_v7 = vperm.slane %v16794_v35, 4  ;;  %v5816_v52 = vperm.slane %v16794_v35, 5  ;;  %v5781_v3 = vmul.f32 %v5776_v61, %v16759_v11 }
 0x6c6   :  { %v5802_v38 = vmul.f32 %v5786_v59, %v5777_v60  ;;  %v5803_v6 = vmul.f32 %v5787_v46, %v5778_v0  ;;  %v5804_v39 = vmul.f32 %v5788_v24, %v5779_v5  ;;  %v5805_v40 = vmul.f32 %v5789_v47, %v5780_v50  ;;  %v15390_v5 = vld [vmem:[#allocation26 + $0x384] sm:$0xf] }
 0x6c7   :  { %9063 = vmatpush.bf16.msrb.mxu0 %v14345_v26  ;;  %v5782_v14 = vmul.f32 %v5776_v61, %v16764_v56  ;;  %v5783_v8 = vmul.f32 %v5776_v61, %v16769_v2  ;;  %v5784_v30 = vmul.f32 %v5776_v61, %v16774_v25  ;;  %v5806_v28 = vmul.f32 %v5790_v31, %v5781_v3  ;;  %v13290_v26 = vld [vmem:[#allocation26 + $0x5e0] sm:$0xf0] }
 0x6c8   :  { %v5827_v37 = vadd.f32 %v5811_v48, %v5802_v38  ;;  %v5828_v18 = vadd.f32 %v5812_v49, %v5803_v6  ;;  %v5829_v16 = vadd.f32 %v5813_v54, %v5804_v39  ;;  %v5830_v27 = vadd.f32 %v5814_v62, %v5805_v40  ;;  %v15326_v62 = vld [vmem:[#allocation26 + $0x184] sm:$0xf] }
 0x6c9   :  { %v5807_v56 = vmul.f32 %v5791_v12, %v5782_v14  ;;  %v5808_v34 = vmul.f32 %v5792_v10, %v5783_v8  ;;  %v5809_v33 = vmul.f32 %v5793_v15, %v5784_v30  ;;  %v12781_v46 = vor.u32 %v15334_v17, %v12778_v58  ;;  %v15454_v50 = vld [vmem:[#allocation26 + $0x584] sm:$0xf] }
 0x6ca   :  { %vm5835_vm3 = vcmp.gt.f32.partialorder %v5827_v37, 0.0  ;;  %vm5836_vm4 = vcmp.gt.f32.partialorder %v5828_v18, 0.0  ;;  %vm5837_vm5 = vcmp.gt.f32.partialorder %v5829_v16, 0.0  ;;  %vm5838_vm6 = vcmp.gt.f32.partialorder %v5830_v27, 0.0  ;;  %v13258_v6 = vld [vmem:[#allocation26 + $0x5a0] sm:$0xf0] }
 0x6cb   :  { %v5843_v51 = vmul.f32 0.2, %v5827_v37  ;;  %v5844_v57 = vmul.f32 0.2, %v5828_v18  ;;  %v5845_v11 = vmul.f32 0.2, %v5829_v16  ;;  %v13037_v24 = vor.u32 %v15398_v1, %v13034_v22 }
 0x6cc   :  { %v5846_v19 = vmul.f32 0.2, %v5830_v27  ;;  %v13293_v49 = vor.u32 %v15462_v9, %v13290_v26  ;;  %v13549_v54 = vor.u32 %v15526_v36, %v13546_v4  ;;  %v5831_v61 = vadd.f32 %v5815_v7, %v5806_v28  ;;  %v15518_v39 = vld [vmem:[#allocation26 + $0x784] sm:$0xf] }
 0x6cd   :  { %v5851_v2 = vsel %vm5835_vm3, %v5827_v37, %v5843_v51  ;;  %v5852_v25 = vsel %vm5836_vm4, %v5828_v18, %v5844_v57  ;;  %v5853_v35 = vsel %vm5837_vm5, %v5829_v16, %v5845_v11  ;;  %v5834_v38 = vadd.f32 %v5818_v29, %v5809_v33  ;;  %v13514_v40 = vld [vmem:[#allocation26 + $0x7a0] sm:$0xf0] }
 0x6ce   :  { %v5859_v42 = vadd.f32 %v5851_v2, %v16716_v23  ;;  %v5860_v45 = vadd.f32 %v5852_v25, %v16723_v63  ;;  %v5854_v43 = vsel %vm5838_vm6, %v5830_v27, %v5846_v19  ;;  %v5861_v59 = vadd.f32 %v5853_v35, %v16730_v21  ;;  %v12746_v23 = vld [vmem:[#allocation26 + $0x1a0] sm:$0xf0] }
 0x6cf   :  { %v5862_v44 = vadd.f32 %v5854_v43, %v16739_v53  ;;  %v5832_v63 = vadd.f32 %v5816_v52, %v5807_v56  ;;  %v13002_v21 = vld [vmem:[#allocation26 + $0x3a0] sm:$0xf0]  ;;  %v5833_v53 = vadd.f32 %v5817_v20, %v5808_v34  ;;  %v12749_v37 = vor.u32 %v15326_v62, %v12746_v23 }
 0x6d0   :  { %v16820_v47 = vpack.c.bf16 %v5859_v42, %v5859_v42  ;;  %v16822_v48 = vpack.c.bf16 %v5860_v45, %v5860_v45  ;;  %v16824_v60 = vpack.c.bf16 %v5861_v59, %v5861_v59  ;;  %v15318_v31 = vld [vmem:[#allocation26 + $0x144] sm:$0xf]  ;;  %v13005_v18 = vor.u32 %v15390_v5, %v13002_v21 }
 0x6d1   :  { %v16826_v0 = vpack.c.bf16 %v5862_v44, %v5862_v44  ;;  %v12714_v12 = vld [vmem:[#allocation26 + $0x160] sm:$0xf0]  ;;  %v5847_v52 = vmul.f32 0.2, %v5831_v61  ;;  %v5848_v3 = vmul.f32 0.2, %v5832_v63  ;;  %v13261_v14 = vor.u32 %v15454_v50, %v13258_v6 }
 0x6d2   :  { %8973 = vmatmul.bf16.vlgmr.msrb.gmra.mxu1 %v16820_v47  ;;  %8986 = vmatmul.bf16.vlgmr.msrb.gmra.mxu2 %v16822_v48  ;;  %v15382_v10 = vld [vmem:[#allocation26 + $0x344] sm:$0xf]  ;;  %v13517_v20 = vor.u32 %v15518_v39, %v13514_v40  ;;  %vm5839_vm7 = vcmp.gt.f32.partialorder %v5831_v61, 0.0  ;;  %vm5840_vm8 = vcmp.gt.f32.partialorder %v5832_v63, 0.0  ;;  %v5849_v8 = vmul.f32 0.2, %v5833_v53 }
 0x6d3   :  { %8999 = vmatmul.bf16.vlgmr.msrb.gmra.mxu3 %v16824_v60  ;;  %9012 = vmatmul.bf16.vlgmr.msra.gmra.mxu0 %v16826_v0  ;;  %v12970_v15 = vld [vmem:[#allocation26 + $0x360] sm:$0xf0]  ;;  %v5850_v30 = vmul.f32 0.2, %v5834_v38  ;;  %vm5841_vm9 = vcmp.gt.f32.partialorder %v5833_v53, 0.0  ;;  %vm5842_vm10 = vcmp.gt.f32.partialorder %v5834_v38, 0.0  ;;  %v12717_v58 = vor.u32 %v15318_v31, %v12714_v12 }
 0x6d4   :  { %9069 = vmatpush.bf16.msrb.mxu1 %v12781_v46  ;;  %9082 = vmatpush.bf16.msrb.mxu2 %v13037_v24  ;;  %v15446_v16 = vld [vmem:[#allocation26 + $0x544] sm:$0xf]  ;;  %v12973_v1 = vor.u32 %v15382_v10, %v12970_v15  ;;  %v5855_v9 = vsel %vm5839_vm7, %v5831_v61, %v5847_v52  ;;  %v5856_v34 = vsel %vm5840_vm8, %v5832_v63, %v5848_v3 }
 0x6d5   :  { %v13226_v27 = vld [vmem:[#allocation26 + $0x560] sm:$0xf0]  ;;  %9095 = vmatpush.bf16.msrb.mxu3 %v13293_v49  ;;  %9108 = vmatpush.bf16.msra.mxu0 %v13549_v54  ;;  %v5857_v25 = vsel %vm5841_vm9, %v5833_v53, %v5849_v8  ;;  %v5858_v26 = vsel %vm5842_vm10, %v5834_v38, %v5850_v30  ;;  %v5863_v35 = vadd.f32 %v5855_v9, %v16783_v13 }
 0x6d6   :  { %v15510_v7 = vld [vmem:[#allocation26 + $0x744] sm:$0xf]  ;;  %v13229_v51 = vor.u32 %v15446_v16, %v13226_v27  ;;  %v5864_v43 = vadd.f32 %v5856_v34, %v16786_v55  ;;  %v5865_v49 = vadd.f32 %v5857_v25, %v16789_v32  ;;  %v5866_v54 = vadd.f32 %v5858_v26, %v16791_v41 }
 0x6d7   :  { %v13482_v29 = vld [vmem:[#allocation26 + $0x760] sm:$0xf0]  ;;  %v16840_v13 = vpack.c.bf16 %v5863_v35, %v5863_v35 }
 0x6d8   :  { %v15310_v17 = vld [vmem:[#allocation26 + $0x104] sm:$0xf]  ;;  %9070 = vmatpush.bf16.msrb.mxu1 %v12749_v37  ;;  %9083 = vmatpush.bf16.msrb.mxu2 %v13005_v18  ;;  %v13485_v56 = vor.u32 %v15510_v7, %v13482_v29  ;;  %v16842_v55 = vpack.c.bf16 %v5864_v43, %v5864_v43  ;;  %v16844_v32 = vpack.c.bf16 %v5865_v49, %v5865_v49 }
 0x6d9   :  { %v12682_v57 = vld [vmem:[#allocation26 + $0x120] sm:$0xf0]  ;;  %9096 = vmatpush.bf16.msrb.mxu3 %v13261_v14  ;;  %9109 = vmatpush.bf16.msra.mxu0 %v13517_v20  ;;  %v16846_v41 = vpack.c.bf16 %v5866_v54, %v5866_v54 }
 0x6da   :  { %v15374_v11 = vld [vmem:[#allocation26 + $0x304] sm:$0xf]  ;;  %v12685_v36 = vor.u32 %v15310_v17, %v12682_v57 }
 0x6db   :  { %v12938_v28 = vld [vmem:[#allocation26 + $0x320] sm:$0xf0] }
 0x6dc   :  { %v15438_v19 = vld [vmem:[#allocation26 + $0x504] sm:$0xf]  ;;  %v12941_v4 = vor.u32 %v15374_v11, %v12938_v28  ;;  %9071 = vmatpush.bf16.msrb.mxu1 %v12717_v58  ;;  %9084 = vmatpush.bf16.msrb.mxu2 %v12973_v1 }
 0x6dd   :  { %v13194_v22 = vld [vmem:[#allocation26 + $0x520] sm:$0xf0]  ;;  %9097 = vmatpush.bf16.msrb.mxu3 %v13229_v51  ;;  %9110 = vmatpush.bf16.msra.mxu0 %v13485_v56 }
 0x6de   :  { %v15502_v33 = vld [vmem:[#allocation26 + $0x704] sm:$0xf]  ;;  %v13197_v45 = vor.u32 %v15438_v19, %v13194_v22 }
 0x6df   :  { %v13450_v2 = vld [vmem:[#allocation26 + $0x720] sm:$0xf0] }
 0x6e0   :  { %v15302_v42 = vld [vmem:[#allocation26 + $0xc4] sm:$0xf]  ;;  %v13453_v24 = vor.u32 %v15502_v33, %v13450_v2  ;;  %9072 = vmatpush.bf16.msrb.mxu1 %v12685_v36  ;;  %9085 = vmatpush.bf16.msrb.mxu2 %v12941_v4 }
 0x6e1   :  { %v12650_v59 = vld [vmem:[#allocation26 + $0xe0] sm:$0xf0]  ;;  %9098 = vmatpush.bf16.msrb.mxu3 %v13197_v45 }
 0x6e2   :  { %v15366_v44 = vld [vmem:[#allocation26 + $0x2c4] sm:$0xf]  ;;  %v12653_v5 = vor.u32 %v15302_v42, %v12650_v59  ;;  %9111 = vmatpush.bf16.msra.mxu0 %v13453_v24  ;;  %9025 = vmatmul.bf16.vlgmr.msra.gmra.mxu1 %v16840_v13 }
 0x6e3   :  { %v12906_v46 = vld [vmem:[#allocation26 + $0x2e0] sm:$0xf0]  ;;  %9038 = vmatmul.bf16.vlgmr.msra.gmra.mxu2 %v16842_v55  ;;  %9051 = vmatmul.bf16.vlgmr.msra.gmra.mxu3 %v16844_v32 }
 0x6e4   :  { %v15430_v62 = vld [vmem:[#allocation26 + $0x4c4] sm:$0xf]  ;;  %v12909_v21 = vor.u32 %v15366_v44, %v12906_v46  ;;  %9064 = vmatmul.bf16.vlgmr.msrb.gmra.mxu0 %v16846_v41  ;;  %9073 = vmatpush.bf16.msrb.mxu1 %v12653_v5 }
 0x6e5   :  { %v13162_v23 = vld [vmem:[#allocation26 + $0x4e0] sm:$0xf0] }
 0x6e6   :  { %v15494_v61 = vld [vmem:[#allocation26 + $0x6c4] sm:$0xf]  ;;  %v13165_v50 = vor.u32 %v15430_v62, %v13162_v23  ;;  %9086 = vmatpush.bf16.msrb.mxu2 %v12909_v21 }
 0x6e7   :  { %v13418_v63 = vld [vmem:[#allocation26 + $0x6e0] sm:$0xf0] }
 0x6e8   :  { %v15294_v53 = vld [vmem:[#allocation26 + $0x84] sm:$0xf]  ;;  %v13421_v6 = vor.u32 %v15494_v61, %v13418_v63  ;;  %9099 = vmatpush.bf16.msrb.mxu3 %v13165_v50 }
 0x6e9   :  { %v12618_v38 = vld [vmem:[#allocation26 + $0xa0] sm:$0xf0] }
 0x6ea   :  { %v15358_v39 = vld [vmem:[#allocation26 + $0x284] sm:$0xf]  ;;  %v12621_v37 = vor.u32 %v15294_v53, %v12618_v38  ;;  %9112 = vmatpush.bf16.msra.mxu0 %v13421_v6 }
 0x6eb   :  { %v12874_v40 = vld [vmem:[#allocation26 + $0x2a0] sm:$0xf0] }
 0x6ec   :  { %v15422_v31 = vld [vmem:[#allocation26 + $0x484] sm:$0xf]  ;;  %v12877_v18 = vor.u32 %v15358_v39, %v12874_v40  ;;  %9074 = vmatpush.bf16.msrb.mxu1 %v12621_v37 }
 0x6ed   :  { %v13130_v12 = vld [vmem:[#allocation26 + $0x4a0] sm:$0xf0] }
 0x6ee   :  { %v15486_v10 = vld [vmem:[#allocation26 + $0x684] sm:$0xf]  ;;  %v13133_v7 = vor.u32 %v15422_v31, %v13130_v12  ;;  %9087 = vmatpush.bf16.msrb.mxu2 %v12877_v18 }
 0x6ef   :  { %v13386_v15 = vld [vmem:[#allocation26 + $0x6a0] sm:$0xf0] }
 0x6f0   :  { %v15286_v16 = vld [vmem:[#allocation26 + $0x44] sm:$0xf]  ;;  %v13389_v52 = vor.u32 %v15486_v10, %v13386_v15  ;;  %9100 = vmatpush.bf16.msrb.mxu3 %v13133_v7 }
 0x6f1   :  { %v12586_v27 = vld [vmem:[#allocation26 + $0x60] sm:$0xf0] }
 0x6f2   :  { %v15350_v3 = vld [vmem:[#allocation26 + $0x244] sm:$0xf]  ;;  %v12589_v58 = vor.u32 %v15286_v16, %v12586_v27  ;;  %9113 = vmatpush.bf16.msra.mxu0 %v13389_v52 }
 0x6f3   :  { %v12842_v14 = vld [vmem:[#allocation26 + $0x260] sm:$0xf0] }
 0x6f4   :  { %v15414_v20 = vld [vmem:[#allocation26 + $0x444] sm:$0xf]  ;;  %v12845_v1 = vor.u32 %v15350_v3, %v12842_v14  ;;  %9075 = vmatpush.bf16.msrb.mxu1 %v12589_v58 }
 0x6f5   :  { %v13098_v29 = vld [vmem:[#allocation26 + $0x460] sm:$0xf0] }
 0x6f6   :  { %v15478_v8 = vld [vmem:[#allocation26 + $0x644] sm:$0xf]  ;;  %v13101_v28 = vor.u32 %v15414_v20, %v13098_v29  ;;  %9088 = vmatpush.bf16.msrb.mxu2 %v12845_v1 }
 0x6f7   :  { %v13354_v30 = vld [vmem:[#allocation26 + $0x660] sm:$0xf0] }
 0x6f8   :  { %v15278_v17 = vld [vmem:[#allocation26 + $0x4] sm:$0xf]  ;;  %v13357_v56 = vor.u32 %v15478_v8, %v13354_v30  ;;  %9101 = vmatpush.bf16.msrb.mxu3 %v13101_v28 }
 0x6f9   :  { %v12554_v51 = vld [vmem:[#allocation26 + $0x20] sm:$0xf0] }
 0x6fa   :  { %v15342_v57 = vld [vmem:[#allocation26 + $0x204] sm:$0xf]  ;;  %v12557_v4 = vor.u32 %v15278_v17, %v12554_v51  ;;  %9114 = vmatpush.bf16.msra.mxu0 %v13357_v56 }
 0x6fb   :  { %v12810_v11 = vld [vmem:[#allocation26 + $0x220] sm:$0xf0] }
 0x6fc   :  { %v15406_v19 = vld [vmem:[#allocation26 + $0x404] sm:$0xf]  ;;  %v12813_v42 = vor.u32 %v15342_v57, %v12810_v11  ;;  %9076 = vmatpush.bf16.msrb.mxu1 %v12557_v4 }
 0x6fd   :  { %v13066_v22 = vld [vmem:[#allocation26 + $0x420] sm:$0xf0] }
 0x6fe   :  { %v15470_v9 = vld [vmem:[#allocation26 + $0x604] sm:$0xf]  ;;  %v13069_v59 = vor.u32 %v15406_v19, %v13066_v22  ;;  %9089 = vmatpush.bf16.msrb.mxu2 %v12813_v42 }
 0x6ff   :  { %v13322_v34 = vld [vmem:[#allocation26 + $0x620] sm:$0xf0]  ;;  %9077 = vmatmul.bf16.vlgmr.msrb.gmra.mxu1 %v16820_v47 }
 0x700   :  { %v15590_v33 = vld [vmem:[#allocation26 + $0x9c4] sm:$0xf]  ;;  %v13325_v44 = vor.u32 %v15470_v9, %v13322_v34  ;;  %9102 = vmatpush.bf16.msrb.mxu3 %v13069_v59 }
 0x701   :  { %v13802_v2 = vld [vmem:[#allocation26 + $0x9e0] sm:$0xf0]  ;;  %9090 = vmatmul.bf16.vlgmr.msrb.gmra.mxu2 %v16822_v48 }
 0x702   :  { %v15654_v25 = vld [vmem:[#allocation26 + $0xbc4] sm:$0xf]  ;;  %v13805_v46 = vor.u32 %v15590_v33, %v13802_v2  ;;  %9115 = vmatpush.bf16.msra.mxu0 %v13325_v44 }
 0x703   :  { %v14058_v26 = vld [vmem:[#allocation26 + $0xbe0] sm:$0xf0]  ;;  %9103 = vmatmul.bf16.vlgmr.msrb.gmra.mxu3 %v16824_v60 }
 0x704   :  { %v15718_v36 = vld [vmem:[#allocation26 + $0xdc4] sm:$0xf]  ;;  %v14061_v24 = vor.u32 %v15654_v25, %v14058_v26  ;;  %9121 = vmatpush.bf16.msra.mxu1 %v13805_v46 }
 0x705   :  { %v14314_v45 = vld [vmem:[#allocation26 + $0xde0] sm:$0xf0]  ;;  %9116 = vmatmul.bf16.vlgmr.msra.gmra.mxu0 %v16826_v0 }
 0x706   :  { %v15782_v35 = vld [vmem:[#allocation26 + $0xfc4] sm:$0xf]  ;;  %v14317_v62 = vor.u32 %v15718_v36, %v14314_v45  ;;  %9134 = vmatpush.bf16.msra.mxu2 %v14061_v24 }
 0x707   :  { %v14570_v43 = vld [vmem:[#allocation26 + $0xfe0] sm:$0xf0] }
 0x708   :  { %v15582_v49 = vld [vmem:[#allocation26 + $0x984] sm:$0xf]  ;;  %v14573_v23 = vor.u32 %v15782_v35, %v14570_v43  ;;  %9147 = vmatpush.bf16.msra.mxu3 %v14317_v62 }
 0x709   :  { %v13770_v54 = vld [vmem:[#allocation26 + $0x9a0] sm:$0xf0] }
 0x70a   :  { %v15646_v61 = vld [vmem:[#allocation26 + $0xb84] sm:$0xf]  ;;  %v13773_v38 = vor.u32 %v15582_v49, %v13770_v54  ;;  %9160 = vmatpush.bf16.msrb.mxu0 %v14573_v23 }
 0x70b   :  { %v14026_v63 = vld [vmem:[#allocation26 + $0xba0] sm:$0xf0] }
 0x70c   :  { %v15710_v5 = vld [vmem:[#allocation26 + $0xd84] sm:$0xf]  ;;  %v14029_v6 = vor.u32 %v15646_v61, %v14026_v63  ;;  %9122 = vmatpush.bf16.msra.mxu1 %v13773_v38 }
 0x70d   :  { %v14282_v21 = vld [vmem:[#allocation26 + $0xda0] sm:$0xf0] }
 0x70e   :  { %v15774_v50 = vld [vmem:[#allocation26 + $0xf84] sm:$0xf]  ;;  %v14285_v31 = vor.u32 %v15710_v5, %v14282_v21  ;;  %9135 = vmatpush.bf16.msra.mxu2 %v14029_v6 }
 0x70f   :  { %v14538_v53 = vld [vmem:[#allocation26 + $0xfa0] sm:$0xf0] }
 0x710   :  { %v15574_v39 = vld [vmem:[#allocation26 + $0x944] sm:$0xf]  ;;  %v14541_v12 = vor.u32 %v15774_v50, %v14538_v53  ;;  %9148 = vmatpush.bf16.msra.mxu3 %v14285_v31 }
 0x711   :  { %v13738_v40 = vld [vmem:[#allocation26 + $0x960] sm:$0xf0] }
 0x712   :  { %v15638_v10 = vld [vmem:[#allocation26 + $0xb44] sm:$0xf]  ;;  %v13741_v7 = vor.u32 %v15574_v39, %v13738_v40  ;;  %9161 = vmatpush.bf16.msrb.mxu0 %v14541_v12 }
 0x713   :  { %v13994_v15 = vld [vmem:[#allocation26 + $0xb60] sm:$0xf0] }
 0x714   :  { %v15702_v37 = vld [vmem:[#allocation26 + $0xd44] sm:$0xf]  ;;  %v13997_v52 = vor.u32 %v15638_v10, %v13994_v15  ;;  %9123 = vmatpush.bf16.msra.mxu1 %v13741_v7 }
 0x715   :  { %v14250_v18 = vld [vmem:[#allocation26 + $0xd60] sm:$0xf0] }
 0x716   :  { %v15766_v16 = vld [vmem:[#allocation26 + $0xf44] sm:$0xf]  ;;  %v14253_v20 = vor.u32 %v15702_v37, %v14250_v18  ;;  %9136 = vmatpush.bf16.msra.mxu2 %v13997_v52 }
 0x717   :  { %v14506_v27 = vld [vmem:[#allocation26 + $0xf60] sm:$0xf0] }
 0x718   :  { %v15566_v3 = vld [vmem:[#allocation26 + $0x904] sm:$0xf]  ;;  %v14509_v29 = vor.u32 %v15766_v16, %v14506_v27  ;;  %9149 = vmatpush.bf16.msra.mxu3 %v14253_v20  ;;  %v12784_v20 = vld [vmem:[#allocation26 + $0x1c8] sm:$0xf] }
 0x719   :  { %v13706_v14 = vld [vmem:[#allocation26 + $0x920] sm:$0xf0] }
 0x71a   :  { %v15630_v8 = vld [vmem:[#allocation26 + $0xb04] sm:$0xf]  ;;  %v13709_v57 = vor.u32 %v15566_v3, %v13706_v14  ;;  %9162 = vmatpush.bf16.msrb.mxu0 %v14509_v29  ;;  %v15339_v29 = vld [vmem:[#allocation26 + $0x1e4] sm:$0xf0] }
 0x71b   :  { %v13962_v30 = vld [vmem:[#allocation26 + $0xb20] sm:$0xf0] }
 0x71c   :  { %v15694_v17 = vld [vmem:[#allocation26 + $0xd04] sm:$0xf]  ;;  %v13965_v11 = vor.u32 %v15630_v8, %v13962_v30  ;;  %9124 = vmatpush.bf16.msra.mxu1 %v13709_v57  ;;  %v13040_v8 = vld [vmem:[#allocation26 + $0x3c8] sm:$0xf] }
 0x71d   :  { %v14218_v58 = vld [vmem:[#allocation26 + $0xd20] sm:$0xf0]  ;;  %v15403_v30 = vld [vmem:[#allocation26 + $0x3e4] sm:$0xf0] }
 0x71e   :  { %v15758_v1 = vld [vmem:[#allocation26 + $0xf04] sm:$0xf]  ;;  %v14221_v19 = vor.u32 %v15694_v17, %v14218_v58  ;;  %9137 = vmatpush.bf16.msra.mxu2 %v13965_v11  ;;  %v13296_v17 = vld [vmem:[#allocation26 + $0x5c8] sm:$0xf] }
 0x71f   :  { %v14474_v51 = vld [vmem:[#allocation26 + $0xf20] sm:$0xf0]  ;;  %v13552_v57 = vld [vmem:[#allocation26 + $0x7c8] sm:$0xf] }
 0x720   :  { %v15558_v28 = vld [vmem:[#allocation26 + $0x8c4] sm:$0xf]  ;;  %v14477_v22 = vor.u32 %v15758_v1, %v14474_v51  ;;  %9150 = vmatpush.bf16.msra.mxu3 %v14221_v19  ;;  %v15467_v51 = vld [vmem:[#allocation26 + $0x5e4] sm:$0xf0]  ;;  %v12785_v19 = vor.u32 %v15339_v29, %v12784_v20 }
 0x721   :  { %v13674_v56 = vld [vmem:[#allocation26 + $0x8e0] sm:$0xf0]  ;;  %v15531_v11 = vld [vmem:[#allocation26 + $0x7e4] sm:$0xf0] }
 0x722   :  { %v15622_v9 = vld [vmem:[#allocation26 + $0xac4] sm:$0xf]  ;;  %v13677_v36 = vor.u32 %v15558_v28, %v13674_v56  ;;  %9163 = vmatpush.bf16.msrb.mxu0 %v14477_v22  ;;  %v13041_v22 = vor.u32 %v15403_v30, %v13040_v8  ;;  %v13168_v20 = vld [vmem:[#allocation26 + $0x4c8] sm:$0xf] }
 0x723   :  { %v13930_v34 = vld [vmem:[#allocation26 + $0xae0] sm:$0xf0]  ;;  %v15435_v29 = vld [vmem:[#allocation26 + $0x4e4] sm:$0xf0] }
 0x724   :  { %v15686_v33 = vld [vmem:[#allocation26 + $0xcc4] sm:$0xf]  ;;  %v13933_v4 = vor.u32 %v15622_v9, %v13930_v34  ;;  %9125 = vmatpush.bf16.msra.mxu1 %v13677_v36  ;;  %v12752_v9 = vld [vmem:[#allocation26 + $0x188] sm:$0xf] }
 0x725   :  { %v14186_v2 = vld [vmem:[#allocation26 + $0xce0] sm:$0xf0]  ;;  %v15331_v34 = vld [vmem:[#allocation26 + $0x1a4] sm:$0xf0] }
 0x726   :  { %v15750_v25 = vld [vmem:[#allocation26 + $0xec4] sm:$0xf]  ;;  %v14189_v35 = vor.u32 %v15686_v33, %v14186_v2  ;;  %9138 = vmatpush.bf16.msra.mxu2 %v13933_v4  ;;  %v13297_v33 = vor.u32 %v15467_v51, %v13296_v17  ;;  %v13553_v2 = vor.u32 %v15531_v11, %v13552_v57  ;;  %v13264_v36 = vld [vmem:[#allocation26 + $0x588] sm:$0xf]  ;;  %v13169_v57 = vor.u32 %v15435_v29, %v13168_v20 }
 0x727   :  { %v14442_v26 = vld [vmem:[#allocation26 + $0xee0] sm:$0xf0]  ;;  %v15459_v4 = vld [vmem:[#allocation26 + $0x5a4] sm:$0xf0] }
 0x728   :  { %v15550_v42 = vld [vmem:[#allocation26 + $0x884] sm:$0xf]  ;;  %v14445_v43 = vor.u32 %v15750_v25, %v14442_v26  ;;  %9151 = vmatpush.bf16.msra.mxu3 %v14189_v35  ;;  %v13008_v25 = vld [vmem:[#allocation26 + $0x388] sm:$0xf]  ;;  %v12753_v35 = vor.u32 %v15331_v34, %v12752_v9 }
 0x729   :  { %v13642_v45 = vld [vmem:[#allocation26 + $0x8a0] sm:$0xf0]  ;;  %v15395_v26 = vld [vmem:[#allocation26 + $0x3a4] sm:$0xf0] }
 0x72a   :  { %v15614_v59 = vld [vmem:[#allocation26 + $0xa84] sm:$0xf]  ;;  %v13645_v62 = vor.u32 %v15550_v42, %v13642_v45  ;;  %9164 = vmatpush.bf16.msrb.mxu0 %v14445_v43  ;;  %v13520_v42 = vld [vmem:[#allocation26 + $0x788] sm:$0xf]  ;;  %v13009_v43 = vor.u32 %v15395_v26, %v13008_v25 }
 0x72b   :  { %v13898_v44 = vld [vmem:[#allocation26 + $0xaa0] sm:$0xf0]  ;;  %v15523_v45 = vld [vmem:[#allocation26 + $0x7a4] sm:$0xf0] }
 0x72c   :  { %v15678_v46 = vld [vmem:[#allocation26 + $0xc84] sm:$0xf]  ;;  %v13901_v23 = vor.u32 %v15614_v59, %v13898_v44  ;;  %9126 = vmatpush.bf16.msra.mxu1 %v13645_v62  ;;  %v12720_v59 = vld [vmem:[#allocation26 + $0x148] sm:$0xf] }
 0x72d   :  { %v14154_v24 = vld [vmem:[#allocation26 + $0xca0] sm:$0xf0]  ;;  %v15323_v44 = vld [vmem:[#allocation26 + $0x164] sm:$0xf0] }
 0x72e   :  { %v15742_v49 = vld [vmem:[#allocation26 + $0xe84] sm:$0xf]  ;;  %v14157_v5 = vor.u32 %v15678_v46, %v14154_v24  ;;  %9139 = vmatpush.bf16.msra.mxu2 %v13901_v23  ;;  %v13265_v46 = vor.u32 %v15459_v4, %v13264_v36  ;;  %v13521_v24 = vor.u32 %v15523_v45, %v13520_v42  ;;  %v13232_v62 = vld [vmem:[#allocation26 + $0x548] sm:$0xf] }
 0x72f   :  { %v14410_v54 = vld [vmem:[#allocation26 + $0xea0] sm:$0xf0]  ;;  %v15451_v23 = vld [vmem:[#allocation26 + $0x564] sm:$0xf0] }
 0x730   :  { %v15542_v61 = vld [vmem:[#allocation26 + $0x844] sm:$0xf]  ;;  %v14413_v21 = vor.u32 %v15742_v49, %v14410_v54  ;;  %9152 = vmatpush.bf16.msra.mxu3 %v14157_v5  ;;  %v12976_v49 = vld [vmem:[#allocation26 + $0x348] sm:$0xf]  ;;  %v12721_v5 = vor.u32 %v15323_v44, %v12720_v59 }
 0x731   :  { %v13610_v63 = vld [vmem:[#allocation26 + $0x860] sm:$0xf0]  ;;  %v15387_v54 = vld [vmem:[#allocation26 + $0x364] sm:$0xf0] }
 0x732   :  { %v15606_v50 = vld [vmem:[#allocation26 + $0xa44] sm:$0xf]  ;;  %v13613_v12 = vor.u32 %v15542_v61, %v13610_v63  ;;  %9165 = vmatpush.bf16.msrb.mxu0 %v14413_v21  ;;  %v13488_v61 = vld [vmem:[#allocation26 + $0x748] sm:$0xf]  ;;  %v12977_v21 = vor.u32 %v15387_v54, %v12976_v49 }
 0x733   :  { %v13866_v53 = vld [vmem:[#allocation26 + $0xa60] sm:$0xf0]  ;;  %v15515_v63 = vld [vmem:[#allocation26 + $0x764] sm:$0xf0] }
 0x734   :  { %v15670_v38 = vld [vmem:[#allocation26 + $0xc44] sm:$0xf]  ;;  %v13869_v10 = vor.u32 %v15606_v50, %v13866_v53  ;;  %9127 = vmatpush.bf16.msra.mxu1 %v13613_v12  ;;  %v12688_v50 = vld [vmem:[#allocation26 + $0x108] sm:$0xf] }
 0x735   :  { %v14122_v6 = vld [vmem:[#allocation26 + $0xc60] sm:$0xf0]  ;;  %v15315_v53 = vld [vmem:[#allocation26 + $0x124] sm:$0xf0] }
 0x736   :  { %v15734_v39 = vld [vmem:[#allocation26 + $0xe44] sm:$0xf]  ;;  %v14125_v16 = vor.u32 %v15670_v38, %v14122_v6  ;;  %9140 = vmatpush.bf16.msra.mxu2 %v13869_v10  ;;  %v13233_v38 = vor.u32 %v15451_v23, %v13232_v62  ;;  %v13489_v6 = vor.u32 %v15515_v63, %v13488_v61  ;;  %v15443_v12 = vld [vmem:[#allocation26 + $0x524] sm:$0xf0] }
 0x737   :  { %v14378_v40 = vld [vmem:[#allocation26 + $0xe60] sm:$0xf0]  ;;  %v13456_v10 = vld [vmem:[#allocation26 + $0x708] sm:$0xf] }
 0x738   :  { %v15534_v31 = vld [vmem:[#allocation26 + $0x804] sm:$0xf]  ;;  %v14381_v27 = vor.u32 %v15734_v39, %v14378_v40  ;;  %9153 = vmatpush.bf16.msra.mxu3 %v14125_v16  ;;  %v12944_v39 = vld [vmem:[#allocation26 + $0x308] sm:$0xf] }
 0x739   :  { %v13578_v15 = vld [vmem:[#allocation26 + $0x820] sm:$0xf0]  ;;  %v15379_v40 = vld [vmem:[#allocation26 + $0x324] sm:$0xf0] }
 0x73a   :  { %v15598_v37 = vld [vmem:[#allocation26 + $0xa04] sm:$0xf]  ;;  %v13581_v58 = vor.u32 %v15534_v31, %v13578_v15  ;;  %9166 = vmatpush.bf16.msrb.mxu0 %v14381_v27  ;;  %v13200_v31 = vld [vmem:[#allocation26 + $0x508] sm:$0xf] }
 0x73b   :  { %v13834_v18 = vld [vmem:[#allocation26 + $0xa20] sm:$0xf0]  ;;  %v15507_v15 = vld [vmem:[#allocation26 + $0x724] sm:$0xf0] }
 0x73c   :  { %v15662_v7 = vld [vmem:[#allocation26 + $0xc04] sm:$0xf]  ;;  %v13837_v1 = vor.u32 %v15598_v37, %v13834_v18  ;;  %9128 = vmatpush.bf16.msra.mxu1 %v13581_v58  ;;  %v12689_v37 = vor.u32 %v15315_v53, %v12688_v50  ;;  %v12945_v18 = vor.u32 %v15379_v40, %v12944_v39  ;;  %v12656_v16 = vld [vmem:[#allocation26 + $0xc8] sm:$0xf] }
 0x73d   :  { %v14090_v52 = vld [vmem:[#allocation26 + $0xc20] sm:$0xf0]  ;;  %v15307_v27 = vld [vmem:[#allocation26 + $0xe4] sm:$0xf0] }
 0x73e   :  { %v15726_v3 = vld [vmem:[#allocation26 + $0xe04] sm:$0xf]  ;;  %v14093_v28 = vor.u32 %v15662_v7, %v14090_v52  ;;  %9141 = vmatpush.bf16.msra.mxu2 %v13837_v1  ;;  %v13201_v7 = vor.u32 %v15443_v12, %v13200_v31  ;;  %v13457_v52 = vor.u32 %v15507_v15, %v13456_v10  ;;  %v13424_v8 = vld [vmem:[#allocation26 + $0x6c8] sm:$0xf]  ;;  %v12657_v17 = vor.u32 %v15307_v27, %v12656_v16 }
 0x73f   :  { %v14346_v14 = vld [vmem:[#allocation26 + $0xe20] sm:$0xf0]  ;;  %9129 = vmatmul.bf16.vlgmr.msra.gmra.mxu1 %v16840_v13  ;;  %v15499_v30 = vld [vmem:[#allocation26 + $0x6e4] sm:$0xf0] }
 0x740   :  { %v14349_v56 = vor.u32 %v15726_v3, %v14346_v14  ;;  %9154 = vmatpush.bf16.msra.mxu3 %v14093_v28  ;;  %9173 = vmatpush.bf16.msrb.mxu1 %v12785_v19  ;;  %v12912_v3 = vld [vmem:[#allocation26 + $0x2c8] sm:$0xf]  ;;  %v13425_v11 = vor.u32 %v15499_v30, %v13424_v8 }
 0x741   :  { %9142 = vmatmul.bf16.vlgmr.msra.gmra.mxu2 %v16842_v55  ;;  %v15371_v14 = vld [vmem:[#allocation26 + $0x2e4] sm:$0xf0] }
 0x742   :  { %9167 = vmatpush.bf16.msrb.mxu0 %v14349_v56  ;;  %9186 = vmatpush.bf16.msrb.mxu2 %v13041_v22  ;;  %v12913_v58 = vor.u32 %v15371_v14, %v12912_v3  ;;  %v12624_v1 = vld [vmem:[#allocation26 + $0x88] sm:$0xf] }
 0x743   :  { %9155 = vmatmul.bf16.vlgmr.msra.gmra.mxu3 %v16844_v32  ;;  %v15299_v51 = vld [vmem:[#allocation26 + $0xa4] sm:$0xf0] }
 0x744   :  { %9199 = vmatpush.bf16.msrb.mxu3 %v13297_v33  ;;  %9174 = vmatpush.bf16.msrb.mxu1 %v12753_v35  ;;  %v12880_v28 = vld [vmem:[#allocation26 + $0x288] sm:$0xf]  ;;  %v12625_v33 = vor.u32 %v15299_v51, %v12624_v1 }
 0x745   :  { %9168 = vmatmul.bf16.vlgmr.msrb.gmra.mxu0 %v16846_v41  ;;  %v15363_v56 = vld [vmem:[#allocation26 + $0x2a4] sm:$0xf0] }
 0x746   :  { %9212 = vmatpush.bf16.msra.mxu0 %v13553_v2  ;;  %9187 = vmatpush.bf16.msrb.mxu2 %v13009_v43  ;;  %v13136_v19 = vld [vmem:[#allocation26 + $0x488] sm:$0xf]  ;;  %v12881_v2 = vor.u32 %v15363_v56, %v12880_v28 }
 0x747   :  { %v15427_v22 = vld [vmem:[#allocation26 + $0x4a4] sm:$0xf0] }
 0x748   :  { %9200 = vmatpush.bf16.msrb.mxu3 %v13265_v46  ;;  %9175 = vmatpush.bf16.msrb.mxu1 %v12721_v5  ;;  %v13392_v9 = vld [vmem:[#allocation26 + $0x688] sm:$0xf]  ;;  %v13137_v36 = vor.u32 %v15427_v22, %v13136_v19 }
 0x749   :  { %v15491_v34 = vld [vmem:[#allocation26 + $0x6a4] sm:$0xf0] }
 0x74a   :  { %9213 = vmatpush.bf16.msra.mxu0 %v13521_v24  ;;  %9188 = vmatpush.bf16.msrb.mxu2 %v12977_v21  ;;  %v12592_v25 = vld [vmem:[#allocation26 + $0x48] sm:$0xf]  ;;  %v13393_v4 = vor.u32 %v15491_v34, %v13392_v9 }
 0x74b   :  { %v15291_v26 = vld [vmem:[#allocation26 + $0x64] sm:$0xf0] }
 0x74c   :  { %9201 = vmatpush.bf16.msrb.mxu3 %v13233_v38  ;;  %9176 = vmatpush.bf16.msrb.mxu1 %v12689_v37  ;;  %v12848_v42 = vld [vmem:[#allocation26 + $0x248] sm:$0xf]  ;;  %v12593_v24 = vor.u32 %v15291_v26, %v12592_v25 }
 0x74d   :  { %v15355_v45 = vld [vmem:[#allocation26 + $0x264] sm:$0xf0] }
 0x74e   :  { %9214 = vmatpush.bf16.msra.mxu0 %v13489_v6  ;;  %9189 = vmatpush.bf16.msrb.mxu2 %v12945_v18  ;;  %v13104_v35 = vld [vmem:[#allocation26 + $0x448] sm:$0xf]  ;;  %v12849_v49 = vor.u32 %v15355_v45, %v12848_v42 }
 0x74f   :  { %v15419_v43 = vld [vmem:[#allocation26 + $0x464] sm:$0xf0] }
 0x750   :  { %9202 = vmatpush.bf16.msrb.mxu3 %v13201_v7  ;;  %9177 = vmatpush.bf16.msrb.mxu1 %v12657_v17  ;;  %v13360_v59 = vld [vmem:[#allocation26 + $0x648] sm:$0xf]  ;;  %v13105_v61 = vor.u32 %v15419_v43, %v13104_v35 }
 0x751   :  { %v15483_v44 = vld [vmem:[#allocation26 + $0x664] sm:$0xf0] }
 0x752   :  { %9215 = vmatpush.bf16.msra.mxu0 %v13457_v52  ;;  %9190 = vmatpush.bf16.msrb.mxu2 %v12913_v58  ;;  %v12560_v46 = vld [vmem:[#allocation26 + $0x8] sm:$0xf]  ;;  %v13361_v63 = vor.u32 %v15483_v44, %v13360_v59 }
 0x753   :  { %v15283_v54 = vld [vmem:[#allocation26 + $0x24] sm:$0xf0] }
 0x754   :  { %9203 = vmatpush.bf16.msrb.mxu3 %v13169_v57  ;;  %9178 = vmatpush.bf16.msrb.mxu1 %v12625_v33  ;;  %v12816_v62 = vld [vmem:[#allocation26 + $0x208] sm:$0xf]  ;;  %v12561_v12 = vor.u32 %v15283_v54, %v12560_v46 }
 0x755   :  { %v15347_v23 = vld [vmem:[#allocation26 + $0x224] sm:$0xf0] }
 0x756   :  { %9216 = vmatpush.bf16.msra.mxu0 %v13425_v11  ;;  %9191 = vmatpush.bf16.msrb.mxu2 %v12881_v2  ;;  %v13072_v5 = vld [vmem:[#allocation26 + $0x408] sm:$0xf]  ;;  %v12817_v10 = vor.u32 %v15347_v23, %v12816_v62 }
 0x757   :  { %v15411_v21 = vld [vmem:[#allocation26 + $0x424] sm:$0xf0] }
 0x758   :  { %9204 = vmatpush.bf16.msrb.mxu3 %v13137_v36  ;;  %v13328_v50 = vld [vmem:[#allocation26 + $0x608] sm:$0xf]  ;;  %9179 = vmatpush.bf16.msrb.mxu1 %v12593_v24  ;;  %v13073_v16 = vor.u32 %v15411_v21, %v13072_v5 }
 0x759   :  { %v15475_v53 = vld [vmem:[#allocation26 + $0x624] sm:$0xf0] }
 0x75a   :  { %9217 = vmatpush.bf16.msra.mxu0 %v13393_v4  ;;  %v13808_v38 = vld [vmem:[#allocation26 + $0x9c8] sm:$0xf]  ;;  %9192 = vmatpush.bf16.msrb.mxu2 %v12849_v49  ;;  %v13329_v27 = vor.u32 %v15475_v53, %v13328_v50 }
 0x75b   :  { %v15595_v6 = vld [vmem:[#allocation26 + $0x9e4] sm:$0xf0] }
 0x75c   :  { %v14064_v39 = vld [vmem:[#allocation26 + $0xbc8] sm:$0xf]  ;;  %9205 = vmatpush.bf16.msrb.mxu3 %v13105_v61  ;;  %v13809_v7 = vor.u32 %v15595_v6, %v13808_v38  ;;  %9180 = vmatpush.bf16.msrb.mxu1 %v12561_v12 }
 0x75d   :  { %v15659_v40 = vld [vmem:[#allocation26 + $0xbe4] sm:$0xf0] }
 0x75e   :  { %v14320_v31 = vld [vmem:[#allocation26 + $0xdc8] sm:$0xf]  ;;  %9218 = vmatpush.bf16.msra.mxu0 %v13361_v63  ;;  %v14065_v52 = vor.u32 %v15659_v40, %v14064_v39  ;;  %9193 = vmatpush.bf16.msrb.mxu2 %v12817_v10 }
 0x75f   :  { %v15723_v15 = vld [vmem:[#allocation26 + $0xde4] sm:$0xf0]  ;;  %9181 = vmatmul.bf16.vlgmr.msrb.gmra.mxu1 %v16820_v47 }
 0x760   :  { %v14576_v37 = vld [vmem:[#allocation26 + $0xfc8] sm:$0xf]  ;;  %v14321_v20 = vor.u32 %v15723_v15, %v14320_v31  ;;  %9206 = vmatpush.bf16.msrb.mxu3 %v13073_v16  ;;  %9225 = vmatpush.bf16.msra.mxu1 %v13809_v7 }
 0x761   :  { %v15787_v18 = vld [vmem:[#allocation26 + $0xfe4] sm:$0xf0]  ;;  %9194 = vmatmul.bf16.vlgmr.msrb.gmra.mxu2 %v16822_v48 }
 0x762   :  { %v13776_v3 = vld [vmem:[#allocation26 + $0x988] sm:$0xf]  ;;  %v14577_v29 = vor.u32 %v15787_v18, %v14576_v37  ;;  %9219 = vmatpush.bf16.msra.mxu0 %v13329_v27  ;;  %9238 = vmatpush.bf16.msra.mxu2 %v14065_v52 }
 0x763   :  { %v15587_v14 = vld [vmem:[#allocation26 + $0x9a4] sm:$0xf0]  ;;  %9207 = vmatmul.bf16.vlgmr.msrb.gmra.mxu3 %v16824_v60 }
 0x764   :  { %v14032_v8 = vld [vmem:[#allocation26 + $0xb88] sm:$0xf]  ;;  %v13777_v57 = vor.u32 %v15587_v14, %v13776_v3  ;;  %9251 = vmatpush.bf16.msra.mxu3 %v14321_v20 }
 0x765   :  { %v15651_v30 = vld [vmem:[#allocation26 + $0xba4] sm:$0xf0]  ;;  %9220 = vmatmul.bf16.vlgmr.msra.gmra.mxu0 %v16826_v0 }
 0x766   :  { %v14288_v17 = vld [vmem:[#allocation26 + $0xd88] sm:$0xf]  ;;  %v14033_v11 = vor.u32 %v15651_v30, %v14032_v8  ;;  %9264 = vmatpush.bf16.msrb.mxu0 %v14577_v29  ;;  %9226 = vmatpush.bf16.msra.mxu1 %v13777_v57 }
 0x767   :  { %v15715_v58 = vld [vmem:[#allocation26 + $0xda4] sm:$0xf0] }
 0x768   :  { %v14544_v1 = vld [vmem:[#allocation26 + $0xf88] sm:$0xf]  ;;  %v14289_v19 = vor.u32 %v15715_v58, %v14288_v17  ;;  %9239 = vmatpush.bf16.msra.mxu2 %v14033_v11 }
 0x769   :  { %v15779_v51 = vld [vmem:[#allocation26 + $0xfa4] sm:$0xf0] }
 0x76a   :  { %v13744_v28 = vld [vmem:[#allocation26 + $0x948] sm:$0xf]  ;;  %v14545_v22 = vor.u32 %v15779_v51, %v14544_v1  ;;  %9252 = vmatpush.bf16.msra.mxu3 %v14289_v19 }
 0x76b   :  { %v15579_v56 = vld [vmem:[#allocation26 + $0x964] sm:$0xf0] }
 0x76c   :  { %v14000_v9 = vld [vmem:[#allocation26 + $0xb48] sm:$0xf]  ;;  %v13745_v36 = vor.u32 %v15579_v56, %v13744_v28  ;;  %9265 = vmatpush.bf16.msrb.mxu0 %v14545_v22 }
 0x76d   :  { %v15643_v34 = vld [vmem:[#allocation26 + $0xb64] sm:$0xf0] }
 0x76e   :  { %v14256_v33 = vld [vmem:[#allocation26 + $0xd48] sm:$0xf]  ;;  %v14001_v4 = vor.u32 %v15643_v34, %v14000_v9  ;;  %9227 = vmatpush.bf16.msra.mxu1 %v13745_v36 }
 0x76f   :  { %v15707_v2 = vld [vmem:[#allocation26 + $0xd64] sm:$0xf0] }
 0x770   :  { %v14512_v25 = vld [vmem:[#allocation26 + $0xf48] sm:$0xf]  ;;  %v14257_v35 = vor.u32 %v15707_v2, %v14256_v33  ;;  %9240 = vmatpush.bf16.msra.mxu2 %v14001_v4 }
 0x771   :  { %v15771_v26 = vld [vmem:[#allocation26 + $0xf64] sm:$0xf0] }
 0x772   :  { %v13712_v42 = vld [vmem:[#allocation26 + $0x908] sm:$0xf]  ;;  %v14513_v43 = vor.u32 %v15771_v26, %v14512_v25  ;;  %9253 = vmatpush.bf16.msra.mxu3 %v14257_v35  ;;  %v15335_v35 = vld [vmem:[#allocation26 + $0x1cc] sm:$0xf] }
 0x773   :  { %v15571_v45 = vld [vmem:[#allocation26 + $0x924] sm:$0xf0] }
 0x774   :  { %v13968_v59 = vld [vmem:[#allocation26 + $0xb08] sm:$0xf]  ;;  %v13713_v62 = vor.u32 %v15571_v45, %v13712_v42  ;;  %9266 = vmatpush.bf16.msrb.mxu0 %v14513_v43  ;;  %v12786_v43 = vld [vmem:[#allocation26 + $0x1e8] sm:$0xf0] }
 0x775   :  { %v15635_v44 = vld [vmem:[#allocation26 + $0xb24] sm:$0xf0] }
 0x776   :  { %v14224_v46 = vld [vmem:[#allocation26 + $0xd08] sm:$0xf]  ;;  %v13969_v23 = vor.u32 %v15635_v44, %v13968_v59  ;;  %9228 = vmatpush.bf16.msra.mxu1 %v13713_v62  ;;  %v15399_v59 = vld [vmem:[#allocation26 + $0x3cc] sm:$0xf] }
 0x777   :  { %v15699_v24 = vld [vmem:[#allocation26 + $0xd24] sm:$0xf0]  ;;  %v13042_v44 = vld [vmem:[#allocation26 + $0x3e8] sm:$0xf0] }
 0x778   :  { %v14480_v49 = vld [vmem:[#allocation26 + $0xf08] sm:$0xf]  ;;  %v14225_v5 = vor.u32 %v15699_v24, %v14224_v46  ;;  %9241 = vmatpush.bf16.msra.mxu2 %v13969_v23  ;;  %v15463_v46 = vld [vmem:[#allocation26 + $0x5cc] sm:$0xf] }
 0x779   :  { %v15763_v54 = vld [vmem:[#allocation26 + $0xf24] sm:$0xf0]  ;;  %v15527_v62 = vld [vmem:[#allocation26 + $0x7cc] sm:$0xf] }
 0x77a   :  { %v13680_v61 = vld [vmem:[#allocation26 + $0x8c8] sm:$0xf]  ;;  %v14481_v21 = vor.u32 %v15763_v54, %v14480_v49  ;;  %9254 = vmatpush.bf16.msra.mxu3 %v14225_v5  ;;  %v13298_v54 = vld [vmem:[#allocation26 + $0x5e8] sm:$0xf0]  ;;  %v12789_v5 = vor.u32 %v15335_v35, %v12786_v43 }
 0x77b   :  { %v15563_v63 = vld [vmem:[#allocation26 + $0x8e4] sm:$0xf0]  ;;  %v13554_v23 = vld [vmem:[#allocation26 + $0x7e8] sm:$0xf0] }
 0x77c   :  { %v13936_v50 = vld [vmem:[#allocation26 + $0xac8] sm:$0xf]  ;;  %v13681_v31 = vor.u32 %v15563_v63, %v13680_v61  ;;  %9267 = vmatpush.bf16.msrb.mxu0 %v14481_v21  ;;  %v13045_v21 = vor.u32 %v15399_v59, %v13042_v44  ;;  %v8987_v59 = vpop.f32.mrf.mxu2  ;;  %v15367_v44 = vld [vmem:[#allocation26 + $0x2cc] sm:$0xf] }
 0x77d   :  { %v15627_v53 = vld [vmem:[#allocation26 + $0xae4] sm:$0xf0] }
 0x77e   :  { %v14192_v38 = vld [vmem:[#allocation26 + $0xcc8] sm:$0xf]  ;;  %v13937_v12 = vor.u32 %v15627_v53, %v13936_v50  ;;  %9229 = vmatpush.bf16.msra.mxu1 %v13681_v31  ;;  %v15327_v50 = vld [vmem:[#allocation26 + $0x18c] sm:$0xf] }
 0x77f   :  { %v15691_v6 = vld [vmem:[#allocation26 + $0xce4] sm:$0xf0]  ;;  %v12754_v53 = vld [vmem:[#allocation26 + $0x1a8] sm:$0xf0] }
 0x780   :  { %v14448_v39 = vld [vmem:[#allocation26 + $0xec8] sm:$0xf]  ;;  %v14193_v37 = vor.u32 %v15691_v6, %v14192_v38  ;;  %9242 = vmatpush.bf16.msra.mxu2 %v13937_v12  ;;  %v13301_v38 = vor.u32 %v15463_v46, %v13298_v54  ;;  %v13557_v6 = vor.u32 %v15527_v62, %v13554_v23  ;;  %v15455_v31 = vld [vmem:[#allocation26 + $0x58c] sm:$0xf] }
 0x781   :  { %v15755_v40 = vld [vmem:[#allocation26 + $0xee4] sm:$0xf0]  ;;  %v13266_v12 = vld [vmem:[#allocation26 + $0x5a8] sm:$0xf0] }
 0x782   :  { %v13648_v10 = vld [vmem:[#allocation26 + $0x888] sm:$0xf]  ;;  %v14449_v18 = vor.u32 %v15755_v40, %v14448_v39  ;;  %9255 = vmatpush.bf16.msra.mxu3 %v14193_v37  ;;  %v15391_v39 = vld [vmem:[#allocation26 + $0x38c] sm:$0xf]  ;;  %v12757_v37 = vor.u32 %v15327_v50, %v12754_v53 }
 0x783   :  { %v15555_v15 = vld [vmem:[#allocation26 + $0x8a4] sm:$0xf0]  ;;  %v13010_v40 = vld [vmem:[#allocation26 + $0x3a8] sm:$0xf0] }
 0x784   :  { %v13904_v16 = vld [vmem:[#allocation26 + $0xa88] sm:$0xf]  ;;  %v13649_v20 = vor.u32 %v15555_v15, %v13648_v10  ;;  %9268 = vmatpush.bf16.msrb.mxu0 %v14449_v18  ;;  %v15519_v10 = vld [vmem:[#allocation26 + $0x78c] sm:$0xf]  ;;  %v13013_v18 = vor.u32 %v15391_v39, %v13010_v40 }
 0x785   :  { %v15619_v27 = vld [vmem:[#allocation26 + $0xaa4] sm:$0xf0]  ;;  %v13522_v15 = vld [vmem:[#allocation26 + $0x7a8] sm:$0xf0] }
 0x786   :  { %v14160_v7 = vld [vmem:[#allocation26 + $0xc88] sm:$0xf]  ;;  %v13905_v29 = vor.u32 %v15619_v27, %v13904_v16  ;;  %9230 = vmatpush.bf16.msra.mxu1 %v13649_v20  ;;  %v15319_v16 = vld [vmem:[#allocation26 + $0x14c] sm:$0xf] }
 0x787   :  { %v15683_v52 = vld [vmem:[#allocation26 + $0xca4] sm:$0xf0]  ;;  %v12722_v27 = vld [vmem:[#allocation26 + $0x168] sm:$0xf0] }
 0x788   :  { %v14416_v3 = vld [vmem:[#allocation26 + $0xe88] sm:$0xf]  ;;  %v14161_v17 = vor.u32 %v15683_v52, %v14160_v7  ;;  %9243 = vmatpush.bf16.msra.mxu2 %v13905_v29  ;;  %v13269_v7 = vor.u32 %v15455_v31, %v13266_v12  ;;  %v13525_v52 = vor.u32 %v15519_v10, %v13522_v15  ;;  %v15447_v20 = vld [vmem:[#allocation26 + $0x54c] sm:$0xf] }
 0x789   :  { %v15747_v14 = vld [vmem:[#allocation26 + $0xea4] sm:$0xf0]  ;;  %v13234_v29 = vld [vmem:[#allocation26 + $0x568] sm:$0xf0] }
 0x78a   :  { %v13616_v8 = vld [vmem:[#allocation26 + $0x848] sm:$0xf]  ;;  %v14417_v58 = vor.u32 %v15747_v14, %v14416_v3  ;;  %9256 = vmatpush.bf16.msra.mxu3 %v14161_v17  ;;  %v15383_v3 = vld [vmem:[#allocation26 + $0x34c] sm:$0xf]  ;;  %v8974_v17 = vpop.f32.mrf.mxu1 }
 0x78b   :  { %v15547_v30 = vld [vmem:[#allocation26 + $0x864] sm:$0xf0]  ;;  %v12978_v14 = vld [vmem:[#allocation26 + $0x368] sm:$0xf0] }
 0x78c   :  { %v13872_v1 = vld [vmem:[#allocation26 + $0xa48] sm:$0xf]  ;;  %v13617_v22 = vor.u32 %v15547_v30, %v13616_v8  ;;  %9269 = vmatpush.bf16.msrb.mxu0 %v14417_v58  ;;  %v15511_v8 = vld [vmem:[#allocation26 + $0x74c] sm:$0xf]  ;;  %v12725_v58 = vor.u32 %v15319_v16, %v12722_v27 }
 0x78d   :  { %v15611_v51 = vld [vmem:[#allocation26 + $0xa64] sm:$0xf0]  ;;  %v13490_v30 = vld [vmem:[#allocation26 + $0x768] sm:$0xf0] }
 0x78e   :  { %v14128_v57 = vld [vmem:[#allocation26 + $0xc48] sm:$0xf]  ;;  %v13873_v9 = vor.u32 %v15611_v51, %v13872_v1  ;;  %9231 = vmatpush.bf16.msra.mxu1 %v13617_v22  ;;  %v12981_v1 = vor.u32 %v15383_v3, %v12978_v14  ;;  %v16868_v51 = vld [vmem:[#allocation28] sm:$0xff]  ;;  %v15375_v22 = vld [vmem:[#allocation26 + $0x30c] sm:$0xf] }
 0x78f   :  { %v15675_v11 = vld [vmem:[#allocation26 + $0xc64] sm:$0xf0]  ;;  %v12914_v46 = vld [vmem:[#allocation26 + $0x2e8] sm:$0xf0] }
 0x790   :  { %v14384_v28 = vld [vmem:[#allocation26 + $0xe48] sm:$0xf]  ;;  %v14129_v25 = vor.u32 %v15675_v11, %v14128_v57  ;;  %9244 = vmatpush.bf16.msra.mxu2 %v13873_v9  ;;  %v16870_v57 = vpop.f32.mrf.mxu0  ;;  %v15311_v11 = vld [vmem:[#allocation26 + $0x10c] sm:$0xf] }
 0x791   :  { %v15739_v56 = vld [vmem:[#allocation26 + $0xe64] sm:$0xf0]  ;;  %v12946_v9 = vld [vmem:[#allocation26 + $0x328] sm:$0xf0] }
 0x792   :  { %v13584_v19 = vld [vmem:[#allocation26 + $0x808] sm:$0xf]  ;;  %v14385_v26 = vor.u32 %v15739_v56, %v14384_v28  ;;  %9257 = vmatpush.bf16.msra.mxu3 %v14129_v25  ;;  %v12690_v28 = vld [vmem:[#allocation26 + $0x128] sm:$0xf0]  ;;  %v13237_v56 = vor.u32 %v15447_v20, %v13234_v29  ;;  %v8989_v20 = vpop.f32.mrf.mxu2 }
 0x793   :  { %v15539_v34 = vld [vmem:[#allocation26 + $0x824] sm:$0xf0]  ;;  %v13458_v25 = vld [vmem:[#allocation26 + $0x728] sm:$0xf0] }
 0x794   :  { %v13840_v33 = vld [vmem:[#allocation26 + $0xa08] sm:$0xf]  ;;  %v13585_v24 = vor.u32 %v15539_v34, %v13584_v19  ;;  %9270 = vmatpush.bf16.msrb.mxu0 %v14385_v26  ;;  %v13493_v19 = vor.u32 %v15511_v8, %v13490_v30  ;;  %v15439_v34 = vld [vmem:[#allocation26 + $0x50c] sm:$0xf]  ;;  %v6389_v26 = vperm.slane %v16868_v51, 0 }
 0x795   :  { %v15603_v2 = vld [vmem:[#allocation26 + $0xa24] sm:$0xf0]  ;;  %v13170_v54 = vld [vmem:[#allocation26 + $0x4e8] sm:$0xf0] }
 0x796   :  { %v14096_v36 = vld [vmem:[#allocation26 + $0xc08] sm:$0xf]  ;;  %v13841_v49 = vor.u32 %v15603_v2, %v13840_v33  ;;  %9232 = vmatpush.bf16.msra.mxu1 %v13585_v24  ;;  %v13202_v33 = vld [vmem:[#allocation26 + $0x528] sm:$0xf0] }
 0x797   :  { %v15667_v4 = vld [vmem:[#allocation26 + $0xc24] sm:$0xf0]  ;;  %v15503_v2 = vld [vmem:[#allocation26 + $0x70c] sm:$0xf]  ;;  %v13205_v35 = vor.u32 %v15439_v34, %v13202_v33 }
 0x798   :  { %v14352_v42 = vld [vmem:[#allocation26 + $0xe08] sm:$0xf]  ;;  %v14097_v61 = vor.u32 %v15667_v4, %v14096_v36  ;;  %9245 = vmatpush.bf16.msra.mxu2 %v13841_v49  ;;  %v12693_v36 = vor.u32 %v15311_v11, %v12690_v28  ;;  %v12949_v4 = vor.u32 %v15375_v22, %v12946_v9  ;;  %v13461_v43 = vor.u32 %v15503_v2, %v13458_v25  ;;  %v15431_v24 = vld [vmem:[#allocation26 + $0x4cc] sm:$0xf]  ;;  %v9000_v49 = vpop.f32.mrf.mxu3  ;;  %v9015_v50 = vpop.f32.mrf.mxu0 }
 0x799   :  { %v15731_v45 = vld [vmem:[#allocation26 + $0xe24] sm:$0xf0]  ;;  %9233 = vmatmul.bf16.vlgmr.msra.gmra.mxu1 %v16840_v13  ;;  %v15495_v62 = vld [vmem:[#allocation26 + $0x6cc] sm:$0xf] }
 0x79a   :  { %v14353_v63 = vor.u32 %v15731_v45, %v14352_v42  ;;  %9258 = vmatpush.bf16.msra.mxu3 %v14097_v61  ;;  %9277 = vmatpush.bf16.msrb.mxu1 %v12789_v5  ;;  %v15303_v42 = vld [vmem:[#allocation26 + $0xcc] sm:$0xf]  ;;  %v8976_v61 = vpop.f32.mrf.mxu1 }
 0x79b   :  { %9246 = vmatmul.bf16.vlgmr.msra.gmra.mxu2 %v16842_v55  ;;  %v12658_v45 = vld [vmem:[#allocation26 + $0xe8] sm:$0xf0] }
 0x79c   :  { %9271 = vmatpush.bf16.msrb.mxu0 %v14353_v63  ;;  %9290 = vmatpush.bf16.msrb.mxu2 %v13045_v21  ;;  %v13426_v23 = vld [vmem:[#allocation26 + $0x6e8] sm:$0xf0]  ;;  %v8975_v63 = vadd.f32 %v8974_v17, %v6389_v26  ;;  %v12661_v5 = vor.u32 %v15303_v42, %v12658_v45  ;;  %v12917_v21 = vor.u32 %v15367_v44, %v12914_v46 }
 0x79d   :  { %9259 = vmatmul.bf16.vlgmr.msra.gmra.mxu3 %v16844_v32  ;;  %v15295_v53 = vld [vmem:[#allocation26 + $0x8c] sm:$0xf]  ;;  %v13429_v39 = vor.u32 %v15495_v62, %v13426_v23 }
 0x79e   :  { %9303 = vmatpush.bf16.msrb.mxu3 %v13301_v38  ;;  %9278 = vmatpush.bf16.msrb.mxu1 %v12757_v37  ;;  %v12626_v38 = vld [vmem:[#allocation26 + $0xa8] sm:$0xf0]  ;;  %v8988_v10 = vadd.f32 %v8987_v59, %v8975_v63 }
 0x79f   :  { %9272 = vmatmul.bf16.vlgmr.msrb.gmra.mxu0 %v16846_v41  ;;  %v15359_v40 = vld [vmem:[#allocation26 + $0x28c] sm:$0xf]  ;;  %v12629_v16 = vor.u32 %v15295_v53, %v12626_v38  ;;  %v9039_v53 = vpop.f32.mrf.mxu2 }
 0x7a0   :  { %9316 = vmatpush.bf16.msra.mxu0 %v13557_v6  ;;  %9291 = vmatpush.bf16.msrb.mxu2 %v13013_v18  ;;  %v13173_v6 = vor.u32 %v15431_v24, %v13170_v54  ;;  %v12882_v31 = vld [vmem:[#allocation26 + $0x2a8] sm:$0xf0]  ;;  %v9001_v17 = vadd.f32 %v9000_v49, %v8988_v10  ;;  %v9065_v34 = vpop.f32.mrf.mxu0 }
 0x7a1   :  { %v15423_v12 = vld [vmem:[#allocation26 + $0x48c] sm:$0xf]  ;;  %v12885_v27 = vor.u32 %v15359_v40, %v12882_v31 }
 0x7a2   :  { %9304 = vmatpush.bf16.msrb.mxu3 %v13269_v7  ;;  %9279 = vmatpush.bf16.msrb.mxu1 %v12725_v58  ;;  %v13138_v15 = vld [vmem:[#allocation26 + $0x4a8] sm:$0xf0]  ;;  %v9002_v58 = vpop.f32.mrf.mxu3 }
 0x7a3   :  { %v15487_v37 = vld [vmem:[#allocation26 + $0x68c] sm:$0xf]  ;;  %v13141_v3 = vor.u32 %v15423_v12, %v13138_v15 }
 0x7a4   :  { %9317 = vmatpush.bf16.msra.mxu0 %v13525_v52  ;;  %9292 = vmatpush.bf16.msrb.mxu2 %v12981_v1  ;;  %v13394_v18 = vld [vmem:[#allocation26 + $0x6a8] sm:$0xf0] }
 0x7a5   :  { %v15287_v7 = vld [vmem:[#allocation26 + $0x4c] sm:$0xf]  ;;  %v13397_v14 = vor.u32 %v15487_v37, %v13394_v18 }
 0x7a6   :  { %9305 = vmatpush.bf16.msrb.mxu3 %v13237_v56  ;;  %9280 = vmatpush.bf16.msrb.mxu1 %v12693_v36  ;;  %v12594_v52 = vld [vmem:[#allocation26 + $0x68] sm:$0xf0]  ;;  %v9026_v56 = vpop.f32.mrf.mxu1 }
 0x7a7   :  { %v15351_v29 = vld [vmem:[#allocation26 + $0x24c] sm:$0xf]  ;;  %v12597_v22 = vor.u32 %v15287_v7, %v12594_v52 }
 0x7a8   :  { %9318 = vmatpush.bf16.msra.mxu0 %v13493_v19  ;;  %9293 = vmatpush.bf16.msrb.mxu2 %v12949_v4  ;;  %v12850_v8 = vld [vmem:[#allocation26 + $0x268] sm:$0xf0]  ;;  %v9067_v7 = vpop.f32.mrf.mxu0 }
 0x7a9   :  { %v15415_v30 = vld [vmem:[#allocation26 + $0x44c] sm:$0xf]  ;;  %v12853_v9 = vor.u32 %v15351_v29, %v12850_v8 }
 0x7aa   :  { %9306 = vmatpush.bf16.msrb.mxu3 %v13205_v35  ;;  %9281 = vmatpush.bf16.msrb.mxu1 %v12661_v5  ;;  %v13106_v1 = vld [vmem:[#allocation26 + $0x468] sm:$0xf0]  ;;  %v9014_v35 = vadd.f32 %v16870_v57, %v9001_v17 }
 0x7ab   :  { %v15479_v11 = vld [vmem:[#allocation26 + $0x64c] sm:$0xf]  ;;  %v13109_v26 = vor.u32 %v15415_v30, %v13106_v1 }
 0x7ac   :  { %9319 = vmatpush.bf16.msra.mxu0 %v13461_v43  ;;  %9294 = vmatpush.bf16.msrb.mxu2 %v12917_v21  ;;  %v13362_v28 = vld [vmem:[#allocation26 + $0x668] sm:$0xf0]  ;;  %v9027_v54 = vadd.f32 %v9026_v56, %v9014_v35 }
 0x7ad   :  { %v15279_v19 = vld [vmem:[#allocation26 + $0xc] sm:$0xf]  ;;  %v13365_v36 = vor.u32 %v15479_v11, %v13362_v28 }
 0x7ae   :  { %9307 = vmatpush.bf16.msrb.mxu3 %v13173_v6  ;;  %9282 = vmatpush.bf16.msrb.mxu1 %v12629_v16  ;;  %v12562_v33 = vld [vmem:[#allocation26 + $0x28] sm:$0xf0]  ;;  %v9040_v6 = vadd.f32 %v9039_v53, %v9027_v54  ;;  %v9028_v15 = vpop.f32.mrf.mxu1 }
 0x7af   :  { %v15343_v2 = vld [vmem:[#allocation26 + $0x20c] sm:$0xf]  ;;  %v12565_v62 = vor.u32 %v15279_v19, %v12562_v33 }
 0x7b0   :  { %9320 = vmatpush.bf16.msra.mxu0 %v13429_v39  ;;  %9295 = vmatpush.bf16.msrb.mxu2 %v12885_v27  ;;  %v12818_v25 = vld [vmem:[#allocation26 + $0x228] sm:$0xf0]  ;;  %v9052_v39 = vpop.f32.mrf.mxu3 }
 0x7b1   :  { %v15407_v4 = vld [vmem:[#allocation26 + $0x40c] sm:$0xf]  ;;  %v12821_v23 = vor.u32 %v15343_v2, %v12818_v25  ;;  %v9053_v27 = vadd.f32 %v9052_v39, %v9040_v6 }
 0x7b2   :  { %9308 = vmatpush.bf16.msrb.mxu3 %v13141_v3  ;;  %v13074_v42 = vld [vmem:[#allocation26 + $0x428] sm:$0xf0]  ;;  %9283 = vmatpush.bf16.msrb.mxu1 %v12597_v22 }
 0x7b3   :  { %v15471_v45 = vld [vmem:[#allocation26 + $0x60c] sm:$0xf]  ;;  %v13077_v21 = vor.u32 %v15407_v4, %v13074_v42  ;;  %v9066_v20 = vadd.f32 %v9065_v34, %v9053_v27  ;;  %v9041_v34 = vpop.f32.mrf.mxu2 }
 0x7b4   :  { %9321 = vmatpush.bf16.msra.mxu0 %v13397_v14  ;;  %v13330_v43 = vld [vmem:[#allocation26 + $0x628] sm:$0xf0]  ;;  %9296 = vmatpush.bf16.msrb.mxu2 %v12853_v9 }
 0x7b5   :  { %v15591_v59 = vld [vmem:[#allocation26 + $0x9cc] sm:$0xf]  ;;  %v13333_v50 = vor.u32 %v15471_v45, %v13330_v43  ;;  %9797 = vst [vmem:[#allocation29] sm:$0xff] %v9066_v20 }
 0x7b6   :  { %v13810_v44 = vld [vmem:[#allocation26 + $0x9e8] sm:$0xf0]  ;;  %9309 = vmatpush.bf16.msrb.mxu3 %v13109_v26  ;;  %9284 = vmatpush.bf16.msrb.mxu1 %v12565_v62 }
 0x7b7   :  { %v15655_v46 = vld [vmem:[#allocation26 + $0xbcc] sm:$0xf]  ;;  %v13813_v57 = vor.u32 %v15591_v59, %v13810_v44 }
 0x7b8   :  { %v14066_v24 = vld [vmem:[#allocation26 + $0xbe8] sm:$0xf0]  ;;  %9322 = vmatpush.bf16.msra.mxu0 %v13365_v36  ;;  %9297 = vmatpush.bf16.msrb.mxu2 %v12821_v23  ;;  %v9054_v25 = vpop.f32.mrf.mxu3 }
 0x7b9   :  { %v15719_v49 = vld [vmem:[#allocation26 + $0xdcc] sm:$0xf]  ;;  %v14069_v38 = vor.u32 %v15655_v46, %v14066_v24  ;;  %9285 = vmatmul.bf16.vlgmr.msrb.gmra.mxu1 %v16820_v47  ;;  %v16878_v24 = vpop.f32.mrf.mxu1 }
 0x7ba   :  { %v14322_v61 = vld [vmem:[#allocation26 + $0xde8] sm:$0xf0]  ;;  %9310 = vmatpush.bf16.msrb.mxu3 %v13077_v21  ;;  %9329 = vmatpush.bf16.msra.mxu1 %v13813_v57 }
 0x7bb   :  { %v15783_v63 = vld [vmem:[#allocation26 + $0xfcc] sm:$0xf]  ;;  %v14325_v12 = vor.u32 %v15719_v49, %v14322_v61  ;;  %9298 = vmatmul.bf16.vlgmr.msrb.gmra.mxu2 %v16822_v48  ;;  %v16880_v49 = vpop.f32.mrf.mxu0 }
 0x7bc   :  { %v14578_v5 = vld [vmem:[#allocation26 + $0xfe8] sm:$0xf0]  ;;  %9323 = vmatpush.bf16.msra.mxu0 %v13333_v50  ;;  %9342 = vmatpush.bf16.msra.mxu2 %v14069_v38 }
 0x7bd   :  { %v15583_v40 = vld [vmem:[#allocation26 + $0x98c] sm:$0xf]  ;;  %v14581_v10 = vor.u32 %v15783_v63, %v14578_v5  ;;  %9311 = vmatmul.bf16.vlgmr.msrb.gmra.mxu3 %v16824_v60 }
 0x7be   :  { %v13778_v31 = vld [vmem:[#allocation26 + $0x9a8] sm:$0xf0]  ;;  %9355 = vmatpush.bf16.msra.mxu3 %v14325_v12 }
 0x7bf   :  { %v15647_v37 = vld [vmem:[#allocation26 + $0xb8c] sm:$0xf]  ;;  %v13781_v29 = vor.u32 %v15583_v40, %v13778_v31  ;;  %9324 = vmatmul.bf16.vlgmr.msra.gmra.mxu0 %v16826_v0 }
 0x7c0   :  { %v14034_v18 = vld [vmem:[#allocation26 + $0xba8] sm:$0xf0]  ;;  %9368 = vmatpush.bf16.msrb.mxu0 %v14581_v10  ;;  %v16884_v7 = vpop.f32.mrf.mxu3 }
 0x7c1   :  { %v15711_v16 = vld [vmem:[#allocation26 + $0xd8c] sm:$0xf]  ;;  %v14037_v8 = vor.u32 %v15647_v37, %v14034_v18  ;;  %9330 = vmatpush.bf16.msra.mxu1 %v13781_v29  ;;  %v16882_v37 = vpop.f32.mrf.mxu2  ;;  %v9080_v20 = vpop.f32.mrf.mxu1 }
 0x7c2   :  { %v14290_v52 = vld [vmem:[#allocation26 + $0xda8] sm:$0xf0]  ;;  %v13528_v20 = vld [vmem:[#allocation26 + $0x790] sm:$0xf] }
 0x7c3   :  { %v15775_v3 = vld [vmem:[#allocation26 + $0xf8c] sm:$0xf]  ;;  %v14293_v1 = vor.u32 %v15711_v16, %v14290_v52  ;;  %9343 = vmatpush.bf16.msra.mxu2 %v14037_v8  ;;  %v9119_v29 = vpop.f32.mrf.mxu0 }
 0x7c4   :  { %v14546_v14 = vld [vmem:[#allocation26 + $0xfa8] sm:$0xf0]  ;;  %v15524_v29 = vld [vmem:[#allocation26 + $0x7ac] sm:$0xf0] }
 0x7c5   :  { %v15575_v30 = vld [vmem:[#allocation26 + $0x94c] sm:$0xf]  ;;  %v14549_v11 = vor.u32 %v15775_v3, %v14546_v14  ;;  %9356 = vmatpush.bf16.msra.mxu3 %v14293_v1 }
 0x7c6   :  { %v13746_v17 = vld [vmem:[#allocation26 + $0x968] sm:$0xf0] }
 0x7c7   :  { %v15639_v58 = vld [vmem:[#allocation26 + $0xb4c] sm:$0xf]  ;;  %v13749_v33 = vor.u32 %v15575_v30, %v13746_v17  ;;  %9369 = vmatpush.bf16.msrb.mxu0 %v14549_v11 }
 0x7c8   :  { %v14002_v28 = vld [vmem:[#allocation26 + $0xb68] sm:$0xf0] }
 0x7c9   :  { %v15703_v56 = vld [vmem:[#allocation26 + $0xd4c] sm:$0xf]  ;;  %v14005_v2 = vor.u32 %v15639_v58, %v14002_v28  ;;  %9331 = vmatpush.bf16.msra.mxu1 %v13749_v33 }
 0x7ca   :  { %v14258_v19 = vld [vmem:[#allocation26 + $0xd68] sm:$0xf0] }
 0x7cb   :  { %v15767_v22 = vld [vmem:[#allocation26 + $0xf4c] sm:$0xf]  ;;  %v14261_v4 = vor.u32 %v15703_v56, %v14258_v19  ;;  %9344 = vmatpush.bf16.msra.mxu2 %v14005_v2 }
 0x7cc   :  { %v14514_v9 = vld [vmem:[#allocation26 + $0xf68] sm:$0xf0] }
 0x7cd   :  { %v15567_v26 = vld [vmem:[#allocation26 + $0x90c] sm:$0xf]  ;;  %v14517_v42 = vor.u32 %v15767_v22, %v14514_v9  ;;  %9357 = vmatpush.bf16.msra.mxu3 %v14261_v4 }
 0x7ce   :  { %v13714_v36 = vld [vmem:[#allocation26 + $0x928] sm:$0xf0] }
 0x7cf   :  { %v15631_v45 = vld [vmem:[#allocation26 + $0xb0c] sm:$0xf]  ;;  %v13717_v54 = vor.u32 %v15567_v26, %v13714_v36  ;;  %9370 = vmatpush.bf16.msrb.mxu0 %v14517_v42 }
 0x7d0   :  { %v13970_v35 = vld [vmem:[#allocation26 + $0xb28] sm:$0xf0] }
 0x7d1   :  { %v15695_v43 = vld [vmem:[#allocation26 + $0xd0c] sm:$0xf]  ;;  %v13973_v62 = vor.u32 %v15631_v45, %v13970_v35  ;;  %9332 = vmatpush.bf16.msra.mxu1 %v13717_v54  ;;  %v9093_v35 = vpop.f32.mrf.mxu2 }
 0x7d2   :  { %v14226_v59 = vld [vmem:[#allocation26 + $0xd28] sm:$0xf0] }
 0x7d3   :  { %v15759_v44 = vld [vmem:[#allocation26 + $0xf0c] sm:$0xf]  ;;  %v14229_v63 = vor.u32 %v15695_v43, %v14226_v59  ;;  %9345 = vmatpush.bf16.msra.mxu2 %v13973_v62  ;;  %v12792_v62 = vld [vmem:[#allocation26 + $0x1d0] sm:$0xf] }
 0x7d4   :  { %v14482_v46 = vld [vmem:[#allocation26 + $0xf28] sm:$0xf0] }
 0x7d5   :  { %v15559_v23 = vld [vmem:[#allocation26 + $0x8cc] sm:$0xf]  ;;  %v14485_v5 = vor.u32 %v15759_v44, %v14482_v46  ;;  %9358 = vmatpush.bf16.msra.mxu3 %v14229_v63  ;;  %v9106_v46 = vpop.f32.mrf.mxu3  ;;  %v15404_v63 = vld [vmem:[#allocation26 + $0x3ec] sm:$0xf0] }
 0x7d6   :  { %v13682_v61 = vld [vmem:[#allocation26 + $0x8e8] sm:$0xf0]  ;;  %v9130_v46 = vpop.f32.mrf.mxu1 }
 0x7d7   :  { %v15623_v21 = vld [vmem:[#allocation26 + $0xacc] sm:$0xf]  ;;  %v13685_v39 = vor.u32 %v15559_v23, %v13682_v61  ;;  %9371 = vmatpush.bf16.msrb.mxu0 %v14485_v5  ;;  %v15340_v23 = vld [vmem:[#allocation26 + $0x1ec] sm:$0xf0] }
 0x7d8   :  { %v13938_v50 = vld [vmem:[#allocation26 + $0xae8] sm:$0xf0]  ;;  %v13048_v61 = vld [vmem:[#allocation26 + $0x3d0] sm:$0xf] }
 0x7d9   :  { %v15687_v53 = vld [vmem:[#allocation26 + $0xccc] sm:$0xf]  ;;  %v13941_v40 = vor.u32 %v15623_v21, %v13938_v50  ;;  %9333 = vmatpush.bf16.msra.mxu1 %v13685_v39  ;;  %v13304_v5 = vld [vmem:[#allocation26 + $0x5d0] sm:$0xf] }
 0x7da   :  { %v14194_v57 = vld [vmem:[#allocation26 + $0xce8] sm:$0xf0] }
 0x7db   :  { %v15751_v38 = vld [vmem:[#allocation26 + $0xecc] sm:$0xf]  ;;  %v14197_v10 = vor.u32 %v15687_v53, %v14194_v57  ;;  %9346 = vmatpush.bf16.msra.mxu2 %v13941_v40  ;;  %v15468_v53 = vld [vmem:[#allocation26 + $0x5ec] sm:$0xf0]  ;;  %v6390_v40 = vperm.slane %v16868_v51, 1 }
 0x7dc   :  { %v14450_v6 = vld [vmem:[#allocation26 + $0xee8] sm:$0xf0]  ;;  %v13560_v57 = vld [vmem:[#allocation26 + $0x7d0] sm:$0xf] }
 0x7dd   :  { %v15551_v31 = vld [vmem:[#allocation26 + $0x88c] sm:$0xf]  ;;  %v14453_v15 = vor.u32 %v15751_v38, %v14450_v6  ;;  %9359 = vmatpush.bf16.msra.mxu3 %v14197_v10  ;;  %v15532_v38 = vld [vmem:[#allocation26 + $0x7ec] sm:$0xf0] }
 0x7de   :  { %v13650_v12 = vld [vmem:[#allocation26 + $0x8a8] sm:$0xf0]  ;;  %v12760_v10 = vld [vmem:[#allocation26 + $0x190] sm:$0xf] }
 0x7df   :  { %v15615_v18 = vld [vmem:[#allocation26 + $0xa8c] sm:$0xf]  ;;  %v13653_v8 = vor.u32 %v15551_v31, %v13650_v12  ;;  %9372 = vmatpush.bf16.msrb.mxu0 %v14453_v15  ;;  %v12793_v31 = vor.u32 %v15340_v23, %v12792_v62  ;;  %v13049_v12 = vor.u32 %v15404_v63, %v13048_v61  ;;  %v15332_v15 = vld [vmem:[#allocation26 + $0x1ac] sm:$0xf0] }
 0x7e0   :  { %v13906_v16 = vld [vmem:[#allocation26 + $0xaa8] sm:$0xf0]  ;;  %v12761_v51 = vor.u32 %v15332_v15, %v12760_v10  ;;  %v12664_v61 = vld [vmem:[#allocation26 + $0xd0] sm:$0xf] }
 0x7e1   :  { %v15679_v27 = vld [vmem:[#allocation26 + $0xc8c] sm:$0xf]  ;;  %v13909_v30 = vor.u32 %v15615_v18, %v13906_v16  ;;  %9334 = vmatpush.bf16.msra.mxu1 %v13653_v8  ;;  %v13305_v18 = vor.u32 %v15468_v53, %v13304_v5  ;;  %v13561_v16 = vor.u32 %v15532_v38, %v13560_v57  ;;  %v9079_v8 = vadd.f32 %v16878_v24, %v6390_v40  ;;  %v15452_v24 = vld [vmem:[#allocation26 + $0x56c] sm:$0xf0] }
 0x7e2   :  { %v14162_v52 = vld [vmem:[#allocation26 + $0xca8] sm:$0xf0]  ;;  %v15308_v63 = vld [vmem:[#allocation26 + $0xec] sm:$0xf0] }
 0x7e3   :  { %v15743_v3 = vld [vmem:[#allocation26 + $0xe8c] sm:$0xf]  ;;  %v14165_v1 = vor.u32 %v15679_v27, %v14162_v52  ;;  %9347 = vmatpush.bf16.msra.mxu2 %v13909_v30  ;;  %v13016_v27 = vld [vmem:[#allocation26 + $0x390] sm:$0xf] }
 0x7e4   :  { %v14418_v14 = vld [vmem:[#allocation26 + $0xea8] sm:$0xf0]  ;;  %v15396_v52 = vld [vmem:[#allocation26 + $0x3ac] sm:$0xf0] }
 0x7e5   :  { %v15543_v17 = vld [vmem:[#allocation26 + $0x84c] sm:$0xf]  ;;  %v14421_v11 = vor.u32 %v15743_v3, %v14418_v14  ;;  %9360 = vmatpush.bf16.msra.mxu3 %v14165_v1  ;;  %v13272_v3 = vld [vmem:[#allocation26 + $0x590] sm:$0xf]  ;;  %v13017_v30 = vor.u32 %v15396_v52, %v13016_v27  ;;  %v9143_v27 = vpop.f32.mrf.mxu2 }
 0x7e6   :  { %v13618_v58 = vld [vmem:[#allocation26 + $0x868] sm:$0xf0]  ;;  %v15460_v14 = vld [vmem:[#allocation26 + $0x5ac] sm:$0xf0] }
 0x7e7   :  { %v15607_v28 = vld [vmem:[#allocation26 + $0xa4c] sm:$0xf]  ;;  %v13621_v2 = vor.u32 %v15543_v17, %v13618_v58  ;;  %9373 = vmatpush.bf16.msrb.mxu0 %v14421_v11  ;;  %v12728_v17 = vld [vmem:[#allocation26 + $0x150] sm:$0xf]  ;;  %v13273_v1 = vor.u32 %v15460_v14, %v13272_v3  ;;  %v13529_v11 = vor.u32 %v15524_v29, %v13528_v20 }
 0x7e8   :  { %v13874_v56 = vld [vmem:[#allocation26 + $0xa68] sm:$0xf0]  ;;  %v15324_v58 = vld [vmem:[#allocation26 + $0x16c] sm:$0xf0] }
 0x7e9   :  { %v15671_v19 = vld [vmem:[#allocation26 + $0xc4c] sm:$0xf]  ;;  %v13877_v25 = vor.u32 %v15607_v28, %v13874_v56  ;;  %9335 = vmatpush.bf16.msra.mxu1 %v13621_v2  ;;  %v12984_v28 = vld [vmem:[#allocation26 + $0x350] sm:$0xf] }
 0x7ea   :  { %v14130_v22 = vld [vmem:[#allocation26 + $0xc68] sm:$0xf0]  ;;  %v15388_v56 = vld [vmem:[#allocation26 + $0x36c] sm:$0xf0] }
 0x7eb   :  { %v15735_v9 = vld [vmem:[#allocation26 + $0xe4c] sm:$0xf]  ;;  %v14133_v42 = vor.u32 %v15671_v19, %v14130_v22  ;;  %9348 = vmatpush.bf16.msra.mxu2 %v13877_v25  ;;  %v13240_v19 = vld [vmem:[#allocation26 + $0x550] sm:$0xf]  ;;  %v9092_v22 = vadd.f32 %v16882_v37, %v9079_v8  ;;  %v12985_v2 = vor.u32 %v15388_v56, %v12984_v28 }
 0x7ec   :  { %v14386_v34 = vld [vmem:[#allocation26 + $0xe68] sm:$0xf0]  ;;  %v12696_v25 = vld [vmem:[#allocation26 + $0x110] sm:$0xf]  ;;  %v13241_v37 = vor.u32 %v15452_v24, %v13240_v19 }
 0x7ed   :  { %v15535_v33 = vld [vmem:[#allocation26 + $0x80c] sm:$0xf]  ;;  %v14389_v45 = vor.u32 %v15735_v9, %v14386_v34  ;;  %9361 = vmatpush.bf16.msra.mxu3 %v14133_v42  ;;  %v13496_v9 = vld [vmem:[#allocation26 + $0x750] sm:$0xf]  ;;  %v9105_v35 = vadd.f32 %v16884_v7, %v9092_v22 }
 0x7ee   :  { %v13586_v26 = vld [vmem:[#allocation26 + $0x828] sm:$0xf0]  ;;  %v15516_v34 = vld [vmem:[#allocation26 + $0x76c] sm:$0xf0] }
 0x7ef   :  { %v15599_v36 = vld [vmem:[#allocation26 + $0xa0c] sm:$0xf]  ;;  %v13589_v21 = vor.u32 %v15535_v33, %v13586_v26  ;;  %9374 = vmatpush.bf16.msrb.mxu0 %v14389_v45  ;;  %v12729_v33 = vor.u32 %v15324_v58, %v12728_v17  ;;  %v15316_v26 = vld [vmem:[#allocation26 + $0x12c] sm:$0xf0]  ;;  %v9118_v7 = vadd.f32 %v16880_v49, %v9105_v35  ;;  %v9156_v49 = vpop.f32.mrf.mxu3 }
 0x7f0   :  { %v13842_v4 = vld [vmem:[#allocation26 + $0xa28] sm:$0xf0]  ;;  %v15380_v42 = vld [vmem:[#allocation26 + $0x32c] sm:$0xf0]  ;;  %v12697_v62 = vor.u32 %v15316_v26, %v12696_v25 }
 0x7f1   :  { %v15663_v43 = vld [vmem:[#allocation26 + $0xc0c] sm:$0xf]  ;;  %v13845_v50 = vor.u32 %v15599_v36, %v13842_v4  ;;  %9336 = vmatpush.bf16.msra.mxu1 %v13589_v21  ;;  %v13497_v36 = vor.u32 %v15516_v34, %v13496_v9  ;;  %v12952_v4 = vld [vmem:[#allocation26 + $0x310] sm:$0xf]  ;;  %v9131_v40 = vadd.f32 %v9130_v46, %v9118_v7 }
 0x7f2   :  { %v14098_v59 = vld [vmem:[#allocation26 + $0xc28] sm:$0xf0]  ;;  %v13208_v45 = vld [vmem:[#allocation26 + $0x510] sm:$0xf]  ;;  %v12953_v23 = vor.u32 %v15380_v42, %v12952_v4 }
 0x7f3   :  { %v15727_v44 = vld [vmem:[#allocation26 + $0xe0c] sm:$0xf]  ;;  %v14101_v6 = vor.u32 %v15663_v43, %v14098_v59  ;;  %9349 = vmatpush.bf16.msra.mxu2 %v13845_v50  ;;  %v15444_v43 = vld [vmem:[#allocation26 + $0x52c] sm:$0xf0]  ;;  %v9144_v20 = vadd.f32 %v9143_v27, %v9131_v40 }
 0x7f4   :  { %v14354_v54 = vld [vmem:[#allocation26 + $0xe28] sm:$0xf0]  ;;  %9337 = vmatmul.bf16.vlgmr.msra.gmra.mxu1 %v16840_v13  ;;  %v13464_v59 = vld [vmem:[#allocation26 + $0x710] sm:$0xf]  ;;  %v13209_v5 = vor.u32 %v15444_v43, %v13208_v45 }
 0x7f5   :  { %v14357_v39 = vor.u32 %v15727_v44, %v14354_v54  ;;  %9362 = vmatpush.bf16.msra.mxu3 %v14101_v6  ;;  %9381 = vmatpush.bf16.msrb.mxu1 %v12793_v31  ;;  %v15508_v44 = vld [vmem:[#allocation26 + $0x72c] sm:$0xf0]  ;;  %v9169_v54 = vpop.f32.mrf.mxu0  ;;  %v12665_v31 = vor.u32 %v15308_v63, %v12664_v61  ;;  %v9157_v17 = vadd.f32 %v9156_v49, %v9144_v20 }
 0x7f6   :  { %9350 = vmatmul.bf16.vlgmr.msra.gmra.mxu2 %v16842_v55  ;;  %v13465_v21 = vor.u32 %v15508_v44, %v13464_v59  ;;  %v12920_v50 = vld [vmem:[#allocation26 + $0x2d0] sm:$0xf]  ;;  %v9145_v44 = vpop.f32.mrf.mxu2 }
 0x7f7   :  { %9375 = vmatpush.bf16.msrb.mxu0 %v14357_v39  ;;  %9394 = vmatpush.bf16.msrb.mxu2 %v13049_v12  ;;  %v15372_v53 = vld [vmem:[#allocation26 + $0x2ec] sm:$0xf0] }
 0x7f8   :  { %9363 = vmatmul.bf16.vlgmr.msra.gmra.mxu3 %v16844_v32  ;;  %v13176_v57 = vld [vmem:[#allocation26 + $0x4d0] sm:$0xf]  ;;  %v12921_v12 = vor.u32 %v15372_v53, %v12920_v50 }
 0x7f9   :  { %9407 = vmatpush.bf16.msrb.mxu3 %v13305_v18  ;;  %9382 = vmatpush.bf16.msrb.mxu1 %v12761_v51  ;;  %v15436_v38 = vld [vmem:[#allocation26 + $0x4ec] sm:$0xf0] }
 0x7fa   :  { %9376 = vmatmul.bf16.vlgmr.msrb.gmra.mxu0 %v16846_v41  ;;  %v13432_v6 = vld [vmem:[#allocation26 + $0x6d0] sm:$0xf]  ;;  %v13177_v18 = vor.u32 %v15436_v38, %v13176_v57 }
 0x7fb   :  { %9420 = vmatpush.bf16.msra.mxu0 %v13561_v16  ;;  %9395 = vmatpush.bf16.msrb.mxu2 %v13017_v30  ;;  %v15500_v39 = vld [vmem:[#allocation26 + $0x6ec] sm:$0xf0]  ;;  %v9132_v30 = vpop.f32.mrf.mxu1 }
 0x7fc   :  { %v12632_v10 = vld [vmem:[#allocation26 + $0x90] sm:$0xf]  ;;  %v13433_v16 = vor.u32 %v15500_v39, %v13432_v6 }
 0x7fd   :  { %9408 = vmatpush.bf16.msrb.mxu3 %v13273_v1  ;;  %9383 = vmatpush.bf16.msrb.mxu1 %v12729_v33  ;;  %v15300_v15 = vld [vmem:[#allocation26 + $0xac] sm:$0xf0]  ;;  %v9171_v58 = vpop.f32.mrf.mxu0  ;;  %v9170_v33 = vadd.f32 %v9169_v54, %v9157_v17 }
 0x7fe   :  { %v12888_v52 = vld [vmem:[#allocation26 + $0x290] sm:$0xf]  ;;  %v12633_v1 = vor.u32 %v15300_v15, %v12632_v10 }
 0x7ff   :  { %9421 = vmatpush.bf16.msra.mxu0 %v13529_v11  ;;  %9396 = vmatpush.bf16.msrb.mxu2 %v12985_v2  ;;  %v15364_v3 = vld [vmem:[#allocation26 + $0x2ac] sm:$0xf0]  ;;  %9798 = vst [vmem:[#allocation29 + $0x8] sm:$0xff] %v9170_v33 }
 0x800   :  { %v13144_v14 = vld [vmem:[#allocation26 + $0x490] sm:$0xf]  ;;  %v12889_v11 = vor.u32 %v15364_v3, %v12888_v52 }
 0x801   :  { %9409 = vmatpush.bf16.msrb.mxu3 %v13241_v37  ;;  %9384 = vmatpush.bf16.msrb.mxu1 %v12697_v62  ;;  %v15428_v29 = vld [vmem:[#allocation26 + $0x4ac] sm:$0xf0] }
 0x802   :  { %v13400_v8 = vld [vmem:[#allocation26 + $0x690] sm:$0xf]  ;;  %v13145_v19 = vor.u32 %v15428_v29, %v13144_v14 }
 0x803   :  { %9422 = vmatpush.bf16.msra.mxu0 %v13497_v36  ;;  %9397 = vmatpush.bf16.msrb.mxu2 %v12953_v23  ;;  %v15492_v51 = vld [vmem:[#allocation26 + $0x6ac] sm:$0xf0]  ;;  %v9158_v23 = vpop.f32.mrf.mxu3 }
 0x804   :  { %v12600_v28 = vld [vmem:[#allocation26 + $0x50] sm:$0xf]  ;;  %v13401_v22 = vor.u32 %v15492_v51, %v13400_v8 }
 0x805   :  { %9410 = vmatpush.bf16.msrb.mxu3 %v13209_v5  ;;  %9385 = vmatpush.bf16.msrb.mxu1 %v12665_v31  ;;  %v15292_v56 = vld [vmem:[#allocation26 + $0x6c] sm:$0xf0] }
 0x806   :  { %v12856_v24 = vld [vmem:[#allocation26 + $0x250] sm:$0xf]  ;;  %v12601_v4 = vor.u32 %v15292_v56, %v12600_v28 }
 0x807   :  { %9423 = vmatpush.bf16.msra.mxu0 %v13465_v21  ;;  %9398 = vmatpush.bf16.msrb.mxu2 %v12921_v12  ;;  %v15356_v9 = vld [vmem:[#allocation26 + $0x26c] sm:$0xf0] }
 0x808   :  { %v13112_v34 = vld [vmem:[#allocation26 + $0x450] sm:$0xf]  ;;  %v12857_v42 = vor.u32 %v15356_v9, %v12856_v24 }
 0x809   :  { %9411 = vmatpush.bf16.msrb.mxu3 %v13177_v18  ;;  %v15420_v2 = vld [vmem:[#allocation26 + $0x46c] sm:$0xf0]  ;;  %9386 = vmatpush.bf16.msrb.mxu1 %v12633_v1 }
 0x80a   :  { %v13368_v25 = vld [vmem:[#allocation26 + $0x650] sm:$0xf]  ;;  %v13113_v43 = vor.u32 %v15420_v2, %v13112_v34 }
 0x80b   :  { %9424 = vmatpush.bf16.msra.mxu0 %v13433_v16  ;;  %v15484_v26 = vld [vmem:[#allocation26 + $0x66c] sm:$0xf0]  ;;  %9399 = vmatpush.bf16.msrb.mxu2 %v12889_v11 }
 0x80c   :  { %v12568_v37 = vld [vmem:[#allocation26 + $0x10] sm:$0xf]  ;;  %v13369_v59 = vor.u32 %v15484_v26, %v13368_v25 }
 0x80d   :  { %v15284_v36 = vld [vmem:[#allocation26 + $0x2c] sm:$0xf0]  ;;  %9412 = vmatpush.bf16.msrb.mxu3 %v13145_v19  ;;  %9387 = vmatpush.bf16.msrb.mxu1 %v12601_v4 }
 0x80e   :  { %v12824_v45 = vld [vmem:[#allocation26 + $0x210] sm:$0xf]  ;;  %v12569_v57 = vor.u32 %v15284_v36, %v12568_v37 }
 0x80f   :  { %v15348_v35 = vld [vmem:[#allocation26 + $0x22c] sm:$0xf0]  ;;  %9425 = vmatpush.bf16.msra.mxu0 %v13401_v22  ;;  %9400 = vmatpush.bf16.msrb.mxu2 %v12857_v42 }
 0x810   :  { %v13080_v46 = vld [vmem:[#allocation26 + $0x410] sm:$0xf]  ;;  %v12825_v7 = vor.u32 %v15348_v35, %v12824_v45 }
 0x811   :  { %v15412_v62 = vld [vmem:[#allocation26 + $0x42c] sm:$0xf0]  ;;  %9413 = vmatpush.bf16.msrb.mxu3 %v13113_v43  ;;  %9388 = vmatpush.bf16.msrb.mxu1 %v12569_v57  ;;  %v16899_v43 = vpop.f32.mrf.mxu1 }
 0x812   :  { %v13336_v54 = vld [vmem:[#allocation26 + $0x610] sm:$0xf]  ;;  %v13081_v40 = vor.u32 %v15412_v62, %v13080_v46 }
 0x813   :  { %v15476_v61 = vld [vmem:[#allocation26 + $0x62c] sm:$0xf0]  ;;  %9426 = vmatpush.bf16.msra.mxu0 %v13369_v59  ;;  %9401 = vmatpush.bf16.msrb.mxu2 %v12825_v7  ;;  %v16901_v59 = vpop.f32.mrf.mxu0 }
 0x814   :  { %v13816_v63 = vld [vmem:[#allocation26 + $0x9d0] sm:$0xf]  ;;  %v13337_v31 = vor.u32 %v15476_v61, %v13336_v54  ;;  %9389 = vmatmul.bf16.vlgmr.msrb.gmra.mxu1 %v16820_v47 }
 0x815   :  { %v15596_v5 = vld [vmem:[#allocation26 + $0x9ec] sm:$0xf0]  ;;  %9414 = vmatpush.bf16.msrb.mxu3 %v13081_v40 }
 0x816   :  { %v14072_v21 = vld [vmem:[#allocation26 + $0xbd0] sm:$0xf]  ;;  %v13817_v12 = vor.u32 %v15596_v5, %v13816_v63  ;;  %9402 = vmatmul.bf16.vlgmr.msrb.gmra.mxu2 %v16822_v48 }
 0x817   :  { %v15660_v50 = vld [vmem:[#allocation26 + $0xbec] sm:$0xf0]  ;;  %9427 = vmatpush.bf16.msra.mxu0 %v13337_v31 }
 0x818   :  { %v14328_v53 = vld [vmem:[#allocation26 + $0xdd0] sm:$0xf]  ;;  %v14073_v10 = vor.u32 %v15660_v50, %v14072_v21  ;;  %9433 = vmatpush.bf16.msra.mxu1 %v13817_v12  ;;  %9415 = vmatmul.bf16.vlgmr.msrb.gmra.mxu3 %v16824_v60  ;;  %v16903_v12 = vpop.f32.mrf.mxu2 }
 0x819   :  { %v15724_v38 = vld [vmem:[#allocation26 + $0xdec] sm:$0xf0] }
 0x81a   :  { %v14584_v6 = vld [vmem:[#allocation26 + $0xfd0] sm:$0xf]  ;;  %v14329_v16 = vor.u32 %v15724_v38, %v14328_v53  ;;  %9446 = vmatpush.bf16.msra.mxu2 %v14073_v10  ;;  %9428 = vmatmul.bf16.vlgmr.msra.gmra.mxu0 %v16826_v0 }
 0x81b   :  { %v15788_v39 = vld [vmem:[#allocation26 + $0xfec] sm:$0xf0] }
 0x81c   :  { %v13784_v15 = vld [vmem:[#allocation26 + $0x990] sm:$0xf]  ;;  %v14585_v27 = vor.u32 %v15788_v39, %v14584_v6  ;;  %9459 = vmatpush.bf16.msra.mxu3 %v14329_v16  ;;  %v16905_v16 = vpop.f32.mrf.mxu3 }
 0x81d   :  { %v15588_v18 = vld [vmem:[#allocation26 + $0x9ac] sm:$0xf0] }
 0x81e   :  { %v14040_v52 = vld [vmem:[#allocation26 + $0xb90] sm:$0xf]  ;;  %v13785_v8 = vor.u32 %v15588_v18, %v13784_v15  ;;  %9472 = vmatpush.bf16.msrb.mxu0 %v14585_v27 }
 0x81f   :  { %v15652_v3 = vld [vmem:[#allocation26 + $0xbac] sm:$0xf0] }
 0x820   :  { %v14296_v14 = vld [vmem:[#allocation26 + $0xd90] sm:$0xf]  ;;  %v14041_v51 = vor.u32 %v15652_v3, %v14040_v52  ;;  %9434 = vmatpush.bf16.msra.mxu1 %v13785_v8 }
 0x821   :  { %v15716_v20 = vld [vmem:[#allocation26 + $0xdac] sm:$0xf0] }
 0x822   :  { %v14552_v49 = vld [vmem:[#allocation26 + $0xf90] sm:$0xf]  ;;  %v14297_v58 = vor.u32 %v15716_v20, %v14296_v14  ;;  %9447 = vmatpush.bf16.msra.mxu2 %v14041_v51  ;;  %v9184_v14 = vpop.f32.mrf.mxu1  ;;  %v9223_v20 = vpop.f32.mrf.mxu0 }
 0x823   :  { %v15780_v29 = vld [vmem:[#allocation26 + $0xfac] sm:$0xf0]  ;;  %v15520_v14 = vld [vmem:[#allocation26 + $0x794] sm:$0xf] }
 0x824   :  { %v13752_v30 = vld [vmem:[#allocation26 + $0x950] sm:$0xf]  ;;  %v14553_v1 = vor.u32 %v15780_v29, %v14552_v49  ;;  %9460 = vmatpush.bf16.msra.mxu3 %v14297_v58  ;;  %v13530_v20 = vld [vmem:[#allocation26 + $0x7b0] sm:$0xf0] }
 0x825   :  { %v15580_v17 = vld [vmem:[#allocation26 + $0x96c] sm:$0xf0] }
 0x826   :  { %v14008_v11 = vld [vmem:[#allocation26 + $0xb50] sm:$0xf]  ;;  %v13753_v9 = vor.u32 %v15580_v17, %v13752_v30  ;;  %9473 = vmatpush.bf16.msrb.mxu0 %v14553_v1 }
 0x827   :  { %v15644_v28 = vld [vmem:[#allocation26 + $0xb6c] sm:$0xf0] }
 0x828   :  { %v14264_v56 = vld [vmem:[#allocation26 + $0xd50] sm:$0xf]  ;;  %v14009_v34 = vor.u32 %v15644_v28, %v14008_v11  ;;  %9435 = vmatpush.bf16.msra.mxu1 %v13753_v9 }
 0x829   :  { %v15708_v19 = vld [vmem:[#allocation26 + $0xd6c] sm:$0xf0] }
 0x82a   :  { %v14520_v22 = vld [vmem:[#allocation26 + $0xf50] sm:$0xf]  ;;  %v14265_v25 = vor.u32 %v15708_v19, %v14264_v56  ;;  %9448 = vmatpush.bf16.msra.mxu2 %v14009_v34 }
 0x82b   :  { %v15772_v24 = vld [vmem:[#allocation26 + $0xf6c] sm:$0xf0] }
 0x82c   :  { %v13720_v33 = vld [vmem:[#allocation26 + $0x910] sm:$0xf]  ;;  %v14521_v26 = vor.u32 %v15772_v24, %v14520_v22  ;;  %9461 = vmatpush.bf16.msra.mxu3 %v14265_v25 }
 0x82d   :  { %v15572_v2 = vld [vmem:[#allocation26 + $0x92c] sm:$0xf0] }
 0x82e   :  { %v13976_v37 = vld [vmem:[#allocation26 + $0xb10] sm:$0xf]  ;;  %v13721_v44 = vor.u32 %v15572_v2, %v13720_v33  ;;  %9474 = vmatpush.bf16.msrb.mxu0 %v14521_v26 }
 0x82f   :  { %v15636_v36 = vld [vmem:[#allocation26 + $0xb2c] sm:$0xf0] }
 0x830   :  { %v14232_v4 = vld [vmem:[#allocation26 + $0xd10] sm:$0xf]  ;;  %v13977_v46 = vor.u32 %v15636_v36, %v13976_v37  ;;  %9436 = vmatpush.bf16.msra.mxu1 %v13721_v44  ;;  %v9197_v37 = vpop.f32.mrf.mxu2  ;;  %v15336_v44 = vld [vmem:[#allocation26 + $0x1d4] sm:$0xf] }
 0x831   :  { %v15700_v42 = vld [vmem:[#allocation26 + $0xd2c] sm:$0xf0]  ;;  %v15440_v37 = vld [vmem:[#allocation26 + $0x514] sm:$0xf] }
 0x832   :  { %v14488_v45 = vld [vmem:[#allocation26 + $0xf10] sm:$0xf]  ;;  %v14233_v23 = vor.u32 %v15700_v42, %v14232_v4  ;;  %9449 = vmatpush.bf16.msra.mxu2 %v13977_v46  ;;  %v12794_v46 = vld [vmem:[#allocation26 + $0x1f0] sm:$0xf0] }
 0x833   :  { %v15764_v35 = vld [vmem:[#allocation26 + $0xf2c] sm:$0xf0] }
 0x834   :  { %v13688_v62 = vld [vmem:[#allocation26 + $0x8d0] sm:$0xf]  ;;  %v14489_v61 = vor.u32 %v15764_v35, %v14488_v45  ;;  %9462 = vmatpush.bf16.msra.mxu3 %v14233_v23  ;;  %v9210_v45 = vpop.f32.mrf.mxu3  ;;  %v15464_v23 = vld [vmem:[#allocation26 + $0x5d4] sm:$0xf] }
 0x835   :  { %v15564_v54 = vld [vmem:[#allocation26 + $0x8ec] sm:$0xf0]  ;;  %v13466_v45 = vld [vmem:[#allocation26 + $0x730] sm:$0xf0] }
 0x836   :  { %v13944_v63 = vld [vmem:[#allocation26 + $0xad0] sm:$0xf]  ;;  %v13689_v7 = vor.u32 %v15564_v54, %v13688_v62  ;;  %9475 = vmatpush.bf16.msrb.mxu0 %v14489_v61  ;;  %v15400_v62 = vld [vmem:[#allocation26 + $0x3d4] sm:$0xf] }
 0x837   :  { %v15628_v5 = vld [vmem:[#allocation26 + $0xaec] sm:$0xf0]  ;;  %v13050_v54 = vld [vmem:[#allocation26 + $0x3f0] sm:$0xf0] }
 0x838   :  { %v14200_v21 = vld [vmem:[#allocation26 + $0xcd0] sm:$0xf]  ;;  %v13945_v38 = vor.u32 %v15628_v5, %v13944_v63  ;;  %9437 = vmatpush.bf16.msra.mxu1 %v13689_v7  ;;  %v13306_v5 = vld [vmem:[#allocation26 + $0x5f0] sm:$0xf0]  ;;  %v16907_v7 = vld [vmem:[#allocation28] sm:$0xff] }
 0x839   :  { %v15692_v50 = vld [vmem:[#allocation26 + $0xcec] sm:$0xf0] }
 0x83a   :  { %v14456_v53 = vld [vmem:[#allocation26 + $0xed0] sm:$0xf]  ;;  %v14201_v40 = vor.u32 %v15692_v50, %v14200_v21  ;;  %9450 = vmatpush.bf16.msra.mxu2 %v13945_v38  ;;  %v15528_v21 = vld [vmem:[#allocation26 + $0x7d4] sm:$0xf]  ;;  %v6391_v38 = vperm.slane %v16907_v7, 2 }
 0x83b   :  { %v15756_v57 = vld [vmem:[#allocation26 + $0xeec] sm:$0xf0]  ;;  %v13562_v50 = vld [vmem:[#allocation26 + $0x7f0] sm:$0xf0] }
 0x83c   :  { %v13656_v6 = vld [vmem:[#allocation26 + $0x890] sm:$0xf]  ;;  %v14457_v31 = vor.u32 %v15756_v57, %v14456_v53  ;;  %9463 = vmatpush.bf16.msra.mxu3 %v14201_v40  ;;  %v15328_v40 = vld [vmem:[#allocation26 + $0x194] sm:$0xf] }
 0x83d   :  { %v15556_v39 = vld [vmem:[#allocation26 + $0x8ac] sm:$0xf0] }
 0x83e   :  { %v13912_v10 = vld [vmem:[#allocation26 + $0xa90] sm:$0xf]  ;;  %v13657_v49 = vor.u32 %v15556_v39, %v13656_v6  ;;  %9476 = vmatpush.bf16.msrb.mxu0 %v14457_v31  ;;  %v12797_v6 = vor.u32 %v15336_v44, %v12794_v46  ;;  %v13053_v39 = vor.u32 %v15400_v62, %v13050_v54  ;;  %v12762_v31 = vld [vmem:[#allocation26 + $0x1b0] sm:$0xf0]  ;;  %v9273_v44 = vpop.f32.mrf.mxu0 }
 0x83f   :  { %v15620_v15 = vld [vmem:[#allocation26 + $0xaac] sm:$0xf0]  ;;  %v15304_v54 = vld [vmem:[#allocation26 + $0xd4] sm:$0xf] }
 0x840   :  { %v14168_v18 = vld [vmem:[#allocation26 + $0xc90] sm:$0xf]  ;;  %v13913_v29 = vor.u32 %v15620_v15, %v13912_v10  ;;  %9438 = vmatpush.bf16.msra.mxu1 %v13657_v49  ;;  %v13309_v10 = vor.u32 %v15464_v23, %v13306_v5  ;;  %v13565_v15 = vor.u32 %v15528_v21, %v13562_v50  ;;  %v9183_v49 = vadd.f32 %v16899_v43, %v6391_v38  ;;  %v13242_v43 = vld [vmem:[#allocation26 + $0x570] sm:$0xf0] }
 0x841   :  { %v15684_v27 = vld [vmem:[#allocation26 + $0xcac] sm:$0xf0]  ;;  %v12666_v23 = vld [vmem:[#allocation26 + $0xf0] sm:$0xf0] }
 0x842   :  { %v14424_v52 = vld [vmem:[#allocation26 + $0xe90] sm:$0xf]  ;;  %v14169_v30 = vor.u32 %v15684_v27, %v14168_v18  ;;  %9451 = vmatpush.bf16.msra.mxu2 %v13913_v29  ;;  %v15392_v18 = vld [vmem:[#allocation26 + $0x394] sm:$0xf]  ;;  %v12765_v29 = vor.u32 %v15328_v40, %v12762_v31 }
 0x843   :  { %v15748_v3 = vld [vmem:[#allocation26 + $0xeac] sm:$0xf0]  ;;  %v13018_v27 = vld [vmem:[#allocation26 + $0x3b0] sm:$0xf0] }
 0x844   :  { %v13624_v8 = vld [vmem:[#allocation26 + $0x850] sm:$0xf]  ;;  %v14425_v17 = vor.u32 %v15748_v3, %v14424_v52  ;;  %9464 = vmatpush.bf16.msra.mxu3 %v14169_v30  ;;  %v15456_v52 = vld [vmem:[#allocation26 + $0x594] sm:$0xf] }
 0x845   :  { %v15548_v51 = vld [vmem:[#allocation26 + $0x86c] sm:$0xf0]  ;;  %v13274_v3 = vld [vmem:[#allocation26 + $0x5b0] sm:$0xf0] }
 0x846   :  { %v13880_v58 = vld [vmem:[#allocation26 + $0xa50] sm:$0xf]  ;;  %v13625_v24 = vor.u32 %v15548_v51, %v13624_v8  ;;  %9477 = vmatpush.bf16.msrb.mxu0 %v14425_v17  ;;  %v13021_v8 = vor.u32 %v15392_v18, %v13018_v27  ;;  %v15320_v51 = vld [vmem:[#allocation26 + $0x154] sm:$0xf]  ;;  %v13277_v17 = vor.u32 %v15456_v52, %v13274_v3  ;;  %v9247_v27 = vpop.f32.mrf.mxu2 }
 0x847   :  { %v15612_v1 = vld [vmem:[#allocation26 + $0xa6c] sm:$0xf0]  ;;  %v12730_v30 = vld [vmem:[#allocation26 + $0x170] sm:$0xf0] }
 0x848   :  { %v14136_v11 = vld [vmem:[#allocation26 + $0xc50] sm:$0xf]  ;;  %v13881_v9 = vor.u32 %v15612_v1, %v13880_v58  ;;  %9439 = vmatpush.bf16.msra.mxu1 %v13625_v24  ;;  %v13533_v58 = vor.u32 %v15520_v14, %v13530_v20  ;;  %v15384_v1 = vld [vmem:[#allocation26 + $0x354] sm:$0xf]  ;;  %v12733_v24 = vor.u32 %v15320_v51, %v12730_v30 }
 0x849   :  { %v15676_v28 = vld [vmem:[#allocation26 + $0xc6c] sm:$0xf0]  ;;  %v15368_v5 = vld [vmem:[#allocation26 + $0x2d4] sm:$0xf] }
 0x84a   :  { %v14392_v56 = vld [vmem:[#allocation26 + $0xe50] sm:$0xf]  ;;  %v14137_v25 = vor.u32 %v15676_v28, %v14136_v11  ;;  %9452 = vmatpush.bf16.msra.mxu2 %v13881_v9  ;;  %v12986_v11 = vld [vmem:[#allocation26 + $0x370] sm:$0xf0] }
 0x84b   :  { %v15740_v19 = vld [vmem:[#allocation26 + $0xe6c] sm:$0xf0]  ;;  %v15448_v28 = vld [vmem:[#allocation26 + $0x554] sm:$0xf]  ;;  %v12989_v9 = vor.u32 %v15384_v1, %v12986_v11 }
 0x84c   :  { %v13592_v22 = vld [vmem:[#allocation26 + $0x810] sm:$0xf]  ;;  %v14393_v26 = vor.u32 %v15740_v19, %v14392_v56  ;;  %9465 = vmatpush.bf16.msra.mxu3 %v14137_v25  ;;  %v9196_v56 = vadd.f32 %v16903_v12, %v9183_v49  ;;  %v15512_v19 = vld [vmem:[#allocation26 + $0x754] sm:$0xf]  ;;  %v13245_v12 = vor.u32 %v15448_v28, %v13242_v43 }
 0x84d   :  { %v15540_v34 = vld [vmem:[#allocation26 + $0x82c] sm:$0xf0]  ;;  %v15376_v25 = vld [vmem:[#allocation26 + $0x314] sm:$0xf] }
 0x84e   :  { %v13848_v33 = vld [vmem:[#allocation26 + $0xa10] sm:$0xf]  ;;  %v13593_v61 = vor.u32 %v15540_v34, %v13592_v22  ;;  %9478 = vmatpush.bf16.msrb.mxu0 %v14393_v26  ;;  %v13498_v22 = vld [vmem:[#allocation26 + $0x770] sm:$0xf0] }
 0x84f   :  { %v15604_v2 = vld [vmem:[#allocation26 + $0xa2c] sm:$0xf0]  ;;  %v15312_v34 = vld [vmem:[#allocation26 + $0x114] sm:$0xf] }
 0x850   :  { %v14104_v36 = vld [vmem:[#allocation26 + $0xc10] sm:$0xf]  ;;  %v13849_v63 = vor.u32 %v15604_v2, %v13848_v33  ;;  %9440 = vmatpush.bf16.msra.mxu1 %v13593_v61  ;;  %v12698_v33 = vld [vmem:[#allocation26 + $0x130] sm:$0xf0]  ;;  %v13501_v2 = vor.u32 %v15512_v19, %v13498_v22 }
 0x851   :  { %v15668_v4 = vld [vmem:[#allocation26 + $0xc2c] sm:$0xf0]  ;;  %v12954_v26 = vld [vmem:[#allocation26 + $0x330] sm:$0xf0]  ;;  %v12701_v46 = vor.u32 %v15312_v34, %v12698_v33 }
 0x852   :  { %v14360_v42 = vld [vmem:[#allocation26 + $0xe10] sm:$0xf]  ;;  %v14105_v53 = vor.u32 %v15668_v4, %v14104_v36  ;;  %9453 = vmatpush.bf16.msra.mxu2 %v13849_v63  ;;  %v9209_v36 = vadd.f32 %v16905_v16, %v9196_v56  ;;  %v13210_v4 = vld [vmem:[#allocation26 + $0x530] sm:$0xf0]  ;;  %v12957_v62 = vor.u32 %v15376_v25, %v12954_v26 }
 0x853   :  { %v15732_v35 = vld [vmem:[#allocation26 + $0xe2c] sm:$0xf0]  ;;  %9441 = vmatmul.bf16.vlgmr.msra.gmra.mxu1 %v16840_v13  ;;  %v13213_v61 = vor.u32 %v15440_v37, %v13210_v4  ;;  %v12922_v21 = vld [vmem:[#allocation26 + $0x2f0] sm:$0xf0] }
 0x854   :  { %v14361_v57 = vor.u32 %v15732_v35, %v14360_v42  ;;  %9466 = vmatpush.bf16.msra.mxu3 %v14105_v53  ;;  %9485 = vmatpush.bf16.msrb.mxu1 %v12797_v6  ;;  %v15504_v42 = vld [vmem:[#allocation26 + $0x714] sm:$0xf]  ;;  %v9234_v35 = vpop.f32.mrf.mxu1  ;;  %v9222_v16 = vadd.f32 %v16901_v59, %v9209_v36  ;;  %v12925_v40 = vor.u32 %v15368_v5, %v12922_v21  ;;  %v9260_v59 = vpop.f32.mrf.mxu3 }
 0x855   :  { %9454 = vmatmul.bf16.vlgmr.msra.gmra.mxu2 %v16842_v55  ;;  %v13469_v63 = vor.u32 %v15504_v42, %v13466_v45  ;;  %v15432_v50 = vld [vmem:[#allocation26 + $0x4d4] sm:$0xf] }
 0x856   :  { %9479 = vmatpush.bf16.msrb.mxu0 %v14361_v57  ;;  %9498 = vmatpush.bf16.msrb.mxu2 %v13053_v39  ;;  %v13178_v53 = vld [vmem:[#allocation26 + $0x4f0] sm:$0xf0]  ;;  %v9235_v6 = vadd.f32 %v9234_v35, %v9222_v16  ;;  %v12669_v39 = vor.u32 %v15304_v54, %v12666_v23  ;;  %v9249_v35 = vpop.f32.mrf.mxu2 }
 0x857   :  { %9467 = vmatmul.bf16.vlgmr.msra.gmra.mxu3 %v16844_v32  ;;  %v15496_v57 = vld [vmem:[#allocation26 + $0x6d4] sm:$0xf] }
 0x858   :  { %9511 = vmatpush.bf16.msrb.mxu3 %v13309_v10  ;;  %9486 = vmatpush.bf16.msrb.mxu1 %v12765_v29  ;;  %v13434_v38 = vld [vmem:[#allocation26 + $0x6f0] sm:$0xf0]  ;;  %v9248_v20 = vadd.f32 %v9247_v27, %v9235_v6 }
 0x859   :  { %9480 = vmatmul.bf16.vlgmr.msrb.gmra.mxu0 %v16846_v41  ;;  %v15296_v31 = vld [vmem:[#allocation26 + $0x94] sm:$0xf]  ;;  %v13437_v18 = vor.u32 %v15496_v57, %v13434_v38 }
 0x85a   :  { %9524 = vmatpush.bf16.msra.mxu0 %v13565_v15  ;;  %9499 = vmatpush.bf16.msrb.mxu2 %v13021_v8  ;;  %v12634_v10 = vld [vmem:[#allocation26 + $0xb0] sm:$0xf0]  ;;  %v13181_v15 = vor.u32 %v15432_v50, %v13178_v53  ;;  %v9261_v30 = vadd.f32 %v9260_v59, %v9248_v20 }
 0x85b   :  { %v15360_v52 = vld [vmem:[#allocation26 + $0x294] sm:$0xf] }
 0x85c   :  { %9512 = vmatpush.bf16.msrb.mxu3 %v13277_v17  ;;  %9487 = vmatpush.bf16.msrb.mxu1 %v12733_v24  ;;  %v12890_v3 = vld [vmem:[#allocation26 + $0x2b0] sm:$0xf0]  ;;  %v9236_v51 = vpop.f32.mrf.mxu1  ;;  %v9275_v17 = vpop.f32.mrf.mxu0 }
 0x85d   :  { %v15424_v14 = vld [vmem:[#allocation26 + $0x494] sm:$0xf]  ;;  %v12893_v1 = vor.u32 %v15360_v52, %v12890_v3  ;;  %v9262_v54 = vpop.f32.mrf.mxu3 }
 0x85e   :  { %9525 = vmatpush.bf16.msra.mxu0 %v13533_v58  ;;  %9500 = vmatpush.bf16.msrb.mxu2 %v12989_v9  ;;  %v13146_v49 = vld [vmem:[#allocation26 + $0x4b0] sm:$0xf0]  ;;  %v12637_v58 = vor.u32 %v15296_v31, %v12634_v10  ;;  %v9274_v9 = vadd.f32 %v9273_v44, %v9261_v30 }
 0x85f   :  { %v15488_v29 = vld [vmem:[#allocation26 + $0x694] sm:$0xf]  ;;  %v13149_v56 = vor.u32 %v15424_v14, %v13146_v49 }
 0x860   :  { %9513 = vmatpush.bf16.msrb.mxu3 %v13245_v12  ;;  %9488 = vmatpush.bf16.msrb.mxu1 %v12701_v46  ;;  %v13402_v8 = vld [vmem:[#allocation26 + $0x6b0] sm:$0xf0]  ;;  %9799 = vst [vmem:[#allocation29 + $0x10] sm:$0xff] %v9274_v9 }
 0x861   :  { %v15288_v11 = vld [vmem:[#allocation26 + $0x54] sm:$0xf]  ;;  %v13405_v43 = vor.u32 %v15488_v29, %v13402_v8 }
 0x862   :  { %9526 = vmatpush.bf16.msra.mxu0 %v13501_v2  ;;  %9501 = vmatpush.bf16.msrb.mxu2 %v12957_v62  ;;  %v12602_v28 = vld [vmem:[#allocation26 + $0x70] sm:$0xf0] }
 0x863   :  { %v15352_v19 = vld [vmem:[#allocation26 + $0x254] sm:$0xf]  ;;  %v12605_v26 = vor.u32 %v15288_v11, %v12602_v28 }
 0x864   :  { %9514 = vmatpush.bf16.msrb.mxu3 %v13213_v61  ;;  %9489 = vmatpush.bf16.msrb.mxu1 %v12669_v39  ;;  %v12858_v22 = vld [vmem:[#allocation26 + $0x270] sm:$0xf0]  ;;  %v16924_v35 = vpop.f32.mrf.mxu0 }
 0x865   :  { %v15416_v24 = vld [vmem:[#allocation26 + $0x454] sm:$0xf]  ;;  %v12861_v37 = vor.u32 %v15352_v19, %v12858_v22 }
 0x866   :  { %9527 = vmatpush.bf16.msra.mxu0 %v13469_v63  ;;  %9502 = vmatpush.bf16.msrb.mxu2 %v12925_v40  ;;  %v13114_v34 = vld [vmem:[#allocation26 + $0x470] sm:$0xf0] }
 0x867   :  { %v15480_v33 = vld [vmem:[#allocation26 + $0x654] sm:$0xf]  ;;  %v13117_v42 = vor.u32 %v15416_v24, %v13114_v34 }
 0x868   :  { %9515 = vmatpush.bf16.msrb.mxu3 %v13181_v15  ;;  %v13370_v12 = vld [vmem:[#allocation26 + $0x670] sm:$0xf0]  ;;  %9490 = vmatpush.bf16.msrb.mxu1 %v12637_v58 }
 0x869   :  { %v15280_v2 = vld [vmem:[#allocation26 + $0x14] sm:$0xf]  ;;  %v13373_v45 = vor.u32 %v15480_v33, %v13370_v12 }
 0x86a   :  { %9528 = vmatpush.bf16.msra.mxu0 %v13437_v18  ;;  %v12570_v25 = vld [vmem:[#allocation26 + $0x30] sm:$0xf0]  ;;  %9503 = vmatpush.bf16.msrb.mxu2 %v12893_v1 }
 0x86b   :  { %v15344_v36 = vld [vmem:[#allocation26 + $0x214] sm:$0xf]  ;;  %v12573_v16 = vor.u32 %v15280_v2, %v12570_v25 }
 0x86c   :  { %v12826_v4 = vld [vmem:[#allocation26 + $0x230] sm:$0xf0]  ;;  %9516 = vmatpush.bf16.msrb.mxu3 %v13149_v56  ;;  %9491 = vmatpush.bf16.msrb.mxu1 %v12605_v26 }
 0x86d   :  { %v15408_v46 = vld [vmem:[#allocation26 + $0x414] sm:$0xf]  ;;  %v12829_v53 = vor.u32 %v15344_v36, %v12826_v4 }
 0x86e   :  { %9529 = vmatpush.bf16.msra.mxu0 %v13405_v43  ;;  %v13082_v62 = vld [vmem:[#allocation26 + $0x430] sm:$0xf0]  ;;  %9504 = vmatpush.bf16.msrb.mxu2 %v12861_v37 }
 0x86f   :  { %v15472_v44 = vld [vmem:[#allocation26 + $0x614] sm:$0xf]  ;;  %v13085_v39 = vor.u32 %v15408_v46, %v13082_v62 }
 0x870   :  { %v13338_v23 = vld [vmem:[#allocation26 + $0x630] sm:$0xf0]  ;;  %9517 = vmatpush.bf16.msrb.mxu3 %v13117_v42  ;;  %9492 = vmatpush.bf16.msrb.mxu1 %v12573_v16 }
 0x871   :  { %v15592_v61 = vld [vmem:[#allocation26 + $0x9d4] sm:$0xf]  ;;  %v13341_v40 = vor.u32 %v15472_v44, %v13338_v23 }
 0x872   :  { %v13818_v63 = vld [vmem:[#allocation26 + $0x9f0] sm:$0xf0]  ;;  %9530 = vmatpush.bf16.msra.mxu0 %v13373_v45  ;;  %9505 = vmatpush.bf16.msrb.mxu2 %v12829_v53  ;;  %v16922_v45 = vpop.f32.mrf.mxu1 }
 0x873   :  { %v15656_v5 = vld [vmem:[#allocation26 + $0xbd4] sm:$0xf]  ;;  %v13821_v31 = vor.u32 %v15592_v61, %v13818_v63  ;;  %9493 = vmatmul.bf16.vlgmr.msrb.gmra.mxu1 %v16820_v47 }
 0x874   :  { %v14074_v21 = vld [vmem:[#allocation26 + $0xbf0] sm:$0xf0]  ;;  %9518 = vmatpush.bf16.msrb.mxu3 %v13085_v39 }
 0x875   :  { %v15720_v50 = vld [vmem:[#allocation26 + $0xdd4] sm:$0xf]  ;;  %v14077_v10 = vor.u32 %v15656_v5, %v14074_v21  ;;  %9537 = vmatpush.bf16.msra.mxu1 %v13821_v31  ;;  %9506 = vmatmul.bf16.vlgmr.msrb.gmra.mxu2 %v16822_v48 }
 0x876   :  { %v14330_v57 = vld [vmem:[#allocation26 + $0xdf0] sm:$0xf0]  ;;  %9531 = vmatpush.bf16.msra.mxu0 %v13341_v40 }
 0x877   :  { %v15784_v38 = vld [vmem:[#allocation26 + $0xfd4] sm:$0xf]  ;;  %v14333_v27 = vor.u32 %v15720_v50, %v14330_v57  ;;  %9550 = vmatpush.bf16.msra.mxu2 %v14077_v10  ;;  %9519 = vmatmul.bf16.vlgmr.msrb.gmra.mxu3 %v16824_v60  ;;  %v16926_v10 = vpop.f32.mrf.mxu2 }
 0x878   :  { %v14586_v6 = vld [vmem:[#allocation26 + $0xff0] sm:$0xf0] }
 0x879   :  { %v15584_v15 = vld [vmem:[#allocation26 + $0x994] sm:$0xf]  ;;  %v14589_v52 = vor.u32 %v15784_v38, %v14586_v6  ;;  %9563 = vmatpush.bf16.msra.mxu3 %v14333_v27  ;;  %9532 = vmatmul.bf16.vlgmr.msra.gmra.mxu0 %v16826_v0 }
 0x87a   :  { %v13786_v18 = vld [vmem:[#allocation26 + $0x9b0] sm:$0xf0] }
 0x87b   :  { %v15648_v3 = vld [vmem:[#allocation26 + $0xb94] sm:$0xf]  ;;  %v13789_v8 = vor.u32 %v15584_v15, %v13786_v18  ;;  %9576 = vmatpush.bf16.msrb.mxu0 %v14589_v52  ;;  %v16928_v52 = vpop.f32.mrf.mxu3 }
 0x87c   :  { %v14042_v14 = vld [vmem:[#allocation26 + $0xbb0] sm:$0xf0] }
 0x87d   :  { %v15712_v20 = vld [vmem:[#allocation26 + $0xd94] sm:$0xf]  ;;  %v14045_v51 = vor.u32 %v15648_v3, %v14042_v14  ;;  %9538 = vmatpush.bf16.msra.mxu1 %v13789_v8 }
 0x87e   :  { %v14298_v59 = vld [vmem:[#allocation26 + $0xdb0] sm:$0xf0] }
 0x87f   :  { %v15776_v49 = vld [vmem:[#allocation26 + $0xf94] sm:$0xf]  ;;  %v14301_v58 = vor.u32 %v15712_v20, %v14298_v59  ;;  %9551 = vmatpush.bf16.msra.mxu2 %v14045_v51  ;;  %v9288_v59 = vpop.f32.mrf.mxu1 }
 0x880   :  { %v14554_v29 = vld [vmem:[#allocation26 + $0xfb0] sm:$0xf0]  ;;  %v13536_v59 = vld [vmem:[#allocation26 + $0x798] sm:$0xf] }
 0x881   :  { %v15576_v30 = vld [vmem:[#allocation26 + $0x954] sm:$0xf]  ;;  %v14557_v1 = vor.u32 %v15776_v49, %v14554_v29  ;;  %9564 = vmatpush.bf16.msra.mxu3 %v14301_v58  ;;  %v9327_v49 = vpop.f32.mrf.mxu0 }
 0x882   :  { %v13754_v17 = vld [vmem:[#allocation26 + $0x970] sm:$0xf0]  ;;  %v15525_v49 = vld [vmem:[#allocation26 + $0x7b4] sm:$0xf0] }
 0x883   :  { %v15640_v11 = vld [vmem:[#allocation26 + $0xb54] sm:$0xf]  ;;  %v13757_v24 = vor.u32 %v15576_v30, %v13754_v17  ;;  %9577 = vmatpush.bf16.msrb.mxu0 %v14557_v1 }
 0x884   :  { %v14010_v28 = vld [vmem:[#allocation26 + $0xb70] sm:$0xf0] }
 0x885   :  { %v15704_v56 = vld [vmem:[#allocation26 + $0xd54] sm:$0xf]  ;;  %v14013_v9 = vor.u32 %v15640_v11, %v14010_v28  ;;  %9539 = vmatpush.bf16.msra.mxu1 %v13757_v24 }
 0x886   :  { %v14266_v43 = vld [vmem:[#allocation26 + $0xd70] sm:$0xf0] }
 0x887   :  { %v15768_v19 = vld [vmem:[#allocation26 + $0xf54] sm:$0xf]  ;;  %v14269_v12 = vor.u32 %v15704_v56, %v14266_v43  ;;  %9552 = vmatpush.bf16.msra.mxu2 %v14013_v9 }
 0x888   :  { %v14522_v22 = vld [vmem:[#allocation26 + $0xf70] sm:$0xf0] }
 0x889   :  { %v15568_v34 = vld [vmem:[#allocation26 + $0x914] sm:$0xf]  ;;  %v14525_v2 = vor.u32 %v15768_v19, %v14522_v22  ;;  %9565 = vmatpush.bf16.msra.mxu3 %v14269_v12 }
 0x88a   :  { %v13722_v33 = vld [vmem:[#allocation26 + $0x930] sm:$0xf0] }
 0x88b   :  { %v15632_v25 = vld [vmem:[#allocation26 + $0xb14] sm:$0xf]  ;;  %v13725_v46 = vor.u32 %v15568_v34, %v13722_v33  ;;  %9578 = vmatpush.bf16.msrb.mxu0 %v14525_v2 }
 0x88c   :  { %v13978_v26 = vld [vmem:[#allocation26 + $0xb30] sm:$0xf0] }
 0x88d   :  { %v15696_v37 = vld [vmem:[#allocation26 + $0xd14] sm:$0xf]  ;;  %v13981_v62 = vor.u32 %v15632_v25, %v13978_v26  ;;  %9540 = vmatpush.bf16.msra.mxu1 %v13725_v46  ;;  %v9301_v26 = vpop.f32.mrf.mxu2 }
 0x88e   :  { %v14234_v36 = vld [vmem:[#allocation26 + $0xd30] sm:$0xf0] }
 0x88f   :  { %v15760_v4 = vld [vmem:[#allocation26 + $0xf14] sm:$0xf]  ;;  %v14237_v23 = vor.u32 %v15696_v37, %v14234_v36  ;;  %9553 = vmatpush.bf16.msra.mxu2 %v13981_v62  ;;  %v12800_v62 = vld [vmem:[#allocation26 + $0x1d8] sm:$0xf] }
 0x890   :  { %v14490_v42 = vld [vmem:[#allocation26 + $0xf30] sm:$0xf0] }
 0x891   :  { %v15560_v44 = vld [vmem:[#allocation26 + $0x8d4] sm:$0xf]  ;;  %v14493_v61 = vor.u32 %v15760_v4, %v14490_v42  ;;  %9566 = vmatpush.bf16.msra.mxu3 %v14237_v23  ;;  %v9314_v42 = vpop.f32.mrf.mxu3  ;;  %v15405_v23 = vld [vmem:[#allocation26 + $0x3f4] sm:$0xf0] }
 0x892   :  { %v13690_v54 = vld [vmem:[#allocation26 + $0x8f0] sm:$0xf0]  ;;  %v9338_v42 = vpop.f32.mrf.mxu1 }
 0x893   :  { %v15624_v63 = vld [vmem:[#allocation26 + $0xad4] sm:$0xf]  ;;  %v13693_v57 = vor.u32 %v15560_v44, %v13690_v54  ;;  %9579 = vmatpush.bf16.msrb.mxu0 %v14493_v61  ;;  %v15341_v44 = vld [vmem:[#allocation26 + $0x1f4] sm:$0xf0] }
 0x894   :  { %v13946_v5 = vld [vmem:[#allocation26 + $0xaf0] sm:$0xf0]  ;;  %v13056_v54 = vld [vmem:[#allocation26 + $0x3d8] sm:$0xf] }
 0x895   :  { %v15688_v21 = vld [vmem:[#allocation26 + $0xcd4] sm:$0xf]  ;;  %v13949_v38 = vor.u32 %v15624_v63, %v13946_v5  ;;  %9541 = vmatpush.bf16.msra.mxu1 %v13693_v57  ;;  %v13312_v61 = vld [vmem:[#allocation26 + $0x5d8] sm:$0xf] }
 0x896   :  { %v14202_v50 = vld [vmem:[#allocation26 + $0xcf0] sm:$0xf0] }
 0x897   :  { %v15752_v16 = vld [vmem:[#allocation26 + $0xed4] sm:$0xf]  ;;  %v14205_v40 = vor.u32 %v15688_v21, %v14202_v50  ;;  %9554 = vmatpush.bf16.msra.mxu2 %v13949_v38  ;;  %v15469_v21 = vld [vmem:[#allocation26 + $0x5f4] sm:$0xf0]  ;;  %v6392_v38 = vperm.slane %v16907_v7, 3 }
 0x898   :  { %v14458_v53 = vld [vmem:[#allocation26 + $0xef0] sm:$0xf0]  ;;  %v13568_v50 = vld [vmem:[#allocation26 + $0x7d8] sm:$0xf] }
 0x899   :  { %v15552_v6 = vld [vmem:[#allocation26 + $0x894] sm:$0xf]  ;;  %v14461_v31 = vor.u32 %v15752_v16, %v14458_v53  ;;  %9567 = vmatpush.bf16.msra.mxu3 %v14205_v40  ;;  %v15533_v16 = vld [vmem:[#allocation26 + $0x7f4] sm:$0xf0] }
 0x89a   :  { %v13658_v39 = vld [vmem:[#allocation26 + $0x8b0] sm:$0xf0]  ;;  %v12768_v40 = vld [vmem:[#allocation26 + $0x198] sm:$0xf] }
 0x89b   :  { %v15616_v15 = vld [vmem:[#allocation26 + $0xa94] sm:$0xf]  ;;  %v13661_v29 = vor.u32 %v15552_v6, %v13658_v39  ;;  %9580 = vmatpush.bf16.msrb.mxu0 %v14461_v31  ;;  %v12801_v6 = vor.u32 %v15341_v44, %v12800_v62  ;;  %v13057_v39 = vor.u32 %v15405_v23, %v13056_v54  ;;  %v15333_v31 = vld [vmem:[#allocation26 + $0x1b4] sm:$0xf0] }
 0x89c   :  { %v13914_v18 = vld [vmem:[#allocation26 + $0xab0] sm:$0xf0]  ;;  %v12769_v7 = vor.u32 %v15333_v31, %v12768_v40  ;;  %v12672_v54 = vld [vmem:[#allocation26 + $0xd8] sm:$0xf] }
 0x89d   :  { %v15680_v27 = vld [vmem:[#allocation26 + $0xc94] sm:$0xf]  ;;  %v13917_v8 = vor.u32 %v15616_v15, %v13914_v18  ;;  %9542 = vmatpush.bf16.msra.mxu1 %v13661_v29  ;;  %v13313_v15 = vor.u32 %v15469_v21, %v13312_v61  ;;  %v13569_v18 = vor.u32 %v15533_v16, %v13568_v50  ;;  %v9287_v29 = vadd.f32 %v16922_v45, %v6392_v38  ;;  %v15453_v45 = vld [vmem:[#allocation26 + $0x574] sm:$0xf0] }
 0x89e   :  { %v14170_v3 = vld [vmem:[#allocation26 + $0xcb0] sm:$0xf0]  ;;  %v15309_v23 = vld [vmem:[#allocation26 + $0xf4] sm:$0xf0] }
 0x89f   :  { %v15744_v14 = vld [vmem:[#allocation26 + $0xe94] sm:$0xf]  ;;  %v14173_v17 = vor.u32 %v15680_v27, %v14170_v3  ;;  %9555 = vmatpush.bf16.msra.mxu2 %v13917_v8  ;;  %v13024_v27 = vld [vmem:[#allocation26 + $0x398] sm:$0xf] }
 0x8a0   :  { %v14426_v20 = vld [vmem:[#allocation26 + $0xeb0] sm:$0xf0]  ;;  %v15397_v3 = vld [vmem:[#allocation26 + $0x3b4] sm:$0xf0] }
 0x8a1   :  { %v15544_v51 = vld [vmem:[#allocation26 + $0x854] sm:$0xf]  ;;  %v14429_v58 = vor.u32 %v15744_v14, %v14426_v20  ;;  %9568 = vmatpush.bf16.msra.mxu3 %v14173_v17  ;;  %v13280_v14 = vld [vmem:[#allocation26 + $0x598] sm:$0xf]  ;;  %v13025_v8 = vor.u32 %v15397_v3, %v13024_v27  ;;  %v9351_v27 = vpop.f32.mrf.mxu2 }
 0x8a2   :  { %v13626_v30 = vld [vmem:[#allocation26 + $0x870] sm:$0xf0]  ;;  %v15461_v20 = vld [vmem:[#allocation26 + $0x5b4] sm:$0xf0] }
 0x8a3   :  { %v15608_v1 = vld [vmem:[#allocation26 + $0xa54] sm:$0xf]  ;;  %v13629_v24 = vor.u32 %v15544_v51, %v13626_v30  ;;  %9581 = vmatpush.bf16.msrb.mxu0 %v14429_v58  ;;  %v12736_v51 = vld [vmem:[#allocation26 + $0x158] sm:$0xf]  ;;  %v13281_v17 = vor.u32 %v15461_v20, %v13280_v14  ;;  %v13537_v58 = vor.u32 %v15525_v49, %v13536_v59 }
 0x8a4   :  { %v13882_v11 = vld [vmem:[#allocation26 + $0xa70] sm:$0xf0]  ;;  %v15325_v30 = vld [vmem:[#allocation26 + $0x174] sm:$0xf0] }
 0x8a5   :  { %v15672_v28 = vld [vmem:[#allocation26 + $0xc54] sm:$0xf]  ;;  %v13885_v9 = vor.u32 %v15608_v1, %v13882_v11  ;;  %9543 = vmatpush.bf16.msra.mxu1 %v13629_v24  ;;  %v12992_v1 = vld [vmem:[#allocation26 + $0x358] sm:$0xf] }
 0x8a6   :  { %v14138_v56 = vld [vmem:[#allocation26 + $0xc70] sm:$0xf0]  ;;  %v15389_v11 = vld [vmem:[#allocation26 + $0x374] sm:$0xf0] }
 0x8a7   :  { %v15736_v43 = vld [vmem:[#allocation26 + $0xe54] sm:$0xf]  ;;  %v14141_v2 = vor.u32 %v15672_v28, %v14138_v56  ;;  %9556 = vmatpush.bf16.msra.mxu2 %v13885_v9  ;;  %v13248_v28 = vld [vmem:[#allocation26 + $0x558] sm:$0xf]  ;;  %v9300_v56 = vadd.f32 %v16926_v10, %v9287_v29  ;;  %v12993_v24 = vor.u32 %v15389_v11, %v12992_v1 }
 0x8a8   :  { %v14394_v19 = vld [vmem:[#allocation26 + $0xe70] sm:$0xf0]  ;;  %v12704_v9 = vld [vmem:[#allocation26 + $0x118] sm:$0xf]  ;;  %v13249_v10 = vor.u32 %v15453_v45, %v13248_v28 }
 0x8a9   :  { %v15536_v22 = vld [vmem:[#allocation26 + $0x814] sm:$0xf]  ;;  %v14397_v25 = vor.u32 %v15736_v43, %v14394_v19  ;;  %9569 = vmatpush.bf16.msra.mxu3 %v14141_v2  ;;  %v13504_v43 = vld [vmem:[#allocation26 + $0x758] sm:$0xf]  ;;  %v9313_v26 = vadd.f32 %v16928_v52, %v9300_v56 }
 0x8aa   :  { %v13594_v34 = vld [vmem:[#allocation26 + $0x830] sm:$0xf0]  ;;  %v15517_v19 = vld [vmem:[#allocation26 + $0x774] sm:$0xf0] }
 0x8ab   :  { %v15600_v33 = vld [vmem:[#allocation26 + $0xa14] sm:$0xf]  ;;  %v13597_v63 = vor.u32 %v15536_v22, %v13594_v34  ;;  %9582 = vmatpush.bf16.msrb.mxu0 %v14397_v25  ;;  %v12737_v22 = vor.u32 %v15325_v30, %v12736_v51  ;;  %v15317_v34 = vld [vmem:[#allocation26 + $0x134] sm:$0xf0]  ;;  %v9326_v52 = vadd.f32 %v16924_v35, %v9313_v26  ;;  %v9364_v35 = vpop.f32.mrf.mxu3 }
 0x8ac   :  { %v13850_v12 = vld [vmem:[#allocation26 + $0xa30] sm:$0xf0]  ;;  %v15381_v2 = vld [vmem:[#allocation26 + $0x334] sm:$0xf0]  ;;  %v12705_v62 = vor.u32 %v15317_v34, %v12704_v9 }
 0x8ad   :  { %v15664_v37 = vld [vmem:[#allocation26 + $0xc14] sm:$0xf]  ;;  %v13853_v5 = vor.u32 %v15600_v33, %v13850_v12  ;;  %9544 = vmatpush.bf16.msra.mxu1 %v13597_v63  ;;  %v13505_v33 = vor.u32 %v15517_v19, %v13504_v43  ;;  %v12960_v12 = vld [vmem:[#allocation26 + $0x318] sm:$0xf]  ;;  %v9339_v38 = vadd.f32 %v9338_v42, %v9326_v52 }
 0x8ae   :  { %v14106_v36 = vld [vmem:[#allocation26 + $0xc30] sm:$0xf0]  ;;  %v13216_v25 = vld [vmem:[#allocation26 + $0x518] sm:$0xf]  ;;  %v12961_v44 = vor.u32 %v15381_v2, %v12960_v12 }
 0x8af   :  { %v15728_v4 = vld [vmem:[#allocation26 + $0xe14] sm:$0xf]  ;;  %v14109_v53 = vor.u32 %v15664_v37, %v14106_v36  ;;  %9557 = vmatpush.bf16.msra.mxu2 %v13853_v5  ;;  %v15445_v37 = vld [vmem:[#allocation26 + $0x534] sm:$0xf0]  ;;  %v9352_v59 = vadd.f32 %v9351_v27, %v9339_v38 }
 0x8b0   :  { %v14362_v46 = vld [vmem:[#allocation26 + $0xe30] sm:$0xf0]  ;;  %9545 = vmatmul.bf16.vlgmr.msra.gmra.mxu1 %v16840_v13  ;;  %v13472_v36 = vld [vmem:[#allocation26 + $0x718] sm:$0xf]  ;;  %v13217_v61 = vor.u32 %v15445_v37, %v13216_v25 }
 0x8b1   :  { %v14365_v57 = vor.u32 %v15728_v4, %v14362_v46  ;;  %9570 = vmatpush.bf16.msra.mxu3 %v14109_v53  ;;  %9589 = vmatpush.bf16.msrb.mxu1 %v12801_v6  ;;  %v15509_v4 = vld [vmem:[#allocation26 + $0x734] sm:$0xf0]  ;;  %v9377_v46 = vpop.f32.mrf.mxu0  ;;  %v12673_v6 = vor.u32 %v15309_v23, %v12672_v54  ;;  %v9365_v51 = vadd.f32 %v9364_v35, %v9352_v59 }
 0x8b2   :  { %9558 = vmatmul.bf16.vlgmr.msra.gmra.mxu2 %v16842_v55  ;;  %v13473_v63 = vor.u32 %v15509_v4, %v13472_v36  ;;  %v12928_v5 = vld [vmem:[#allocation26 + $0x2d8] sm:$0xf]  ;;  %v9353_v4 = vpop.f32.mrf.mxu2 }
 0x8b3   :  { %9583 = vmatpush.bf16.msrb.mxu0 %v14365_v57  ;;  %9602 = vmatpush.bf16.msrb.mxu2 %v13057_v39  ;;  %v15373_v21 = vld [vmem:[#allocation26 + $0x2f4] sm:$0xf0] }
 0x8b4   :  { %9571 = vmatmul.bf16.vlgmr.msra.gmra.mxu3 %v16844_v32  ;;  %v13184_v50 = vld [vmem:[#allocation26 + $0x4d8] sm:$0xf]  ;;  %v12929_v39 = vor.u32 %v15373_v21, %v12928_v5 }
 0x8b5   :  { %9615 = vmatpush.bf16.msrb.mxu3 %v13313_v15  ;;  %9590 = vmatpush.bf16.msrb.mxu1 %v12769_v7  ;;  %v15437_v16 = vld [vmem:[#allocation26 + $0x4f4] sm:$0xf0] }
 0x8b6   :  { %9584 = vmatmul.bf16.vlgmr.msrb.gmra.mxu0 %v16846_v41  ;;  %v13440_v53 = vld [vmem:[#allocation26 + $0x6d8] sm:$0xf]  ;;  %v13185_v15 = vor.u32 %v15437_v16, %v13184_v50 }
 0x8b7   :  { %9628 = vmatpush.bf16.msra.mxu0 %v13569_v18  ;;  %9603 = vmatpush.bf16.msrb.mxu2 %v13025_v8  ;;  %v15501_v57 = vld [vmem:[#allocation26 + $0x6f4] sm:$0xf0]  ;;  %v9340_v8 = vpop.f32.mrf.mxu1 }
 0x8b8   :  { %v12640_v40 = vld [vmem:[#allocation26 + $0x98] sm:$0xf]  ;;  %v13441_v18 = vor.u32 %v15501_v57, %v13440_v53 }
 0x8b9   :  { %9616 = vmatpush.bf16.msrb.mxu3 %v13281_v17  ;;  %9591 = vmatpush.bf16.msrb.mxu1 %v12737_v22  ;;  %v15301_v31 = vld [vmem:[#allocation26 + $0xb4] sm:$0xf0]  ;;  %v9379_v30 = vpop.f32.mrf.mxu0  ;;  %v9378_v22 = vadd.f32 %v9377_v46, %v9365_v51 }
 0x8ba   :  { %v12896_v3 = vld [vmem:[#allocation26 + $0x298] sm:$0xf]  ;;  %v12641_v17 = vor.u32 %v15301_v31, %v12640_v40 }
 0x8bb   :  { %9629 = vmatpush.bf16.msra.mxu0 %v13537_v58  ;;  %9604 = vmatpush.bf16.msrb.mxu2 %v12993_v24  ;;  %v15365_v14 = vld [vmem:[#allocation26 + $0x2b4] sm:$0xf0]  ;;  %9800 = vst [vmem:[#allocation29 + $0x18] sm:$0xff] %v9378_v22 }
 0x8bc   :  { %v13152_v20 = vld [vmem:[#allocation26 + $0x498] sm:$0xf]  ;;  %v12897_v58 = vor.u32 %v15365_v14, %v12896_v3 }
 0x8bd   :  { %9617 = vmatpush.bf16.msrb.mxu3 %v13249_v10  ;;  %9592 = vmatpush.bf16.msrb.mxu1 %v12705_v62  ;;  %v15429_v49 = vld [vmem:[#allocation26 + $0x4b4] sm:$0xf0] }
 0x8be   :  { %v13408_v29 = vld [vmem:[#allocation26 + $0x698] sm:$0xf]  ;;  %v13153_v28 = vor.u32 %v15429_v49, %v13152_v20 }
 0x8bf   :  { %9630 = vmatpush.bf16.msra.mxu0 %v13505_v33  ;;  %9605 = vmatpush.bf16.msrb.mxu2 %v12961_v44  ;;  %v15493_v7 = vld [vmem:[#allocation26 + $0x6b4] sm:$0xf0]  ;;  %v9366_v44 = vpop.f32.mrf.mxu3 }
 0x8c0   :  { %v12608_v1 = vld [vmem:[#allocation26 + $0x58] sm:$0xf]  ;;  %v13409_v56 = vor.u32 %v15493_v7, %v13408_v29 }
 0x8c1   :  { %9618 = vmatpush.bf16.msrb.mxu3 %v13217_v61  ;;  %9593 = vmatpush.bf16.msrb.mxu1 %v12673_v6  ;;  %v15293_v11 = vld [vmem:[#allocation26 + $0x74] sm:$0xf0] }
 0x8c2   :  { %v12864_v45 = vld [vmem:[#allocation26 + $0x258] sm:$0xf]  ;;  %v12609_v12 = vor.u32 %v15293_v11, %v12608_v1 }
 0x8c3   :  { %9631 = vmatpush.bf16.msra.mxu0 %v13473_v63  ;;  %9606 = vmatpush.bf16.msrb.mxu2 %v12929_v39  ;;  %v15357_v43 = vld [vmem:[#allocation26 + $0x274] sm:$0xf0] }
 0x8c4   :  { %v13120_v19 = vld [vmem:[#allocation26 + $0x458] sm:$0xf]  ;;  %v12865_v2 = vor.u32 %v15357_v43, %v12864_v45 }
 0x8c5   :  { %9619 = vmatpush.bf16.msrb.mxu3 %v13185_v15  ;;  %v15421_v24 = vld [vmem:[#allocation26 + $0x474] sm:$0xf0]  ;;  %9594 = vmatpush.bf16.msrb.mxu1 %v12641_v17 }
 0x8c6   :  { %v13376_v9 = vld [vmem:[#allocation26 + $0x658] sm:$0xf]  ;;  %v13121_v37 = vor.u32 %v15421_v24, %v13120_v19 }
 0x8c7   :  { %9632 = vmatpush.bf16.msra.mxu0 %v13441_v18  ;;  %v15485_v34 = vld [vmem:[#allocation26 + $0x674] sm:$0xf0]  ;;  %9607 = vmatpush.bf16.msrb.mxu2 %v12897_v58 }
 0x8c8   :  { %v12576_v10 = vld [vmem:[#allocation26 + $0x18] sm:$0xf]  ;;  %v13377_v36 = vor.u32 %v15485_v34, %v13376_v9 }
 0x8c9   :  { %v15285_v33 = vld [vmem:[#allocation26 + $0x34] sm:$0xf0]  ;;  %9620 = vmatpush.bf16.msrb.mxu3 %v13153_v28  ;;  %9595 = vmatpush.bf16.msrb.mxu1 %v12609_v12 }
 0x8ca   :  { %v12832_v25 = vld [vmem:[#allocation26 + $0x218] sm:$0xf]  ;;  %v12577_v50 = vor.u32 %v15285_v33, %v12576_v10 }
 0x8cb   :  { %v15349_v26 = vld [vmem:[#allocation26 + $0x234] sm:$0xf0]  ;;  %9633 = vmatpush.bf16.msra.mxu0 %v13409_v56  ;;  %9608 = vmatpush.bf16.msrb.mxu2 %v12865_v2 }
 0x8cc   :  { %v13088_v42 = vld [vmem:[#allocation26 + $0x418] sm:$0xf]  ;;  %v12833_v52 = vor.u32 %v15349_v26, %v12832_v25 }
 0x8cd   :  { %v15413_v62 = vld [vmem:[#allocation26 + $0x434] sm:$0xf0]  ;;  %9621 = vmatpush.bf16.msrb.mxu3 %v13121_v37  ;;  %9596 = vmatpush.bf16.msrb.mxu1 %v12577_v50  ;;  %v16943_v37 = vpop.f32.mrf.mxu1 }
 0x8ce   :  { %v13344_v46 = vld [vmem:[#allocation26 + $0x618] sm:$0xf]  ;;  %v13089_v38 = vor.u32 %v15413_v62, %v13088_v42 }
 0x8cf   :  { %v15477_v54 = vld [vmem:[#allocation26 + $0x634] sm:$0xf0]  ;;  %9634 = vmatpush.bf16.msra.mxu0 %v13377_v36  ;;  %9609 = vmatpush.bf16.msrb.mxu2 %v12833_v52  ;;  %v16945_v36 = vpop.f32.mrf.mxu0 }
 0x8d0   :  { %v13824_v23 = vld [vmem:[#allocation26 + $0x9d8] sm:$0xf]  ;;  %v13345_v6 = vor.u32 %v15477_v54, %v13344_v46  ;;  %9597 = vmatmul.bf16.vlgmr.msrb.gmra.mxu1 %v16820_v47 }
 0x8d1   :  { %v15597_v61 = vld [vmem:[#allocation26 + $0x9f4] sm:$0xf0]  ;;  %9622 = vmatpush.bf16.msrb.mxu3 %v13089_v38 }
 0x8d2   :  { %v14080_v63 = vld [vmem:[#allocation26 + $0xbd8] sm:$0xf]  ;;  %v13825_v39 = vor.u32 %v15597_v61, %v13824_v23  ;;  %9610 = vmatmul.bf16.vlgmr.msrb.gmra.mxu2 %v16822_v48 }
 0x8d3   :  { %v15661_v5 = vld [vmem:[#allocation26 + $0xbf4] sm:$0xf0]  ;;  %9635 = vmatpush.bf16.msra.mxu0 %v13345_v6 }
 0x8d4   :  { %v14336_v21 = vld [vmem:[#allocation26 + $0xdd8] sm:$0xf]  ;;  %v14081_v40 = vor.u32 %v15661_v5, %v14080_v63  ;;  %9641 = vmatpush.bf16.msra.mxu1 %v13825_v39  ;;  %9623 = vmatmul.bf16.vlgmr.msrb.gmra.mxu3 %v16824_v60  ;;  %v16947_v39 = vpop.f32.mrf.mxu2 }
 0x8d5   :  { %v15725_v16 = vld [vmem:[#allocation26 + $0xdf4] sm:$0xf0] }
 0x8d6   :  { %v14592_v53 = vld [vmem:[#allocation26 + $0xfd8] sm:$0xf]  ;;  %v14337_v18 = vor.u32 %v15725_v16, %v14336_v21  ;;  %9654 = vmatpush.bf16.msra.mxu2 %v14081_v40  ;;  %9636 = vmatmul.bf16.vlgmr.msra.gmra.mxu0 %v16826_v0 }
 0x8d7   :  { %v15789_v57 = vld [vmem:[#allocation26 + $0xff4] sm:$0xf0] }
 0x8d8   :  { %v13792_v31 = vld [vmem:[#allocation26 + $0x998] sm:$0xf]  ;;  %v14593_v27 = vor.u32 %v15789_v57, %v14592_v53  ;;  %9667 = vmatpush.bf16.msra.mxu3 %v14337_v18  ;;  %v16949_v18 = vpop.f32.mrf.mxu3 }
 0x8d9   :  { %v15589_v15 = vld [vmem:[#allocation26 + $0x9b4] sm:$0xf0] }
 0x8da   :  { %v14048_v3 = vld [vmem:[#allocation26 + $0xb98] sm:$0xf]  ;;  %v13793_v29 = vor.u32 %v15589_v15, %v13792_v31  ;;  %9680 = vmatpush.bf16.msrb.mxu0 %v14593_v27 }
 0x8db   :  { %v15653_v14 = vld [vmem:[#allocation26 + $0xbb4] sm:$0xf0] }
 0x8dc   :  { %v14304_v20 = vld [vmem:[#allocation26 + $0xd98] sm:$0xf]  ;;  %v14049_v7 = vor.u32 %v15653_v14, %v14048_v3  ;;  %9642 = vmatpush.bf16.msra.mxu1 %v13793_v29 }
 0x8dd   :  { %v15717_v59 = vld [vmem:[#allocation26 + $0xdb4] sm:$0xf0] }
 0x8de   :  { %v14560_v35 = vld [vmem:[#allocation26 + $0xf98] sm:$0xf]  ;;  %v14305_v30 = vor.u32 %v15717_v59, %v14304_v20  ;;  %9655 = vmatpush.bf16.msra.mxu2 %v14049_v7  ;;  %v9392_v20 = vpop.f32.mrf.mxu1  ;;  %v9431_v59 = vpop.f32.mrf.mxu0 }
 0x8df   :  { %v15781_v49 = vld [vmem:[#allocation26 + $0xfb4] sm:$0xf0]  ;;  %v15521_v20 = vld [vmem:[#allocation26 + $0x79c] sm:$0xf] }
 0x8e0   :  { %v13760_v8 = vld [vmem:[#allocation26 + $0x958] sm:$0xf]  ;;  %v14561_v17 = vor.u32 %v15781_v49, %v14560_v35  ;;  %9668 = vmatpush.bf16.msra.mxu3 %v14305_v30  ;;  %v13538_v59 = vld [vmem:[#allocation26 + $0x7b8] sm:$0xf0] }
 0x8e1   :  { %v15581_v51 = vld [vmem:[#allocation26 + $0x974] sm:$0xf0] }
 0x8e2   :  { %v14016_v58 = vld [vmem:[#allocation26 + $0xb58] sm:$0xf]  ;;  %v13761_v43 = vor.u32 %v15581_v51, %v13760_v8  ;;  %9681 = vmatpush.bf16.msrb.mxu0 %v14561_v17 }
 0x8e3   :  { %v15645_v1 = vld [vmem:[#allocation26 + $0xb74] sm:$0xf0] }
 0x8e4   :  { %v14272_v11 = vld [vmem:[#allocation26 + $0xd58] sm:$0xf]  ;;  %v14017_v19 = vor.u32 %v15645_v1, %v14016_v58  ;;  %9643 = vmatpush.bf16.msra.mxu1 %v13761_v43 }
 0x8e5   :  { %v15709_v28 = vld [vmem:[#allocation26 + $0xd74] sm:$0xf0] }
 0x8e6   :  { %v14528_v56 = vld [vmem:[#allocation26 + $0xf58] sm:$0xf]  ;;  %v14273_v9 = vor.u32 %v15709_v28, %v14272_v11  ;;  %9656 = vmatpush.bf16.msra.mxu2 %v14017_v19 }
 0x8e7   :  { %v15773_v45 = vld [vmem:[#allocation26 + $0xf74] sm:$0xf0] }
 0x8e8   :  { %v13728_v22 = vld [vmem:[#allocation26 + $0x918] sm:$0xf]  ;;  %v14529_v34 = vor.u32 %v15773_v45, %v14528_v56  ;;  %9669 = vmatpush.bf16.msra.mxu3 %v14273_v9 }
 0x8e9   :  { %v15573_v24 = vld [vmem:[#allocation26 + $0x934] sm:$0xf0] }
 0x8ea   :  { %v13984_v10 = vld [vmem:[#allocation26 + $0xb18] sm:$0xf]  ;;  %v13729_v4 = vor.u32 %v15573_v24, %v13728_v22  ;;  %9682 = vmatpush.bf16.msrb.mxu0 %v14529_v34 }
 0x8eb   :  { %v15637_v33 = vld [vmem:[#allocation26 + $0xb34] sm:$0xf0] }
 0x8ec   :  { %v14240_v12 = vld [vmem:[#allocation26 + $0xd18] sm:$0xf]  ;;  %v13985_v42 = vor.u32 %v15637_v33, %v13984_v10  ;;  %9644 = vmatpush.bf16.msra.mxu1 %v13729_v4  ;;  %v9405_v10 = vpop.f32.mrf.mxu2  ;;  %v15337_v4 = vld [vmem:[#allocation26 + $0x1dc] sm:$0xf] }
 0x8ed   :  { %v15701_v2 = vld [vmem:[#allocation26 + $0xd34] sm:$0xf0]  ;;  %v15441_v10 = vld [vmem:[#allocation26 + $0x51c] sm:$0xf] }
 0x8ee   :  { %v14496_v25 = vld [vmem:[#allocation26 + $0xf18] sm:$0xf]  ;;  %v14241_v44 = vor.u32 %v15701_v2, %v14240_v12  ;;  %9657 = vmatpush.bf16.msra.mxu2 %v13985_v42  ;;  %v12802_v42 = vld [vmem:[#allocation26 + $0x1f8] sm:$0xf0] }
 0x8ef   :  { %v15765_v26 = vld [vmem:[#allocation26 + $0xf34] sm:$0xf0] }
 0x8f0   :  { %v13696_v62 = vld [vmem:[#allocation26 + $0x8d8] sm:$0xf]  ;;  %v14497_v54 = vor.u32 %v15765_v26, %v14496_v25  ;;  %9670 = vmatpush.bf16.msra.mxu3 %v14241_v44  ;;  %v9418_v25 = vpop.f32.mrf.mxu3  ;;  %v15465_v44 = vld [vmem:[#allocation26 + $0x5dc] sm:$0xf] }
 0x8f1   :  { %v15565_v46 = vld [vmem:[#allocation26 + $0x8f4] sm:$0xf0]  ;;  %v13474_v25 = vld [vmem:[#allocation26 + $0x738] sm:$0xf0] }
 0x8f2   :  { %v13952_v23 = vld [vmem:[#allocation26 + $0xad8] sm:$0xf]  ;;  %v13697_v52 = vor.u32 %v15565_v46, %v13696_v62  ;;  %9683 = vmatpush.bf16.msrb.mxu0 %v14497_v54  ;;  %v15401_v62 = vld [vmem:[#allocation26 + $0x3dc] sm:$0xf] }
 0x8f3   :  { %v15629_v61 = vld [vmem:[#allocation26 + $0xaf4] sm:$0xf0]  ;;  %v13058_v46 = vld [vmem:[#allocation26 + $0x3f8] sm:$0xf0] }
 0x8f4   :  { %v14208_v63 = vld [vmem:[#allocation26 + $0xcd8] sm:$0xf]  ;;  %v13953_v16 = vor.u32 %v15629_v61, %v13952_v23  ;;  %9645 = vmatpush.bf16.msra.mxu1 %v13697_v52  ;;  %v13314_v61 = vld [vmem:[#allocation26 + $0x5f8] sm:$0xf0]  ;;  %v16951_v52 = vld [vmem:[#allocation28] sm:$0xff] }
 0x8f5   :  { %v15693_v5 = vld [vmem:[#allocation26 + $0xcf4] sm:$0xf0] }
 0x8f6   :  { %v14464_v21 = vld [vmem:[#allocation26 + $0xed8] sm:$0xf]  ;;  %v14209_v38 = vor.u32 %v15693_v5, %v14208_v63  ;;  %9658 = vmatpush.bf16.msra.mxu2 %v13953_v16  ;;  %v15529_v63 = vld [vmem:[#allocation26 + $0x7dc] sm:$0xf]  ;;  %v6393_v16 = vperm.slane %v16951_v52, 4 }
 0x8f7   :  { %v15757_v50 = vld [vmem:[#allocation26 + $0xef4] sm:$0xf0]  ;;  %v13570_v5 = vld [vmem:[#allocation26 + $0x7f8] sm:$0xf0] }
 0x8f8   :  { %v13664_v53 = vld [vmem:[#allocation26 + $0x898] sm:$0xf]  ;;  %v14465_v6 = vor.u32 %v15757_v50, %v14464_v21  ;;  %9671 = vmatpush.bf16.msra.mxu3 %v14209_v38  ;;  %v15329_v38 = vld [vmem:[#allocation26 + $0x19c] sm:$0xf] }
 0x8f9   :  { %v15557_v57 = vld [vmem:[#allocation26 + $0x8b4] sm:$0xf0] }
 0x8fa   :  { %v13920_v40 = vld [vmem:[#allocation26 + $0xa98] sm:$0xf]  ;;  %v13665_v35 = vor.u32 %v15557_v57, %v13664_v53  ;;  %9684 = vmatpush.bf16.msrb.mxu0 %v14465_v6  ;;  %v12805_v53 = vor.u32 %v15337_v4, %v12802_v42  ;;  %v13061_v57 = vor.u32 %v15401_v62, %v13058_v46  ;;  %v12770_v6 = vld [vmem:[#allocation26 + $0x1b8] sm:$0xf0]  ;;  %v9481_v4 = vpop.f32.mrf.mxu0 }
 0x8fb   :  { %v15621_v31 = vld [vmem:[#allocation26 + $0xab4] sm:$0xf0]  ;;  %v15305_v46 = vld [vmem:[#allocation26 + $0xdc] sm:$0xf] }
 0x8fc   :  { %v14176_v15 = vld [vmem:[#allocation26 + $0xc98] sm:$0xf]  ;;  %v13921_v49 = vor.u32 %v15621_v31, %v13920_v40  ;;  %9646 = vmatpush.bf16.msra.mxu1 %v13665_v35  ;;  %v13317_v40 = vor.u32 %v15465_v44, %v13314_v61  ;;  %v13573_v31 = vor.u32 %v15529_v63, %v13570_v5  ;;  %v9391_v35 = vadd.f32 %v16943_v37, %v6393_v16  ;;  %v13250_v37 = vld [vmem:[#allocation26 + $0x578] sm:$0xf0] }
 0x8fd   :  { %v15685_v27 = vld [vmem:[#allocation26 + $0xcb4] sm:$0xf0]  ;;  %v12674_v44 = vld [vmem:[#allocation26 + $0xf8] sm:$0xf0] }
 0x8fe   :  { %v14432_v3 = vld [vmem:[#allocation26 + $0xe98] sm:$0xf]  ;;  %v14177_v8 = vor.u32 %v15685_v27, %v14176_v15  ;;  %9659 = vmatpush.bf16.msra.mxu2 %v13921_v49  ;;  %v15393_v15 = vld [vmem:[#allocation26 + $0x39c] sm:$0xf]  ;;  %v12773_v49 = vor.u32 %v15329_v38, %v12770_v6 }
 0x8ff   :  { %v15749_v14 = vld [vmem:[#allocation26 + $0xeb4] sm:$0xf0]  ;;  %v13026_v27 = vld [vmem:[#allocation26 + $0x3b8] sm:$0xf0] }
 0x900   :  { %v13632_v29 = vld [vmem:[#allocation26 + $0x858] sm:$0xf]  ;;  %v14433_v51 = vor.u32 %v15749_v14, %v14432_v3  ;;  %9672 = vmatpush.bf16.msra.mxu3 %v14177_v8  ;;  %v15457_v3 = vld [vmem:[#allocation26 + $0x59c] sm:$0xf] }
 0x901   :  { %v15549_v7 = vld [vmem:[#allocation26 + $0x874] sm:$0xf0]  ;;  %v13282_v14 = vld [vmem:[#allocation26 + $0x5b8] sm:$0xf0] }
 0x902   :  { %v13888_v30 = vld [vmem:[#allocation26 + $0xa58] sm:$0xf]  ;;  %v13633_v45 = vor.u32 %v15549_v7, %v13632_v29  ;;  %9685 = vmatpush.bf16.msrb.mxu0 %v14433_v51  ;;  %v13029_v29 = vor.u32 %v15393_v15, %v13026_v27  ;;  %v15321_v7 = vld [vmem:[#allocation26 + $0x15c] sm:$0xf]  ;;  %v13285_v51 = vor.u32 %v15457_v3, %v13282_v14  ;;  %v9455_v27 = vpop.f32.mrf.mxu2 }
 0x903   :  { %v15613_v17 = vld [vmem:[#allocation26 + $0xa74] sm:$0xf0]  ;;  %v12738_v8 = vld [vmem:[#allocation26 + $0x178] sm:$0xf0] }
 0x904   :  { %v14144_v58 = vld [vmem:[#allocation26 + $0xc58] sm:$0xf]  ;;  %v13889_v43 = vor.u32 %v15613_v17, %v13888_v30  ;;  %9647 = vmatpush.bf16.msra.mxu1 %v13633_v45  ;;  %v13541_v30 = vor.u32 %v15521_v20, %v13538_v59  ;;  %v15385_v17 = vld [vmem:[#allocation26 + $0x35c] sm:$0xf]  ;;  %v12741_v45 = vor.u32 %v15321_v7, %v12738_v8 }
 0x905   :  { %v15677_v1 = vld [vmem:[#allocation26 + $0xc74] sm:$0xf0]  ;;  %v15369_v61 = vld [vmem:[#allocation26 + $0x2dc] sm:$0xf] }
 0x906   :  { %v14400_v11 = vld [vmem:[#allocation26 + $0xe58] sm:$0xf]  ;;  %v14145_v9 = vor.u32 %v15677_v1, %v14144_v58  ;;  %9660 = vmatpush.bf16.msra.mxu2 %v13889_v43  ;;  %v12994_v58 = vld [vmem:[#allocation26 + $0x378] sm:$0xf0] }
 0x907   :  { %v15741_v28 = vld [vmem:[#allocation26 + $0xe74] sm:$0xf0]  ;;  %v15449_v1 = vld [vmem:[#allocation26 + $0x55c] sm:$0xf]  ;;  %v12997_v43 = vor.u32 %v15385_v17, %v12994_v58 }
 0x908   :  { %v13600_v56 = vld [vmem:[#allocation26 + $0x818] sm:$0xf]  ;;  %v14401_v34 = vor.u32 %v15741_v28, %v14400_v11  ;;  %9673 = vmatpush.bf16.msra.mxu3 %v14145_v9  ;;  %v9404_v11 = vadd.f32 %v16947_v39, %v9391_v35  ;;  %v15513_v28 = vld [vmem:[#allocation26 + $0x75c] sm:$0xf]  ;;  %v13253_v39 = vor.u32 %v15449_v1, %v13250_v37 }
 0x909   :  { %v15541_v19 = vld [vmem:[#allocation26 + $0x834] sm:$0xf0]  ;;  %v15377_v9 = vld [vmem:[#allocation26 + $0x31c] sm:$0xf] }
 0x90a   :  { %v13856_v22 = vld [vmem:[#allocation26 + $0xa18] sm:$0xf]  ;;  %v13601_v54 = vor.u32 %v15541_v19, %v13600_v56  ;;  %9686 = vmatpush.bf16.msrb.mxu0 %v14401_v34  ;;  %v13506_v56 = vld [vmem:[#allocation26 + $0x778] sm:$0xf0] }
 0x90b   :  { %v15605_v24 = vld [vmem:[#allocation26 + $0xa34] sm:$0xf0]  ;;  %v15313_v19 = vld [vmem:[#allocation26 + $0x11c] sm:$0xf] }
 0x90c   :  { %v14112_v33 = vld [vmem:[#allocation26 + $0xc18] sm:$0xf]  ;;  %v13857_v23 = vor.u32 %v15605_v24, %v13856_v22  ;;  %9648 = vmatpush.bf16.msra.mxu1 %v13601_v54  ;;  %v12706_v22 = vld [vmem:[#allocation26 + $0x138] sm:$0xf0]  ;;  %v13509_v24 = vor.u32 %v15513_v28, %v13506_v56 }
 0x90d   :  { %v15669_v12 = vld [vmem:[#allocation26 + $0xc34] sm:$0xf0]  ;;  %v12962_v34 = vld [vmem:[#allocation26 + $0x338] sm:$0xf0]  ;;  %v12709_v42 = vor.u32 %v15313_v19, %v12706_v22 }
 0x90e   :  { %v14368_v2 = vld [vmem:[#allocation26 + $0xe18] sm:$0xf]  ;;  %v14113_v21 = vor.u32 %v15669_v12, %v14112_v33  ;;  %9661 = vmatpush.bf16.msra.mxu2 %v13857_v23  ;;  %v9417_v33 = vadd.f32 %v16949_v18, %v9404_v11  ;;  %v13218_v12 = vld [vmem:[#allocation26 + $0x538] sm:$0xf0]  ;;  %v12965_v62 = vor.u32 %v15377_v9, %v12962_v34 }
 0x90f   :  { %v15733_v26 = vld [vmem:[#allocation26 + $0xe34] sm:$0xf0]  ;;  %9649 = vmatmul.bf16.vlgmr.msra.gmra.mxu1 %v16840_v13  ;;  %v13221_v54 = vor.u32 %v15441_v10, %v13218_v12  ;;  %v12930_v63 = vld [vmem:[#allocation26 + $0x2f8] sm:$0xf0] }
 0x910   :  { %v14369_v50 = vor.u32 %v15733_v26, %v14368_v2  ;;  %9674 = vmatpush.bf16.msra.mxu3 %v14113_v21  ;;  %9693 = vmatpush.bf16.msrb.mxu1 %v12805_v53  ;;  %v15505_v2 = vld [vmem:[#allocation26 + $0x71c] sm:$0xf]  ;;  %v9442_v26 = vpop.f32.mrf.mxu1  ;;  %v9430_v18 = vadd.f32 %v16945_v36, %v9417_v33  ;;  %v12933_v38 = vor.u32 %v15369_v61, %v12930_v63  ;;  %v9468_v36 = vpop.f32.mrf.mxu3 }
 0x911   :  { %9662 = vmatmul.bf16.vlgmr.msra.gmra.mxu2 %v16842_v55  ;;  %v13477_v23 = vor.u32 %v15505_v2, %v13474_v25  ;;  %v15433_v5 = vld [vmem:[#allocation26 + $0x4dc] sm:$0xf] }
 0x912   :  { %9687 = vmatpush.bf16.msrb.mxu0 %v14369_v50  ;;  %9706 = vmatpush.bf16.msrb.mxu2 %v13061_v57  ;;  %v13186_v21 = vld [vmem:[#allocation26 + $0x4f8] sm:$0xf0]  ;;  %v9443_v53 = vadd.f32 %v9442_v26, %v9430_v18  ;;  %v12677_v57 = vor.u32 %v15305_v46, %v12674_v44  ;;  %v9457_v26 = vpop.f32.mrf.mxu2 }
 0x913   :  { %9675 = vmatmul.bf16.vlgmr.msra.gmra.mxu3 %v16844_v32  ;;  %v15497_v50 = vld [vmem:[#allocation26 + $0x6dc] sm:$0xf] }
 0x914   :  { %9719 = vmatpush.bf16.msrb.mxu3 %v13317_v40  ;;  %9694 = vmatpush.bf16.msrb.mxu1 %v12773_v49  ;;  %v13442_v16 = vld [vmem:[#allocation26 + $0x6f8] sm:$0xf0]  ;;  %v9456_v59 = vadd.f32 %v9455_v27, %v9443_v53 }
 0x915   :  { %9688 = vmatmul.bf16.vlgmr.msrb.gmra.mxu0 %v16846_v41  ;;  %v15297_v6 = vld [vmem:[#allocation26 + $0x9c] sm:$0xf]  ;;  %v13445_v15 = vor.u32 %v15497_v50, %v13442_v16 }
 0x916   :  { %9732 = vmatpush.bf16.msra.mxu0 %v13573_v31  ;;  %9707 = vmatpush.bf16.msrb.mxu2 %v13029_v29  ;;  %v12642_v40 = vld [vmem:[#allocation26 + $0xb8] sm:$0xf0]  ;;  %v13189_v31 = vor.u32 %v15433_v5, %v13186_v21  ;;  %v9469_v8 = vadd.f32 %v9468_v36, %v9456_v59 }
 0x917   :  { %v15361_v3 = vld [vmem:[#allocation26 + $0x29c] sm:$0xf] }
 0x918   :  { %9720 = vmatpush.bf16.msrb.mxu3 %v13285_v51  ;;  %9695 = vmatpush.bf16.msrb.mxu1 %v12741_v45  ;;  %v12898_v14 = vld [vmem:[#allocation26 + $0x2b8] sm:$0xf0]  ;;  %v9444_v7 = vpop.f32.mrf.mxu1  ;;  %v9483_v51 = vpop.f32.mrf.mxu0 }
 0x919   :  { %v15425_v20 = vld [vmem:[#allocation26 + $0x49c] sm:$0xf]  ;;  %v12901_v17 = vor.u32 %v15361_v3, %v12898_v14  ;;  %v9470_v46 = vpop.f32.mrf.mxu3 }
 0x91a   :  { %9733 = vmatpush.bf16.msra.mxu0 %v13541_v30  ;;  %9708 = vmatpush.bf16.msrb.mxu2 %v12997_v43  ;;  %v13154_v35 = vld [vmem:[#allocation26 + $0x4b8] sm:$0xf0]  ;;  %v12645_v30 = vor.u32 %v15297_v6, %v12642_v40  ;;  %v9482_v43 = vadd.f32 %v9481_v4, %v9469_v8 }
 0x91b   :  { %v15489_v49 = vld [vmem:[#allocation26 + $0x69c] sm:$0xf]  ;;  %v13157_v11 = vor.u32 %v15425_v20, %v13154_v35 }
 0x91c   :  { %9721 = vmatpush.bf16.msrb.mxu3 %v13253_v39  ;;  %9696 = vmatpush.bf16.msrb.mxu1 %v12709_v42  ;;  %v13410_v29 = vld [vmem:[#allocation26 + $0x6b8] sm:$0xf0]  ;;  %9801 = vst [vmem:[#allocation29 + $0x20] sm:$0xff] %v9482_v43 }
 0x91d   :  { %v15289_v58 = vld [vmem:[#allocation26 + $0x5c] sm:$0xf]  ;;  %v13413_v37 = vor.u32 %v15489_v49, %v13410_v29 }
 0x91e   :  { %9734 = vmatpush.bf16.msra.mxu0 %v13509_v24  ;;  %9709 = vmatpush.bf16.msrb.mxu2 %v12965_v62  ;;  %v12610_v1 = vld [vmem:[#allocation26 + $0x78] sm:$0xf0] }
 0x91f   :  { %v15353_v28 = vld [vmem:[#allocation26 + $0x25c] sm:$0xf]  ;;  %v12613_v34 = vor.u32 %v15289_v58, %v12610_v1 }
 0x920   :  { %9722 = vmatpush.bf16.msrb.mxu3 %v13221_v54  ;;  %9697 = vmatpush.bf16.msrb.mxu1 %v12677_v57  ;;  %v12866_v56 = vld [vmem:[#allocation26 + $0x278] sm:$0xf0] }
 0x921   :  { %v15417_v45 = vld [vmem:[#allocation26 + $0x45c] sm:$0xf]  ;;  %v12869_v10 = vor.u32 %v15353_v28, %v12866_v56 }
 0x922   :  { %9735 = vmatpush.bf16.msra.mxu0 %v13477_v23  ;;  %9710 = vmatpush.bf16.msrb.mxu2 %v12933_v38  ;;  %v13122_v19 = vld [vmem:[#allocation26 + $0x478] sm:$0xf0] }
 0x923   :  { %v15481_v22 = vld [vmem:[#allocation26 + $0x65c] sm:$0xf]  ;;  %v13125_v2 = vor.u32 %v15417_v45, %v13122_v19 }
 0x924   :  { %9723 = vmatpush.bf16.msrb.mxu3 %v13189_v31  ;;  %v13378_v39 = vld [vmem:[#allocation26 + $0x678] sm:$0xf0]  ;;  %9698 = vmatpush.bf16.msrb.mxu1 %v12645_v30 }
 0x925   :  { %v15281_v24 = vld [vmem:[#allocation26 + $0x1c] sm:$0xf]  ;;  %v13381_v25 = vor.u32 %v15481_v22, %v13378_v39 }
 0x926   :  { %9736 = vmatpush.bf16.msra.mxu0 %v13445_v15  ;;  %v12578_v9 = vld [vmem:[#allocation26 + $0x38] sm:$0xf0]  ;;  %9711 = vmatpush.bf16.msrb.mxu2 %v12901_v17 }
 0x927   :  { %v15345_v33 = vld [vmem:[#allocation26 + $0x21c] sm:$0xf]  ;;  %v12581_v18 = vor.u32 %v15281_v24, %v12578_v9 }
 0x928   :  { %v12834_v12 = vld [vmem:[#allocation26 + $0x238] sm:$0xf0]  ;;  %9724 = vmatpush.bf16.msrb.mxu3 %v13157_v11  ;;  %9699 = vmatpush.bf16.msrb.mxu1 %v12613_v34 }
 0x929   :  { %v15409_v42 = vld [vmem:[#allocation26 + $0x41c] sm:$0xf]  ;;  %v12837_v21 = vor.u32 %v15345_v33, %v12834_v12  ;;  %v16966_v12 = vpop.f32.mrf.mxu1 }
 0x92a   :  { %9737 = vmatpush.bf16.msra.mxu0 %v13413_v37  ;;  %v13090_v62 = vld [vmem:[#allocation26 + $0x438] sm:$0xf0]  ;;  %9712 = vmatpush.bf16.msrb.mxu2 %v12869_v10 }
 0x92b   :  { %v15473_v4 = vld [vmem:[#allocation26 + $0x61c] sm:$0xf]  ;;  %v13093_v57 = vor.u32 %v15409_v42, %v13090_v62 }
 0x92c   :  { %v13346_v44 = vld [vmem:[#allocation26 + $0x638] sm:$0xf0]  ;;  %9725 = vmatpush.bf16.msrb.mxu3 %v13125_v2  ;;  %9700 = vmatpush.bf16.msrb.mxu1 %v12581_v18 }
 0x92d   :  { %v15593_v54 = vld [vmem:[#allocation26 + $0x9dc] sm:$0xf]  ;;  %v13349_v38 = vor.u32 %v15473_v4, %v13346_v44 }
 0x92e   :  { %v13826_v23 = vld [vmem:[#allocation26 + $0x9f8] sm:$0xf0]  ;;  %9738 = vmatpush.bf16.msra.mxu0 %v13381_v25  ;;  %9713 = vmatpush.bf16.msrb.mxu2 %v12837_v21 }
 0x92f   :  { %v15657_v61 = vld [vmem:[#allocation26 + $0xbdc] sm:$0xf]  ;;  %v13829_v6 = vor.u32 %v15593_v54, %v13826_v23  ;;  %9701 = vmatmul.bf16.vlgmr.msrb.gmra.mxu1 %v16820_v47 }
 0x930   :  { %v14082_v63 = vld [vmem:[#allocation26 + $0xbf8] sm:$0xf0]  ;;  %9726 = vmatpush.bf16.msrb.mxu3 %v13093_v57 }
 0x931   :  { %v15721_v5 = vld [vmem:[#allocation26 + $0xddc] sm:$0xf]  ;;  %v14085_v40 = vor.u32 %v15657_v61, %v14082_v63  ;;  %9745 = vmatpush.bf16.msra.mxu1 %v13829_v6  ;;  %9714 = vmatmul.bf16.vlgmr.msrb.gmra.mxu2 %v16822_v48 }
 0x932   :  { %v14338_v50 = vld [vmem:[#allocation26 + $0xdf8] sm:$0xf0]  ;;  %9739 = vmatpush.bf16.msra.mxu0 %v13349_v38 }
 0x933   :  { %v15785_v16 = vld [vmem:[#allocation26 + $0xfdc] sm:$0xf]  ;;  %v14341_v27 = vor.u32 %v15721_v5, %v14338_v50  ;;  %9758 = vmatpush.bf16.msra.mxu2 %v14085_v40  ;;  %9727 = vmatmul.bf16.vlgmr.msrb.gmra.mxu3 %v16824_v60  ;;  %v16968_v60 = vpop.f32.mrf.mxu0  ;;  %v9520_v40 = vpop.f32.mrf.mxu3 }
 0x934   :  { %v14594_v53 = vld [vmem:[#allocation26 + $0xff8] sm:$0xf0] }
 0x935   :  { %v15585_v31 = vld [vmem:[#allocation26 + $0x99c] sm:$0xf]  ;;  %v14597_v3 = vor.u32 %v15785_v16, %v14594_v53  ;;  %9771 = vmatpush.bf16.msra.mxu3 %v14341_v27  ;;  %9740 = vmatmul.bf16.vlgmr.msra.gmra.mxu0 %v16826_v0  ;;  %v9507_v53 = vpop.f32.mrf.mxu2 }
 0x936   :  { %v13794_v15 = vld [vmem:[#allocation26 + $0x9b8] sm:$0xf0] }
 0x937   :  { %v15649_v14 = vld [vmem:[#allocation26 + $0xb9c] sm:$0xf]  ;;  %v13797_v29 = vor.u32 %v15585_v31, %v13794_v15  ;;  %9784 = vmatpush.bf16.msrb.mxu0 %v14597_v3  ;;  %v9496_v3 = vpop.f32.mrf.mxu1 }
 0x938   :  { %v14050_v20 = vld [vmem:[#allocation26 + $0xbb8] sm:$0xf0] }
 0x939   :  { %v15713_v59 = vld [vmem:[#allocation26 + $0xd9c] sm:$0xf]  ;;  %v14053_v7 = vor.u32 %v15649_v14, %v14050_v20  ;;  %9746 = vmatpush.bf16.msra.mxu1 %v13797_v29 }
 0x93a   :  { %v14306_v36 = vld [vmem:[#allocation26 + $0xdb8] sm:$0xf0] }
 0x93b   :  { %v15777_v35 = vld [vmem:[#allocation26 + $0xf9c] sm:$0xf]  ;;  %v14309_v30 = vor.u32 %v15713_v59, %v14306_v36  ;;  %9759 = vmatpush.bf16.msra.mxu2 %v14053_v7  ;;  %v9535_v14 = vpop.f32.mrf.mxu0 }
 0x93c   :  { %v14562_v49 = vld [vmem:[#allocation26 + $0xfb8] sm:$0xf0] }
 0x93d   :  { %v15577_v8 = vld [vmem:[#allocation26 + $0x95c] sm:$0xf]  ;;  %v14565_v17 = vor.u32 %v15777_v35, %v14562_v49  ;;  %9772 = vmatpush.bf16.msra.mxu3 %v14309_v30 }
 0x93e   :  { %v13762_v51 = vld [vmem:[#allocation26 + $0x978] sm:$0xf0] }
 0x93f   :  { %v15641_v58 = vld [vmem:[#allocation26 + $0xb5c] sm:$0xf]  ;;  %v13765_v45 = vor.u32 %v15577_v8, %v13762_v51  ;;  %9785 = vmatpush.bf16.msrb.mxu0 %v14565_v17 }
 0x940   :  { %v14018_v1 = vld [vmem:[#allocation26 + $0xb78] sm:$0xf0] }
 0x941   :  { %v15705_v11 = vld [vmem:[#allocation26 + $0xd5c] sm:$0xf]  ;;  %v14021_v43 = vor.u32 %v15641_v58, %v14018_v1  ;;  %9747 = vmatpush.bf16.msra.mxu1 %v13765_v45 }
 0x942   :  { %v14274_v37 = vld [vmem:[#allocation26 + $0xd78] sm:$0xf0] }
 0x943   :  { %v15769_v28 = vld [vmem:[#allocation26 + $0xf5c] sm:$0xf]  ;;  %v14277_v39 = vor.u32 %v15705_v11, %v14274_v37  ;;  %9760 = vmatpush.bf16.msra.mxu2 %v14021_v43  ;;  %v9509_v43 = vpop.f32.mrf.mxu2 }
 0x944   :  { %v14530_v56 = vld [vmem:[#allocation26 + $0xf78] sm:$0xf0] }
 0x945   :  { %v15569_v19 = vld [vmem:[#allocation26 + $0x91c] sm:$0xf]  ;;  %v14533_v24 = vor.u32 %v15769_v28, %v14530_v56  ;;  %9773 = vmatpush.bf16.msra.mxu3 %v14277_v39 }
 0x946   :  { %v13730_v22 = vld [vmem:[#allocation26 + $0x938] sm:$0xf0] }
 0x947   :  { %v15633_v47 = vld [vmem:[#allocation26 + $0xb1c] sm:$0xf]  ;;  %v13733_v0 = vor.u32 %v15569_v19, %v13730_v22  ;;  %9786 = vmatpush.bf16.msrb.mxu0 %v14533_v24  ;;  %v9522_v24 = vpop.f32.mrf.mxu3 }
 0x948   :  { %v13986_v9 = vld [vmem:[#allocation26 + $0xb38] sm:$0xf0] }
 0x949   :  { %v15697_v48 = vld [vmem:[#allocation26 + $0xd1c] sm:$0xf]  ;;  %v13989_v2 = vor.u32 %v15633_v47, %v13986_v9  ;;  %9748 = vmatpush.bf16.msra.mxu1 %v13733_v0 }
 0x94a   :  { %v14242_v34 = vld [vmem:[#allocation26 + $0xd38] sm:$0xf0] }
 0x94b   :  { %v15761_v10 = vld [vmem:[#allocation26 + $0xf1c] sm:$0xf]  ;;  %v14245_v42 = vor.u32 %v15697_v48, %v14242_v34  ;;  %9761 = vmatpush.bf16.msra.mxu2 %v13989_v2  ;;  %v6394_v2 = vperm.slane %v16951_v52, 5 }
 0x94c   :  { %v14498_v33 = vld [vmem:[#allocation26 + $0xf38] sm:$0xf0] }
 0x94d   :  { %v15561_v25 = vld [vmem:[#allocation26 + $0x8dc] sm:$0xf]  ;;  %v14501_v62 = vor.u32 %v15761_v10, %v14498_v33  ;;  %9774 = vmatpush.bf16.msra.mxu3 %v14245_v42 }
 0x94e   :  { %v13698_v26 = vld [vmem:[#allocation26 + $0x8f8] sm:$0xf0] }
 0x94f   :  { %v15625_v4 = vld [vmem:[#allocation26 + $0xadc] sm:$0xf]  ;;  %v13701_v63 = vor.u32 %v15561_v25, %v13698_v26  ;;  %9787 = vmatpush.bf16.msrb.mxu0 %v14501_v62  ;;  %v9495_v25 = vadd.f32 %v16966_v12, %v6394_v2  ;;  %v9546_v62 = vpop.f32.mrf.mxu1 }
 0x950   :  { %v13954_v46 = vld [vmem:[#allocation26 + $0xaf8] sm:$0xf0] }
 0x951   :  { %v15689_v44 = vld [vmem:[#allocation26 + $0xcdc] sm:$0xf]  ;;  %v13957_v5 = vor.u32 %v15625_v4, %v13954_v46  ;;  %9749 = vmatpush.bf16.msra.mxu1 %v13701_v63  ;;  %v9508_v26 = vadd.f32 %v9507_v53, %v9495_v25  ;;  %v9585_v4 = vpop.f32.mrf.mxu0 }
 0x952   :  { %v14210_v54 = vld [vmem:[#allocation26 + $0xcf8] sm:$0xf0] }
 0x953   :  { %v15753_v23 = vld [vmem:[#allocation26 + $0xedc] sm:$0xf]  ;;  %v14213_v50 = vor.u32 %v15689_v44, %v14210_v54  ;;  %9762 = vmatpush.bf16.msra.mxu2 %v13957_v5  ;;  %v9521_v42 = vadd.f32 %v9520_v40, %v9508_v26  ;;  %v9559_v54 = vpop.f32.mrf.mxu2 }
 0x954   :  { %v14466_v61 = vld [vmem:[#allocation26 + $0xef8] sm:$0xf0] }
 0x955   :  { %v15553_v18 = vld [vmem:[#allocation26 + $0x89c] sm:$0xf]  ;;  %v14469_v16 = vor.u32 %v15753_v23, %v14466_v61  ;;  %9775 = vmatpush.bf16.msra.mxu3 %v14213_v50  ;;  %v9534_v46 = vadd.f32 %v16968_v60, %v9521_v42  ;;  %v9572_v61 = vpop.f32.mrf.mxu3  ;;  %v6395_v60 = vperm.slane %v16951_v52, 6 }
 0x956   :  { %v13666_v21 = vld [vmem:[#allocation26 + $0x8b8] sm:$0xf0] }
 0x957   :  { %v15617_v57 = vld [vmem:[#allocation26 + $0xa9c] sm:$0xf]  ;;  %v13669_v20 = vor.u32 %v15553_v18, %v13666_v21  ;;  %9788 = vmatpush.bf16.msrb.mxu0 %v14469_v16  ;;  %v9547_v44 = vadd.f32 %v9546_v62, %v9534_v46  ;;  %v9548_v63 = vpop.f32.mrf.mxu1 }
 0x958   :  { %v13922_v38 = vld [vmem:[#allocation26 + $0xab8] sm:$0xf0] }
 0x959   :  { %v15681_v6 = vld [vmem:[#allocation26 + $0xc9c] sm:$0xf]  ;;  %v13925_v59 = vor.u32 %v15617_v57, %v13922_v38  ;;  %9750 = vmatpush.bf16.msra.mxu1 %v13669_v20  ;;  %v9560_v23 = vadd.f32 %v9559_v54, %v9547_v44  ;;  %v9587_v5 = vpop.f32.mrf.mxu0 }
 0x95a   :  { %v14178_v31 = vld [vmem:[#allocation26 + $0xcb8] sm:$0xf0] }
 0x95b   :  { %v15745_v15 = vld [vmem:[#allocation26 + $0xe9c] sm:$0xf]  ;;  %v14181_v49 = vor.u32 %v15681_v6, %v14178_v31  ;;  %9763 = vmatpush.bf16.msra.mxu2 %v13925_v59  ;;  %v9573_v12 = vadd.f32 %v9572_v61, %v9560_v23 }
 0x95c   :  { %v14434_v27 = vld [vmem:[#allocation26 + $0xeb8] sm:$0xf0] }
 0x95d   :  { %v15545_v36 = vld [vmem:[#allocation26 + $0x85c] sm:$0xf]  ;;  %v14437_v29 = vor.u32 %v15745_v15, %v14434_v27  ;;  %9776 = vmatpush.bf16.msra.mxu3 %v14181_v49  ;;  %v9574_v18 = vpop.f32.mrf.mxu3 }
 0x95e   :  { %v13634_v35 = vld [vmem:[#allocation26 + $0x878] sm:$0xf0] }
 0x95f   :  { %v15609_v7 = vld [vmem:[#allocation26 + $0xa5c] sm:$0xf]  ;;  %v13637_v1 = vor.u32 %v15545_v36, %v13634_v35  ;;  %9789 = vmatpush.bf16.msrb.mxu0 %v14437_v29  ;;  %v9598_v21 = vpop.f32.mrf.mxu1 }
 0x960   :  { %v13890_v8 = vld [vmem:[#allocation26 + $0xa78] sm:$0xf0]  ;;  %v9599_v6 = vadd.f32 %v9598_v21, %v6395_v60 }
 0x961   :  { %v15673_v51 = vld [vmem:[#allocation26 + $0xc5c] sm:$0xf]  ;;  %v13893_v11 = vor.u32 %v15609_v7, %v13890_v8  ;;  %9751 = vmatpush.bf16.msra.mxu1 %v13637_v1 }
 0x962   :  { %v14146_v30 = vld [vmem:[#allocation26 + $0xc78] sm:$0xf0] }
 0x963   :  { %v15737_v17 = vld [vmem:[#allocation26 + $0xe5c] sm:$0xf]  ;;  %v14149_v56 = vor.u32 %v15673_v51, %v14146_v30  ;;  %9764 = vmatpush.bf16.msra.mxu2 %v13893_v11 }
 0x964   :  { %v14402_v58 = vld [vmem:[#allocation26 + $0xe78] sm:$0xf0] }
 0x965   :  { %v15537_v37 = vld [vmem:[#allocation26 + $0x81c] sm:$0xf]  ;;  %v14405_v45 = vor.u32 %v15737_v17, %v14402_v58  ;;  %9777 = vmatpush.bf16.msra.mxu3 %v14149_v56 }
 0x966   :  { %v13602_v28 = vld [vmem:[#allocation26 + $0x838] sm:$0xf0] }
 0x967   :  { %v15601_v19 = vld [vmem:[#allocation26 + $0xa1c] sm:$0xf]  ;;  %v13605_v34 = vor.u32 %v15537_v37, %v13602_v28  ;;  %9790 = vmatpush.bf16.msrb.mxu0 %v14405_v45  ;;  %v9600_v16 = vpop.f32.mrf.mxu1  ;;  %v6396_v45 = vperm.slane %v16951_v52, 7 }
 0x968   :  { %v13858_v22 = vld [vmem:[#allocation26 + $0xa38] sm:$0xf0] }
 0x969   :  { %v15665_v39 = vld [vmem:[#allocation26 + $0xc1c] sm:$0xf]  ;;  %v13861_v10 = vor.u32 %v15601_v19, %v13858_v22  ;;  %9752 = vmatpush.bf16.msra.mxu1 %v13605_v34 }
 0x96a   :  { %v14114_v47 = vld [vmem:[#allocation26 + $0xc38] sm:$0xf0] }
 0x96b   :  { %v15729_v9 = vld [vmem:[#allocation26 + $0xe1c] sm:$0xf]  ;;  %v14117_v33 = vor.u32 %v15665_v39, %v14114_v47  ;;  %9765 = vmatpush.bf16.msra.mxu2 %v13861_v10 }
 0x96c   :  { %v14370_v48 = vld [vmem:[#allocation26 + $0xe38] sm:$0xf0]  ;;  %9753 = vmatmul.bf16.vlgmr.msra.gmra.mxu1 %v16840_v13  ;;  %v9586_v13 = vadd.f32 %v9585_v4, %v9573_v12 }
 0x96d   :  { %v14373_v0 = vor.u32 %v15729_v9, %v14370_v48  ;;  %9778 = vmatpush.bf16.msra.mxu3 %v14117_v33 }
 0x96e   :  { %9766 = vmatmul.bf16.vlgmr.msra.gmra.mxu2 %v16842_v55  ;;  %9802 = vst [vmem:[#allocation29 + $0x28] sm:$0xff] %v9586_v13  ;;  %v9561_v55 = vpop.f32.mrf.mxu2 }
 0x96f   :  { %9791 = vmatpush.bf16.msrb.mxu0 %v14373_v0 }
 0x970   :  { %9779 = vmatmul.bf16.vlgmr.msra.gmra.mxu3 %v16844_v32  ;;  %v9637_v32 = vpop.f32.mrf.mxu0 }
 0x972   :  { %9792 = vmatmul.bf16.vlgmr.msrb.gmra.mxu0 %v16846_v41  ;;  %v9624_v41 = vpop.f32.mrf.mxu3 }
 0x976   :  { %v9611_v50 = vpop.f32.mrf.mxu2 }
 0x977   :  { %v9612_v40 = vadd.f32 %v9611_v50, %v9599_v6 }
 0x978   :  { %v9639_v53 = vpop.f32.mrf.mxu0 }
 0x979   :  { %v9625_v31 = vadd.f32 %v9624_v41, %v9612_v40 }
 0x97a   :  { %v9626_v38 = vpop.f32.mrf.mxu3 }
 0x97b   :  { %v9638_v3 = vadd.f32 %v9637_v32, %v9625_v31 }
 0x97e   :  { %v9613_v57 = vpop.f32.mrf.mxu2 }
 0x98c   :  { %v9650_v15 = vpop.f32.mrf.mxu1 }
 0x98d   :  { %v9651_v14 = vadd.f32 %v9650_v15, %v9638_v3 }
 0x992   :  { %v9689_v27 = vpop.f32.mrf.mxu0 }
 0x994   :  { %v9663_v20 = vpop.f32.mrf.mxu2  ;;  %v9652_v35 = vpop.f32.mrf.mxu1 }
 0x995   :  { %v9664_v59 = vadd.f32 %v9663_v20, %v9651_v14 }
 0x996   :  { %v9676_v36 = vpop.f32.mrf.mxu3 }
 0x997   :  { %v9677_v49 = vadd.f32 %v9676_v36, %v9664_v59 }
 0x999   :  { %v9690_v7 = vadd.f32 %v9689_v27, %v9677_v49 }
 0x99a   :  { %v9691_v29 = vpop.f32.mrf.mxu0 }
 0x99b   :  { %9803 = vst [vmem:[#allocation29 + $0x30] sm:$0xff] %v9690_v7 }
 0x99c   :  { %v9665_v8 = vpop.f32.mrf.mxu2 }
 0x99e   :  { %v9678_v51 = vpop.f32.mrf.mxu3 }
 0x9ac   :  { %v9702_v30 = vpop.f32.mrf.mxu1 }
 0x9ad   :  { %v9703_v43 = vadd.f32 %v9702_v30, %v6396_v45 }
 0x9b2   :  { %v9741_v17 = vpop.f32.mrf.mxu0 }
 0x9b4   :  { %v9715_v58 = vpop.f32.mrf.mxu2  ;;  %v9704_v11 = vpop.f32.mrf.mxu1 }
 0x9b5   :  { %v9716_v19 = vadd.f32 %v9715_v58, %v9703_v43 }
 0x9b6   :  { %v9728_v1 = vpop.f32.mrf.mxu3 }
 0x9b7   :  { %v9729_v22 = vadd.f32 %v9728_v1, %v9716_v19 }
 0x9b9   :  { %v9742_v47 = vadd.f32 %v9741_v17, %v9729_v22 }
 0x9ba   :  { %v9743_v37 = vpop.f32.mrf.mxu0 }
 0x9bc   :  { %v9717_v28 = vpop.f32.mrf.mxu2 }
 0x9be   :  { %v9730_v56 = vpop.f32.mrf.mxu3 }
 0x9e9   :  { %v9754_v39 = vpop.f32.mrf.mxu1 }
 0x9ea   :  { %v9755_v9 = vadd.f32 %v9754_v39, %v9742_v47 }
 0x9ef   :  { %v9793_v24 = vpop.f32.mrf.mxu0 }
 0x9f1   :  { %v9767_v48 = vpop.f32.mrf.mxu2  ;;  %v9756_v33 = vpop.f32.mrf.mxu1 }
 0x9f2   :  { %v9768_v34 = vadd.f32 %v9767_v48, %v9755_v9 }
 0x9f3   :  { %v9780_v10 = vpop.f32.mrf.mxu3 }
 0x9f4   :  { %v9781_v0 = vadd.f32 %v9780_v10, %v9768_v34 }
 0x9f6   :  { %v9794_v52 = vadd.f32 %v9793_v24, %v9781_v0 }
 0x9f7   :  { %v9795_v2 = vpop.f32.mrf.mxu0 }
 0x9f8   :  { %9804 = vst [vmem:[#allocation29 + $0x38] sm:$0xff] %v9794_v52 }
 0x9f9   :  { %v9769_v25 = vpop.f32.mrf.mxu2  ;;  %9815 = dma.vmem_to_hbm [thread:$0]  %s9811_s16, 1024, %s9813_s5, [#allocation4]  }
 0x9fb   :  { %v9782_v26 = vpop.f32.mrf.mxu3 }
 0x9fc   :  { %16285 = dma.done.wait [#allocation4], 1024  }
 0x9fd   :  { %16286 = vsyncadd [#allocation4], 4294966272 }
 0x9fe   :  { %9820 = vsyncpa [#allocation3], 1 }
 0x9ff   :  { %9821 = vsyncpa [#allocation6], 1 }
 0xa00   :  { %9822 = vsyncpa [#allocation9], 1 }
 0xa01   :  { %9823 = vsyncpa [#allocation12], 1 }
 0xa02   :  { %9824 = vsyncpa [#allocation15], 1 }
 0xa03   :  { %9825 = vsyncpa [#allocation18], 1 }
 0xa04   :  { %9826 = vsyncpa [#allocation21], 1 }
 0xa05   :  { %9827 = vsyncpa [#allocation24], 1 }
 0xa06   :  { %9828 = vsyncpa [#allocation27], 1 }
 0xa07   :  { %9829 = vsyncpa [#allocation4], 1 }

</bundles_post_ra>
